<compile_context>
chip_gen: v7x
topology: tpu7x:2x2x1
jax: 0.10.0
libtpu: 0.0.40
codegen_flags: <defaults>
</compile_context>

<pallas_src>
import functools

import jax
import jax.numpy as jnp
from jax.experimental import pallas as pl
from jax.experimental.pallas import tpu as pltpu

NEG_SLOPE = 0.01          # nn.LeakyReLU default negative_slope
LN_EPS = 1e-5             # torch_geometric.nn.LayerNorm eps
GEN_EPS = 1e-7            # GENConv eps
ROW_TILE = 128            # sublane tile for row-gridded kernels (good for v5e..v7x)
VMEM_LIMIT = 48 * 1024 * 1024


def _round_up(x, m):
    return (x + m - 1) // m * m


def _pad_rows(x, rows):
    pad = rows - x.shape[0]
    return x if pad == 0 else jnp.pad(x, ((0, pad), (0, 0)))


def _cparams(grid_rank):
    return pltpu.CompilerParams(
        dimension_semantics=("parallel",) * grid_rank,
        vmem_limit_bytes=VMEM_LIMIT)


# ----------------------------- generic fused MLP (row-gridded) -----------------------

def _mlp_kernel(*refs, n_lin):
    # refs: x, w0, b0, w1, b1, ..., out
    h = refs[0][...]
    for i in range(n_lin):
        w = refs[1 + 2 * i][...]
        b = refs[2 + 2 * i][...]
        h = jnp.dot(h.astype(jnp.bfloat16), w, preferred_element_type=jnp.float32) + b
        if i < n_lin - 1:
            h = jnp.maximum(h, NEG_SLOPE * h)          # LeakyReLU as a single vmax
    refs[-1][...] = h.astype(refs[-1].dtype)


def pallas_mlp(x, layers, row_tile=ROW_TILE):
    """x: (m, k) bf16, layers: list of (w_bf16, b_f32[1,n]). Returns (m, n_out) f32."""
    m, k = x.shape
    mp = _round_up(max(m, 1), row_tile)
    xp = _pad_rows(x, mp)
    n_lin = len(layers)
    n_out = layers[-1][0].shape[1]
    in_specs = [pl.BlockSpec((row_tile, k), lambda i: (i, 0))]
    args = [xp]
    for (w, b) in layers:
        in_specs.append(pl.BlockSpec(w.shape, lambda i: (0, 0)))   # VMEM-resident weight
        in_specs.append(pl.BlockSpec(b.shape, lambda i: (0, 0)))
        args.extend([w, b])
    out = pl.pallas_call(
        functools.partial(_mlp_kernel, n_lin=n_lin),
        grid=(mp // row_tile,),
        out_shape=jax.ShapeDtypeStruct((mp, n_out), jnp.float32),
        in_specs=in_specs,
        out_specs=pl.BlockSpec((row_tile, n_out), lambda i: (i, 0)),
        compiler_params=_cparams(1),
    )(*args)
    return out[:m]


# ----------------------------- pre-stage: scatter-mean for self-loop attrs ------------

def _scatter_mean_kernel(t_ref, e_ref, o_ref):
    t = t_ref[...]
    deg = jnp.sum(t.astype(jnp.float32), axis=1, keepdims=True)
    s = jnp.dot(t, e_ref[...], preferred_element_type=jnp.float32)
    o_ref[...] = s / jnp.maximum(deg, 1.0)


def scatter_mean(t_pre, e_pre_b, row_tile=ROW_TILE):
    np_, epp = t_pre.shape
    c = e_pre_b.shape[1]
    return pl.pallas_call(
        _scatter_mean_kernel,
        grid=(np_ // row_tile,),
        out_shape=jax.ShapeDtypeStruct((np_, c), jnp.float32),
        in_specs=[pl.BlockSpec((row_tile, epp), lambda i: (i, 0)),
                  pl.BlockSpec((epp, c), lambda i: (0, 0))],
        out_specs=pl.BlockSpec((row_tile, c), lambda i: (i, 0)),
        compiler_params=_cparams(1),
    )(t_pre, e_pre_b)


# ----------------------------- layer kernel 1: GENConv message (edge grid) ------------

def _gen_message_kernel(s_ref, o_ref, e_ref, msg_ref):
    gathered = jnp.dot(s_ref[...], o_ref[...], preferred_element_type=jnp.float32)  # o[src]
    m = jnp.maximum(gathered + e_ref[...].astype(jnp.float32), 0.0) + GEN_EPS
    msg_ref[...] = m.astype(jnp.bfloat16)


def gen_message(s, o_b, e_b, row_tile=ROW_TILE):
    ep, np_ = s.shape
    c = o_b.shape[1]
    return pl.pallas_call(
        _gen_message_kernel,
        grid=(ep // row_tile,),
        out_shape=jax.ShapeDtypeStruct((ep, c), jnp.bfloat16),
        in_specs=[pl.BlockSpec((row_tile, np_), lambda j: (j, 0)),
                  pl.BlockSpec((np_, c), lambda j: (0, 0)),
                  pl.BlockSpec((row_tile, c), lambda j: (j, 0))],
        out_specs=pl.BlockSpec((row_tile, c), lambda j: (j, 0)),
        compiler_params=_cparams(1),
    )(s, o_b, e_b)


# -------------------- layer kernel 2: aggregate + gen_mlp + fused QSKV (node grid) ----

def _node_proj_kernel(tt_ref, msg_ref, o_ref, wg_ref, bg_ref, wq_ref, bq_ref, out_ref):
    o = o_ref[...]
    agg = jnp.dot(tt_ref[...], msg_ref[...], preferred_element_type=jnp.float32) + o
    g = jnp.dot(agg.astype(jnp.bfloat16), wg_ref[...],
                preferred_element_type=jnp.float32) + bg_ref[...]
    xcat = jnp.concatenate([o, g], axis=1).astype(jnp.bfloat16)          # (TM, 2C)
    qskv = jnp.dot(xcat, wq_ref[...], preferred_element_type=jnp.float32) + bq_ref[...]
    out_ref[...] = qskv.astype(jnp.bfloat16)                             # [Q|SKIP|K|V]


def node_proj(tt, msg, o, gen, qskv, row_tile=ROW_TILE):
    np_, ep = tt.shape
    c = o.shape[1]
    wg, bg = gen
    wq, bq = qskv
    n4 = wq.shape[1]
    return pl.pallas_call(
        _node_proj_kernel,
        grid=(np_ // row_tile,),
        out_shape=jax.ShapeDtypeStruct((np_, n4), jnp.bfloat16),
        in_specs=[pl.BlockSpec((row_tile, ep), lambda i: (i, 0)),
                  pl.BlockSpec((ep, c), lambda i: (0, 0)),
                  pl.BlockSpec((row_tile, c), lambda i: (i, 0)),
                  pl.BlockSpec(wg.shape, lambda i: (0, 0)),
                  pl.BlockSpec(bg.shape, lambda i: (0, 0)),
                  pl.BlockSpec(wq.shape, lambda i: (0, 0)),
                  pl.BlockSpec(bq.shape, lambda i: (0, 0))],
        out_specs=pl.BlockSpec((row_tile, n4), lambda i: (i, 0)),
        compiler_params=_cparams(1),
    )(tt, msg, o, wg, bg, wq, bq)


# ----------------------- layer kernel 3: per-edge key/value (edge grid) ---------------

def _edge_kv_kernel(s_ref, qkvs_ref, e_ref, we_ref, kv_ref, *, hc):
    eemb = jnp.dot(e_ref[...], we_ref[...], preferred_element_type=jnp.float32)   # (TE, HC)
    kvg = jnp.dot(s_ref[...], qkvs_ref[:, 2 * hc:4 * hc],                         # [k|v][src]
                  preferred_element_type=jnp.float32)
    kv = kvg + jnp.concatenate([eemb, eemb], axis=1)
    kv_ref[...] = kv.astype(jnp.bfloat16)                                         # [key|value]


def edge_kv(s, qkvs, e_b, we, hc, row_tile=ROW_TILE):
    ep, np_ = s.shape
    c = e_b.shape[1]
    return pl.pallas_call(
        functools.partial(_edge_kv_kernel, hc=hc),
        grid=(ep // row_tile,),
        out_shape=jax.ShapeDtypeStruct((ep, 2 * hc), jnp.bfloat16),
        in_specs=[pl.BlockSpec((row_tile, np_), lambda j: (j, 0)),
                  pl.BlockSpec(qkvs.shape, lambda j: (0, 0)),
                  pl.BlockSpec((row_tile, c), lambda j: (j, 0)),
                  pl.BlockSpec(we.shape, lambda j: (0, 0))],
        out_specs=pl.BlockSpec((row_tile, 2 * hc), lambda j: (j, 0)),
        compiler_params=_cparams(1),
    )(s, qkvs, e_b, we)


# ------------- layer kernel 4: masked softmax attention + lin_out + residual ----------

def _node_attn_kernel(tt_ref, q_ref, kv_ref, o_ref, wo_ref, bo_ref, out_ref, *, H, C):
    hc = H * C
    mask = tt_ref[...].astype(jnp.float32) > 0.5            # (TM, EP) incidence mask
    scale = 1.0 / (C ** 0.5)
    outs = []
    for h in range(H):
        qh = q_ref[:, h * C:(h + 1) * C]                     # (TM, C) bf16
        kh = kv_ref[:, h * C:(h + 1) * C]                    # (EP, C) bf16
        vh = kv_ref[:, hc + h * C: hc + (h + 1) * C]         # (EP, C) bf16
        s = jax.lax.dot_general(qh, kh, (((1,), (1,)), ((), ())),
                                preferred_element_type=jnp.float32) * scale
        sm = jnp.where(mask, s, -1e30)
        amax = jnp.max(sm, axis=1, keepdims=True)            # exact per-target max
        amax = jnp.where(amax < -1e29, 0.0, amax)            # guard fully-padded rows
        p = jnp.exp(sm - amax)                               # f32 softmax numerator
        denom = jnp.sum(p, axis=1, keepdims=True) + 1e-16
        p = p * pl.reciprocal(denom, approx=True)
        outs.append(jnp.dot(p.astype(jnp.bfloat16), vh, preferred_element_type=jnp.float32))
    t_out = jnp.concatenate(outs, axis=1) + q_ref[:, hc:2 * hc].astype(jnp.float32)  # + skip
    y = jnp.dot(t_out.astype(jnp.bfloat16), wo_ref[...],
                preferred_element_type=jnp.float32) + bo_ref[...]
    out_ref[...] = o_ref[...] + y                            # pre-norm residual, f32


def node_attn(tt, qkvs, kv, o, out_lin, H, C, row_tile=ROW_TILE):
    np_, ep = tt.shape
    wo, bo = out_lin
    return pl.pallas_call(
        functools.partial(_node_attn_kernel, H=H, C=C),
        grid=(np_ // row_tile,),
        out_shape=jax.ShapeDtypeStruct((np_, C), jnp.float32),
        in_specs=[pl.BlockSpec((row_tile, ep), lambda i: (i, 0)),
                  pl.BlockSpec((row_tile, qkvs.shape[1]), lambda i: (i, 0)),
                  pl.BlockSpec(kv.shape, lambda i: (0, 0)),
                  pl.BlockSpec((row_tile, C), lambda i: (i, 0)),
                  pl.BlockSpec(wo.shape, lambda i: (0, 0)),
                  pl.BlockSpec(bo.shape, lambda i: (0, 0))],
        out_specs=pl.BlockSpec((row_tile, C), lambda i: (i, 0)),
        compiler_params=_cparams(1),
    )(tt, qkvs, kv, o, wo, bo)


# ----------------- layer kernel 5: graph-LayerNorm + FF + graph-LayerNorm -------------

def _norm_ff_norm_kernel(x_ref, b_ref, bt_ref, invn_ref, mask_ref,
                         w1_ref, b1_ref, w2_ref, b2_ref, out_ref):
    bm = b_ref[...]
    bt = bt_ref[...]
    invn = invn_ref[...]                                     # (G,1) = 1/(count_g*C)
    mask = mask_ref[...]                                     # (NP,1) valid-node mask

    def gnorm(x):                                            # pyg LayerNorm(mode='graph')
        gsum = jnp.dot(bt, x, preferred_element_type=jnp.float32)            # (G, C)
        mean_g = jnp.sum(gsum, axis=1, keepdims=True) * invn
        xc = x - jnp.dot(bm, mean_g, preferred_element_type=jnp.float32)
        gsq = jnp.dot(bt, xc * xc, preferred_element_type=jnp.float32)
        var_g = jnp.sum(gsq, axis=1, keepdims=True) * invn
        rstd_n = jnp.dot(bm, jax.lax.rsqrt(var_g + LN_EPS),
                         preferred_element_type=jnp.float32)
        return xc * rstd_n * mask

    o1 = gnorm(x_ref[...])                                   # norm1
    h = jnp.dot(o1.astype(jnp.bfloat16), w1_ref[...],
                preferred_element_type=jnp.float32) + b1_ref[...]
    h = jnp.maximum(h, NEG_SLOPE * h)
    y = jnp.dot(h.astype(jnp.bfloat16), w2_ref[...],
                preferred_element_type=jnp.float32) + b2_ref[...]
    out_ref[...] = gnorm(o1 + y)                             # norm2


def norm_ff_norm(x, bm, bt, invn, mask, ff):
    np_, c = x.shape
    (w1, b1), (w2, b2) = ff
    vmem = pl.BlockSpec(memory_space=pltpu.MemorySpace.VMEM)
    return pl.pallas_call(
        _norm_ff_norm_kernel,
        out_shape=jax.ShapeDtypeStruct((np_, c), jnp.float32),
        in_specs=[vmem] * 9,
        out_specs=vmem,
        compiler_params=pltpu.CompilerParams(vmem_limit_bytes=VMEM_LIMIT),
    )(x, bm, bt, invn, mask, w1, b1, w2, b2)


# ----------------------------- global mean pool ---------------------------------------

def _pool_kernel(bt_ref, x_ref, inv_ref, o_ref):
    o_ref[...] = jnp.dot(bt_ref[...], x_ref[...],
                         preferred_element_type=jnp.float32) * inv_ref[...]


def global_mean_pool(bt_pool, x, inv_counts):
    g, c = bt_pool.shape[0], x.shape[1]
    vmem = pl.BlockSpec(memory_space=pltpu.MemorySpace.VMEM)
    return pl.pallas_call(
        _pool_kernel,
        out_shape=jax.ShapeDtypeStruct((g, c), jnp.float32),
        in_specs=[vmem] * 3,
        out_specs=vmem,
        compiler_params=pltpu.CompilerParams(vmem_limit_bytes=VMEM_LIMIT),
    )(bt_pool, x, inv_counts)


# ----------------------------- model forward -------------------------------------------

def graph_transformer_forward(p, x, edge_index, edge_attr, batch, cond, num_heads):
    N = x.shape[0]
    G = cond.shape[0]
    E = edge_index.shape[1]

    o_n = pallas_mlp(x.astype(jnp.bfloat16), p['x2h'])          # (N, C)
    e_h = pallas_mlp(edge_attr.astype(jnp.bfloat16), p['e2h'])  # (E, C)
    c = pallas_mlp(cond.astype(jnp.bfloat16), p['c2h'])         # (G, C)
    C = o_n.shape[1]
    H = num_heads
    HC = H * C

    # virtual node edges (node <-> its graph's virtual node)
    u = jnp.arange(N, dtype=jnp.int32)
    v = batch.astype(jnp.int32) + N
    src_pre = jnp.concatenate([edge_index[0].astype(jnp.int32), u, v])
    tgt_pre = jnp.concatenate([edge_index[1].astype(jnp.int32), v, u])
    e_p = jnp.zeros((2 * N, C), jnp.float32).at[:, 0].set(1.0)
    e_pre = jnp.concatenate([e_h, e_p], axis=0)                 # (E + 2N, C)

    N_aug = N + G
    E_pre = E + 2 * N
    E_aug = E_pre + N_aug
    NP = _round_up(N_aug, ROW_TILE)
    EP = _round_up(E_aug, ROW_TILE)
    EPp = _round_up(E_pre, ROW_TILE)

    node_iota = jnp.arange(NP, dtype=jnp.int32)
    graph_iota = jnp.arange(G, dtype=jnp.int32)

    def pad_idx(idx, length):
        return jnp.full((length,), -1, jnp.int32).at[:idx.shape[0]].set(idx.astype(jnp.int32))

    # add_self_loops(..., fill_value='mean'): self-loop attr = scatter_mean(aug_e, target)
    t_pre = (node_iota[:, None] == pad_idx(tgt_pre, EPp)[None, :]).astype(jnp.bfloat16)
    loop_attr = scatter_mean(t_pre, _pad_rows(e_pre, EPp).astype(jnp.bfloat16))[:N_aug]

    loop_idx = jnp.arange(N_aug, dtype=jnp.int32)
    src = jnp.concatenate([src_pre, loop_idx])
    tgt = jnp.concatenate([tgt_pre, loop_idx])
    aug_e = jnp.concatenate([e_pre, loop_attr], axis=0)          # (E_aug, C)
    aug_e_b = _pad_rows(aug_e, EP).astype(jnp.bfloat16)

    # incidence matrices, built directly in the consumed orientation (no transposes)
    src_p = pad_idx(src, EP)
    tgt_p = pad_idx(tgt, EP)
    S = (src_p[:, None] == node_iota[None, :]).astype(jnp.bfloat16)    # (EP, NP) gather-by-src
    Tt = (node_iota[:, None] == tgt_p[None, :]).astype(jnp.bfloat16)   # (NP, EP) scatter-to-tgt

    aug_batch = jnp.concatenate([batch.astype(jnp.int32), graph_iota])
    ab_p = pad_idx(aug_batch, NP)
    Bm = (ab_p[:, None] == graph_iota[None, :]).astype(jnp.float32)    # (NP, G)
    Bt = (graph_iota[:, None] == ab_p[None, :]).astype(jnp.float32)    # (G, NP)
    counts = jnp.maximum(jnp.sum(Bm, axis=0), 1.0)
    invn = (1.0 / (counts * C)).reshape(G, 1)
    mask_node = (node_iota < N_aug).astype(jnp.float32)[:, None]

    o = _pad_rows(jnp.concatenate([o_n, c], axis=0), NP)               # (NP, C) f32

    for lp in p['layers']:
        o_b = o.astype(jnp.bfloat16)
        msg = gen_message(S, o_b, aug_e_b)                             # GENConv message
        qskv = node_proj(Tt, msg, o, lp['gen'], lp['qskv'])            # aggr + mlp + [Q|SKIP|K|V]
        kv = edge_kv(S, qskv, aug_e_b, lp['edge_w'], HC)               # per-edge [key|value]
        x1 = node_attn(Tt, qskv, kv, o, lp['out'], H, C)               # attn + lin_out + resid
        o = norm_ff_norm(x1, Bm, Bt, invn, mask_node, lp['ff'])        # norm1 + ff + norm2

    node_o = o[:N]
    virt = o[N:N_aug]
    bt_pool = (graph_iota[:, None] == pad_idx(batch.astype(jnp.int32), NP)[None, :]
               ).astype(jnp.float32)                                   # real nodes only
    inv_pool = 1.0 / jnp.maximum(jnp.sum(bt_pool, axis=1, keepdims=True), 1.0)
    pooled = global_mean_pool(bt_pool, o, inv_pool)                    # (G, C)

    glob = jnp.concatenate([pooled, virt, c], axis=1)                  # (G, 3C)
    node_embeddings = jnp.concatenate([node_o, c[batch]], axis=1)      # (N, 2C)
    return node_embeddings, glob


def frag_gfn_forward(params, g, cond, *, num_heads):
    node_emb, graph_emb = graph_transformer_forward(
        params, g['x'], g['edge_index'], g['edge_attr'], g['batch'], cond, num_heads)

    e_row = g['edge_index'][0, ::2]
    e_col = g['edge_index'][1, ::2]
    row_f = node_emb[e_row]
    col_f = node_emb[e_col]
    edge_emb = pallas_mlp((row_f + col_f).astype(jnp.bfloat16), params['edge2emb'])
    ee_b = edge_emb.astype(jnp.bfloat16)

    # fused src/dst anchor logits: one call on stacked rows
    stacked = jnp.concatenate(
        [jnp.concatenate([ee_b, row_f.astype(jnp.bfloat16)], axis=1),
         jnp.concatenate([ee_b, col_f.astype(jnp.bfloat16)], axis=1)], axis=0)
    anchor = pallas_mlp(stacked, params['emb2set_edge_attr'])
    n_e = e_row.shape[0]
    src_logits, dst_logits = anchor[:n_e], anchor[n_e:]

    # fused stop + reward heads (one matmul over graph embeddings)
    sr = pallas_mlp(graph_emb.astype(jnp.bfloat16), params['stop_reward'])
    stop_logits, reward = sr[:, 0:1], sr[:, 1:2]

    add_node_logits = pallas_mlp(node_emb.astype(jnp.bfloat16), params['emb2add_node'])

    def _mask(val, m):
        return val * m + -1000.0 * (1.0 - m)

    add_node_logits = _mask(add_node_logits, g['add_node_mask'])
    set_edge_attr_logits = _mask(jnp.concatenate([src_logits, dst_logits], axis=1),
                                 g['set_edge_attr_mask'])
    # TODO(synk): GraphActionCategorical is a python-side container with no compute;
    # we return its logits list directly.
    return (stop_logits, add_node_logits, set_edge_attr_logits), reward


# ----------------------------- parameter init / prepare --------------------------------

def init_linear(key, n_in, n_out):
    kw, kb = jax.random.split(key)
    bound = 1.0 / (n_in ** 0.5)
    w = jax.random.uniform(kw, (n_in, n_out), jnp.float32, -bound, bound)
    b = jax.random.uniform(kb, (n_out,), jnp.float32, -bound, bound)
    return w, b


def init_mlp(key, n_in, n_hid, n_out, n_layer):
    dims = [n_in] + [n_hid] * n_layer + [n_out]
    keys = jax.random.split(key, len(dims) - 1)
    return [init_linear(keys[i], dims[i], dims[i + 1]) for i in range(len(dims) - 1)]


def init_params(key, x_dim, e_dim, g_dim, num_emb, num_layers, num_heads,
                num_new_node_values, num_edge_attr_logits):
    ks = jax.random.split(key, 6)
    t_keys = jax.random.split(ks[0], 3 + num_layers)
    transf = {
        'x2h': init_mlp(t_keys[0], x_dim, num_emb, num_emb, 2),
        'e2h': init_mlp(t_keys[1], e_dim, num_emb, num_emb, 2),
        'c2h': init_mlp(t_keys[2], g_dim, num_emb, num_emb, 2),
        'layers': [],
    }
    for i in range(num_layers):
        lk = jax.random.split(t_keys[3 + i], 8)
        bound = 1.0 / (num_emb ** 0.5)
        transf['layers'].append({
            'gen_mlp': init_linear(lk[0], num_emb, num_emb),
            'lin_query': init_linear(lk[1], 2 * num_emb, num_heads * num_emb),
            'lin_key': init_linear(lk[2], 2 * num_emb, num_heads * num_emb),
            'lin_value': init_linear(lk[3], 2 * num_emb, num_heads * num_emb),
            'lin_edge_w': jax.random.uniform(lk[4], (num_emb, num_heads * num_emb),
                                             jnp.float32, -bound, bound),  # bias=False
            'lin_skip': init_linear(lk[5], 2 * num_emb, num_heads * num_emb),
            'lin_out': init_linear(lk[6], num_heads * num_emb, num_emb),
            'ff': init_mlp(lk[7], num_emb, 4 * num_emb, num_emb, 1),
        })
    num_final = 2 * num_emb
    return {
        'transf': transf,
        'emb2add_node': init_linear(ks[1], num_final, num_new_node_values),
        'emb2set_edge_attr': init_linear(ks[2], num_emb + num_final, num_edge_attr_logits // 2),
        'emb2stop': init_linear(ks[3], 3 * num_emb, 1),
        'emb2reward': init_linear(ks[4], 3 * num_emb, 1),
        'edge2emb': init_linear(ks[5], num_final, num_emb),
        # logZ head exists in the torch module but is unused in forward(); omitted.
    }


def prepare_params(p):
    """Cast weights to bf16, reshape biases to (1, n), fuse Q/SKIP/K/V and stop/reward."""
    def lin(wb):
        w, b = wb
        return (w.astype(jnp.bfloat16), b.reshape(1, -1).astype(jnp.float32))

    def lin_list(ls):
        return [lin(wb) for wb in ls]

    t = p['transf']
    layers = []
    for lp in t['layers']:
        wq, bq = lp['lin_query']
        wk, bk = lp['lin_key']
        wv, bv = lp['lin_value']
        ws, bs = lp['lin_skip']
        w_qskv = jnp.concatenate([wq, ws, wk, wv], axis=1).astype(jnp.bfloat16)
        b_qskv = jnp.concatenate([bq, bs, bk, bv], axis=0).reshape(1, -1).astype(jnp.float32)
        layers.append({
            'gen': lin(lp['gen_mlp']),
            'qskv': (w_qskv, b_qskv),
            'edge_w': lp['lin_edge_w'].astype(jnp.bfloat16),
            'out': lin(lp['lin_out']),
            'ff': lin_list(lp['ff']),
        })
    wst, bst = p['emb2stop']
    wrw, brw = p['emb2reward']
    w_sr = jnp.concatenate([wst, wrw], axis=1).astype(jnp.bfloat16)
    b_sr = jnp.concatenate([bst, brw], axis=0).reshape(1, -1).astype(jnp.float32)
    return {
        'x2h': lin_list(t['x2h']),
        'e2h': lin_list(t['e2h']),
        'c2h': lin_list(t['c2h']),
        'layers': layers,
        'edge2emb': lin_list([p['edge2emb']]),
        'emb2set_edge_attr': lin_list([p['emb2set_edge_attr']]),
        'emb2add_node': lin_list([p['emb2add_node']]),
        'stop_reward': [(w_sr, b_sr)],
    }


# ----------------------------- demo --------------------------------------------------

if __name__ == "__main__":
    # env_ctx-like config (small)
    num_node_dim, num_edge_dim, num_cond_dim = 8, 4, 6
    num_new_node_values, num_edge_attr_logits = 5, 8
    num_emb, num_layers, num_heads = 32, 3, 2

    key = jax.random.PRNGKey(0)
    kx, ke, kc, km1, km2, kp = jax.random.split(key, 6)

    # Graph batch: 2 graphs (3 + 4 nodes); undirected edges stored as (u,v),(v,u) pairs
    # so that edge_index[:, ::2] picks one direction per edge (PyG frag-GFN convention).
    batch = jnp.array([0, 0, 0, 1, 1, 1, 1], dtype=jnp.int32)
    und_edges = [(0, 1), (1, 2), (3, 4), (4, 5), (5, 6), (3, 6)]
    ei = []
    for (a, b) in und_edges:
        ei.append((a, b))
        ei.append((b, a))
    edge_index = jnp.array(ei, dtype=jnp.int32).T                     # (2, 12)

    num_nodes = 7
    num_graphs = 2
    x = jax.random.normal(kx, (num_nodes, num_node_dim), jnp.float32)
    edge_attr = jax.random.normal(ke, (edge_index.shape[1], num_edge_dim), jnp.float32)
    cond = jax.random.normal(kc, (num_graphs, num_cond_dim), jnp.float32)
    add_node_mask = jax.random.bernoulli(
        km1, 0.7, (num_nodes, num_new_node_values)).astype(jnp.float32)
    set_edge_attr_mask = jax.random.bernoulli(
        km2, 0.7, (len(und_edges), num_edge_attr_logits)).astype(jnp.float32)

    g = {'x': x, 'edge_index': edge_index, 'edge_attr': edge_attr, 'batch': batch,
         'add_node_mask': add_node_mask, 'set_edge_attr_mask': set_edge_attr_mask}

    params = init_params(kp, num_node_dim, num_edge_dim, num_cond_dim, num_emb,
                         num_layers, num_heads, num_new_node_values, num_edge_attr_logits)
    prepped = jax.tree_util.tree_map(jnp.asarray, prepare_params(params))

    fwd = jax.jit(functools.partial(frag_gfn_forward, num_heads=num_heads))
    (stop_logits, add_node_logits, set_edge_attr_logits), reward = fwd(prepped, g, cond)
    jax.block_until_ready((stop_logits, add_node_logits, set_edge_attr_logits, reward))

    assert stop_logits.shape == (num_graphs, 1)
    assert add_node_logits.shape == (num_nodes, num_new_node_values)
    assert set_edge_attr_logits.shape == (len(und_edges), num_edge_attr_logits)
    assert reward.shape == (num_graphs, 1)
    print("KERNEL_OK")
</pallas_src>

<mosaic_0001>
module attributes {stable_mosaic.version = 11 : i64} {
  func.func @_mlp_kernel(%arg0: i32, %arg1: memref<128x6xbf16, #tpu.memory_space<vmem>>, %arg2: memref<6x32xbf16, #tpu.memory_space<vmem>>, %arg3: memref<1x32xf32, #tpu.memory_space<vmem>>, %arg4: memref<32x32xbf16, #tpu.memory_space<vmem>>, %arg5: memref<1x32xf32, #tpu.memory_space<vmem>>, %arg6: memref<32x32xbf16, #tpu.memory_space<vmem>>, %arg7: memref<1x32xf32, #tpu.memory_space<vmem>>, %arg8: memref<128x32xf32, #tpu.memory_space<vmem>>) attributes {dimension_semantics = [#tpu.dimension_semantics<parallel>], iteration_bounds = array<i64: 1>, scalar_prefetch = 0 : i64, scratch_operands = 0 : i64, tpu.core_type = #tpu.core_type<tc>, window_params = [{transform_indices = @transform_0, window_bounds = array<i64: 128, 6>}, {pipeline_mode = #tpu.pipeline_mode<synchronous>, transform_indices = @transform_1, window_bounds = array<i64: 6, 32>}, {pipeline_mode = #tpu.pipeline_mode<synchronous>, transform_indices = @transform_2, window_bounds = array<i64: 1, 32>}, {pipeline_mode = #tpu.pipeline_mode<synchronous>, transform_indices = @transform_3, window_bounds = array<i64: 32, 32>}, {pipeline_mode = #tpu.pipeline_mode<synchronous>, transform_indices = @transform_4, window_bounds = array<i64: 1, 32>}, {pipeline_mode = #tpu.pipeline_mode<synchronous>, transform_indices = @transform_5, window_bounds = array<i64: 32, 32>}, {pipeline_mode = #tpu.pipeline_mode<synchronous>, transform_indices = @transform_6, window_bounds = array<i64: 1, 32>}, {transform_indices = @transform_7, window_bounds = array<i64: 128, 32>}]} {
    %c0 = arith.constant 0 : index
    %c0_0 = arith.constant 0 : index
    %0 = vector.load %arg1[%c0, %c0_0] : memref<128x6xbf16, #tpu.memory_space<vmem>>, vector<128x6xbf16>
    %c0_1 = arith.constant 0 : index
    %c0_2 = arith.constant 0 : index
    %1 = vector.load %arg2[%c0_1, %c0_2] : memref<6x32xbf16, #tpu.memory_space<vmem>>, vector<6x32xbf16>
    %c0_3 = arith.constant 0 : index
    %c0_4 = arith.constant 0 : index
    %2 = vector.load %arg3[%c0_3, %c0_4] : memref<1x32xf32, #tpu.memory_space<vmem>>, vector<1x32xf32>
    %cst = arith.constant dense<0.000000e+00> : vector<128x32xf32>
    %3 = tpu.matmul %0, %1, %cst {dimension_numbers = #tpu.dot_dimension_numbers<[1], [0], [0], [1], [0, 0, 1, 1], [], []>} : vector<128x6xbf16>, vector<6x32xbf16>, vector<128x32xf32> -> vector<128x32xf32>
    %4 = vector.broadcast %2 : vector<1x32xf32> to vector<128x32xf32>
    %5 = arith.addf %3, %4 : vector<128x32xf32>
    %cst_5 = arith.constant 0.00999999977 : f32
    %6 = vector.broadcast %cst_5 : f32 to vector<128x32xf32>
    %7 = arith.mulf %6, %5 : vector<128x32xf32>
    %8 = arith.maximumf %5, %7 : vector<128x32xf32>
    %c0_6 = arith.constant 0 : index
    %c0_7 = arith.constant 0 : index
    %9 = vector.load %arg4[%c0_6, %c0_7] : memref<32x32xbf16, #tpu.memory_space<vmem>>, vector<32x32xbf16>
    %c0_8 = arith.constant 0 : index
    %c0_9 = arith.constant 0 : index
    %10 = vector.load %arg5[%c0_8, %c0_9] : memref<1x32xf32, #tpu.memory_space<vmem>>, vector<1x32xf32>
    %11 = arith.truncf %8 : vector<128x32xf32> to vector<128x32xbf16>
    %cst_10 = arith.constant dense<0.000000e+00> : vector<128x32xf32>
    %12 = tpu.matmul %11, %9, %cst_10 {dimension_numbers = #tpu.dot_dimension_numbers<[1], [0], [0], [1], [0, 0, 1, 1], [], []>} : vector<128x32xbf16>, vector<32x32xbf16>, vector<128x32xf32> -> vector<128x32xf32>
    %13 = vector.broadcast %10 : vector<1x32xf32> to vector<128x32xf32>
    %14 = arith.addf %12, %13 : vector<128x32xf32>
    %cst_11 = arith.constant 0.00999999977 : f32
    %15 = vector.broadcast %cst_11 : f32 to vector<128x32xf32>
    %16 = arith.mulf %15, %14 : vector<128x32xf32>
    %17 = arith.maximumf %14, %16 : vector<128x32xf32>
    %c0_12 = arith.constant 0 : index
    %c0_13 = arith.constant 0 : index
    %18 = vector.load %arg6[%c0_12, %c0_13] : memref<32x32xbf16, #tpu.memory_space<vmem>>, vector<32x32xbf16>
    %c0_14 = arith.constant 0 : index
    %c0_15 = arith.constant 0 : index
    %19 = vector.load %arg7[%c0_14, %c0_15] : memref<1x32xf32, #tpu.memory_space<vmem>>, vector<1x32xf32>
    %20 = arith.truncf %17 : vector<128x32xf32> to vector<128x32xbf16>
    %cst_16 = arith.constant dense<0.000000e+00> : vector<128x32xf32>
    %21 = tpu.matmul %20, %18, %cst_16 {dimension_numbers = #tpu.dot_dimension_numbers<[1], [0], [0], [1], [0, 0, 1, 1], [], []>} : vector<128x32xbf16>, vector<32x32xbf16>, vector<128x32xf32> -> vector<128x32xf32>
    %22 = vector.broadcast %19 : vector<1x32xf32> to vector<128x32xf32>
    %23 = arith.addf %21, %22 : vector<128x32xf32>
    %c0_17 = arith.constant 0 : index
    %c0_18 = arith.constant 0 : index
    %24 = vector.load %arg8[%c0_17, %c0_18] : memref<128x32xf32, #tpu.memory_space<vmem>>, vector<128x32xf32>
    tpu.vector_store %arg8[%c0_17, %c0_18], %23 {strides = array<i32>} : memref<128x32xf32, #tpu.memory_space<vmem>>, vector<128x32xf32>,
    return
  }
  func.func @transform_0(%arg0: i32) -> (i32, i32) {
    %c0_i32 = arith.constant 0 : i32
    %c0_i32_0 = arith.constant 0 : i32
    return %arg0, %c0_i32 : i32, i32
  }
  func.func @transform_1(%arg0: i32) -> (i32, i32) {
    %c0_i32 = arith.constant 0 : i32
    %c0_i32_0 = arith.constant 0 : i32
    %c0_i32_1 = arith.constant 0 : i32
    return %c0_i32, %c0_i32_0 : i32, i32
  }
  func.func @transform_2(%arg0: i32) -> (i32, i32) {
    %c0_i32 = arith.constant 0 : i32
    %c0_i32_0 = arith.constant 0 : i32
    %c0_i32_1 = arith.constant 0 : i32
    return %c0_i32, %c0_i32_0 : i32, i32
  }
  func.func @transform_3(%arg0: i32) -> (i32, i32) {
    %c0_i32 = arith.constant 0 : i32
    %c0_i32_0 = arith.constant 0 : i32
    %c0_i32_1 = arith.constant 0 : i32
    return %c0_i32, %c0_i32_0 : i32, i32
  }
  func.func @transform_4(%arg0: i32) -> (i32, i32) {
    %c0_i32 = arith.constant 0 : i32
    %c0_i32_0 = arith.constant 0 : i32
    %c0_i32_1 = arith.constant 0 : i32
    return %c0_i32, %c0_i32_0 : i32, i32
  }
  func.func @transform_5(%arg0: i32) -> (i32, i32) {
    %c0_i32 = arith.constant 0 : i32
    %c0_i32_0 = arith.constant 0 : i32
    %c0_i32_1 = arith.constant 0 : i32
    return %c0_i32, %c0_i32_0 : i32, i32
  }
  func.func @transform_6(%arg0: i32) -> (i32, i32) {
    %c0_i32 = arith.constant 0 : i32
    %c0_i32_0 = arith.constant 0 : i32
    %c0_i32_1 = arith.constant 0 : i32
    return %c0_i32, %c0_i32_0 : i32, i32
  }
  func.func @transform_7(%arg0: i32) -> (i32, i32) {
    %c0_i32 = arith.constant 0 : i32
    %c0_i32_0 = arith.constant 0 : i32
    return %arg0, %c0_i32 : i32, i32
  }
}

module attributes {stable_mosaic.version = 11 : i64} {
  func.func @_scatter_mean_kernel(%arg0: i32, %arg1: memref<128x128xbf16, #tpu.memory_space<vmem>>, %arg2: memref<128x32xbf16, #tpu.memory_space<vmem>>, %arg3: memref<128x32xf32, #tpu.memory_space<vmem>>) attributes {dimension_semantics = [#tpu.dimension_semantics<parallel>], iteration_bounds = array<i64: 1>, scalar_prefetch = 0 : i64, scratch_operands = 0 : i64, tpu.core_type = #tpu.core_type<tc>, window_params = [{transform_indices = @transform_0, window_bounds = array<i64: 128, 128>}, {pipeline_mode = #tpu.pipeline_mode<synchronous>, transform_indices = @transform_1, window_bounds = array<i64: 128, 32>}, {transform_indices = @transform_2, window_bounds = array<i64: 128, 32>}]} {
    %c0 = arith.constant 0 : index
    %c0_0 = arith.constant 0 : index
    %0 = vector.load %arg1[%c0, %c0_0] : memref<128x128xbf16, #tpu.memory_space<vmem>>, vector<128x128xbf16>
    %1 = arith.extf %0 : vector<128x128xbf16> to vector<128x128xf32>
    %cst = arith.constant dense<0.000000e+00> : vector<128xf32>
    %2 = vector.multi_reduction <add>, %1, %cst [1] : vector<128x128xf32> to vector<128xf32>
    %3 = vector.shape_cast %2 : vector<128xf32> to vector<128x1xf32>
    %c0_1 = arith.constant 0 : index
    %c0_2 = arith.constant 0 : index
    %4 = vector.load %arg2[%c0_1, %c0_2] : memref<128x32xbf16, #tpu.memory_space<vmem>>, vector<128x32xbf16>
    %cst_3 = arith.constant dense<0.000000e+00> : vector<128x32xf32>
    %5 = tpu.matmul %0, %4, %cst_3 {dimension_numbers = #tpu.dot_dimension_numbers<[1], [0], [0], [1], [0, 0, 1, 1], [], []>} : vector<128x128xbf16>, vector<128x32xbf16>, vector<128x32xf32> -> vector<128x32xf32>
    %cst_4 = arith.constant 1.000000e+00 : f32
    %6 = vector.broadcast %cst_4 : f32 to vector<128x1xf32>
    %7 = arith.maximumf %3, %6 : vector<128x1xf32>
    %8 = vector.broadcast %7 : vector<128x1xf32> to vector<128x32xf32>
    %9 = arith.divf %5, %8 : vector<128x32xf32>
    %c0_5 = arith.constant 0 : index
    %c0_6 = arith.constant 0 : index
    %10 = vector.load %arg3[%c0_5, %c0_6] : memref<128x32xf32, #tpu.memory_space<vmem>>, vector<128x32xf32>
    tpu.vector_store %arg3[%c0_5, %c0_6], %9 {strides = array<i32>} : memref<128x32xf32, #tpu.memory_space<vmem>>, vector<128x32xf32>,
    return
  }
  func.func @transform_0(%arg0: i32) -> (i32, i32) {
    %c0_i32 = arith.constant 0 : i32
    %c0_i32_0 = arith.constant 0 : i32
    return %arg0, %c0_i32 : i32, i32
  }
  func.func @transform_1(%arg0: i32) -> (i32, i32) {
    %c0_i32 = arith.constant 0 : i32
    %c0_i32_0 = arith.constant 0 : i32
    %c0_i32_1 = arith.constant 0 : i32
    return %c0_i32, %c0_i32_0 : i32, i32
  }
  func.func @transform_2(%arg0: i32) -> (i32, i32) {
    %c0_i32 = arith.constant 0 : i32
    %c0_i32_0 = arith.constant 0 : i32
    return %arg0, %c0_i32 : i32, i32
  }
}

module attributes {stable_mosaic.version = 11 : i64} {
  func.func @_mlp_kernel(%arg0: i32, %arg1: memref<128x4xbf16, #tpu.memory_space<vmem>>, %arg2: memref<4x32xbf16, #tpu.memory_space<vmem>>, %arg3: memref<1x32xf32, #tpu.memory_space<vmem>>, %arg4: memref<32x32xbf16, #tpu.memory_space<vmem>>, %arg5: memref<1x32xf32, #tpu.memory_space<vmem>>, %arg6: memref<32x32xbf16, #tpu.memory_space<vmem>>, %arg7: memref<1x32xf32, #tpu.memory_space<vmem>>, %arg8: memref<128x32xf32, #tpu.memory_space<vmem>>) attributes {dimension_semantics = [#tpu.dimension_semantics<parallel>], iteration_bounds = array<i64: 1>, scalar_prefetch = 0 : i64, scratch_operands = 0 : i64, tpu.core_type = #tpu.core_type<tc>, window_params = [{transform_indices = @transform_0, window_bounds = array<i64: 128, 4>}, {pipeline_mode = #tpu.pipeline_mode<synchronous>, transform_indices = @transform_1, window_bounds = array<i64: 4, 32>}, {pipeline_mode = #tpu.pipeline_mode<synchronous>, transform_indices = @transform_2, window_bounds = array<i64: 1, 32>}, {pipeline_mode = #tpu.pipeline_mode<synchronous>, transform_indices = @transform_3, window_bounds = array<i64: 32, 32>}, {pipeline_mode = #tpu.pipeline_mode<synchronous>, transform_indices = @transform_4, window_bounds = array<i64: 1, 32>}, {pipeline_mode = #tpu.pipeline_mode<synchronous>, transform_indices = @transform_5, window_bounds = array<i64: 32, 32>}, {pipeline_mode = #tpu.pipeline_mode<synchronous>, transform_indices = @transform_6, window_bounds = array<i64: 1, 32>}, {transform_indices = @transform_7, window_bounds = array<i64: 128, 32>}]} {
    %c0 = arith.constant 0 : index
    %c0_0 = arith.constant 0 : index
    %0 = vector.load %arg1[%c0, %c0_0] : memref<128x4xbf16, #tpu.memory_space<vmem>>, vector<128x4xbf16>
    %c0_1 = arith.constant 0 : index
    %c0_2 = arith.constant 0 : index
    %1 = vector.load %arg2[%c0_1, %c0_2] : memref<4x32xbf16, #tpu.memory_space<vmem>>, vector<4x32xbf16>
    %c0_3 = arith.constant 0 : index
    %c0_4 = arith.constant 0 : index
    %2 = vector.load %arg3[%c0_3, %c0_4] : memref<1x32xf32, #tpu.memory_space<vmem>>, vector<1x32xf32>
    %cst = arith.constant dense<0.000000e+00> : vector<128x32xf32>
    %3 = tpu.matmul %0, %1, %cst {dimension_numbers = #tpu.dot_dimension_numbers<[1], [0], [0], [1], [0, 0, 1, 1], [], []>} : vector<128x4xbf16>, vector<4x32xbf16>, vector<128x32xf32> -> vector<128x32xf32>
    %4 = vector.broadcast %2 : vector<1x32xf32> to vector<128x32xf32>
    %5 = arith.addf %3, %4 : vector<128x32xf32>
    %cst_5 = arith.constant 0.00999999977 : f32
    %6 = vector.broadcast %cst_5 : f32 to vector<128x32xf32>
    %7 = arith.mulf %6, %5 : vector<128x32xf32>
    %8 = arith.maximumf %5, %7 : vector<128x32xf32>
    %c0_6 = arith.constant 0 : index
    %c0_7 = arith.constant 0 : index
    %9 = vector.load %arg4[%c0_6, %c0_7] : memref<32x32xbf16, #tpu.memory_space<vmem>>, vector<32x32xbf16>
    %c0_8 = arith.constant 0 : index
    %c0_9 = arith.constant 0 : index
    %10 = vector.load %arg5[%c0_8, %c0_9] : memref<1x32xf32, #tpu.memory_space<vmem>>, vector<1x32xf32>
    %11 = arith.truncf %8 : vector<128x32xf32> to vector<128x32xbf16>
    %cst_10 = arith.constant dense<0.000000e+00> : vector<128x32xf32>
    %12 = tpu.matmul %11, %9, %cst_10 {dimension_numbers = #tpu.dot_dimension_numbers<[1], [0], [0], [1], [0, 0, 1, 1], [], []>} : vector<128x32xbf16>, vector<32x32xbf16>, vector<128x32xf32> -> vector<128x32xf32>
    %13 = vector.broadcast %10 : vector<1x32xf32> to vector<128x32xf32>
    %14 = arith.addf %12, %13 : vector<128x32xf32>
    %cst_11 = arith.constant 0.00999999977 : f32
    %15 = vector.broadcast %cst_11 : f32 to vector<128x32xf32>
    %16 = arith.mulf %15, %14 : vector<128x32xf32>
    %17 = arith.maximumf %14, %16 : vector<128x32xf32>
    %c0_12 = arith.constant 0 : index
    %c0_13 = arith.constant 0 : index
    %18 = vector.load %arg6[%c0_12, %c0_13] : memref<32x32xbf16, #tpu.memory_space<vmem>>, vector<32x32xbf16>
    %c0_14 = arith.constant 0 : index
    %c0_15 = arith.constant 0 : index
    %19 = vector.load %arg7[%c0_14, %c0_15] : memref<1x32xf32, #tpu.memory_space<vmem>>, vector<1x32xf32>
    %20 = arith.truncf %17 : vector<128x32xf32> to vector<128x32xbf16>
    %cst_16 = arith.constant dense<0.000000e+00> : vector<128x32xf32>
    %21 = tpu.matmul %20, %18, %cst_16 {dimension_numbers = #tpu.dot_dimension_numbers<[1], [0], [0], [1], [0, 0, 1, 1], [], []>} : vector<128x32xbf16>, vector<32x32xbf16>, vector<128x32xf32> -> vector<128x32xf32>
    %22 = vector.broadcast %19 : vector<1x32xf32> to vector<128x32xf32>
    %23 = arith.addf %21, %22 : vector<128x32xf32>
    %c0_17 = arith.constant 0 : index
    %c0_18 = arith.constant 0 : index
    %24 = vector.load %arg8[%c0_17, %c0_18] : memref<128x32xf32, #tpu.memory_space<vmem>>, vector<128x32xf32>
    tpu.vector_store %arg8[%c0_17, %c0_18], %23 {strides = array<i32>} : memref<128x32xf32, #tpu.memory_space<vmem>>, vector<128x32xf32>,
    return
  }
  func.func @transform_0(%arg0: i32) -> (i32, i32) {
    %c0_i32 = arith.constant 0 : i32
    %c0_i32_0 = arith.constant 0 : i32
    return %arg0, %c0_i32 : i32, i32
  }
  func.func @transform_1(%arg0: i32) -> (i32, i32) {
    %c0_i32 = arith.constant 0 : i32
    %c0_i32_0 = arith.constant 0 : i32
    %c0_i32_1 = arith.constant 0 : i32
    return %c0_i32, %c0_i32_0 : i32, i32
  }
  func.func @transform_2(%arg0: i32) -> (i32, i32) {
    %c0_i32 = arith.constant 0 : i32
    %c0_i32_0 = arith.constant 0 : i32
    %c0_i32_1 = arith.constant 0 : i32
    return %c0_i32, %c0_i32_0 : i32, i32
  }
  func.func @transform_3(%arg0: i32) -> (i32, i32) {
    %c0_i32 = arith.constant 0 : i32
    %c0_i32_0 = arith.constant 0 : i32
    %c0_i32_1 = arith.constant 0 : i32
    return %c0_i32, %c0_i32_0 : i32, i32
  }
  func.func @transform_4(%arg0: i32) -> (i32, i32) {
    %c0_i32 = arith.constant 0 : i32
    %c0_i32_0 = arith.constant 0 : i32
    %c0_i32_1 = arith.constant 0 : i32
    return %c0_i32, %c0_i32_0 : i32, i32
  }
  func.func @transform_5(%arg0: i32) -> (i32, i32) {
    %c0_i32 = arith.constant 0 : i32
    %c0_i32_0 = arith.constant 0 : i32
    %c0_i32_1 = arith.constant 0 : i32
    return %c0_i32, %c0_i32_0 : i32, i32
  }
  func.func @transform_6(%arg0: i32) -> (i32, i32) {
    %c0_i32 = arith.constant 0 : i32
    %c0_i32_0 = arith.constant 0 : i32
    %c0_i32_1 = arith.constant 0 : i32
    return %c0_i32, %c0_i32_0 : i32, i32
  }
  func.func @transform_7(%arg0: i32) -> (i32, i32) {
    %c0_i32 = arith.constant 0 : i32
    %c0_i32_0 = arith.constant 0 : i32
    return %arg0, %c0_i32 : i32, i32
  }
}

module attributes {stable_mosaic.version = 11 : i64} {
  func.func @_mlp_kernel(%arg0: i32, %arg1: memref<128x8xbf16, #tpu.memory_space<vmem>>, %arg2: memref<8x32xbf16, #tpu.memory_space<vmem>>, %arg3: memref<1x32xf32, #tpu.memory_space<vmem>>, %arg4: memref<32x32xbf16, #tpu.memory_space<vmem>>, %arg5: memref<1x32xf32, #tpu.memory_space<vmem>>, %arg6: memref<32x32xbf16, #tpu.memory_space<vmem>>, %arg7: memref<1x32xf32, #tpu.memory_space<vmem>>, %arg8: memref<128x32xf32, #tpu.memory_space<vmem>>) attributes {dimension_semantics = [#tpu.dimension_semantics<parallel>], iteration_bounds = array<i64: 1>, scalar_prefetch = 0 : i64, scratch_operands = 0 : i64, tpu.core_type = #tpu.core_type<tc>, window_params = [{transform_indices = @transform_0, window_bounds = array<i64: 128, 8>}, {pipeline_mode = #tpu.pipeline_mode<synchronous>, transform_indices = @transform_1, window_bounds = array<i64: 8, 32>}, {pipeline_mode = #tpu.pipeline_mode<synchronous>, transform_indices = @transform_2, window_bounds = array<i64: 1, 32>}, {pipeline_mode = #tpu.pipeline_mode<synchronous>, transform_indices = @transform_3, window_bounds = array<i64: 32, 32>}, {pipeline_mode = #tpu.pipeline_mode<synchronous>, transform_indices = @transform_4, window_bounds = array<i64: 1, 32>}, {pipeline_mode = #tpu.pipeline_mode<synchronous>, transform_indices = @transform_5, window_bounds = array<i64: 32, 32>}, {pipeline_mode = #tpu.pipeline_mode<synchronous>, transform_indices = @transform_6, window_bounds = array<i64: 1, 32>}, {transform_indices = @transform_7, window_bounds = array<i64: 128, 32>}]} {
    %c0 = arith.constant 0 : index
    %c0_0 = arith.constant 0 : index
    %0 = vector.load %arg1[%c0, %c0_0] : memref<128x8xbf16, #tpu.memory_space<vmem>>, vector<128x8xbf16>
    %c0_1 = arith.constant 0 : index
    %c0_2 = arith.constant 0 : index
    %1 = vector.load %arg2[%c0_1, %c0_2] : memref<8x32xbf16, #tpu.memory_space<vmem>>, vector<8x32xbf16>
    %c0_3 = arith.constant 0 : index
    %c0_4 = arith.constant 0 : index
    %2 = vector.load %arg3[%c0_3, %c0_4] : memref<1x32xf32, #tpu.memory_space<vmem>>, vector<1x32xf32>
    %cst = arith.constant dense<0.000000e+00> : vector<128x32xf32>
    %3 = tpu.matmul %0, %1, %cst {dimension_numbers = #tpu.dot_dimension_numbers<[1], [0], [0], [1], [0, 0, 1, 1], [], []>} : vector<128x8xbf16>, vector<8x32xbf16>, vector<128x32xf32> -> vector<128x32xf32>
    %4 = vector.broadcast %2 : vector<1x32xf32> to vector<128x32xf32>
    %5 = arith.addf %3, %4 : vector<128x32xf32>
    %cst_5 = arith.constant 0.00999999977 : f32
    %6 = vector.broadcast %cst_5 : f32 to vector<128x32xf32>
    %7 = arith.mulf %6, %5 : vector<128x32xf32>
    %8 = arith.maximumf %5, %7 : vector<128x32xf32>
    %c0_6 = arith.constant 0 : index
    %c0_7 = arith.constant 0 : index
    %9 = vector.load %arg4[%c0_6, %c0_7] : memref<32x32xbf16, #tpu.memory_space<vmem>>, vector<32x32xbf16>
    %c0_8 = arith.constant 0 : index
    %c0_9 = arith.constant 0 : index
    %10 = vector.load %arg5[%c0_8, %c0_9] : memref<1x32xf32, #tpu.memory_space<vmem>>, vector<1x32xf32>
    %11 = arith.truncf %8 : vector<128x32xf32> to vector<128x32xbf16>
    %cst_10 = arith.constant dense<0.000000e+00> : vector<128x32xf32>
    %12 = tpu.matmul %11, %9, %cst_10 {dimension_numbers = #tpu.dot_dimension_numbers<[1], [0], [0], [1], [0, 0, 1, 1], [], []>} : vector<128x32xbf16>, vector<32x32xbf16>, vector<128x32xf32> -> vector<128x32xf32>
    %13 = vector.broadcast %10 : vector<1x32xf32> to vector<128x32xf32>
    %14 = arith.addf %12, %13 : vector<128x32xf32>
    %cst_11 = arith.constant 0.00999999977 : f32
    %15 = vector.broadcast %cst_11 : f32 to vector<128x32xf32>
    %16 = arith.mulf %15, %14 : vector<128x32xf32>
    %17 = arith.maximumf %14, %16 : vector<128x32xf32>
    %c0_12 = arith.constant 0 : index
    %c0_13 = arith.constant 0 : index
    %18 = vector.load %arg6[%c0_12, %c0_13] : memref<32x32xbf16, #tpu.memory_space<vmem>>, vector<32x32xbf16>
    %c0_14 = arith.constant 0 : index
    %c0_15 = arith.constant 0 : index
    %19 = vector.load %arg7[%c0_14, %c0_15] : memref<1x32xf32, #tpu.memory_space<vmem>>, vector<1x32xf32>
    %20 = arith.truncf %17 : vector<128x32xf32> to vector<128x32xbf16>
    %cst_16 = arith.constant dense<0.000000e+00> : vector<128x32xf32>
    %21 = tpu.matmul %20, %18, %cst_16 {dimension_numbers = #tpu.dot_dimension_numbers<[1], [0], [0], [1], [0, 0, 1, 1], [], []>} : vector<128x32xbf16>, vector<32x32xbf16>, vector<128x32xf32> -> vector<128x32xf32>
    %22 = vector.broadcast %19 : vector<1x32xf32> to vector<128x32xf32>
    %23 = arith.addf %21, %22 : vector<128x32xf32>
    %c0_17 = arith.constant 0 : index
    %c0_18 = arith.constant 0 : index
    %24 = vector.load %arg8[%c0_17, %c0_18] : memref<128x32xf32, #tpu.memory_space<vmem>>, vector<128x32xf32>
    tpu.vector_store %arg8[%c0_17, %c0_18], %23 {strides = array<i32>} : memref<128x32xf32, #tpu.memory_space<vmem>>, vector<128x32xf32>,
    return
  }
  func.func @transform_0(%arg0: i32) -> (i32, i32) {
    %c0_i32 = arith.constant 0 : i32
    %c0_i32_0 = arith.constant 0 : i32
    return %arg0, %c0_i32 : i32, i32
  }
  func.func @transform_1(%arg0: i32) -> (i32, i32) {
    %c0_i32 = arith.constant 0 : i32
    %c0_i32_0 = arith.constant 0 : i32
    %c0_i32_1 = arith.constant 0 : i32
    return %c0_i32, %c0_i32_0 : i32, i32
  }
  func.func @transform_2(%arg0: i32) -> (i32, i32) {
    %c0_i32 = arith.constant 0 : i32
    %c0_i32_0 = arith.constant 0 : i32
    %c0_i32_1 = arith.constant 0 : i32
    return %c0_i32, %c0_i32_0 : i32, i32
  }
  func.func @transform_3(%arg0: i32) -> (i32, i32) {
    %c0_i32 = arith.constant 0 : i32
    %c0_i32_0 = arith.constant 0 : i32
    %c0_i32_1 = arith.constant 0 : i32
    return %c0_i32, %c0_i32_0 : i32, i32
  }
  func.func @transform_4(%arg0: i32) -> (i32, i32) {
    %c0_i32 = arith.constant 0 : i32
    %c0_i32_0 = arith.constant 0 : i32
    %c0_i32_1 = arith.constant 0 : i32
    return %c0_i32, %c0_i32_0 : i32, i32
  }
  func.func @transform_5(%arg0: i32) -> (i32, i32) {
    %c0_i32 = arith.constant 0 : i32
    %c0_i32_0 = arith.constant 0 : i32
    %c0_i32_1 = arith.constant 0 : i32
    return %c0_i32, %c0_i32_0 : i32, i32
  }
  func.func @transform_6(%arg0: i32) -> (i32, i32) {
    %c0_i32 = arith.constant 0 : i32
    %c0_i32_0 = arith.constant 0 : i32
    %c0_i32_1 = arith.constant 0 : i32
    return %c0_i32, %c0_i32_0 : i32, i32
  }
  func.func @transform_7(%arg0: i32) -> (i32, i32) {
    %c0_i32 = arith.constant 0 : i32
    %c0_i32_0 = arith.constant 0 : i32
    return %arg0, %c0_i32 : i32, i32
  }
}

module attributes {stable_mosaic.version = 11 : i64} {
  func.func @_gen_message_kernel(%arg0: i32, %arg1: memref<128x128xbf16, #tpu.memory_space<vmem>>, %arg2: memref<128x32xbf16, #tpu.memory_space<vmem>>, %arg3: memref<128x32xbf16, #tpu.memory_space<vmem>>, %arg4: memref<128x32xbf16, #tpu.memory_space<vmem>>) attributes {dimension_semantics = [#tpu.dimension_semantics<parallel>], iteration_bounds = array<i64: 1>, scalar_prefetch = 0 : i64, scratch_operands = 0 : i64, tpu.core_type = #tpu.core_type<tc>, window_params = [{transform_indices = @transform_0, window_bounds = array<i64: 128, 128>}, {pipeline_mode = #tpu.pipeline_mode<synchronous>, transform_indices = @transform_1, window_bounds = array<i64: 128, 32>}, {transform_indices = @transform_2, window_bounds = array<i64: 128, 32>}, {transform_indices = @transform_3, window_bounds = array<i64: 128, 32>}]} {
    %c0 = arith.constant 0 : index
    %c0_0 = arith.constant 0 : index
    %0 = vector.load %arg1[%c0, %c0_0] : memref<128x128xbf16, #tpu.memory_space<vmem>>, vector<128x128xbf16>
    %c0_1 = arith.constant 0 : index
    %c0_2 = arith.constant 0 : index
    %1 = vector.load %arg2[%c0_1, %c0_2] : memref<128x32xbf16, #tpu.memory_space<vmem>>, vector<128x32xbf16>
    %cst = arith.constant dense<0.000000e+00> : vector<128x32xf32>
    %2 = tpu.matmul %0, %1, %cst {dimension_numbers = #tpu.dot_dimension_numbers<[1], [0], [0], [1], [0, 0, 1, 1], [], []>} : vector<128x128xbf16>, vector<128x32xbf16>, vector<128x32xf32> -> vector<128x32xf32>
    %c0_3 = arith.constant 0 : index
    %c0_4 = arith.constant 0 : index
    %3 = vector.load %arg3[%c0_3, %c0_4] : memref<128x32xbf16, #tpu.memory_space<vmem>>, vector<128x32xbf16>
    %4 = arith.extf %3 : vector<128x32xbf16> to vector<128x32xf32>
    %5 = arith.addf %2, %4 : vector<128x32xf32>
    %cst_5 = arith.constant 0.000000e+00 : f32
    %6 = vector.broadcast %cst_5 : f32 to vector<128x32xf32>
    %7 = arith.maximumf %5, %6 : vector<128x32xf32>
    %cst_6 = arith.constant 1.000000e-07 : f32
    %8 = vector.broadcast %cst_6 : f32 to vector<128x32xf32>
    %9 = arith.addf %7, %8 : vector<128x32xf32>
    %10 = arith.truncf %9 : vector<128x32xf32> to vector<128x32xbf16>
    %c0_7 = arith.constant 0 : index
    %c0_8 = arith.constant 0 : index
    %11 = vector.load %arg4[%c0_7, %c0_8] : memref<128x32xbf16, #tpu.memory_space<vmem>>, vector<128x32xbf16>
    tpu.vector_store %arg4[%c0_7, %c0_8], %10 {strides = array<i32>} : memref<128x32xbf16, #tpu.memory_space<vmem>>, vector<128x32xbf16>,
    return
  }
  func.func @transform_0(%arg0: i32) -> (i32, i32) {
    %c0_i32 = arith.constant 0 : i32
    %c0_i32_0 = arith.constant 0 : i32
    return %arg0, %c0_i32 : i32, i32
  }
  func.func @transform_1(%arg0: i32) -> (i32, i32) {
    %c0_i32 = arith.constant 0 : i32
    %c0_i32_0 = arith.constant 0 : i32
    %c0_i32_1 = arith.constant 0 : i32
    return %c0_i32, %c0_i32_0 : i32, i32
  }
  func.func @transform_2(%arg0: i32) -> (i32, i32) {
    %c0_i32 = arith.constant 0 : i32
    %c0_i32_0 = arith.constant 0 : i32
    return %arg0, %c0_i32 : i32, i32
  }
  func.func @transform_3(%arg0: i32) -> (i32, i32) {
    %c0_i32 = arith.constant 0 : i32
    %c0_i32_0 = arith.constant 0 : i32
    return %arg0, %c0_i32 : i32, i32
  }
}

module attributes {stable_mosaic.version = 11 : i64} {
  func.func @_node_proj_kernel(%arg0: i32, %arg1: memref<128x128xbf16, #tpu.memory_space<vmem>>, %arg2: memref<128x32xbf16, #tpu.memory_space<vmem>>, %arg3: memref<128x32xf32, #tpu.memory_space<vmem>>, %arg4: memref<32x32xbf16, #tpu.memory_space<vmem>>, %arg5: memref<1x32xf32, #tpu.memory_space<vmem>>, %arg6: memref<64x256xbf16, #tpu.memory_space<vmem>>, %arg7: memref<1x256xf32, #tpu.memory_space<vmem>>, %arg8: memref<128x256xbf16, #tpu.memory_space<vmem>>) attributes {dimension_semantics = [#tpu.dimension_semantics<parallel>], iteration_bounds = array<i64: 1>, scalar_prefetch = 0 : i64, scratch_operands = 0 : i64, tpu.core_type = #tpu.core_type<tc>, window_params = [{transform_indices = @transform_0, window_bounds = array<i64: 128, 128>}, {pipeline_mode = #tpu.pipeline_mode<synchronous>, transform_indices = @transform_1, window_bounds = array<i64: 128, 32>}, {transform_indices = @transform_2, window_bounds = array<i64: 128, 32>}, {pipeline_mode = #tpu.pipeline_mode<synchronous>, transform_indices = @transform_3, window_bounds = array<i64: 32, 32>}, {pipeline_mode = #tpu.pipeline_mode<synchronous>, transform_indices = @transform_4, window_bounds = array<i64: 1, 32>}, {pipeline_mode = #tpu.pipeline_mode<synchronous>, transform_indices = @transform_5, window_bounds = array<i64: 64, 256>}, {pipeline_mode = #tpu.pipeline_mode<synchronous>, transform_indices = @transform_6, window_bounds = array<i64: 1, 256>}, {transform_indices = @transform_7, window_bounds = array<i64: 128, 256>}]} {
    %c0 = arith.constant 0 : index
    %c0_0 = arith.constant 0 : index
    %0 = vector.load %arg3[%c0, %c0_0] : memref<128x32xf32, #tpu.memory_space<vmem>>, vector<128x32xf32>
    %c0_1 = arith.constant 0 : index
    %c0_2 = arith.constant 0 : index
    %1 = vector.load %arg1[%c0_1, %c0_2] : memref<128x128xbf16, #tpu.memory_space<vmem>>, vector<128x128xbf16>
    %c0_3 = arith.constant 0 : index
    %c0_4 = arith.constant 0 : index
    %2 = vector.load %arg2[%c0_3, %c0_4] : memref<128x32xbf16, #tpu.memory_space<vmem>>, vector<128x32xbf16>
    %cst = arith.constant dense<0.000000e+00> : vector<128x32xf32>
    %3 = tpu.matmul %1, %2, %cst {dimension_numbers = #tpu.dot_dimension_numbers<[1], [0], [0], [1], [0, 0, 1, 1], [], []>} : vector<128x128xbf16>, vector<128x32xbf16>, vector<128x32xf32> -> vector<128x32xf32>
    %4 = arith.addf %3, %0 : vector<128x32xf32>
    %5 = arith.truncf %4 : vector<128x32xf32> to vector<128x32xbf16>
    %c0_5 = arith.constant 0 : index
    %c0_6 = arith.constant 0 : index
    %6 = vector.load %arg4[%c0_5, %c0_6] : memref<32x32xbf16, #tpu.memory_space<vmem>>, vector<32x32xbf16>
    %cst_7 = arith.constant dense<0.000000e+00> : vector<128x32xf32>
    %7 = tpu.matmul %5, %6, %cst_7 {dimension_numbers = #tpu.dot_dimension_numbers<[1], [0], [0], [1], [0, 0, 1, 1], [], []>} : vector<128x32xbf16>, vector<32x32xbf16>, vector<128x32xf32> -> vector<128x32xf32>
    %c0_8 = arith.constant 0 : index
    %c0_9 = arith.constant 0 : index
    %8 = vector.load %arg5[%c0_8, %c0_9] : memref<1x32xf32, #tpu.memory_space<vmem>>, vector<1x32xf32>
    %9 = vector.broadcast %8 : vector<1x32xf32> to vector<128x32xf32>
    %10 = arith.addf %7, %9 : vector<128x32xf32>
    %11 = tpu.concatenate %0, %10 in 1 : vector<128x32xf32>, vector<128x32xf32> -> vector<128x64xf32>
    %12 = arith.truncf %11 : vector<128x64xf32> to vector<128x64xbf16>
    %c0_10 = arith.constant 0 : index
    %c0_11 = arith.constant 0 : index
    %13 = vector.load %arg6[%c0_10, %c0_11] : memref<64x256xbf16, #tpu.memory_space<vmem>>, vector<64x256xbf16>
    %cst_12 = arith.constant dense<0.000000e+00> : vector<128x256xf32>
    %14 = tpu.matmul %12, %13, %cst_12 {dimension_numbers = #tpu.dot_dimension_numbers<[1], [0], [0], [1], [0, 0, 1, 1], [], []>} : vector<128x64xbf16>, vector<64x256xbf16>, vector<128x256xf32> -> vector<128x256xf32>
    %c0_13 = arith.constant 0 : index
    %c0_14 = arith.constant 0 : index
    %15 = vector.load %arg7[%c0_13, %c0_14] : memref<1x256xf32, #tpu.memory_space<vmem>>, vector<1x256xf32>
    %16 = vector.broadcast %15 : vector<1x256xf32> to vector<128x256xf32>
    %17 = arith.addf %14, %16 : vector<128x256xf32>
    %18 = arith.truncf %17 : vector<128x256xf32> to vector<128x256xbf16>
    %c0_15 = arith.constant 0 : index
    %c0_16 = arith.constant 0 : index
    %19 = vector.load %arg8[%c0_15, %c0_16] : memref<128x256xbf16, #tpu.memory_space<vmem>>, vector<128x256xbf16>
    tpu.vector_store %arg8[%c0_15, %c0_16], %18 {strides = array<i32>} : memref<128x256xbf16, #tpu.memory_space<vmem>>, vector<128x256xbf16>,
    return
  }
  func.func @transform_0(%arg0: i32) -> (i32, i32) {
    %c0_i32 = arith.constant 0 : i32
    %c0_i32_0 = arith.constant 0 : i32
    return %arg0, %c0_i32 : i32, i32
  }
  func.func @transform_1(%arg0: i32) -> (i32, i32) {
    %c0_i32 = arith.constant 0 : i32
    %c0_i32_0 = arith.constant 0 : i32
    %c0_i32_1 = arith.constant 0 : i32
    return %c0_i32, %c0_i32_0 : i32, i32
  }
  func.func @transform_2(%arg0: i32) -> (i32, i32) {
    %c0_i32 = arith.constant 0 : i32
    %c0_i32_0 = arith.constant 0 : i32
    return %arg0, %c0_i32 : i32, i32
  }
  func.func @transform_3(%arg0: i32) -> (i32, i32) {
    %c0_i32 = arith.constant 0 : i32
    %c0_i32_0 = arith.constant 0 : i32
    %c0_i32_1 = arith.constant 0 : i32
    return %c0_i32, %c0_i32_0 : i32, i32
  }
  func.func @transform_4(%arg0: i32) -> (i32, i32) {
    %c0_i32 = arith.constant 0 : i32
    %c0_i32_0 = arith.constant 0 : i32
    %c0_i32_1 = arith.constant 0 : i32
    return %c0_i32, %c0_i32_0 : i32, i32
  }
  func.func @transform_5(%arg0: i32) -> (i32, i32) {
    %c0_i32 = arith.constant 0 : i32
    %c0_i32_0 = arith.constant 0 : i32
    %c0_i32_1 = arith.constant 0 : i32
    return %c0_i32, %c0_i32_0 : i32, i32
  }
  func.func @transform_6(%arg0: i32) -> (i32, i32) {
    %c0_i32 = arith.constant 0 : i32
    %c0_i32_0 = arith.constant 0 : i32
    %c0_i32_1 = arith.constant 0 : i32
    return %c0_i32, %c0_i32_0 : i32, i32
  }
  func.func @transform_7(%arg0: i32) -> (i32, i32) {
    %c0_i32 = arith.constant 0 : i32
    %c0_i32_0 = arith.constant 0 : i32
    return %arg0, %c0_i32 : i32, i32
  }
}

module attributes {stable_mosaic.version = 11 : i64} {
  func.func @_edge_kv_kernel(%arg0: i32, %arg1: memref<128x128xbf16, #tpu.memory_space<vmem>>, %arg2: memref<128x256xbf16, #tpu.memory_space<vmem>>, %arg3: memref<128x32xbf16, #tpu.memory_space<vmem>>, %arg4: memref<32x64xbf16, #tpu.memory_space<vmem>>, %arg5: memref<128x128xbf16, #tpu.memory_space<vmem>>) attributes {dimension_semantics = [#tpu.dimension_semantics<parallel>], iteration_bounds = array<i64: 1>, scalar_prefetch = 0 : i64, scratch_operands = 0 : i64, tpu.core_type = #tpu.core_type<tc>, window_params = [{transform_indices = @transform_0, window_bounds = array<i64: 128, 128>}, {pipeline_mode = #tpu.pipeline_mode<synchronous>, transform_indices = @transform_1, window_bounds = array<i64: 128, 256>}, {transform_indices = @transform_2, window_bounds = array<i64: 128, 32>}, {pipeline_mode = #tpu.pipeline_mode<synchronous>, transform_indices = @transform_3, window_bounds = array<i64: 32, 64>}, {transform_indices = @transform_4, window_bounds = array<i64: 128, 128>}]} {
    %c0 = arith.constant 0 : index
    %c0_0 = arith.constant 0 : index
    %0 = vector.load %arg3[%c0, %c0_0] : memref<128x32xbf16, #tpu.memory_space<vmem>>, vector<128x32xbf16>
    %c0_1 = arith.constant 0 : index
    %c0_2 = arith.constant 0 : index
    %1 = vector.load %arg4[%c0_1, %c0_2] : memref<32x64xbf16, #tpu.memory_space<vmem>>, vector<32x64xbf16>
    %cst = arith.constant dense<0.000000e+00> : vector<128x64xf32>
    %2 = tpu.matmul %0, %1, %cst {dimension_numbers = #tpu.dot_dimension_numbers<[1], [0], [0], [1], [0, 0, 1, 1], [], []>} : vector<128x32xbf16>, vector<32x64xbf16>, vector<128x64xf32> -> vector<128x64xf32>
    %c0_3 = arith.constant 0 : index
    %c0_4 = arith.constant 0 : index
    %3 = vector.load %arg1[%c0_3, %c0_4] : memref<128x128xbf16, #tpu.memory_space<vmem>>, vector<128x128xbf16>
    %c0_5 = arith.constant 0 : index
    %c128 = arith.constant 128 : index
    %4 = vector.load %arg2[%c0_5, %c128] : memref<128x256xbf16, #tpu.memory_space<vmem>>, vector<128x128xbf16>
    %cst_6 = arith.constant dense<0.000000e+00> : vector<128x128xf32>
    %5 = tpu.matmul %3, %4, %cst_6 {dimension_numbers = #tpu.dot_dimension_numbers<[1], [0], [0], [1], [0, 0, 1, 1], [], []>} : vector<128x128xbf16>, vector<128x128xbf16>, vector<128x128xf32> -> vector<128x128xf32>
    %6 = tpu.concatenate %2, %2 in 1 : vector<128x64xf32>, vector<128x64xf32> -> vector<128x128xf32>
    %7 = arith.addf %5, %6 : vector<128x128xf32>
    %8 = arith.truncf %7 : vector<128x128xf32> to vector<128x128xbf16>
    %c0_7 = arith.constant 0 : index
    %c0_8 = arith.constant 0 : index
    %9 = vector.load %arg5[%c0_7, %c0_8] : memref<128x128xbf16, #tpu.memory_space<vmem>>, vector<128x128xbf16>
    tpu.vector_store %arg5[%c0_7, %c0_8], %8 {strides = array<i32>} : memref<128x128xbf16, #tpu.memory_space<vmem>>, vector<128x128xbf16>,
    return
  }
  func.func @transform_0(%arg0: i32) -> (i32, i32) {
    %c0_i32 = arith.constant 0 : i32
    %c0_i32_0 = arith.constant 0 : i32
    return %arg0, %c0_i32 : i32, i32
  }
  func.func @transform_1(%arg0: i32) -> (i32, i32) {
    %c0_i32 = arith.constant 0 : i32
    %c0_i32_0 = arith.constant 0 : i32
    %c0_i32_1 = arith.constant 0 : i32
    return %c0_i32, %c0_i32_0 : i32, i32
  }
  func.func @transform_2(%arg0: i32) -> (i32, i32) {
    %c0_i32 = arith.constant 0 : i32
    %c0_i32_0 = arith.constant 0 : i32
    return %arg0, %c0_i32 : i32, i32
  }
  func.func @transform_3(%arg0: i32) -> (i32, i32) {
    %c0_i32 = arith.constant 0 : i32
    %c0_i32_0 = arith.constant 0 : i32
    %c0_i32_1 = arith.constant 0 : i32
    return %c0_i32, %c0_i32_0 : i32, i32
  }
  func.func @transform_4(%arg0: i32) -> (i32, i32) {
    %c0_i32 = arith.constant 0 : i32
    %c0_i32_0 = arith.constant 0 : i32
    return %arg0, %c0_i32 : i32, i32
  }
}

module attributes {stable_mosaic.version = 11 : i64} {
  func.func @_node_attn_kernel(%arg0: i32, %arg1: memref<128x128xbf16, #tpu.memory_space<vmem>>, %arg2: memref<128x256xbf16, #tpu.memory_space<vmem>>, %arg3: memref<128x128xbf16, #tpu.memory_space<vmem>>, %arg4: memref<128x32xf32, #tpu.memory_space<vmem>>, %arg5: memref<64x32xbf16, #tpu.memory_space<vmem>>, %arg6: memref<1x32xf32, #tpu.memory_space<vmem>>, %arg7: memref<128x32xf32, #tpu.memory_space<vmem>>) attributes {dimension_semantics = [#tpu.dimension_semantics<parallel>], iteration_bounds = array<i64: 1>, scalar_prefetch = 0 : i64, scratch_operands = 0 : i64, tpu.core_type = #tpu.core_type<tc>, window_params = [{transform_indices = @transform_0, window_bounds = array<i64: 128, 128>}, {transform_indices = @transform_1, window_bounds = array<i64: 128, 256>}, {pipeline_mode = #tpu.pipeline_mode<synchronous>, transform_indices = @transform_2, window_bounds = array<i64: 128, 128>}, {transform_indices = @transform_3, window_bounds = array<i64: 128, 32>}, {pipeline_mode = #tpu.pipeline_mode<synchronous>, transform_indices = @transform_4, window_bounds = array<i64: 64, 32>}, {pipeline_mode = #tpu.pipeline_mode<synchronous>, transform_indices = @transform_5, window_bounds = array<i64: 1, 32>}, {transform_indices = @transform_6, window_bounds = array<i64: 128, 32>}]} {
    %c0 = arith.constant 0 : index
    %c0_0 = arith.constant 0 : index
    %0 = vector.load %arg1[%c0, %c0_0] : memref<128x128xbf16, #tpu.memory_space<vmem>>, vector<128x128xbf16>
    %1 = arith.extf %0 : vector<128x128xbf16> to vector<128x128xf32>
    %cst = arith.constant 5.000000e-01 : f32
    %2 = vector.broadcast %cst : f32 to vector<128x128xf32>
    %3 = arith.cmpf ogt, %1, %2 : vector<128x128xf32>
    %c0_1 = arith.constant 0 : index
    %c0_2 = arith.constant 0 : index
    %4 = vector.load %arg2[%c0_1, %c0_2] : memref<128x256xbf16, #tpu.memory_space<vmem>>, vector<128x32xbf16>
    %c0_3 = arith.constant 0 : index
    %c0_4 = arith.constant 0 : index
    %5 = vector.load %arg3[%c0_3, %c0_4] : memref<128x128xbf16, #tpu.memory_space<vmem>>, vector<128x32xbf16>
    %c0_5 = arith.constant 0 : index
    %c64 = arith.constant 64 : index
    %6 = vector.load %arg3[%c0_5, %c64] : memref<128x128xbf16, #tpu.memory_space<vmem>>, vector<128x32xbf16>
    %cst_6 = arith.constant dense<0.000000e+00> : vector<128x128xf32>
    %7 = tpu.matmul %4, %5, %cst_6 {dimension_numbers = #tpu.dot_dimension_numbers<[1], [1], [0], [0], [0, 0, 1, 0], [], []>} : vector<128x32xbf16>, vector<128x32xbf16>, vector<128x128xf32> -> vector<128x128xf32>
    %cst_7 = arith.constant 0.176776692 : f32
    %8 = vector.broadcast %cst_7 : f32 to vector<128x128xf32>
    %9 = arith.mulf %7, %8 : vector<128x128xf32>
    %cst_8 = arith.constant -1.000000e+30 : f32
    %10 = vector.broadcast %cst_8 : f32 to vector<128x128xf32>
    %11 = arith.select %3, %9, %10 : vector<128x128xi1>, vector<128x128xf32>
    %cst_9 = arith.constant dense<0xFF800000> : vector<128xf32>
    %12 = vector.multi_reduction <maximumf>, %11, %cst_9 [1] : vector<128x128xf32> to vector<128xf32>
    %13 = vector.shape_cast %12 : vector<128xf32> to vector<128x1xf32>
    %cst_10 = arith.constant -1.000000e+29 : f32
    %14 = vector.broadcast %cst_10 : f32 to vector<128x1xf32>
    %15 = arith.cmpf olt, %13, %14 : vector<128x1xf32>
    %cst_11 = arith.constant 0.000000e+00 : f32
    %16 = vector.broadcast %cst_11 : f32 to vector<128x1xf32>
    %17 = arith.select %15, %16, %13 : vector<128x1xi1>, vector<128x1xf32>
    %18 = vector.broadcast %17 : vector<128x1xf32> to vector<128x128xf32>
    %19 = arith.subf %11, %18 : vector<128x128xf32>
    %20 = math.exp %19 : vector<128x128xf32>
    %cst_12 = arith.constant dense<0.000000e+00> : vector<128xf32>
    %21 = vector.multi_reduction <add>, %20, %cst_12 [1] : vector<128x128xf32> to vector<128xf32>
    %22 = vector.shape_cast %21 : vector<128xf32> to vector<128x1xf32>
    %cst_13 = arith.constant 1.000000e-16 : f32
    %23 = vector.broadcast %cst_13 : f32 to vector<128x1xf32>
    %24 = arith.addf %22, %23 : vector<128x1xf32>
    %25 = tpu.reciprocal %24 {approx = true} : vector<128x1xf32> -> vector<128x1xf32>
    %26 = vector.broadcast %25 : vector<128x1xf32> to vector<128x128xf32>
    %27 = arith.mulf %20, %26 : vector<128x128xf32>
    %28 = arith.truncf %27 : vector<128x128xf32> to vector<128x128xbf16>
    %cst_14 = arith.constant dense<0.000000e+00> : vector<128x32xf32>
    %29 = tpu.matmul %28, %6, %cst_14 {dimension_numbers = #tpu.dot_dimension_numbers<[1], [0], [0], [1], [0, 0, 1, 1], [], []>} : vector<128x128xbf16>, vector<128x32xbf16>, vector<128x32xf32> -> vector<128x32xf32>
    %c0_15 = arith.constant 0 : index
    %c32 = arith.constant 32 : index
    %30 = vector.load %arg2[%c0_15, %c32] : memref<128x256xbf16, #tpu.memory_space<vmem>>, vector<128x32xbf16>
    %c0_16 = arith.constant 0 : index
    %c32_17 = arith.constant 32 : index
    %31 = vector.load %arg3[%c0_16, %c32_17] : memref<128x128xbf16, #tpu.memory_space<vmem>>, vector<128x32xbf16>
    %c0_18 = arith.constant 0 : index
    %c96 = arith.constant 96 : index
    %32 = vector.load %arg3[%c0_18, %c96] : memref<128x128xbf16, #tpu.memory_space<vmem>>, vector<128x32xbf16>
    %cst_19 = arith.constant dense<0.000000e+00> : vector<128x128xf32>
    %33 = tpu.matmul %30, %31, %cst_19 {dimension_numbers = #tpu.dot_dimension_numbers<[1], [1], [0], [0], [0, 0, 1, 0], [], []>} : vector<128x32xbf16>, vector<128x32xbf16>, vector<128x128xf32> -> vector<128x128xf32>
    %cst_20 = arith.constant 0.176776692 : f32
    %34 = vector.broadcast %cst_20 : f32 to vector<128x128xf32>
    %35 = arith.mulf %33, %34 : vector<128x128xf32>
    %cst_21 = arith.constant -1.000000e+30 : f32
    %36 = vector.broadcast %cst_21 : f32 to vector<128x128xf32>
    %37 = arith.select %3, %35, %36 : vector<128x128xi1>, vector<128x128xf32>
    %cst_22 = arith.constant dense<0xFF800000> : vector<128xf32>
    %38 = vector.multi_reduction <maximumf>, %37, %cst_22 [1] : vector<128x128xf32> to vector<128xf32>
    %39 = vector.shape_cast %38 : vector<128xf32> to vector<128x1xf32>
    %cst_23 = arith.constant -1.000000e+29 : f32
    %40 = vector.broadcast %cst_23 : f32 to vector<128x1xf32>
    %41 = arith.cmpf olt, %39, %40 : vector<128x1xf32>
    %cst_24 = arith.constant 0.000000e+00 : f32
    %42 = vector.broadcast %cst_24 : f32 to vector<128x1xf32>
    %43 = arith.select %41, %42, %39 : vector<128x1xi1>, vector<128x1xf32>
    %44 = vector.broadcast %43 : vector<128x1xf32> to vector<128x128xf32>
    %45 = arith.subf %37, %44 : vector<128x128xf32>
    %46 = math.exp %45 : vector<128x128xf32>
    %cst_25 = arith.constant dense<0.000000e+00> : vector<128xf32>
    %47 = vector.multi_reduction <add>, %46, %cst_25 [1] : vector<128x128xf32> to vector<128xf32>
    %48 = vector.shape_cast %47 : vector<128xf32> to vector<128x1xf32>
    %cst_26 = arith.constant 1.000000e-16 : f32
    %49 = vector.broadcast %cst_26 : f32 to vector<128x1xf32>
    %50 = arith.addf %48, %49 : vector<128x1xf32>
    %51 = tpu.reciprocal %50 {approx = true} : vector<128x1xf32> -> vector<128x1xf32>
    %52 = vector.broadcast %51 : vector<128x1xf32> to vector<128x128xf32>
    %53 = arith.mulf %46, %52 : vector<128x128xf32>
    %54 = arith.truncf %53 : vector<128x128xf32> to vector<128x128xbf16>
    %cst_27 = arith.constant dense<0.000000e+00> : vector<128x32xf32>
    %55 = tpu.matmul %54, %32, %cst_27 {dimension_numbers = #tpu.dot_dimension_numbers<[1], [0], [0], [1], [0, 0, 1, 1], [], []>} : vector<128x128xbf16>, vector<128x32xbf16>, vector<128x32xf32> -> vector<128x32xf32>
    %56 = tpu.concatenate %29, %55 in 1 : vector<128x32xf32>, vector<128x32xf32> -> vector<128x64xf32>
    %c0_28 = arith.constant 0 : index
    %c64_29 = arith.constant 64 : index
    %57 = vector.load %arg2[%c0_28, %c64_29] : memref<128x256xbf16, #tpu.memory_space<vmem>>, vector<128x64xbf16>
    %58 = arith.extf %57 : vector<128x64xbf16> to vector<128x64xf32>
    %59 = arith.addf %56, %58 : vector<128x64xf32>
    %60 = arith.truncf %59 : vector<128x64xf32> to vector<128x64xbf16>
    %c0_30 = arith.constant 0 : index
    %c0_31 = arith.constant 0 : index
    %61 = vector.load %arg5[%c0_30, %c0_31] : memref<64x32xbf16, #tpu.memory_space<vmem>>, vector<64x32xbf16>
    %cst_32 = arith.constant dense<0.000000e+00> : vector<128x32xf32>
    %62 = tpu.matmul %60, %61, %cst_32 {dimension_numbers = #tpu.dot_dimension_numbers<[1], [0], [0], [1], [0, 0, 1, 1], [], []>} : vector<128x64xbf16>, vector<64x32xbf16>, vector<128x32xf32> -> vector<128x32xf32>
    %c0_33 = arith.constant 0 : index
    %c0_34 = arith.constant 0 : index
    %63 = vector.load %arg6[%c0_33, %c0_34] : memref<1x32xf32, #tpu.memory_space<vmem>>, vector<1x32xf32>
    %64 = vector.broadcast %63 : vector<1x32xf32> to vector<128x32xf32>
    %65 = arith.addf %62, %64 : vector<128x32xf32>
    %c0_35 = arith.constant 0 : index
    %c0_36 = arith.constant 0 : index
    %66 = vector.load %arg4[%c0_35, %c0_36] : memref<128x32xf32, #tpu.memory_space<vmem>>, vector<128x32xf32>
    %67 = arith.addf %66, %65 : vector<128x32xf32>
    %c0_37 = arith.constant 0 : index
    %c0_38 = arith.constant 0 : index
    %68 = vector.load %arg7[%c0_37, %c0_38] : memref<128x32xf32, #tpu.memory_space<vmem>>, vector<128x32xf32>
    tpu.vector_store %arg7[%c0_37, %c0_38], %67 {strides = array<i32>} : memref<128x32xf32, #tpu.memory_space<vmem>>, vector<128x32xf32>,
    return
  }
  func.func @transform_0(%arg0: i32) -> (i32, i32) {
    %c0_i32 = arith.constant 0 : i32
    %c0_i32_0 = arith.constant 0 : i32
    return %arg0, %c0_i32 : i32, i32
  }
  func.func @transform_1(%arg0: i32) -> (i32, i32) {
    %c0_i32 = arith.constant 0 : i32
    %c0_i32_0 = arith.constant 0 : i32
    return %arg0, %c0_i32 : i32, i32
  }
  func.func @transform_2(%arg0: i32) -> (i32, i32) {
    %c0_i32 = arith.constant 0 : i32
    %c0_i32_0 = arith.constant 0 : i32
    %c0_i32_1 = arith.constant 0 : i32
    return %c0_i32, %c0_i32_0 : i32, i32
  }
  func.func @transform_3(%arg0: i32) -> (i32, i32) {
    %c0_i32 = arith.constant 0 : i32
    %c0_i32_0 = arith.constant 0 : i32
    return %arg0, %c0_i32 : i32, i32
  }
  func.func @transform_4(%arg0: i32) -> (i32, i32) {
    %c0_i32 = arith.constant 0 : i32
    %c0_i32_0 = arith.constant 0 : i32
    %c0_i32_1 = arith.constant 0 : i32
    return %c0_i32, %c0_i32_0 : i32, i32
  }
  func.func @transform_5(%arg0: i32) -> (i32, i32) {
    %c0_i32 = arith.constant 0 : i32
    %c0_i32_0 = arith.constant 0 : i32
    %c0_i32_1 = arith.constant 0 : i32
    return %c0_i32, %c0_i32_0 : i32, i32
  }
  func.func @transform_6(%arg0: i32) -> (i32, i32) {
    %c0_i32 = arith.constant 0 : i32
    %c0_i32_0 = arith.constant 0 : i32
    return %arg0, %c0_i32 : i32, i32
  }
}

module attributes {stable_mosaic.version = 11 : i64} {
  func.func @_pool_kernel(%arg0: memref<2x128xf32, #tpu.memory_space<vmem>>, %arg1: memref<128x32xf32, #tpu.memory_space<vmem>>, %arg2: memref<2x1xf32, #tpu.memory_space<vmem>>, %arg3: memref<2x32xf32, #tpu.memory_space<vmem>>) attributes {dimension_semantics = [], scalar_prefetch = 0 : i64, scratch_operands = 0 : i64, tpu.core_type = #tpu.core_type<tc>} {
    %c0 = arith.constant 0 : index
    %c0_0 = arith.constant 0 : index
    %0 = vector.load %arg0[%c0, %c0_0] : memref<2x128xf32, #tpu.memory_space<vmem>>, vector<2x128xf32>
    %c0_1 = arith.constant 0 : index
    %c0_2 = arith.constant 0 : index
    %1 = vector.load %arg1[%c0_1, %c0_2] : memref<128x32xf32, #tpu.memory_space<vmem>>, vector<128x32xf32>
    %cst = arith.constant dense<0.000000e+00> : vector<2x32xf32>
    %2 = tpu.matmul %0, %1, %cst {dimension_numbers = #tpu.dot_dimension_numbers<[1], [0], [0], [1], [0, 0, 1, 1], [], []>} : vector<2x128xf32>, vector<128x32xf32>, vector<2x32xf32> -> vector<2x32xf32>
    %c0_3 = arith.constant 0 : index
    %c0_4 = arith.constant 0 : index
    %3 = vector.load %arg2[%c0_3, %c0_4] : memref<2x1xf32, #tpu.memory_space<vmem>>, vector<2x1xf32>
    %4 = vector.broadcast %3 : vector<2x1xf32> to vector<2x32xf32>
    %5 = arith.mulf %2, %4 : vector<2x32xf32>
    %c0_5 = arith.constant 0 : index
    %c0_6 = arith.constant 0 : index
    %6 = vector.load %arg3[%c0_5, %c0_6] : memref<2x32xf32, #tpu.memory_space<vmem>>, vector<2x32xf32>
    tpu.vector_store %arg3[%c0_5, %c0_6], %5 {strides = array<i32>} : memref<2x32xf32, #tpu.memory_space<vmem>>, vector<2x32xf32>,
    return
  }
}

module attributes {stable_mosaic.version = 11 : i64} {
  func.func @_mlp_kernel(%arg0: i32, %arg1: memref<128x96xbf16, #tpu.memory_space<vmem>>, %arg2: memref<96x2xbf16, #tpu.memory_space<vmem>>, %arg3: memref<1x2xf32, #tpu.memory_space<vmem>>, %arg4: memref<128x2xf32, #tpu.memory_space<vmem>>) attributes {dimension_semantics = [#tpu.dimension_semantics<parallel>], iteration_bounds = array<i64: 1>, scalar_prefetch = 0 : i64, scratch_operands = 0 : i64, tpu.core_type = #tpu.core_type<tc>, window_params = [{transform_indices = @transform_0, window_bounds = array<i64: 128, 96>}, {pipeline_mode = #tpu.pipeline_mode<synchronous>, transform_indices = @transform_1, window_bounds = array<i64: 96, 2>}, {pipeline_mode = #tpu.pipeline_mode<synchronous>, transform_indices = @transform_2, window_bounds = array<i64: 1, 2>}, {transform_indices = @transform_3, window_bounds = array<i64: 128, 2>}]} {
    %c0 = arith.constant 0 : index
    %c0_0 = arith.constant 0 : index
    %0 = vector.load %arg1[%c0, %c0_0] : memref<128x96xbf16, #tpu.memory_space<vmem>>, vector<128x96xbf16>
    %c0_1 = arith.constant 0 : index
    %c0_2 = arith.constant 0 : index
    %1 = vector.load %arg2[%c0_1, %c0_2] : memref<96x2xbf16, #tpu.memory_space<vmem>>, vector<96x2xbf16>
    %c0_3 = arith.constant 0 : index
    %c0_4 = arith.constant 0 : index
    %2 = vector.load %arg3[%c0_3, %c0_4] : memref<1x2xf32, #tpu.memory_space<vmem>>, vector<1x2xf32>
    %cst = arith.constant dense<0.000000e+00> : vector<128x2xf32>
    %3 = tpu.matmul %0, %1, %cst {dimension_numbers = #tpu.dot_dimension_numbers<[1], [0], [0], [1], [0, 0, 1, 1], [], []>} : vector<128x96xbf16>, vector<96x2xbf16>, vector<128x2xf32> -> vector<128x2xf32>
    %4 = vector.broadcast %2 : vector<1x2xf32> to vector<128x2xf32>
    %5 = arith.addf %3, %4 : vector<128x2xf32>
    %c0_5 = arith.constant 0 : index
    %c0_6 = arith.constant 0 : index
    %6 = vector.load %arg4[%c0_5, %c0_6] : memref<128x2xf32, #tpu.memory_space<vmem>>, vector<128x2xf32>
    tpu.vector_store %arg4[%c0_5, %c0_6], %5 {strides = array<i32>} : memref<128x2xf32, #tpu.memory_space<vmem>>, vector<128x2xf32>,
    return
  }
  func.func @transform_0(%arg0: i32) -> (i32, i32) {
    %c0_i32 = arith.constant 0 : i32
    %c0_i32_0 = arith.constant 0 : i32
    return %arg0, %c0_i32 : i32, i32
  }
  func.func @transform_1(%arg0: i32) -> (i32, i32) {
    %c0_i32 = arith.constant 0 : i32
    %c0_i32_0 = arith.constant 0 : i32
    %c0_i32_1 = arith.constant 0 : i32
    return %c0_i32, %c0_i32_0 : i32, i32
  }
  func.func @transform_2(%arg0: i32) -> (i32, i32) {
    %c0_i32 = arith.constant 0 : i32
    %c0_i32_0 = arith.constant 0 : i32
    %c0_i32_1 = arith.constant 0 : i32
    return %c0_i32, %c0_i32_0 : i32, i32
  }
  func.func @transform_3(%arg0: i32) -> (i32, i32) {
    %c0_i32 = arith.constant 0 : i32
    %c0_i32_0 = arith.constant 0 : i32
    return %arg0, %c0_i32 : i32, i32
  }
}

module attributes {stable_mosaic.version = 11 : i64} {
  func.func @_norm_ff_norm_kernel(%arg0: memref<128x32xf32, #tpu.memory_space<vmem>>, %arg1: memref<128x2xf32, #tpu.memory_space<vmem>>, %arg2: memref<2x128xf32, #tpu.memory_space<vmem>>, %arg3: memref<2x1xf32, #tpu.memory_space<vmem>>, %arg4: memref<128x1xf32, #tpu.memory_space<vmem>>, %arg5: memref<32x128xbf16, #tpu.memory_space<vmem>>, %arg6: memref<1x128xf32, #tpu.memory_space<vmem>>, %arg7: memref<128x32xbf16, #tpu.memory_space<vmem>>, %arg8: memref<1x32xf32, #tpu.memory_space<vmem>>, %arg9: memref<128x32xf32, #tpu.memory_space<vmem>>) attributes {dimension_semantics = [], scalar_prefetch = 0 : i64, scratch_operands = 0 : i64, tpu.core_type = #tpu.core_type<tc>} {
    %c0 = arith.constant 0 : index
    %c0_0 = arith.constant 0 : index
    %0 = vector.load %arg1[%c0, %c0_0] : memref<128x2xf32, #tpu.memory_space<vmem>>, vector<128x2xf32>
    %c0_1 = arith.constant 0 : index
    %c0_2 = arith.constant 0 : index
    %1 = vector.load %arg2[%c0_1, %c0_2] : memref<2x128xf32, #tpu.memory_space<vmem>>, vector<2x128xf32>
    %c0_3 = arith.constant 0 : index
    %c0_4 = arith.constant 0 : index
    %2 = vector.load %arg3[%c0_3, %c0_4] : memref<2x1xf32, #tpu.memory_space<vmem>>, vector<2x1xf32>
    %c0_5 = arith.constant 0 : index
    %c0_6 = arith.constant 0 : index
    %3 = vector.load %arg4[%c0_5, %c0_6] : memref<128x1xf32, #tpu.memory_space<vmem>>, vector<128x1xf32>
    %c0_7 = arith.constant 0 : index
    %c0_8 = arith.constant 0 : index
    %4 = vector.load %arg0[%c0_7, %c0_8] : memref<128x32xf32, #tpu.memory_space<vmem>>, vector<128x32xf32>
    %cst = arith.constant dense<0.000000e+00> : vector<2x32xf32>
    %5 = tpu.matmul %1, %4, %cst {dimension_numbers = #tpu.dot_dimension_numbers<[1], [0], [0], [1], [0, 0, 1, 1], [], []>} : vector<2x128xf32>, vector<128x32xf32>, vector<2x32xf32> -> vector<2x32xf32>
    %cst_9 = arith.constant dense<0.000000e+00> : vector<2xf32>
    %6 = vector.multi_reduction <add>, %5, %cst_9 [1] : vector<2x32xf32> to vector<2xf32>
    %7 = vector.shape_cast %6 : vector<2xf32> to vector<2x1xf32>
    %8 = arith.mulf %7, %2 : vector<2x1xf32>
    %cst_10 = arith.constant dense<0.000000e+00> : vector<128x1xf32>
    %9 = tpu.matmul %0, %8, %cst_10 {dimension_numbers = #tpu.dot_dimension_numbers<[1], [0], [0], [1], [0, 0, 1, 1], [], []>} : vector<128x2xf32>, vector<2x1xf32>, vector<128x1xf32> -> vector<128x1xf32>
    %10 = vector.broadcast %9 : vector<128x1xf32> to vector<128x32xf32>
    %11 = arith.subf %4, %10 : vector<128x32xf32>
    %12 = arith.mulf %11, %11 : vector<128x32xf32>
    %cst_11 = arith.constant dense<0.000000e+00> : vector<2x32xf32>
    %13 = tpu.matmul %1, %12, %cst_11 {dimension_numbers = #tpu.dot_dimension_numbers<[1], [0], [0], [1], [0, 0, 1, 1], [], []>} : vector<2x128xf32>, vector<128x32xf32>, vector<2x32xf32> -> vector<2x32xf32>
    %cst_12 = arith.constant dense<0.000000e+00> : vector<2xf32>
    %14 = vector.multi_reduction <add>, %13, %cst_12 [1] : vector<2x32xf32> to vector<2xf32>
    %15 = vector.shape_cast %14 : vector<2xf32> to vector<2x1xf32>
    %16 = arith.mulf %15, %2 : vector<2x1xf32>
    %cst_13 = arith.constant 9.99999974E-6 : f32
    %17 = vector.broadcast %cst_13 : f32 to vector<2x1xf32>
    %18 = arith.addf %16, %17 : vector<2x1xf32>
    %19 = math.rsqrt %18 : vector<2x1xf32>
    %cst_14 = arith.constant dense<0.000000e+00> : vector<128x1xf32>
    %20 = tpu.matmul %0, %19, %cst_14 {dimension_numbers = #tpu.dot_dimension_numbers<[1], [0], [0], [1], [0, 0, 1, 1], [], []>} : vector<128x2xf32>, vector<2x1xf32>, vector<128x1xf32> -> vector<128x1xf32>
    %21 = vector.broadcast %20 : vector<128x1xf32> to vector<128x32xf32>
    %22 = arith.mulf %11, %21 : vector<128x32xf32>
    %23 = vector.broadcast %3 : vector<128x1xf32> to vector<128x32xf32>
    %24 = arith.mulf %22, %23 : vector<128x32xf32>
    %25 = arith.truncf %24 : vector<128x32xf32> to vector<128x32xbf16>
    %c0_15 = arith.constant 0 : index
    %c0_16 = arith.constant 0 : index
    %26 = vector.load %arg5[%c0_15, %c0_16] : memref<32x128xbf16, #tpu.memory_space<vmem>>, vector<32x128xbf16>
    %cst_17 = arith.constant dense<0.000000e+00> : vector<128x128xf32>
    %27 = tpu.matmul %25, %26, %cst_17 {dimension_numbers = #tpu.dot_dimension_numbers<[1], [0], [0], [1], [0, 0, 1, 1], [], []>} : vector<128x32xbf16>, vector<32x128xbf16>, vector<128x128xf32> -> vector<128x128xf32>
    %c0_18 = arith.constant 0 : index
    %c0_19 = arith.constant 0 : index
    %28 = vector.load %arg6[%c0_18, %c0_19] : memref<1x128xf32, #tpu.memory_space<vmem>>, vector<1x128xf32>
    %29 = vector.broadcast %28 : vector<1x128xf32> to vector<128x128xf32>
    %30 = arith.addf %27, %29 : vector<128x128xf32>
    %cst_20 = arith.constant 0.00999999977 : f32
    %31 = vector.broadcast %cst_20 : f32 to vector<128x128xf32>
    %32 = arith.mulf %31, %30 : vector<128x128xf32>
    %33 = arith.maximumf %30, %32 : vector<128x128xf32>
    %34 = arith.truncf %33 : vector<128x128xf32> to vector<128x128xbf16>
    %c0_21 = arith.constant 0 : index
    %c0_22 = arith.constant 0 : index
    %35 = vector.load %arg7[%c0_21, %c0_22] : memref<128x32xbf16, #tpu.memory_space<vmem>>, vector<128x32xbf16>
    %cst_23 = arith.constant dense<0.000000e+00> : vector<128x32xf32>
    %36 = tpu.matmul %34, %35, %cst_23 {dimension_numbers = #tpu.dot_dimension_numbers<[1], [0], [0], [1], [0, 0, 1, 1], [], []>} : vector<128x128xbf16>, vector<128x32xbf16>, vector<128x32xf32> -> vector<128x32xf32>
    %c0_24 = arith.constant 0 : index
    %c0_25 = arith.constant 0 : index
    %37 = vector.load %arg8[%c0_24, %c0_25] : memref<1x32xf32, #tpu.memory_space<vmem>>, vector<1x32xf32>
    %38 = vector.broadcast %37 : vector<1x32xf32> to vector<128x32xf32>
    %39 = arith.addf %36, %38 : vector<128x32xf32>
    %40 = arith.addf %24, %39 : vector<128x32xf32>
    %cst_26 = arith.constant dense<0.000000e+00> : vector<2x32xf32>
    %41 = tpu.matmul %1, %40, %cst_26 {dimension_numbers = #tpu.dot_dimension_numbers<[1], [0], [0], [1], [0, 0, 1, 1], [], []>} : vector<2x128xf32>, vector<128x32xf32>, vector<2x32xf32> -> vector<2x32xf32>
    %cst_27 = arith.constant dense<0.000000e+00> : vector<2xf32>
    %42 = vector.multi_reduction <add>, %41, %cst_27 [1] : vector<2x32xf32> to vector<2xf32>
    %43 = vector.shape_cast %42 : vector<2xf32> to vector<2x1xf32>
    %44 = arith.mulf %43, %2 : vector<2x1xf32>
    %cst_28 = arith.constant dense<0.000000e+00> : vector<128x1xf32>
    %45 = tpu.matmul %0, %44, %cst_28 {dimension_numbers = #tpu.dot_dimension_numbers<[1], [0], [0], [1], [0, 0, 1, 1], [], []>} : vector<128x2xf32>, vector<2x1xf32>, vector<128x1xf32> -> vector<128x1xf32>
    %46 = vector.broadcast %45 : vector<128x1xf32> to vector<128x32xf32>
    %47 = arith.subf %40, %46 : vector<128x32xf32>
    %48 = arith.mulf %47, %47 : vector<128x32xf32>
    %cst_29 = arith.constant dense<0.000000e+00> : vector<2x32xf32>
    %49 = tpu.matmul %1, %48, %cst_29 {dimension_numbers = #tpu.dot_dimension_numbers<[1], [0], [0], [1], [0, 0, 1, 1], [], []>} : vector<2x128xf32>, vector<128x32xf32>, vector<2x32xf32> -> vector<2x32xf32>
    %cst_30 = arith.constant dense<0.000000e+00> : vector<2xf32>
    %50 = vector.multi_reduction <add>, %49, %cst_30 [1] : vector<2x32xf32> to vector<2xf32>
    %51 = vector.shape_cast %50 : vector<2xf32> to vector<2x1xf32>
    %52 = arith.mulf %51, %2 : vector<2x1xf32>
    %cst_31 = arith.constant 9.99999974E-6 : f32
    %53 = vector.broadcast %cst_31 : f32 to vector<2x1xf32>
    %54 = arith.addf %52, %53 : vector<2x1xf32>
    %55 = math.rsqrt %54 : vector<2x1xf32>
    %cst_32 = arith.constant dense<0.000000e+00> : vector<128x1xf32>
    %56 = tpu.matmul %0, %55, %cst_32 {dimension_numbers = #tpu.dot_dimension_numbers<[1], [0], [0], [1], [0, 0, 1, 1], [], []>} : vector<128x2xf32>, vector<2x1xf32>, vector<128x1xf32> -> vector<128x1xf32>
    %57 = vector.broadcast %56 : vector<128x1xf32> to vector<128x32xf32>
    %58 = arith.mulf %47, %57 : vector<128x32xf32>
    %59 = vector.broadcast %3 : vector<128x1xf32> to vector<128x32xf32>
    %60 = arith.mulf %58, %59 : vector<128x32xf32>
    %c0_33 = arith.constant 0 : index
    %c0_34 = arith.constant 0 : index
    %61 = vector.load %arg9[%c0_33, %c0_34] : memref<128x32xf32, #tpu.memory_space<vmem>>, vector<128x32xf32>
    tpu.vector_store %arg9[%c0_33, %c0_34], %60 {strides = array<i32>} : memref<128x32xf32, #tpu.memory_space<vmem>>, vector<128x32xf32>,
    return
  }
}

module attributes {stable_mosaic.version = 11 : i64} {
  func.func @_mlp_kernel(%arg0: i32, %arg1: memref<128x64xbf16, #tpu.memory_space<vmem>>, %arg2: memref<64x5xbf16, #tpu.memory_space<vmem>>, %arg3: memref<1x5xf32, #tpu.memory_space<vmem>>, %arg4: memref<128x5xf32, #tpu.memory_space<vmem>>) attributes {dimension_semantics = [#tpu.dimension_semantics<parallel>], iteration_bounds = array<i64: 1>, scalar_prefetch = 0 : i64, scratch_operands = 0 : i64, tpu.core_type = #tpu.core_type<tc>, window_params = [{transform_indices = @transform_0, window_bounds = array<i64: 128, 64>}, {pipeline_mode = #tpu.pipeline_mode<synchronous>, transform_indices = @transform_1, window_bounds = array<i64: 64, 5>}, {pipeline_mode = #tpu.pipeline_mode<synchronous>, transform_indices = @transform_2, window_bounds = array<i64: 1, 5>}, {transform_indices = @transform_3, window_bounds = array<i64: 128, 5>}]} {
    %c0 = arith.constant 0 : index
    %c0_0 = arith.constant 0 : index
    %0 = vector.load %arg1[%c0, %c0_0] : memref<128x64xbf16, #tpu.memory_space<vmem>>, vector<128x64xbf16>
    %c0_1 = arith.constant 0 : index
    %c0_2 = arith.constant 0 : index
    %1 = vector.load %arg2[%c0_1, %c0_2] : memref<64x5xbf16, #tpu.memory_space<vmem>>, vector<64x5xbf16>
    %c0_3 = arith.constant 0 : index
    %c0_4 = arith.constant 0 : index
    %2 = vector.load %arg3[%c0_3, %c0_4] : memref<1x5xf32, #tpu.memory_space<vmem>>, vector<1x5xf32>
    %cst = arith.constant dense<0.000000e+00> : vector<128x5xf32>
    %3 = tpu.matmul %0, %1, %cst {dimension_numbers = #tpu.dot_dimension_numbers<[1], [0], [0], [1], [0, 0, 1, 1], [], []>} : vector<128x64xbf16>, vector<64x5xbf16>, vector<128x5xf32> -> vector<128x5xf32>
    %4 = vector.broadcast %2 : vector<1x5xf32> to vector<128x5xf32>
    %5 = arith.addf %3, %4 : vector<128x5xf32>
    %c0_5 = arith.constant 0 : index
    %c0_6 = arith.constant 0 : index
    %6 = vector.load %arg4[%c0_5, %c0_6] : memref<128x5xf32, #tpu.memory_space<vmem>>, vector<128x5xf32>
    tpu.vector_store %arg4[%c0_5, %c0_6], %5 {strides = array<i32>} : memref<128x5xf32, #tpu.memory_space<vmem>>, vector<128x5xf32>,
    return
  }
  func.func @transform_0(%arg0: i32) -> (i32, i32) {
    %c0_i32 = arith.constant 0 : i32
    %c0_i32_0 = arith.constant 0 : i32
    return %arg0, %c0_i32 : i32, i32
  }
  func.func @transform_1(%arg0: i32) -> (i32, i32) {
    %c0_i32 = arith.constant 0 : i32
    %c0_i32_0 = arith.constant 0 : i32
    %c0_i32_1 = arith.constant 0 : i32
    return %c0_i32, %c0_i32_0 : i32, i32
  }
  func.func @transform_2(%arg0: i32) -> (i32, i32) {
    %c0_i32 = arith.constant 0 : i32
    %c0_i32_0 = arith.constant 0 : i32
    %c0_i32_1 = arith.constant 0 : i32
    return %c0_i32, %c0_i32_0 : i32, i32
  }
  func.func @transform_3(%arg0: i32) -> (i32, i32) {
    %c0_i32 = arith.constant 0 : i32
    %c0_i32_0 = arith.constant 0 : i32
    return %arg0, %c0_i32 : i32, i32
  }
}

module attributes {stable_mosaic.version = 11 : i64} {
  func.func @_mlp_kernel(%arg0: i32, %arg1: memref<128x64xbf16, #tpu.memory_space<vmem>>, %arg2: memref<64x32xbf16, #tpu.memory_space<vmem>>, %arg3: memref<1x32xf32, #tpu.memory_space<vmem>>, %arg4: memref<128x32xf32, #tpu.memory_space<vmem>>) attributes {dimension_semantics = [#tpu.dimension_semantics<parallel>], iteration_bounds = array<i64: 1>, scalar_prefetch = 0 : i64, scratch_operands = 0 : i64, tpu.core_type = #tpu.core_type<tc>, window_params = [{transform_indices = @transform_0, window_bounds = array<i64: 128, 64>}, {pipeline_mode = #tpu.pipeline_mode<synchronous>, transform_indices = @transform_1, window_bounds = array<i64: 64, 32>}, {pipeline_mode = #tpu.pipeline_mode<synchronous>, transform_indices = @transform_2, window_bounds = array<i64: 1, 32>}, {transform_indices = @transform_3, window_bounds = array<i64: 128, 32>}]} {
    %c0 = arith.constant 0 : index
    %c0_0 = arith.constant 0 : index
    %0 = vector.load %arg1[%c0, %c0_0] : memref<128x64xbf16, #tpu.memory_space<vmem>>, vector<128x64xbf16>
    %c0_1 = arith.constant 0 : index
    %c0_2 = arith.constant 0 : index
    %1 = vector.load %arg2[%c0_1, %c0_2] : memref<64x32xbf16, #tpu.memory_space<vmem>>, vector<64x32xbf16>
    %c0_3 = arith.constant 0 : index
    %c0_4 = arith.constant 0 : index
    %2 = vector.load %arg3[%c0_3, %c0_4] : memref<1x32xf32, #tpu.memory_space<vmem>>, vector<1x32xf32>
    %cst = arith.constant dense<0.000000e+00> : vector<128x32xf32>
    %3 = tpu.matmul %0, %1, %cst {dimension_numbers = #tpu.dot_dimension_numbers<[1], [0], [0], [1], [0, 0, 1, 1], [], []>} : vector<128x64xbf16>, vector<64x32xbf16>, vector<128x32xf32> -> vector<128x32xf32>
    %4 = vector.broadcast %2 : vector<1x32xf32> to vector<128x32xf32>
    %5 = arith.addf %3, %4 : vector<128x32xf32>
    %c0_5 = arith.constant 0 : index
    %c0_6 = arith.constant 0 : index
    %6 = vector.load %arg4[%c0_5, %c0_6] : memref<128x32xf32, #tpu.memory_space<vmem>>, vector<128x32xf32>
    tpu.vector_store %arg4[%c0_5, %c0_6], %5 {strides = array<i32>} : memref<128x32xf32, #tpu.memory_space<vmem>>, vector<128x32xf32>,
    return
  }
  func.func @transform_0(%arg0: i32) -> (i32, i32) {
    %c0_i32 = arith.constant 0 : i32
    %c0_i32_0 = arith.constant 0 : i32
    return %arg0, %c0_i32 : i32, i32
  }
  func.func @transform_1(%arg0: i32) -> (i32, i32) {
    %c0_i32 = arith.constant 0 : i32
    %c0_i32_0 = arith.constant 0 : i32
    %c0_i32_1 = arith.constant 0 : i32
    return %c0_i32, %c0_i32_0 : i32, i32
  }
  func.func @transform_2(%arg0: i32) -> (i32, i32) {
    %c0_i32 = arith.constant 0 : i32
    %c0_i32_0 = arith.constant 0 : i32
    %c0_i32_1 = arith.constant 0 : i32
    return %c0_i32, %c0_i32_0 : i32, i32
  }
  func.func @transform_3(%arg0: i32) -> (i32, i32) {
    %c0_i32 = arith.constant 0 : i32
    %c0_i32_0 = arith.constant 0 : i32
    return %arg0, %c0_i32 : i32, i32
  }
}

module attributes {stable_mosaic.version = 11 : i64} {
  func.func @_mlp_kernel(%arg0: i32, %arg1: memref<128x96xbf16, #tpu.memory_space<vmem>>, %arg2: memref<96x4xbf16, #tpu.memory_space<vmem>>, %arg3: memref<1x4xf32, #tpu.memory_space<vmem>>, %arg4: memref<128x4xf32, #tpu.memory_space<vmem>>) attributes {dimension_semantics = [#tpu.dimension_semantics<parallel>], iteration_bounds = array<i64: 1>, scalar_prefetch = 0 : i64, scratch_operands = 0 : i64, tpu.core_type = #tpu.core_type<tc>, window_params = [{transform_indices = @transform_0, window_bounds = array<i64: 128, 96>}, {pipeline_mode = #tpu.pipeline_mode<synchronous>, transform_indices = @transform_1, window_bounds = array<i64: 96, 4>}, {pipeline_mode = #tpu.pipeline_mode<synchronous>, transform_indices = @transform_2, window_bounds = array<i64: 1, 4>}, {transform_indices = @transform_3, window_bounds = array<i64: 128, 4>}]} {
    %c0 = arith.constant 0 : index
    %c0_0 = arith.constant 0 : index
    %0 = vector.load %arg1[%c0, %c0_0] : memref<128x96xbf16, #tpu.memory_space<vmem>>, vector<128x96xbf16>
    %c0_1 = arith.constant 0 : index
    %c0_2 = arith.constant 0 : index
    %1 = vector.load %arg2[%c0_1, %c0_2] : memref<96x4xbf16, #tpu.memory_space<vmem>>, vector<96x4xbf16>
    %c0_3 = arith.constant 0 : index
    %c0_4 = arith.constant 0 : index
    %2 = vector.load %arg3[%c0_3, %c0_4] : memref<1x4xf32, #tpu.memory_space<vmem>>, vector<1x4xf32>
    %cst = arith.constant dense<0.000000e+00> : vector<128x4xf32>
    %3 = tpu.matmul %0, %1, %cst {dimension_numbers = #tpu.dot_dimension_numbers<[1], [0], [0], [1], [0, 0, 1, 1], [], []>} : vector<128x96xbf16>, vector<96x4xbf16>, vector<128x4xf32> -> vector<128x4xf32>
    %4 = vector.broadcast %2 : vector<1x4xf32> to vector<128x4xf32>
    %5 = arith.addf %3, %4 : vector<128x4xf32>
    %c0_5 = arith.constant 0 : index
    %c0_6 = arith.constant 0 : index
    %6 = vector.load %arg4[%c0_5, %c0_6] : memref<128x4xf32, #tpu.memory_space<vmem>>, vector<128x4xf32>
    tpu.vector_store %arg4[%c0_5, %c0_6], %5 {strides = array<i32>} : memref<128x4xf32, #tpu.memory_space<vmem>>, vector<128x4xf32>,
    return
  }
  func.func @transform_0(%arg0: i32) -> (i32, i32) {
    %c0_i32 = arith.constant 0 : i32
    %c0_i32_0 = arith.constant 0 : i32
    return %arg0, %c0_i32 : i32, i32
  }
  func.func @transform_1(%arg0: i32) -> (i32, i32) {
    %c0_i32 = arith.constant 0 : i32
    %c0_i32_0 = arith.constant 0 : i32
    %c0_i32_1 = arith.constant 0 : i32
    return %c0_i32, %c0_i32_0 : i32, i32
  }
  func.func @transform_2(%arg0: i32) -> (i32, i32) {
    %c0_i32 = arith.constant 0 : i32
    %c0_i32_0 = arith.constant 0 : i32
    %c0_i32_1 = arith.constant 0 : i32
    return %c0_i32, %c0_i32_0 : i32, i32
  }
  func.func @transform_3(%arg0: i32) -> (i32, i32) {
    %c0_i32 = arith.constant 0 : i32
    %c0_i32_0 = arith.constant 0 : i32
    return %arg0, %c0_i32 : i32, i32
  }
}

</mosaic_0001>

<bundles_post_ra>
// kernel: frag_gfn_forward.26
= control target key start
LH: loop header
LB: loop body
LE: loop exit
PB: predicated region body
PF: predicated region fallthrough
CT: control target
= control target key end

     0   :  { %vm116_vm0 = vcmask 1042432   ;;  %vm91_vm1 = vcmask 48128   ;;  %vm280_vm2 = vcmask 261120   ;;  %s960_s1 = inlined_call_operand.vmem [shape: bf16[6,32], index: 1, kind: input, shape index: {}]   ;;  %s961_s0 = inlined_call_operand.vmem [shape: bf16[128,6], index: 0, kind: input, shape index: {}]   ;;  %s962_s3 = inlined_call_operand.vmem [shape: bf16[32,32], index: 3, kind: input, shape index: {}]   ;;  %s963_s5 = inlined_call_operand.vmem [shape: bf16[32,32], index: 5, kind: input, shape index: {}]   ;;  %s964_s2 = inlined_call_operand.vmem [shape: f32[1,32], index: 2, kind: input, shape index: {}]   ;;  %s965_s4 = inlined_call_operand.vmem [shape: f32[1,32], index: 4, kind: input, shape index: {}]   ;;  %s966_s6 = inlined_call_operand.vmem [shape: f32[1,32], index: 6, kind: input, shape index: {}]   ;;  %s967_s7 = inlined_call_operand.vmem [shape: f32[128,32], index: 7, kind: output, shape index: {}]  }
   0x1   :  { %v43_v0 = vld [vmem:[%s960_s1] sm:$0x7]  ;;  %v737_v3 = vld [vmem:[%s961_s0 + $0x8] sm:$0xff]   ;;  %v738_v4 = vld [vmem:[%s961_s0 + $0x10] sm:$0xff]  }
   0x2   :  { %734 = vmatprep.subr.msk.bf16.mxu0 %vm116_vm0, %v43_v0  ;;  %v118_v1 = vsel %vm116_vm0, %v43_v0, 0  ;;  %v736_v2 = vld [vmem:[%s961_s0] sm:$0xff]   ;;  %735 = vmatprep.subr.msk.bf16.mxu1 %vm116_vm0, %v43_v0  ;;  %v741_v6 = vld [vmem:[%s961_s0 + $0x28] sm:$0xff]   ;;  %v742_v7 = vld [vmem:[%s961_s0 + $0x30] sm:$0xff]  }
   0x3   :  { %675 = vmatpush3.bf16.msra.mxu0 %v118_v1  ;;  %733 = vmatpush3.bf16.msra.mxu1 %v118_v1  ;;  %v740_v5 = vld [vmem:[%s961_s0 + $0x20] sm:$0xff]   ;;  %v739_v8 = vld [vmem:[%s961_s0 + $0x18] sm:$0xff]   ;;  %v745_v11 = vld [vmem:[%s962_s3 + $0x8] sm:$0xff]  }
   0x4   :  { %676 = vmatprep.mubr.msk.bf16.mxu0 %vm91_vm1, %v736_v2  ;;  %684 = vmatprep.mubr.msk.bf16.mxu1 %vm91_vm1, %v740_v5  ;;  %v744_v9 = vld [vmem:[%s962_s3] sm:$0xff]   ;;  %v743_v10 = vld [vmem:[%s961_s0 + $0x38] sm:$0xff]  }
   0x5   :  { %692 = vmatprep.subr.bf16.mxu1 %v744_v9  ;;  %v746_v12 = vld [vmem:[%s963_s5] sm:$0xff]  }
   0x6   :  { %677 = vmatmul.mubr.msk.bf16.vlgmr.msra.gmra.mrb[0].mxu0 %vm91_vm1, %v737_v3  ;;  %685 = vmatmul.mubr.msk.bf16.vlgmr.msra.gmra.mrb[0].mxu1 %vm91_vm1, %v741_v6  ;;  %v835_v13 = vld [vmem:[%s964_s2] ss:$0 sm:$0xff] }
   0x7   :  { %680 = vmatprep.mubr.msk.bf16.mxu0 %vm91_vm1, %v738_v4  ;;  %688 = vmatprep.mubr.msk.bf16.mxu1 %vm91_vm1, %v742_v7 }
   0x8   :  { %693 = vmatpush3.bf16.msra.mxu1 %v744_v9  ;;  %712 = vmatprep.subr.bf16.mxu0 %v746_v12 }
   0x9   :  { %694 = vmatprep.subr.bf16.mxu1 %v745_v11  ;;  %713 = vmatpush3.bf16.msra.mxu0 %v746_v12 }
   0xc   :  { %695 = vmatpush3.bf16.msra.mxu1 %v745_v11 }
   0xe   :  { %681 = vmatmul.mubr.msk.bf16.gmra.mrb[4].mxu0 %vm91_vm1, %v739_v8  ;;  %689 = vmatmul.mubr.msk.bf16.gmra.mrb[4].mxu1 %vm91_vm1, %v743_v10 }
  0xd9   :  { %v678_v14 = vpop.f32.mrb[0].mxu0  ;;  %v686_v22 = vpop.f32.mrb[0].mxu1 }
  0xda   :  { %v163_v15 = vadd.f32 %v678_v14, %v835_v13  ;;  %v154_v16 = vpop.f32.mrb[1].mxu0  ;;  %v195_v25 = vadd.f32 %v686_v22, %v835_v13  ;;  %v186_v26 = vpop.f32.mrb[1].mxu1 }
  0xdb   :  { %v155_v17 = vadd.f32 %v835_v13, %v154_v16  ;;  %v679_v18 = vpop.f32.mrb[2].mxu0  ;;  %v187_v28 = vadd.f32 %v835_v13, %v186_v26  ;;  %v687_v29 = vpop.f32.mrb[2].mxu1 }
  0xdc   :  { %v219_v19 = vmul.f32 0.01, %v163_v15  ;;  %v166_v20 = vadd.f32 %v679_v18, %v835_v13  ;;  %v157_v21 = vpop.f32.mrb[3].mxu0  ;;  %v227_v31 = vmul.f32 0.01, %v195_v25  ;;  %v198_v32 = vadd.f32 %v687_v29, %v835_v13  ;;  %v189_v33 = vpop.f32.mrb[3].mxu1 }
  0xdd   :  { %v217_v23 = vmul.f32 0.01, %v155_v17  ;;  %v158_v24 = vadd.f32 %v835_v13, %v157_v21  ;;  %v225_v36 = vmul.f32 0.01, %v187_v28  ;;  %v190_v37 = vadd.f32 %v835_v13, %v189_v33 }
  0xde   :  { %v220_v27 = vmul.f32 0.01, %v166_v20  ;;  %v235_v34 = vmax.f32 %v163_v15, %v219_v19  ;;  %v243_v41 = vmax.f32 %v195_v25, %v227_v31  ;;  %v228_v42 = vmul.f32 0.01, %v198_v32 }
  0xdf   :  { %v218_v30 = vmul.f32 0.01, %v158_v24  ;;  %v233_v38 = vmax.f32 %v155_v17, %v217_v23  ;;  %v241_v46 = vmax.f32 %v187_v28, %v225_v36  ;;  %v226_v47 = vmul.f32 0.01, %v190_v37  ;;  %v867_v23 = vld [vmem:[%s965_s4] ss:$0 sm:$0xff] }
  0xe0   :  { %v236_v35 = vmax.f32 %v166_v20, %v220_v27  ;;  %v244_v51 = vmax.f32 %v198_v32, %v228_v42 }
  0xe1   :  { %v234_v39 = vmax.f32 %v158_v24, %v218_v30  ;;  %v682_v40 = vpop.f32.mrb[4].mxu0  ;;  %v242_v55 = vmax.f32 %v190_v37, %v226_v47  ;;  %v690_v56 = vpop.f32.mrb[4].mxu1 }
  0xe2   :  { %v255_v43 = vpack.c.bf16 %v236_v35, %v235_v34  ;;  %v179_v44 = vadd.f32 %v682_v40, %v835_v13  ;;  %v170_v45 = vpop.f32.mrb[5].mxu0  ;;  %v259_v59 = vpack.c.bf16 %v244_v51, %v243_v41  ;;  %v211_v60 = vadd.f32 %v690_v56, %v835_v13  ;;  %v202_v61 = vpop.f32.mrb[5].mxu1 }
  0xe3   :  { %v254_v48 = vpack.c.bf16 %v234_v39, %v233_v38  ;;  %v171_v49 = vadd.f32 %v835_v13, %v170_v45  ;;  %v683_v50 = vpop.f32.mrb[6].mxu0  ;;  %v258_v63 = vpack.c.bf16 %v242_v55, %v241_v46  ;;  %v203_v0 = vadd.f32 %v835_v13, %v202_v61  ;;  %v691_v1 = vpop.f32.mrb[6].mxu1 }
  0xe4   :  { %v223_v52 = vmul.f32 0.01, %v179_v44  ;;  %v182_v53 = vadd.f32 %v683_v50, %v835_v13  ;;  %v173_v54 = vpop.f32.mrb[7].mxu0  ;;  %v231_v3 = vmul.f32 0.01, %v211_v60  ;;  %v214_v4 = vadd.f32 %v691_v1, %v835_v13  ;;  %v205_v5 = vpop.f32.mrb[7].mxu1 }
  0xe5   :  { %v221_v57 = vmul.f32 0.01, %v171_v49  ;;  %v174_v58 = vadd.f32 %v835_v13, %v173_v54  ;;  %696 = vmatprep.mubr.msk.bf16.mxu1 %vm280_vm2, %v254_v48  ;;  %v229_v8 = vmul.f32 0.01, %v203_v0  ;;  %v206_v9 = vadd.f32 %v835_v13, %v205_v5  ;;  %v747_v13 = vld [vmem:[%s963_s5 + $0x8] sm:$0xff]  }
  0xe6   :  { %v224_v62 = vmul.f32 0.01, %v182_v53  ;;  %697 = vmatmul.mubr.msk.bf16.vlgmr.msra.gmra.mrb[8].mxu1 %vm280_vm2, %v255_v43  ;;  %v239_v6 = vmax.f32 %v179_v44, %v223_v52  ;;  %v247_v12 = vmax.f32 %v211_v60, %v231_v3  ;;  %v232_v14 = vmul.f32 0.01, %v214_v4  ;;  %714 = vmatprep.subr.bf16.mxu0 %v747_v13 }
  0xe7   :  { %v222_v2 = vmul.f32 0.01, %v174_v58  ;;  %v237_v10 = vmax.f32 %v171_v49, %v221_v57  ;;  %v245_v16 = vmax.f32 %v203_v0, %v229_v8  ;;  %v230_v17 = vmul.f32 0.01, %v206_v9  ;;  %715 = vmatpush3.bf16.msra.mxu0 %v747_v13 }
  0xe8   :  { %v240_v7 = vmax.f32 %v182_v53, %v224_v62  ;;  %v248_v19 = vmax.f32 %v214_v4, %v232_v14 }
  0xe9   :  { %v238_v11 = vmax.f32 %v174_v58, %v222_v2  ;;  %v246_v20 = vmax.f32 %v206_v9, %v230_v17 }
  0xea   :  { %v257_v15 = vpack.c.bf16 %v240_v7, %v239_v6  ;;  %v261_v21 = vpack.c.bf16 %v248_v19, %v247_v12 }
  0xeb   :  { %v256_v18 = vpack.c.bf16 %v238_v11, %v237_v10  ;;  %v260_v22 = vpack.c.bf16 %v246_v20, %v245_v16 }
  0xed   :  { %700 = vmatprep.mubr.msk.bf16.mxu1 %vm280_vm2, %v256_v18 }
  0xee   :  { %701 = vmatmul.mubr.msk.bf16.gmra.mrb[12].mxu1 %vm280_vm2, %v257_v15 }
  0xef   :  { %704 = vmatprep.mubr.msk.bf16.mxu1 %vm280_vm2, %v258_v63 }
  0xf6   :  { %705 = vmatmul.mubr.msk.bf16.gmra.mrb[16].mxu1 %vm280_vm2, %v259_v59 }
  0xf7   :  { %708 = vmatprep.mubr.msk.bf16.mxu1 %vm280_vm2, %v260_v22 }
  0xfe   :  { %709 = vmatmul.mubr.msk.bf16.gmra.mrb[20].mxu1 %vm280_vm2, %v261_v21 }
 0x1b9   :  { %v698_v24 = vpop.f32.mrb[8].mxu1 }
 0x1ba   :  { %v348_v25 = vadd.f32 %v698_v24, %v867_v23  ;;  %v339_v26 = vpop.f32.mrb[9].mxu1 }
 0x1bb   :  { %v340_v27 = vadd.f32 %v867_v23, %v339_v26  ;;  %v699_v28 = vpop.f32.mrb[10].mxu1 }
 0x1bc   :  { %v404_v29 = vmul.f32 0.01, %v348_v25  ;;  %v351_v30 = vadd.f32 %v699_v28, %v867_v23  ;;  %v342_v31 = vpop.f32.mrb[11].mxu1 }
 0x1bd   :  { %v402_v32 = vmul.f32 0.01, %v340_v27  ;;  %v343_v33 = vadd.f32 %v867_v23, %v342_v31 }
 0x1be   :  { %v405_v34 = vmul.f32 0.01, %v351_v30  ;;  %v420_v36 = vmax.f32 %v348_v25, %v404_v29 }
 0x1bf   :  { %v403_v35 = vmul.f32 0.01, %v343_v33  ;;  %v418_v38 = vmax.f32 %v340_v27, %v402_v32 }
 0x1c0   :  { %v421_v37 = vmax.f32 %v351_v30, %v405_v34 }
 0x1c1   :  { %v419_v39 = vmax.f32 %v343_v33, %v403_v35  ;;  %v702_v40 = vpop.f32.mrb[12].mxu1 }
 0x1c2   :  { %v440_v41 = vpack.c.bf16 %v421_v37, %v420_v36  ;;  %v364_v42 = vadd.f32 %v702_v40, %v867_v23  ;;  %v355_v43 = vpop.f32.mrb[13].mxu1 }
 0x1c3   :  { %v439_v44 = vpack.c.bf16 %v419_v39, %v418_v38  ;;  %v356_v45 = vadd.f32 %v867_v23, %v355_v43  ;;  %v703_v46 = vpop.f32.mrb[14].mxu1 }
 0x1c4   :  { %v408_v47 = vmul.f32 0.01, %v364_v42  ;;  %v367_v48 = vadd.f32 %v703_v46, %v867_v23  ;;  %v358_v49 = vpop.f32.mrb[15].mxu1 }
 0x1c5   :  { %v406_v50 = vmul.f32 0.01, %v356_v45  ;;  %v359_v51 = vadd.f32 %v867_v23, %v358_v49  ;;  %716 = vmatprep.mubr.msk.bf16.mxu0 %vm280_vm2, %v439_v44 }
 0x1c6   :  { %v409_v52 = vmul.f32 0.01, %v367_v48  ;;  %717 = vmatmul.mubr.msk.bf16.vlgmr.msra.gmra.mrb[8].mxu0 %vm280_vm2, %v440_v41  ;;  %v424_v54 = vmax.f32 %v364_v42, %v408_v47 }
 0x1c7   :  { %v407_v53 = vmul.f32 0.01, %v359_v51  ;;  %v422_v56 = vmax.f32 %v356_v45, %v406_v50 }
 0x1c8   :  { %v425_v55 = vmax.f32 %v367_v48, %v409_v52 }
 0x1c9   :  { %v423_v57 = vmax.f32 %v359_v51, %v407_v53  ;;  %v706_v58 = vpop.f32.mrb[16].mxu1 }
 0x1ca   :  { %v442_v59 = vpack.c.bf16 %v425_v55, %v424_v54  ;;  %v380_v60 = vadd.f32 %v706_v58, %v867_v23  ;;  %v371_v61 = vpop.f32.mrb[17].mxu1 }
 0x1cb   :  { %v441_v62 = vpack.c.bf16 %v423_v57, %v422_v56  ;;  %v372_v63 = vadd.f32 %v867_v23, %v371_v61  ;;  %v707_v0 = vpop.f32.mrb[18].mxu1 }
 0x1cc   :  { %v412_v1 = vmul.f32 0.01, %v380_v60  ;;  %v383_v2 = vadd.f32 %v707_v0, %v867_v23  ;;  %v374_v3 = vpop.f32.mrb[19].mxu1 }
 0x1cd   :  { %v410_v4 = vmul.f32 0.01, %v372_v63  ;;  %v375_v5 = vadd.f32 %v867_v23, %v374_v3  ;;  %720 = vmatprep.mubr.msk.bf16.mxu0 %vm280_vm2, %v441_v62 }
 0x1ce   :  { %v413_v6 = vmul.f32 0.01, %v383_v2  ;;  %721 = vmatmul.mubr.msk.bf16.gmra.mrb[12].mxu0 %vm280_vm2, %v442_v59  ;;  %v428_v8 = vmax.f32 %v380_v60, %v412_v1 }
 0x1cf   :  { %v411_v7 = vmul.f32 0.01, %v375_v5  ;;  %v426_v10 = vmax.f32 %v372_v63, %v410_v4 }
 0x1d0   :  { %v429_v9 = vmax.f32 %v383_v2, %v413_v6 }
 0x1d1   :  { %v427_v11 = vmax.f32 %v375_v5, %v411_v7  ;;  %v710_v12 = vpop.f32.mrb[20].mxu1 }
 0x1d2   :  { %v444_v14 = vpack.c.bf16 %v429_v9, %v428_v8  ;;  %v396_v15 = vadd.f32 %v710_v12, %v867_v23  ;;  %v387_v16 = vpop.f32.mrb[21].mxu1 }
 0x1d3   :  { %v443_v17 = vpack.c.bf16 %v427_v11, %v426_v10  ;;  %v388_v18 = vadd.f32 %v867_v23, %v387_v16  ;;  %v711_v19 = vpop.f32.mrb[22].mxu1 }
 0x1d4   :  { %v416_v20 = vmul.f32 0.01, %v396_v15  ;;  %v399_v21 = vadd.f32 %v711_v19, %v867_v23  ;;  %v390_v22 = vpop.f32.mrb[23].mxu1 }
 0x1d5   :  { %v414_v13 = vmul.f32 0.01, %v388_v18  ;;  %v391_v24 = vadd.f32 %v867_v23, %v390_v22  ;;  %724 = vmatprep.mubr.msk.bf16.mxu0 %vm280_vm2, %v443_v17  ;;  %v634_v23 = vld [vmem:[%s966_s6] ss:$0 sm:$0xff] }
 0x1d6   :  { %v417_v25 = vmul.f32 0.01, %v399_v21  ;;  %725 = vmatmul.mubr.msk.bf16.gmra.mrb[16].mxu0 %vm280_vm2, %v444_v14  ;;  %v432_v27 = vmax.f32 %v396_v15, %v416_v20 }
 0x1d7   :  { %v415_v26 = vmul.f32 0.01, %v391_v24  ;;  %v430_v29 = vmax.f32 %v388_v18, %v414_v13 }
 0x1d8   :  { %v433_v28 = vmax.f32 %v399_v21, %v417_v25 }
 0x1d9   :  { %v431_v30 = vmax.f32 %v391_v24, %v415_v26 }
 0x1da   :  { %v446_v31 = vpack.c.bf16 %v433_v28, %v432_v27 }
 0x1db   :  { %v445_v32 = vpack.c.bf16 %v431_v30, %v430_v29 }
 0x1dd   :  { %728 = vmatprep.mubr.msk.bf16.mxu0 %vm280_vm2, %v445_v32 }
 0x1de   :  { %729 = vmatmul.mubr.msk.bf16.gmra.mrb[20].mxu0 %vm280_vm2, %v446_v31 }
 0x299   :  { %v718_v33 = vpop.f32.mrb[8].mxu0 }
 0x29a   :  { %v532_v34 = vadd.f32 %v718_v33, %v634_v23  ;;  %v523_v35 = vpop.f32.mrb[9].mxu0 }
 0x29b   :  { %v524_v36 = vadd.f32 %v634_v23, %v523_v35  ;;  %v719_v37 = vpop.f32.mrb[10].mxu0 }
 0x29c   :  { %588 = vst.msk [vmem:[%s967_s7 + $0x10] sm:$0xff] %vm280_vm2, %v532_v34  ;;  %v535_v38 = vadd.f32 %v719_v37, %v634_v23  ;;  %v526_v39 = vpop.f32.mrb[11].mxu0 }
 0x29d   :  { %586 = vst.msk [vmem:[%s967_s7] sm:$0xff] %vm280_vm2, %v524_v36  ;;  %v527_v40 = vadd.f32 %v634_v23, %v526_v39 }
 0x29e   :  { %589 = vst.msk [vmem:[%s967_s7 + $0x18] sm:$0xff] %vm280_vm2, %v535_v38 }
 0x29f   :  { %587 = vst.msk [vmem:[%s967_s7 + $0x8] sm:$0xff] %vm280_vm2, %v527_v40 }
 0x2a1   :  { %v722_v41 = vpop.f32.mrb[12].mxu0 }
 0x2a2   :  { %v548_v42 = vadd.f32 %v722_v41, %v634_v23  ;;  %v539_v43 = vpop.f32.mrb[13].mxu0 }
 0x2a3   :  { %v540_v44 = vadd.f32 %v634_v23, %v539_v43  ;;  %v723_v45 = vpop.f32.mrb[14].mxu0 }
 0x2a4   :  { %592 = vst.msk [vmem:[%s967_s7 + $0x30] sm:$0xff] %vm280_vm2, %v548_v42  ;;  %v551_v46 = vadd.f32 %v723_v45, %v634_v23  ;;  %v542_v47 = vpop.f32.mrb[15].mxu0 }
 0x2a5   :  { %590 = vst.msk [vmem:[%s967_s7 + $0x20] sm:$0xff] %vm280_vm2, %v540_v44  ;;  %v543_v48 = vadd.f32 %v634_v23, %v542_v47 }
 0x2a6   :  { %593 = vst.msk [vmem:[%s967_s7 + $0x38] sm:$0xff] %vm280_vm2, %v551_v46 }
 0x2a7   :  { %591 = vst.msk [vmem:[%s967_s7 + $0x28] sm:$0xff] %vm280_vm2, %v543_v48 }
 0x2a9   :  { %v726_v49 = vpop.f32.mrb[16].mxu0 }
 0x2aa   :  { %v564_v50 = vadd.f32 %v726_v49, %v634_v23  ;;  %v555_v51 = vpop.f32.mrb[17].mxu0 }
 0x2ab   :  { %v556_v52 = vadd.f32 %v634_v23, %v555_v51  ;;  %v727_v53 = vpop.f32.mrb[18].mxu0 }
 0x2ac   :  { %596 = vst.msk [vmem:[%s967_s7 + $0x50] sm:$0xff] %vm280_vm2, %v564_v50  ;;  %v567_v54 = vadd.f32 %v727_v53, %v634_v23  ;;  %v558_v55 = vpop.f32.mrb[19].mxu0 }
 0x2ad   :  { %594 = vst.msk [vmem:[%s967_s7 + $0x40] sm:$0xff] %vm280_vm2, %v556_v52  ;;  %v559_v56 = vadd.f32 %v634_v23, %v558_v55 }
 0x2ae   :  { %597 = vst.msk [vmem:[%s967_s7 + $0x58] sm:$0xff] %vm280_vm2, %v567_v54 }
 0x2af   :  { %595 = vst.msk [vmem:[%s967_s7 + $0x48] sm:$0xff] %vm280_vm2, %v559_v56 }
 0x2b1   :  { %v730_v57 = vpop.f32.mrb[20].mxu0 }
 0x2b2   :  { %v580_v58 = vadd.f32 %v730_v57, %v634_v23  ;;  %v571_v59 = vpop.f32.mrb[21].mxu0 }
 0x2b3   :  { %v572_v60 = vadd.f32 %v634_v23, %v571_v59  ;;  %v731_v61 = vpop.f32.mrb[22].mxu0 }
 0x2b4   :  { %600 = vst.msk [vmem:[%s967_s7 + $0x70] sm:$0xff] %vm280_vm2, %v580_v58  ;;  %v583_v62 = vadd.f32 %v731_v61, %v634_v23  ;;  %v574_v63 = vpop.f32.mrb[23].mxu0 }
 0x2b5   :  { %598 = vst.msk [vmem:[%s967_s7 + $0x60] sm:$0xff] %vm280_vm2, %v572_v60  ;;  %v575_v0 = vadd.f32 %v634_v23, %v574_v63 }
 0x2b6   :  { %601 = vst.msk [vmem:[%s967_s7 + $0x78] sm:$0xff] %vm280_vm2, %v583_v62 }
 0x2b7   :  { %599 = vst.msk [vmem:[%s967_s7 + $0x68] sm:$0xff] %vm280_vm2, %v575_v0 }

// kernel: frag_gfn_forward.27
= control target key start
LH: loop header
LB: loop body
LE: loop exit
PB: predicated region body
PF: predicated region fallthrough
CT: control target
= control target key end

     0   :  { %vm333_vm0 = vcmask 261120   ;;  %s617_s1 = inlined_call_operand.vmem [shape: bf16[128,32], index: 1, kind: input, shape index: {}]   ;;  %s618_s0 = inlined_call_operand.vmem [shape: bf16[128,128], index: 0, kind: input, shape index: {}]   ;;  %s619_s2 = inlined_call_operand.vmem [shape: f32[128,32], index: 2, kind: output, shape index: {}]  }
   0x1   :  { %v434_v0 = vld [vmem:[%s617_s1] sm:$0xff]   ;;  %v435_v1 = vld [vmem:[%s617_s1 + $0x8] sm:$0xff]   ;;  %v436_v2 = vld [vmem:[%s617_s1 + $0x10] sm:$0xff]  }
   0x2   :  { %386 = vmatprep.subr.bf16.mxu0 %v434_v0  ;;  %418 = vmatprep.subr.bf16.mxu1 %v434_v0  ;;  %v437_v3 = vld [vmem:[%s617_s1 + $0x18] sm:$0xff]   ;;  %v12_v4 = vld [vmem:[%s618_s0] sm:$0xff]   ;;  %v14_v6 = vld [vmem:[%s618_s0 + $0x8] sm:$0xff]  }
   0x3   :  { %387 = vmatpush3.bf16.msra.mxu0 %v434_v0  ;;  %426 = vmatpush3.bf16.msra.mxu1 %v434_v0  ;;  %v20_v5 = vld [vmem:[%s618_s0 + $0x20] sm:$0xff]   ;;  %v28_v7 = vunpack.c.l.bf16 %v12_v4  ;;  %v30_v8 = vunpack.c.l.bf16 %v14_v6  ;;  %v29_v10 = vunpack.c.h.bf16 %v12_v4  ;;  %v31_v11 = vunpack.c.h.bf16 %v14_v6  ;;  %v439_v12 = vld [vmem:[%s617_s1 + $0x28] sm:$0xff]   ;;  %v16_v13 = vld [vmem:[%s618_s0 + $0x10] sm:$0xff]  }
   0x4   :  { %388 = vmatprep.subr.bf16.mxu0 %v435_v1  ;;  %419 = vmatprep.subr.bf16.mxu1 %v435_v1  ;;  %v438_v9 = vld [vmem:[%s617_s1 + $0x20] sm:$0xff]   ;;  %v32_v14 = vunpack.c.l.bf16 %v16_v13  ;;  %v33_v15 = vunpack.c.h.bf16 %v16_v13  ;;  %v440_v16 = vld [vmem:[%s617_s1 + $0x30] sm:$0xff]   ;;  %v18_v17 = vld [vmem:[%s618_s0 + $0x18] sm:$0xff]   ;;  %v36_v21 = vunpack.c.l.bf16 %v20_v5  ;;  %v37_v22 = vunpack.c.h.bf16 %v20_v5 }
   0x5   :  { %402 = vmatprep.mubr.bf16.mxu0 %v12_v4  ;;  %410 = vmatprep.mubr.bf16.mxu1 %v20_v5  ;;  %v34_v18 = vunpack.c.l.bf16 %v18_v17  ;;  %v35_v19 = vunpack.c.h.bf16 %v18_v17  ;;  %v441_v20 = vld [vmem:[%s617_s1 + $0x38] sm:$0xff]   ;;  %v22_v23 = vld [vmem:[%s618_s0 + $0x28] sm:$0xff]   ;;  %v24_v24 = vld [vmem:[%s618_s0 + $0x30] sm:$0xff]  }
   0x6   :  { %44 = vadd.xlane.f32.xlu0 %v28_v7  ;;  %48 = vadd.xlane.f32.xlu1 %v30_v8  ;;  %v38_v25 = vunpack.c.l.bf16 %v22_v23  ;;  %v39_v26 = vunpack.c.h.bf16 %v22_v23  ;;  %v26_v27 = vld [vmem:[%s618_s0 + $0x38] sm:$0xff]   ;;  %v40_v28 = vunpack.c.l.bf16 %v24_v24  ;;  %v41_v29 = vunpack.c.h.bf16 %v24_v24 }
   0x7   :  { %389 = vmatpush3.bf16.msra.mxu0 %v435_v1  ;;  %427 = vmatpush3.bf16.msra.mxu1 %v435_v1  ;;  %v42_v30 = vunpack.c.l.bf16 %v26_v27  ;;  %v43_v31 = vunpack.c.h.bf16 %v26_v27 }
   0x8   :  { %390 = vmatprep.subr.bf16.mxu0 %v436_v2  ;;  %420 = vmatprep.subr.bf16.mxu1 %v436_v2 }
   0xa   :  { %46 = vadd.xlane.f32.xlu0 %v29_v10  ;;  %50 = vadd.xlane.f32.xlu1 %v31_v11 }
   0xb   :  { %391 = vmatpush3.bf16.msra.mxu0 %v436_v2  ;;  %428 = vmatpush3.bf16.msra.mxu1 %v436_v2 }
   0xc   :  { %392 = vmatprep.subr.bf16.mxu0 %v437_v3  ;;  %421 = vmatprep.subr.bf16.mxu1 %v437_v3 }
   0xe   :  { %52 = vadd.xlane.f32.xlu0 %v32_v14  ;;  %54 = vadd.xlane.f32.xlu1 %v33_v15 }
   0xf   :  { %393 = vmatpush3.bf16.msra.mxu0 %v437_v3  ;;  %429 = vmatpush3.bf16.msra.mxu1 %v437_v3 }
  0x10   :  { %394 = vmatprep.subr.bf16.mxu0 %v438_v9  ;;  %422 = vmatprep.subr.bf16.mxu1 %v438_v9 }
  0x12   :  { %56 = vadd.xlane.f32.xlu0 %v34_v18  ;;  %58 = vadd.xlane.f32.xlu1 %v35_v19 }
  0x13   :  { %395 = vmatpush3.bf16.msra.mxu0 %v438_v9  ;;  %430 = vmatpush3.bf16.msra.mxu1 %v438_v9 }
  0x14   :  { %396 = vmatprep.subr.bf16.mxu0 %v439_v12  ;;  %423 = vmatprep.subr.bf16.mxu1 %v439_v12 }
  0x16   :  { %60 = vadd.xlane.f32.xlu0 %v36_v21  ;;  %62 = vadd.xlane.f32.xlu1 %v37_v22 }
  0x17   :  { %397 = vmatpush3.bf16.msra.mxu0 %v439_v12  ;;  %431 = vmatpush3.bf16.msra.mxu1 %v439_v12 }
  0x18   :  { %398 = vmatprep.subr.bf16.mxu0 %v440_v16  ;;  %424 = vmatprep.subr.bf16.mxu1 %v440_v16 }
  0x1a   :  { %64 = vadd.xlane.f32.xlu0 %v38_v25  ;;  %66 = vadd.xlane.f32.xlu1 %v39_v26 }
  0x1b   :  { %399 = vmatpush3.bf16.msra.mxu0 %v440_v16  ;;  %432 = vmatpush3.bf16.msra.mxu1 %v440_v16 }
  0x1c   :  { %400 = vmatprep.subr.bf16.mxu0 %v441_v20  ;;  %425 = vmatprep.subr.bf16.mxu1 %v441_v20 }
  0x1e   :  { %68 = vadd.xlane.f32.xlu0 %v40_v28  ;;  %70 = vadd.xlane.f32.xlu1 %v41_v29 }
  0x1f   :  { %401 = vmatpush3.bf16.msra.mxu0 %v441_v20  ;;  %433 = vmatpush3.bf16.msra.mxu1 %v441_v20 }
  0x22   :  { %403 = vmatmul.mubr.bf16.vlgmr.msra.gmra.mrb[0].mxu0 %v14_v6  ;;  %411 = vmatmul.mubr.bf16.vlgmr.msra.gmra.mrb[0].mxu1 %v22_v23 }
  0x23   :  { %406 = vmatprep.mubr.bf16.mxu0 %v16_v13  ;;  %414 = vmatprep.mubr.bf16.mxu1 %v24_v24 }
  0x24   :  { %72 = vadd.xlane.f32.xlu0 %v42_v30  ;;  %74 = vadd.xlane.f32.xlu1 %v43_v31 }
  0x2a   :  { %407 = vmatmul.mubr.bf16.gmra.mrb[4].mxu0 %v18_v17  ;;  %415 = vmatmul.mubr.bf16.gmra.mrb[4].mxu1 %v26_v27 }
  0x93   :  { %v45_v32 = vpop.xlane.xlu0 %44  ;;  %v49_v33 = vpop.xlane.xlu1 %48 }
  0x94   :  { %v285_v44 = vmax.f32 %v45_v32, 1.0  ;;  %v287_v45 = vmax.f32 %v49_v33, 1.0 }
  0x96   :  { %458 = vrcp.f32 %v285_v44 }
  0x97   :  { %v47_v34 = vpop.xlane.xlu0 %46  ;;  %v51_v35 = vpop.xlane.xlu1 %50  ;;  %460 = vrcp.f32 %v287_v45 }
  0x98   :  { %v286_v48 = vmax.f32 %v47_v34, 1.0  ;;  %v288_v52 = vmax.f32 %v51_v35, 1.0 }
  0x9b   :  { %v53_v36 = vpop.xlane.xlu0 %52  ;;  %v55_v37 = vpop.xlane.xlu1 %54 }
  0x9c   :  { %v289_v55 = vmax.f32 %v53_v36, 1.0  ;;  %v290_v56 = vmax.f32 %v55_v37, 1.0 }
  0x9f   :  { %v57_v38 = vpop.xlane.xlu0 %56  ;;  %v59_v39 = vpop.xlane.xlu1 %58 }
  0xa0   :  { %v291_v59 = vmax.f32 %v57_v38, 1.0  ;;  %v459_v62 = vpop.eup %458  ;;  %v292_v63 = vmax.f32 %v59_v39, 1.0 }
  0xa1   :  { %v461_v0 = vpop.eup %460 }
  0xa3   :  { %v61_v40 = vpop.xlane.xlu0 %60  ;;  %v63_v41 = vpop.xlane.xlu1 %62 }
  0xa4   :  { %v293_v51 = vmax.f32 %v61_v40, 1.0  ;;  %v294_v53 = vmax.f32 %v63_v41, 1.0 }
  0xa7   :  { %v65_v42 = vpop.xlane.xlu0 %64  ;;  %v67_v43 = vpop.xlane.xlu1 %66 }
  0xa8   :  { %v295_v47 = vmax.f32 %v65_v42, 1.0  ;;  %v296_v50 = vmax.f32 %v67_v43, 1.0 }
  0xaa   :  { %462 = vrcp.f32 %v295_v47 }
  0xab   :  { %v69_v46 = vpop.xlane.xlu0 %68  ;;  %v71_v49 = vpop.xlane.xlu1 %70  ;;  %464 = vrcp.f32 %v286_v48 }
  0xac   :  { %466 = vrcp.f32 %v296_v50  ;;  %v297_v61 = vmax.f32 %v69_v46, 1.0  ;;  %v298_v1 = vmax.f32 %v71_v49, 1.0 }
  0xad   :  { %468 = vrcp.f32 %v293_v51 }
  0xae   :  { %470 = vrcp.f32 %v288_v52 }
  0xaf   :  { %472 = vrcp.f32 %v294_v53 }
  0xb0   :  { %474 = vrcp.f32 %v289_v55 }
  0xb1   :  { %v73_v54 = vpop.xlane.xlu0 %72  ;;  %v75_v57 = vpop.xlane.xlu1 %74  ;;  %476 = vrcp.f32 %v290_v56 }
  0xb2   :  { %v299_v58 = vmax.f32 %v73_v54, 1.0  ;;  %v300_v60 = vmax.f32 %v75_v57, 1.0 }
  0xb4   :  { %478 = vrcp.f32 %v299_v58  ;;  %v463_v2 = vpop.eup %462 }
  0xb5   :  { %480 = vrcp.f32 %v291_v59  ;;  %v465_v3 = vpop.eup %464 }
  0xb6   :  { %482 = vrcp.f32 %v300_v60  ;;  %v467_v4 = vpop.eup %466 }
  0xb7   :  { %484 = vrcp.f32 %v297_v61  ;;  %v469_v7 = vpop.eup %468 }
  0xb8   :  { %486 = vrcp.f32 %v292_v63  ;;  %v471_v12 = vpop.eup %470 }
  0xb9   :  { %488 = vrcp.f32 %v298_v1  ;;  %v473_v17 = vpop.eup %472 }
  0xba   :  { %v475_v22 = vpop.eup %474 }
  0xbb   :  { %v477_v25 = vpop.eup %476 }
  0xbe   :  { %v479_v26 = vpop.eup %478 }
  0xbf   :  { %v481_v27 = vpop.eup %480 }
  0xc0   :  { %v483_v28 = vpop.eup %482 }
  0xc1   :  { %v485_v31 = vpop.eup %484 }
  0xc2   :  { %v487_v36 = vpop.eup %486 }
  0xc3   :  { %v489_v41 = vpop.eup %488 }
  0xf5   :  { %v404_v5 = vpop.f32.mrb[0].mxu0  ;;  %v412_v6 = vpop.f32.mrb[0].mxu1 }
  0xf6   :  { %v306_v8 = vmul.f32 %v461_v0, %v404_v5  ;;  %v322_v9 = vmul.f32 %v463_v2, %v412_v6  ;;  %v222_v10 = vpop.f32.mrb[1].mxu0  ;;  %v254_v11 = vpop.f32.mrb[1].mxu1 }
  0xf7   :  { %v302_v13 = vmul.f32 %v459_v62, %v222_v10  ;;  %v318_v14 = vmul.f32 %v469_v7, %v254_v11  ;;  %v405_v15 = vpop.f32.mrb[2].mxu0  ;;  %v413_v16 = vpop.f32.mrb[2].mxu1 }
  0xf8   :  { %336 = vst.msk [vmem:[%s619_s2 + $0x10] sm:$0xff] %vm333_vm0, %v306_v8  ;;  %344 = vst.msk [vmem:[%s619_s2 + $0x50] sm:$0xff] %vm333_vm0, %v322_v9  ;;  %v308_v18 = vmul.f32 %v471_v12, %v405_v15  ;;  %v324_v19 = vmul.f32 %v467_v4, %v413_v16  ;;  %v225_v20 = vpop.f32.mrb[3].mxu0  ;;  %v257_v21 = vpop.f32.mrb[3].mxu1 }
  0xf9   :  { %334 = vst.msk [vmem:[%s619_s2] sm:$0xff] %vm333_vm0, %v302_v13  ;;  %342 = vst.msk [vmem:[%s619_s2 + $0x40] sm:$0xff] %vm333_vm0, %v318_v14  ;;  %v304_v23 = vmul.f32 %v465_v3, %v225_v20  ;;  %v320_v24 = vmul.f32 %v473_v17, %v257_v21 }
  0xfa   :  { %337 = vst.msk [vmem:[%s619_s2 + $0x18] sm:$0xff] %vm333_vm0, %v308_v18  ;;  %345 = vst.msk [vmem:[%s619_s2 + $0x58] sm:$0xff] %vm333_vm0, %v324_v19 }
  0xfb   :  { %335 = vst.msk [vmem:[%s619_s2 + $0x8] sm:$0xff] %vm333_vm0, %v304_v23  ;;  %343 = vst.msk [vmem:[%s619_s2 + $0x48] sm:$0xff] %vm333_vm0, %v320_v24 }
  0xfd   :  { %v408_v29 = vpop.f32.mrb[4].mxu0  ;;  %v416_v30 = vpop.f32.mrb[4].mxu1 }
  0xfe   :  { %v314_v32 = vmul.f32 %v481_v27, %v408_v29  ;;  %v330_v33 = vmul.f32 %v479_v26, %v416_v30  ;;  %v238_v34 = vpop.f32.mrb[5].mxu0  ;;  %v270_v35 = vpop.f32.mrb[5].mxu1 }
  0xff   :  { %v310_v37 = vmul.f32 %v475_v22, %v238_v34  ;;  %v326_v38 = vmul.f32 %v485_v31, %v270_v35  ;;  %v409_v39 = vpop.f32.mrb[6].mxu0  ;;  %v417_v40 = vpop.f32.mrb[6].mxu1 }
 0x100   :  { %340 = vst.msk [vmem:[%s619_s2 + $0x30] sm:$0xff] %vm333_vm0, %v314_v32  ;;  %348 = vst.msk [vmem:[%s619_s2 + $0x70] sm:$0xff] %vm333_vm0, %v330_v33  ;;  %v316_v42 = vmul.f32 %v487_v36, %v409_v39  ;;  %v332_v43 = vmul.f32 %v483_v28, %v417_v40  ;;  %v241_v44 = vpop.f32.mrb[7].mxu0  ;;  %v273_v45 = vpop.f32.mrb[7].mxu1 }
 0x101   :  { %338 = vst.msk [vmem:[%s619_s2 + $0x20] sm:$0xff] %vm333_vm0, %v310_v37  ;;  %346 = vst.msk [vmem:[%s619_s2 + $0x60] sm:$0xff] %vm333_vm0, %v326_v38  ;;  %v312_v46 = vmul.f32 %v477_v25, %v241_v44  ;;  %v328_v47 = vmul.f32 %v489_v41, %v273_v45 }
 0x102   :  { %341 = vst.msk [vmem:[%s619_s2 + $0x38] sm:$0xff] %vm333_vm0, %v316_v42  ;;  %349 = vst.msk [vmem:[%s619_s2 + $0x78] sm:$0xff] %vm333_vm0, %v332_v43 }
 0x103   :  { %339 = vst.msk [vmem:[%s619_s2 + $0x28] sm:$0xff] %vm333_vm0, %v312_v46  ;;  %347 = vst.msk [vmem:[%s619_s2 + $0x68] sm:$0xff] %vm333_vm0, %v328_v47 }

// kernel: frag_gfn_forward.25
= control target key start
LH: loop header
LB: loop body
LE: loop exit
PB: predicated region body
PF: predicated region fallthrough
CT: control target
= control target key end

     0   :  { %vm116_vm0 = vcmask 1041408   ;;  %vm91_vm1 = vcmask 31744   ;;  %vm280_vm2 = vcmask 261120   ;;  %s960_s1 = inlined_call_operand.vmem [shape: bf16[4,32], index: 1, kind: input, shape index: {}]   ;;  %s961_s0 = inlined_call_operand.vmem [shape: bf16[128,4], index: 0, kind: input, shape index: {}]   ;;  %s962_s3 = inlined_call_operand.vmem [shape: bf16[32,32], index: 3, kind: input, shape index: {}]   ;;  %s963_s5 = inlined_call_operand.vmem [shape: bf16[32,32], index: 5, kind: input, shape index: {}]   ;;  %s964_s2 = inlined_call_operand.vmem [shape: f32[1,32], index: 2, kind: input, shape index: {}]   ;;  %s965_s4 = inlined_call_operand.vmem [shape: f32[1,32], index: 4, kind: input, shape index: {}]   ;;  %s966_s6 = inlined_call_operand.vmem [shape: f32[1,32], index: 6, kind: input, shape index: {}]   ;;  %s967_s7 = inlined_call_operand.vmem [shape: f32[128,32], index: 7, kind: output, shape index: {}]  }
   0x1   :  { %v43_v0 = vld [vmem:[%s960_s1] sm:$0x3]  ;;  %v737_v3 = vld [vmem:[%s961_s0 + $0x8] sm:$0xff]   ;;  %v738_v4 = vld [vmem:[%s961_s0 + $0x10] sm:$0xff]  }
   0x2   :  { %734 = vmatprep.subr.msk.bf16.mxu0 %vm116_vm0, %v43_v0  ;;  %v118_v1 = vsel %vm116_vm0, %v43_v0, 0  ;;  %v736_v2 = vld [vmem:[%s961_s0] sm:$0xff]   ;;  %735 = vmatprep.subr.msk.bf16.mxu1 %vm116_vm0, %v43_v0  ;;  %v741_v6 = vld [vmem:[%s961_s0 + $0x28] sm:$0xff]   ;;  %v742_v7 = vld [vmem:[%s961_s0 + $0x30] sm:$0xff]  }
   0x3   :  { %675 = vmatpush3.bf16.msra.mxu0 %v118_v1  ;;  %733 = vmatpush3.bf16.msra.mxu1 %v118_v1  ;;  %v740_v5 = vld [vmem:[%s961_s0 + $0x20] sm:$0xff]   ;;  %v739_v8 = vld [vmem:[%s961_s0 + $0x18] sm:$0xff]   ;;  %v745_v11 = vld [vmem:[%s962_s3 + $0x8] sm:$0xff]  }
   0x4   :  { %676 = vmatprep.mubr.msk.bf16.mxu0 %vm91_vm1, %v736_v2  ;;  %684 = vmatprep.mubr.msk.bf16.mxu1 %vm91_vm1, %v740_v5  ;;  %v744_v9 = vld [vmem:[%s962_s3] sm:$0xff]   ;;  %v743_v10 = vld [vmem:[%s961_s0 + $0x38] sm:$0xff]  }
   0x5   :  { %692 = vmatprep.subr.bf16.mxu1 %v744_v9  ;;  %v746_v12 = vld [vmem:[%s963_s5] sm:$0xff]  }
   0x6   :  { %677 = vmatmul.mubr.msk.bf16.vlgmr.msra.gmra.mrb[0].mxu0 %vm91_vm1, %v737_v3  ;;  %685 = vmatmul.mubr.msk.bf16.vlgmr.msra.gmra.mrb[0].mxu1 %vm91_vm1, %v741_v6  ;;  %v835_v13 = vld [vmem:[%s964_s2] ss:$0 sm:$0xff] }
   0x7   :  { %680 = vmatprep.mubr.msk.bf16.mxu0 %vm91_vm1, %v738_v4  ;;  %688 = vmatprep.mubr.msk.bf16.mxu1 %vm91_vm1, %v742_v7 }
   0x8   :  { %693 = vmatpush3.bf16.msra.mxu1 %v744_v9  ;;  %712 = vmatprep.subr.bf16.mxu0 %v746_v12 }
   0x9   :  { %694 = vmatprep.subr.bf16.mxu1 %v745_v11  ;;  %713 = vmatpush3.bf16.msra.mxu0 %v746_v12 }
   0xc   :  { %695 = vmatpush3.bf16.msra.mxu1 %v745_v11 }
   0xe   :  { %681 = vmatmul.mubr.msk.bf16.gmra.mrb[4].mxu0 %vm91_vm1, %v739_v8  ;;  %689 = vmatmul.mubr.msk.bf16.gmra.mrb[4].mxu1 %vm91_vm1, %v743_v10 }
  0xd9   :  { %v678_v14 = vpop.f32.mrb[0].mxu0  ;;  %v686_v22 = vpop.f32.mrb[0].mxu1 }
  0xda   :  { %v163_v15 = vadd.f32 %v678_v14, %v835_v13  ;;  %v154_v16 = vpop.f32.mrb[1].mxu0  ;;  %v195_v25 = vadd.f32 %v686_v22, %v835_v13  ;;  %v186_v26 = vpop.f32.mrb[1].mxu1 }
  0xdb   :  { %v155_v17 = vadd.f32 %v835_v13, %v154_v16  ;;  %v679_v18 = vpop.f32.mrb[2].mxu0  ;;  %v187_v28 = vadd.f32 %v835_v13, %v186_v26  ;;  %v687_v29 = vpop.f32.mrb[2].mxu1 }
  0xdc   :  { %v219_v19 = vmul.f32 0.01, %v163_v15  ;;  %v166_v20 = vadd.f32 %v679_v18, %v835_v13  ;;  %v157_v21 = vpop.f32.mrb[3].mxu0  ;;  %v227_v31 = vmul.f32 0.01, %v195_v25  ;;  %v198_v32 = vadd.f32 %v687_v29, %v835_v13  ;;  %v189_v33 = vpop.f32.mrb[3].mxu1 }
  0xdd   :  { %v217_v23 = vmul.f32 0.01, %v155_v17  ;;  %v158_v24 = vadd.f32 %v835_v13, %v157_v21  ;;  %v225_v36 = vmul.f32 0.01, %v187_v28  ;;  %v190_v37 = vadd.f32 %v835_v13, %v189_v33 }
  0xde   :  { %v220_v27 = vmul.f32 0.01, %v166_v20  ;;  %v235_v34 = vmax.f32 %v163_v15, %v219_v19  ;;  %v243_v41 = vmax.f32 %v195_v25, %v227_v31  ;;  %v228_v42 = vmul.f32 0.01, %v198_v32 }
  0xdf   :  { %v218_v30 = vmul.f32 0.01, %v158_v24  ;;  %v233_v38 = vmax.f32 %v155_v17, %v217_v23  ;;  %v241_v46 = vmax.f32 %v187_v28, %v225_v36  ;;  %v226_v47 = vmul.f32 0.01, %v190_v37  ;;  %v867_v23 = vld [vmem:[%s965_s4] ss:$0 sm:$0xff] }
  0xe0   :  { %v236_v35 = vmax.f32 %v166_v20, %v220_v27  ;;  %v244_v51 = vmax.f32 %v198_v32, %v228_v42 }
  0xe1   :  { %v234_v39 = vmax.f32 %v158_v24, %v218_v30  ;;  %v682_v40 = vpop.f32.mrb[4].mxu0  ;;  %v242_v55 = vmax.f32 %v190_v37, %v226_v47  ;;  %v690_v56 = vpop.f32.mrb[4].mxu1 }
  0xe2   :  { %v255_v43 = vpack.c.bf16 %v236_v35, %v235_v34  ;;  %v179_v44 = vadd.f32 %v682_v40, %v835_v13  ;;  %v170_v45 = vpop.f32.mrb[5].mxu0  ;;  %v259_v59 = vpack.c.bf16 %v244_v51, %v243_v41  ;;  %v211_v60 = vadd.f32 %v690_v56, %v835_v13  ;;  %v202_v61 = vpop.f32.mrb[5].mxu1 }
  0xe3   :  { %v254_v48 = vpack.c.bf16 %v234_v39, %v233_v38  ;;  %v171_v49 = vadd.f32 %v835_v13, %v170_v45  ;;  %v683_v50 = vpop.f32.mrb[6].mxu0  ;;  %v258_v63 = vpack.c.bf16 %v242_v55, %v241_v46  ;;  %v203_v0 = vadd.f32 %v835_v13, %v202_v61  ;;  %v691_v1 = vpop.f32.mrb[6].mxu1 }
  0xe4   :  { %v223_v52 = vmul.f32 0.01, %v179_v44  ;;  %v182_v53 = vadd.f32 %v683_v50, %v835_v13  ;;  %v173_v54 = vpop.f32.mrb[7].mxu0  ;;  %v231_v3 = vmul.f32 0.01, %v211_v60  ;;  %v214_v4 = vadd.f32 %v691_v1, %v835_v13  ;;  %v205_v5 = vpop.f32.mrb[7].mxu1 }
  0xe5   :  { %v221_v57 = vmul.f32 0.01, %v171_v49  ;;  %v174_v58 = vadd.f32 %v835_v13, %v173_v54  ;;  %696 = vmatprep.mubr.msk.bf16.mxu1 %vm280_vm2, %v254_v48  ;;  %v229_v8 = vmul.f32 0.01, %v203_v0  ;;  %v206_v9 = vadd.f32 %v835_v13, %v205_v5  ;;  %v747_v13 = vld [vmem:[%s963_s5 + $0x8] sm:$0xff]  }
  0xe6   :  { %v224_v62 = vmul.f32 0.01, %v182_v53  ;;  %697 = vmatmul.mubr.msk.bf16.vlgmr.msra.gmra.mrb[8].mxu1 %vm280_vm2, %v255_v43  ;;  %v239_v6 = vmax.f32 %v179_v44, %v223_v52  ;;  %v247_v12 = vmax.f32 %v211_v60, %v231_v3  ;;  %v232_v14 = vmul.f32 0.01, %v214_v4  ;;  %714 = vmatprep.subr.bf16.mxu0 %v747_v13 }
  0xe7   :  { %v222_v2 = vmul.f32 0.01, %v174_v58  ;;  %v237_v10 = vmax.f32 %v171_v49, %v221_v57  ;;  %v245_v16 = vmax.f32 %v203_v0, %v229_v8  ;;  %v230_v17 = vmul.f32 0.01, %v206_v9  ;;  %715 = vmatpush3.bf16.msra.mxu0 %v747_v13 }
  0xe8   :  { %v240_v7 = vmax.f32 %v182_v53, %v224_v62  ;;  %v248_v19 = vmax.f32 %v214_v4, %v232_v14 }
  0xe9   :  { %v238_v11 = vmax.f32 %v174_v58, %v222_v2  ;;  %v246_v20 = vmax.f32 %v206_v9, %v230_v17 }
  0xea   :  { %v257_v15 = vpack.c.bf16 %v240_v7, %v239_v6  ;;  %v261_v21 = vpack.c.bf16 %v248_v19, %v247_v12 }
  0xeb   :  { %v256_v18 = vpack.c.bf16 %v238_v11, %v237_v10  ;;  %v260_v22 = vpack.c.bf16 %v246_v20, %v245_v16 }
  0xed   :  { %700 = vmatprep.mubr.msk.bf16.mxu1 %vm280_vm2, %v256_v18 }
  0xee   :  { %701 = vmatmul.mubr.msk.bf16.gmra.mrb[12].mxu1 %vm280_vm2, %v257_v15 }
  0xef   :  { %704 = vmatprep.mubr.msk.bf16.mxu1 %vm280_vm2, %v258_v63 }
  0xf6   :  { %705 = vmatmul.mubr.msk.bf16.gmra.mrb[16].mxu1 %vm280_vm2, %v259_v59 }
  0xf7   :  { %708 = vmatprep.mubr.msk.bf16.mxu1 %vm280_vm2, %v260_v22 }
  0xfe   :  { %709 = vmatmul.mubr.msk.bf16.gmra.mrb[20].mxu1 %vm280_vm2, %v261_v21 }
 0x1b9   :  { %v698_v24 = vpop.f32.mrb[8].mxu1 }
 0x1ba   :  { %v348_v25 = vadd.f32 %v698_v24, %v867_v23  ;;  %v339_v26 = vpop.f32.mrb[9].mxu1 }
 0x1bb   :  { %v340_v27 = vadd.f32 %v867_v23, %v339_v26  ;;  %v699_v28 = vpop.f32.mrb[10].mxu1 }
 0x1bc   :  { %v404_v29 = vmul.f32 0.01, %v348_v25  ;;  %v351_v30 = vadd.f32 %v699_v28, %v867_v23  ;;  %v342_v31 = vpop.f32.mrb[11].mxu1 }
 0x1bd   :  { %v402_v32 = vmul.f32 0.01, %v340_v27  ;;  %v343_v33 = vadd.f32 %v867_v23, %v342_v31 }
 0x1be   :  { %v405_v34 = vmul.f32 0.01, %v351_v30  ;;  %v420_v36 = vmax.f32 %v348_v25, %v404_v29 }
 0x1bf   :  { %v403_v35 = vmul.f32 0.01, %v343_v33  ;;  %v418_v38 = vmax.f32 %v340_v27, %v402_v32 }
 0x1c0   :  { %v421_v37 = vmax.f32 %v351_v30, %v405_v34 }
 0x1c1   :  { %v419_v39 = vmax.f32 %v343_v33, %v403_v35  ;;  %v702_v40 = vpop.f32.mrb[12].mxu1 }
 0x1c2   :  { %v440_v41 = vpack.c.bf16 %v421_v37, %v420_v36  ;;  %v364_v42 = vadd.f32 %v702_v40, %v867_v23  ;;  %v355_v43 = vpop.f32.mrb[13].mxu1 }
 0x1c3   :  { %v439_v44 = vpack.c.bf16 %v419_v39, %v418_v38  ;;  %v356_v45 = vadd.f32 %v867_v23, %v355_v43  ;;  %v703_v46 = vpop.f32.mrb[14].mxu1 }
 0x1c4   :  { %v408_v47 = vmul.f32 0.01, %v364_v42  ;;  %v367_v48 = vadd.f32 %v703_v46, %v867_v23  ;;  %v358_v49 = vpop.f32.mrb[15].mxu1 }
 0x1c5   :  { %v406_v50 = vmul.f32 0.01, %v356_v45  ;;  %v359_v51 = vadd.f32 %v867_v23, %v358_v49  ;;  %716 = vmatprep.mubr.msk.bf16.mxu0 %vm280_vm2, %v439_v44 }
 0x1c6   :  { %v409_v52 = vmul.f32 0.01, %v367_v48  ;;  %717 = vmatmul.mubr.msk.bf16.vlgmr.msra.gmra.mrb[8].mxu0 %vm280_vm2, %v440_v41  ;;  %v424_v54 = vmax.f32 %v364_v42, %v408_v47 }
 0x1c7   :  { %v407_v53 = vmul.f32 0.01, %v359_v51  ;;  %v422_v56 = vmax.f32 %v356_v45, %v406_v50 }
 0x1c8   :  { %v425_v55 = vmax.f32 %v367_v48, %v409_v52 }
 0x1c9   :  { %v423_v57 = vmax.f32 %v359_v51, %v407_v53  ;;  %v706_v58 = vpop.f32.mrb[16].mxu1 }
 0x1ca   :  { %v442_v59 = vpack.c.bf16 %v425_v55, %v424_v54  ;;  %v380_v60 = vadd.f32 %v706_v58, %v867_v23  ;;  %v371_v61 = vpop.f32.mrb[17].mxu1 }
 0x1cb   :  { %v441_v62 = vpack.c.bf16 %v423_v57, %v422_v56  ;;  %v372_v63 = vadd.f32 %v867_v23, %v371_v61  ;;  %v707_v0 = vpop.f32.mrb[18].mxu1 }
 0x1cc   :  { %v412_v1 = vmul.f32 0.01, %v380_v60  ;;  %v383_v2 = vadd.f32 %v707_v0, %v867_v23  ;;  %v374_v3 = vpop.f32.mrb[19].mxu1 }
 0x1cd   :  { %v410_v4 = vmul.f32 0.01, %v372_v63  ;;  %v375_v5 = vadd.f32 %v867_v23, %v374_v3  ;;  %720 = vmatprep.mubr.msk.bf16.mxu0 %vm280_vm2, %v441_v62 }
 0x1ce   :  { %v413_v6 = vmul.f32 0.01, %v383_v2  ;;  %721 = vmatmul.mubr.msk.bf16.gmra.mrb[12].mxu0 %vm280_vm2, %v442_v59  ;;  %v428_v8 = vmax.f32 %v380_v60, %v412_v1 }
 0x1cf   :  { %v411_v7 = vmul.f32 0.01, %v375_v5  ;;  %v426_v10 = vmax.f32 %v372_v63, %v410_v4 }
 0x1d0   :  { %v429_v9 = vmax.f32 %v383_v2, %v413_v6 }
 0x1d1   :  { %v427_v11 = vmax.f32 %v375_v5, %v411_v7  ;;  %v710_v12 = vpop.f32.mrb[20].mxu1 }
 0x1d2   :  { %v444_v14 = vpack.c.bf16 %v429_v9, %v428_v8  ;;  %v396_v15 = vadd.f32 %v710_v12, %v867_v23  ;;  %v387_v16 = vpop.f32.mrb[21].mxu1 }
 0x1d3   :  { %v443_v17 = vpack.c.bf16 %v427_v11, %v426_v10  ;;  %v388_v18 = vadd.f32 %v867_v23, %v387_v16  ;;  %v711_v19 = vpop.f32.mrb[22].mxu1 }
 0x1d4   :  { %v416_v20 = vmul.f32 0.01, %v396_v15  ;;  %v399_v21 = vadd.f32 %v711_v19, %v867_v23  ;;  %v390_v22 = vpop.f32.mrb[23].mxu1 }
 0x1d5   :  { %v414_v13 = vmul.f32 0.01, %v388_v18  ;;  %v391_v24 = vadd.f32 %v867_v23, %v390_v22  ;;  %724 = vmatprep.mubr.msk.bf16.mxu0 %vm280_vm2, %v443_v17  ;;  %v634_v23 = vld [vmem:[%s966_s6] ss:$0 sm:$0xff] }
 0x1d6   :  { %v417_v25 = vmul.f32 0.01, %v399_v21  ;;  %725 = vmatmul.mubr.msk.bf16.gmra.mrb[16].mxu0 %vm280_vm2, %v444_v14  ;;  %v432_v27 = vmax.f32 %v396_v15, %v416_v20 }
 0x1d7   :  { %v415_v26 = vmul.f32 0.01, %v391_v24  ;;  %v430_v29 = vmax.f32 %v388_v18, %v414_v13 }
 0x1d8   :  { %v433_v28 = vmax.f32 %v399_v21, %v417_v25 }
 0x1d9   :  { %v431_v30 = vmax.f32 %v391_v24, %v415_v26 }
 0x1da   :  { %v446_v31 = vpack.c.bf16 %v433_v28, %v432_v27 }
 0x1db   :  { %v445_v32 = vpack.c.bf16 %v431_v30, %v430_v29 }
 0x1dd   :  { %728 = vmatprep.mubr.msk.bf16.mxu0 %vm280_vm2, %v445_v32 }
 0x1de   :  { %729 = vmatmul.mubr.msk.bf16.gmra.mrb[20].mxu0 %vm280_vm2, %v446_v31 }
 0x299   :  { %v718_v33 = vpop.f32.mrb[8].mxu0 }
 0x29a   :  { %v532_v34 = vadd.f32 %v718_v33, %v634_v23  ;;  %v523_v35 = vpop.f32.mrb[9].mxu0 }
 0x29b   :  { %v524_v36 = vadd.f32 %v634_v23, %v523_v35  ;;  %v719_v37 = vpop.f32.mrb[10].mxu0 }
 0x29c   :  { %588 = vst.msk [vmem:[%s967_s7 + $0x10] sm:$0xff] %vm280_vm2, %v532_v34  ;;  %v535_v38 = vadd.f32 %v719_v37, %v634_v23  ;;  %v526_v39 = vpop.f32.mrb[11].mxu0 }
 0x29d   :  { %586 = vst.msk [vmem:[%s967_s7] sm:$0xff] %vm280_vm2, %v524_v36  ;;  %v527_v40 = vadd.f32 %v634_v23, %v526_v39 }
 0x29e   :  { %589 = vst.msk [vmem:[%s967_s7 + $0x18] sm:$0xff] %vm280_vm2, %v535_v38 }
 0x29f   :  { %587 = vst.msk [vmem:[%s967_s7 + $0x8] sm:$0xff] %vm280_vm2, %v527_v40 }
 0x2a1   :  { %v722_v41 = vpop.f32.mrb[12].mxu0 }
 0x2a2   :  { %v548_v42 = vadd.f32 %v722_v41, %v634_v23  ;;  %v539_v43 = vpop.f32.mrb[13].mxu0 }
 0x2a3   :  { %v540_v44 = vadd.f32 %v634_v23, %v539_v43  ;;  %v723_v45 = vpop.f32.mrb[14].mxu0 }
 0x2a4   :  { %592 = vst.msk [vmem:[%s967_s7 + $0x30] sm:$0xff] %vm280_vm2, %v548_v42  ;;  %v551_v46 = vadd.f32 %v723_v45, %v634_v23  ;;  %v542_v47 = vpop.f32.mrb[15].mxu0 }
 0x2a5   :  { %590 = vst.msk [vmem:[%s967_s7 + $0x20] sm:$0xff] %vm280_vm2, %v540_v44  ;;  %v543_v48 = vadd.f32 %v634_v23, %v542_v47 }
 0x2a6   :  { %593 = vst.msk [vmem:[%s967_s7 + $0x38] sm:$0xff] %vm280_vm2, %v551_v46 }
 0x2a7   :  { %591 = vst.msk [vmem:[%s967_s7 + $0x28] sm:$0xff] %vm280_vm2, %v543_v48 }
 0x2a9   :  { %v726_v49 = vpop.f32.mrb[16].mxu0 }
 0x2aa   :  { %v564_v50 = vadd.f32 %v726_v49, %v634_v23  ;;  %v555_v51 = vpop.f32.mrb[17].mxu0 }
 0x2ab   :  { %v556_v52 = vadd.f32 %v634_v23, %v555_v51  ;;  %v727_v53 = vpop.f32.mrb[18].mxu0 }
 0x2ac   :  { %596 = vst.msk [vmem:[%s967_s7 + $0x50] sm:$0xff] %vm280_vm2, %v564_v50  ;;  %v567_v54 = vadd.f32 %v727_v53, %v634_v23  ;;  %v558_v55 = vpop.f32.mrb[19].mxu0 }
 0x2ad   :  { %594 = vst.msk [vmem:[%s967_s7 + $0x40] sm:$0xff] %vm280_vm2, %v556_v52  ;;  %v559_v56 = vadd.f32 %v634_v23, %v558_v55 }
 0x2ae   :  { %597 = vst.msk [vmem:[%s967_s7 + $0x58] sm:$0xff] %vm280_vm2, %v567_v54 }
 0x2af   :  { %595 = vst.msk [vmem:[%s967_s7 + $0x48] sm:$0xff] %vm280_vm2, %v559_v56 }
 0x2b1   :  { %v730_v57 = vpop.f32.mrb[20].mxu0 }
 0x2b2   :  { %v580_v58 = vadd.f32 %v730_v57, %v634_v23  ;;  %v571_v59 = vpop.f32.mrb[21].mxu0 }
 0x2b3   :  { %v572_v60 = vadd.f32 %v634_v23, %v571_v59  ;;  %v731_v61 = vpop.f32.mrb[22].mxu0 }
 0x2b4   :  { %600 = vst.msk [vmem:[%s967_s7 + $0x70] sm:$0xff] %vm280_vm2, %v580_v58  ;;  %v583_v62 = vadd.f32 %v731_v61, %v634_v23  ;;  %v574_v63 = vpop.f32.mrb[23].mxu0 }
 0x2b5   :  { %598 = vst.msk [vmem:[%s967_s7 + $0x60] sm:$0xff] %vm280_vm2, %v572_v60  ;;  %v575_v0 = vadd.f32 %v634_v23, %v574_v63 }
 0x2b6   :  { %601 = vst.msk [vmem:[%s967_s7 + $0x78] sm:$0xff] %vm280_vm2, %v583_v62 }
 0x2b7   :  { %599 = vst.msk [vmem:[%s967_s7 + $0x68] sm:$0xff] %vm280_vm2, %v575_v0 }

// kernel: frag_gfn_forward.24
= control target key start
LH: loop header
LB: loop body
LE: loop exit
PB: predicated region body
PF: predicated region fallthrough
CT: control target
= control target key end

     0   :  { %vm116_vm0 = vcmask 1043456   ;;  %vm91_vm1 = vcmask 64512   ;;  %vm280_vm2 = vcmask 261120   ;;  %s960_s1 = inlined_call_operand.vmem [shape: bf16[8,32], index: 1, kind: input, shape index: {}]   ;;  %s961_s0 = inlined_call_operand.vmem [shape: bf16[128,8], index: 0, kind: input, shape index: {}]   ;;  %s962_s3 = inlined_call_operand.vmem [shape: bf16[32,32], index: 3, kind: input, shape index: {}]   ;;  %s963_s5 = inlined_call_operand.vmem [shape: bf16[32,32], index: 5, kind: input, shape index: {}]   ;;  %s964_s2 = inlined_call_operand.vmem [shape: f32[1,32], index: 2, kind: input, shape index: {}]   ;;  %s965_s4 = inlined_call_operand.vmem [shape: f32[1,32], index: 4, kind: input, shape index: {}]   ;;  %s966_s6 = inlined_call_operand.vmem [shape: f32[1,32], index: 6, kind: input, shape index: {}]   ;;  %s967_s7 = inlined_call_operand.vmem [shape: f32[128,32], index: 7, kind: output, shape index: {}]  }
   0x1   :  { %v43_v0 = vld [vmem:[%s960_s1] sm:$0xf]  ;;  %v737_v3 = vld [vmem:[%s961_s0 + $0x8] sm:$0xff]   ;;  %v738_v4 = vld [vmem:[%s961_s0 + $0x10] sm:$0xff]  }
   0x2   :  { %734 = vmatprep.subr.msk.bf16.mxu0 %vm116_vm0, %v43_v0  ;;  %v118_v1 = vsel %vm116_vm0, %v43_v0, 0  ;;  %v736_v2 = vld [vmem:[%s961_s0] sm:$0xff]   ;;  %735 = vmatprep.subr.msk.bf16.mxu1 %vm116_vm0, %v43_v0  ;;  %v741_v6 = vld [vmem:[%s961_s0 + $0x28] sm:$0xff]   ;;  %v742_v7 = vld [vmem:[%s961_s0 + $0x30] sm:$0xff]  }
   0x3   :  { %675 = vmatpush3.bf16.msra.mxu0 %v118_v1  ;;  %733 = vmatpush3.bf16.msra.mxu1 %v118_v1  ;;  %v740_v5 = vld [vmem:[%s961_s0 + $0x20] sm:$0xff]   ;;  %v739_v8 = vld [vmem:[%s961_s0 + $0x18] sm:$0xff]   ;;  %v745_v11 = vld [vmem:[%s962_s3 + $0x8] sm:$0xff]  }
   0x4   :  { %676 = vmatprep.mubr.msk.bf16.mxu0 %vm91_vm1, %v736_v2  ;;  %684 = vmatprep.mubr.msk.bf16.mxu1 %vm91_vm1, %v740_v5  ;;  %v744_v9 = vld [vmem:[%s962_s3] sm:$0xff]   ;;  %v743_v10 = vld [vmem:[%s961_s0 + $0x38] sm:$0xff]  }
   0x5   :  { %692 = vmatprep.subr.bf16.mxu1 %v744_v9  ;;  %v746_v12 = vld [vmem:[%s963_s5] sm:$0xff]  }
   0x6   :  { %677 = vmatmul.mubr.msk.bf16.vlgmr.msra.gmra.mrb[0].mxu0 %vm91_vm1, %v737_v3  ;;  %685 = vmatmul.mubr.msk.bf16.vlgmr.msra.gmra.mrb[0].mxu1 %vm91_vm1, %v741_v6  ;;  %v835_v13 = vld [vmem:[%s964_s2] ss:$0 sm:$0xff] }
   0x7   :  { %680 = vmatprep.mubr.msk.bf16.mxu0 %vm91_vm1, %v738_v4  ;;  %688 = vmatprep.mubr.msk.bf16.mxu1 %vm91_vm1, %v742_v7 }
   0x8   :  { %693 = vmatpush3.bf16.msra.mxu1 %v744_v9  ;;  %712 = vmatprep.subr.bf16.mxu0 %v746_v12 }
   0x9   :  { %694 = vmatprep.subr.bf16.mxu1 %v745_v11  ;;  %713 = vmatpush3.bf16.msra.mxu0 %v746_v12 }
   0xc   :  { %695 = vmatpush3.bf16.msra.mxu1 %v745_v11 }
   0xe   :  { %681 = vmatmul.mubr.msk.bf16.gmra.mrb[4].mxu0 %vm91_vm1, %v739_v8  ;;  %689 = vmatmul.mubr.msk.bf16.gmra.mrb[4].mxu1 %vm91_vm1, %v743_v10 }
  0xd9   :  { %v678_v14 = vpop.f32.mrb[0].mxu0  ;;  %v686_v22 = vpop.f32.mrb[0].mxu1 }
  0xda   :  { %v163_v15 = vadd.f32 %v678_v14, %v835_v13  ;;  %v154_v16 = vpop.f32.mrb[1].mxu0  ;;  %v195_v25 = vadd.f32 %v686_v22, %v835_v13  ;;  %v186_v26 = vpop.f32.mrb[1].mxu1 }
  0xdb   :  { %v155_v17 = vadd.f32 %v835_v13, %v154_v16  ;;  %v679_v18 = vpop.f32.mrb[2].mxu0  ;;  %v187_v28 = vadd.f32 %v835_v13, %v186_v26  ;;  %v687_v29 = vpop.f32.mrb[2].mxu1 }
  0xdc   :  { %v219_v19 = vmul.f32 0.01, %v163_v15  ;;  %v166_v20 = vadd.f32 %v679_v18, %v835_v13  ;;  %v157_v21 = vpop.f32.mrb[3].mxu0  ;;  %v227_v31 = vmul.f32 0.01, %v195_v25  ;;  %v198_v32 = vadd.f32 %v687_v29, %v835_v13  ;;  %v189_v33 = vpop.f32.mrb[3].mxu1 }
  0xdd   :  { %v217_v23 = vmul.f32 0.01, %v155_v17  ;;  %v158_v24 = vadd.f32 %v835_v13, %v157_v21  ;;  %v225_v36 = vmul.f32 0.01, %v187_v28  ;;  %v190_v37 = vadd.f32 %v835_v13, %v189_v33 }
  0xde   :  { %v220_v27 = vmul.f32 0.01, %v166_v20  ;;  %v235_v34 = vmax.f32 %v163_v15, %v219_v19  ;;  %v243_v41 = vmax.f32 %v195_v25, %v227_v31  ;;  %v228_v42 = vmul.f32 0.01, %v198_v32 }
  0xdf   :  { %v218_v30 = vmul.f32 0.01, %v158_v24  ;;  %v233_v38 = vmax.f32 %v155_v17, %v217_v23  ;;  %v241_v46 = vmax.f32 %v187_v28, %v225_v36  ;;  %v226_v47 = vmul.f32 0.01, %v190_v37  ;;  %v867_v23 = vld [vmem:[%s965_s4] ss:$0 sm:$0xff] }
  0xe0   :  { %v236_v35 = vmax.f32 %v166_v20, %v220_v27  ;;  %v244_v51 = vmax.f32 %v198_v32, %v228_v42 }
  0xe1   :  { %v234_v39 = vmax.f32 %v158_v24, %v218_v30  ;;  %v682_v40 = vpop.f32.mrb[4].mxu0  ;;  %v242_v55 = vmax.f32 %v190_v37, %v226_v47  ;;  %v690_v56 = vpop.f32.mrb[4].mxu1 }
  0xe2   :  { %v255_v43 = vpack.c.bf16 %v236_v35, %v235_v34  ;;  %v179_v44 = vadd.f32 %v682_v40, %v835_v13  ;;  %v170_v45 = vpop.f32.mrb[5].mxu0  ;;  %v259_v59 = vpack.c.bf16 %v244_v51, %v243_v41  ;;  %v211_v60 = vadd.f32 %v690_v56, %v835_v13  ;;  %v202_v61 = vpop.f32.mrb[5].mxu1 }
  0xe3   :  { %v254_v48 = vpack.c.bf16 %v234_v39, %v233_v38  ;;  %v171_v49 = vadd.f32 %v835_v13, %v170_v45  ;;  %v683_v50 = vpop.f32.mrb[6].mxu0  ;;  %v258_v63 = vpack.c.bf16 %v242_v55, %v241_v46  ;;  %v203_v0 = vadd.f32 %v835_v13, %v202_v61  ;;  %v691_v1 = vpop.f32.mrb[6].mxu1 }
  0xe4   :  { %v223_v52 = vmul.f32 0.01, %v179_v44  ;;  %v182_v53 = vadd.f32 %v683_v50, %v835_v13  ;;  %v173_v54 = vpop.f32.mrb[7].mxu0  ;;  %v231_v3 = vmul.f32 0.01, %v211_v60  ;;  %v214_v4 = vadd.f32 %v691_v1, %v835_v13  ;;  %v205_v5 = vpop.f32.mrb[7].mxu1 }
  0xe5   :  { %v221_v57 = vmul.f32 0.01, %v171_v49  ;;  %v174_v58 = vadd.f32 %v835_v13, %v173_v54  ;;  %696 = vmatprep.mubr.msk.bf16.mxu1 %vm280_vm2, %v254_v48  ;;  %v229_v8 = vmul.f32 0.01, %v203_v0  ;;  %v206_v9 = vadd.f32 %v835_v13, %v205_v5  ;;  %v747_v13 = vld [vmem:[%s963_s5 + $0x8] sm:$0xff]  }
  0xe6   :  { %v224_v62 = vmul.f32 0.01, %v182_v53  ;;  %697 = vmatmul.mubr.msk.bf16.vlgmr.msra.gmra.mrb[8].mxu1 %vm280_vm2, %v255_v43  ;;  %v239_v6 = vmax.f32 %v179_v44, %v223_v52  ;;  %v247_v12 = vmax.f32 %v211_v60, %v231_v3  ;;  %v232_v14 = vmul.f32 0.01, %v214_v4  ;;  %714 = vmatprep.subr.bf16.mxu0 %v747_v13 }
  0xe7   :  { %v222_v2 = vmul.f32 0.01, %v174_v58  ;;  %v237_v10 = vmax.f32 %v171_v49, %v221_v57  ;;  %v245_v16 = vmax.f32 %v203_v0, %v229_v8  ;;  %v230_v17 = vmul.f32 0.01, %v206_v9  ;;  %715 = vmatpush3.bf16.msra.mxu0 %v747_v13 }
  0xe8   :  { %v240_v7 = vmax.f32 %v182_v53, %v224_v62  ;;  %v248_v19 = vmax.f32 %v214_v4, %v232_v14 }
  0xe9   :  { %v238_v11 = vmax.f32 %v174_v58, %v222_v2  ;;  %v246_v20 = vmax.f32 %v206_v9, %v230_v17 }
  0xea   :  { %v257_v15 = vpack.c.bf16 %v240_v7, %v239_v6  ;;  %v261_v21 = vpack.c.bf16 %v248_v19, %v247_v12 }
  0xeb   :  { %v256_v18 = vpack.c.bf16 %v238_v11, %v237_v10  ;;  %v260_v22 = vpack.c.bf16 %v246_v20, %v245_v16 }
  0xed   :  { %700 = vmatprep.mubr.msk.bf16.mxu1 %vm280_vm2, %v256_v18 }
  0xee   :  { %701 = vmatmul.mubr.msk.bf16.gmra.mrb[12].mxu1 %vm280_vm2, %v257_v15 }
  0xef   :  { %704 = vmatprep.mubr.msk.bf16.mxu1 %vm280_vm2, %v258_v63 }
  0xf6   :  { %705 = vmatmul.mubr.msk.bf16.gmra.mrb[16].mxu1 %vm280_vm2, %v259_v59 }
  0xf7   :  { %708 = vmatprep.mubr.msk.bf16.mxu1 %vm280_vm2, %v260_v22 }
  0xfe   :  { %709 = vmatmul.mubr.msk.bf16.gmra.mrb[20].mxu1 %vm280_vm2, %v261_v21 }
 0x1b9   :  { %v698_v24 = vpop.f32.mrb[8].mxu1 }
 0x1ba   :  { %v348_v25 = vadd.f32 %v698_v24, %v867_v23  ;;  %v339_v26 = vpop.f32.mrb[9].mxu1 }
 0x1bb   :  { %v340_v27 = vadd.f32 %v867_v23, %v339_v26  ;;  %v699_v28 = vpop.f32.mrb[10].mxu1 }
 0x1bc   :  { %v404_v29 = vmul.f32 0.01, %v348_v25  ;;  %v351_v30 = vadd.f32 %v699_v28, %v867_v23  ;;  %v342_v31 = vpop.f32.mrb[11].mxu1 }
 0x1bd   :  { %v402_v32 = vmul.f32 0.01, %v340_v27  ;;  %v343_v33 = vadd.f32 %v867_v23, %v342_v31 }
 0x1be   :  { %v405_v34 = vmul.f32 0.01, %v351_v30  ;;  %v420_v36 = vmax.f32 %v348_v25, %v404_v29 }
 0x1bf   :  { %v403_v35 = vmul.f32 0.01, %v343_v33  ;;  %v418_v38 = vmax.f32 %v340_v27, %v402_v32 }
 0x1c0   :  { %v421_v37 = vmax.f32 %v351_v30, %v405_v34 }
 0x1c1   :  { %v419_v39 = vmax.f32 %v343_v33, %v403_v35  ;;  %v702_v40 = vpop.f32.mrb[12].mxu1 }
 0x1c2   :  { %v440_v41 = vpack.c.bf16 %v421_v37, %v420_v36  ;;  %v364_v42 = vadd.f32 %v702_v40, %v867_v23  ;;  %v355_v43 = vpop.f32.mrb[13].mxu1 }
 0x1c3   :  { %v439_v44 = vpack.c.bf16 %v419_v39, %v418_v38  ;;  %v356_v45 = vadd.f32 %v867_v23, %v355_v43  ;;  %v703_v46 = vpop.f32.mrb[14].mxu1 }
 0x1c4   :  { %v408_v47 = vmul.f32 0.01, %v364_v42  ;;  %v367_v48 = vadd.f32 %v703_v46, %v867_v23  ;;  %v358_v49 = vpop.f32.mrb[15].mxu1 }
 0x1c5   :  { %v406_v50 = vmul.f32 0.01, %v356_v45  ;;  %v359_v51 = vadd.f32 %v867_v23, %v358_v49  ;;  %716 = vmatprep.mubr.msk.bf16.mxu0 %vm280_vm2, %v439_v44 }
 0x1c6   :  { %v409_v52 = vmul.f32 0.01, %v367_v48  ;;  %717 = vmatmul.mubr.msk.bf16.vlgmr.msra.gmra.mrb[8].mxu0 %vm280_vm2, %v440_v41  ;;  %v424_v54 = vmax.f32 %v364_v42, %v408_v47 }
 0x1c7   :  { %v407_v53 = vmul.f32 0.01, %v359_v51  ;;  %v422_v56 = vmax.f32 %v356_v45, %v406_v50 }
 0x1c8   :  { %v425_v55 = vmax.f32 %v367_v48, %v409_v52 }
 0x1c9   :  { %v423_v57 = vmax.f32 %v359_v51, %v407_v53  ;;  %v706_v58 = vpop.f32.mrb[16].mxu1 }
 0x1ca   :  { %v442_v59 = vpack.c.bf16 %v425_v55, %v424_v54  ;;  %v380_v60 = vadd.f32 %v706_v58, %v867_v23  ;;  %v371_v61 = vpop.f32.mrb[17].mxu1 }
 0x1cb   :  { %v441_v62 = vpack.c.bf16 %v423_v57, %v422_v56  ;;  %v372_v63 = vadd.f32 %v867_v23, %v371_v61  ;;  %v707_v0 = vpop.f32.mrb[18].mxu1 }
 0x1cc   :  { %v412_v1 = vmul.f32 0.01, %v380_v60  ;;  %v383_v2 = vadd.f32 %v707_v0, %v867_v23  ;;  %v374_v3 = vpop.f32.mrb[19].mxu1 }
 0x1cd   :  { %v410_v4 = vmul.f32 0.01, %v372_v63  ;;  %v375_v5 = vadd.f32 %v867_v23, %v374_v3  ;;  %720 = vmatprep.mubr.msk.bf16.mxu0 %vm280_vm2, %v441_v62 }
 0x1ce   :  { %v413_v6 = vmul.f32 0.01, %v383_v2  ;;  %721 = vmatmul.mubr.msk.bf16.gmra.mrb[12].mxu0 %vm280_vm2, %v442_v59  ;;  %v428_v8 = vmax.f32 %v380_v60, %v412_v1 }
 0x1cf   :  { %v411_v7 = vmul.f32 0.01, %v375_v5  ;;  %v426_v10 = vmax.f32 %v372_v63, %v410_v4 }
 0x1d0   :  { %v429_v9 = vmax.f32 %v383_v2, %v413_v6 }
 0x1d1   :  { %v427_v11 = vmax.f32 %v375_v5, %v411_v7  ;;  %v710_v12 = vpop.f32.mrb[20].mxu1 }
 0x1d2   :  { %v444_v14 = vpack.c.bf16 %v429_v9, %v428_v8  ;;  %v396_v15 = vadd.f32 %v710_v12, %v867_v23  ;;  %v387_v16 = vpop.f32.mrb[21].mxu1 }
 0x1d3   :  { %v443_v17 = vpack.c.bf16 %v427_v11, %v426_v10  ;;  %v388_v18 = vadd.f32 %v867_v23, %v387_v16  ;;  %v711_v19 = vpop.f32.mrb[22].mxu1 }
 0x1d4   :  { %v416_v20 = vmul.f32 0.01, %v396_v15  ;;  %v399_v21 = vadd.f32 %v711_v19, %v867_v23  ;;  %v390_v22 = vpop.f32.mrb[23].mxu1 }
 0x1d5   :  { %v414_v13 = vmul.f32 0.01, %v388_v18  ;;  %v391_v24 = vadd.f32 %v867_v23, %v390_v22  ;;  %724 = vmatprep.mubr.msk.bf16.mxu0 %vm280_vm2, %v443_v17  ;;  %v634_v23 = vld [vmem:[%s966_s6] ss:$0 sm:$0xff] }
 0x1d6   :  { %v417_v25 = vmul.f32 0.01, %v399_v21  ;;  %725 = vmatmul.mubr.msk.bf16.gmra.mrb[16].mxu0 %vm280_vm2, %v444_v14  ;;  %v432_v27 = vmax.f32 %v396_v15, %v416_v20 }
 0x1d7   :  { %v415_v26 = vmul.f32 0.01, %v391_v24  ;;  %v430_v29 = vmax.f32 %v388_v18, %v414_v13 }
 0x1d8   :  { %v433_v28 = vmax.f32 %v399_v21, %v417_v25 }
 0x1d9   :  { %v431_v30 = vmax.f32 %v391_v24, %v415_v26 }
 0x1da   :  { %v446_v31 = vpack.c.bf16 %v433_v28, %v432_v27 }
 0x1db   :  { %v445_v32 = vpack.c.bf16 %v431_v30, %v430_v29 }
 0x1dd   :  { %728 = vmatprep.mubr.msk.bf16.mxu0 %vm280_vm2, %v445_v32 }
 0x1de   :  { %729 = vmatmul.mubr.msk.bf16.gmra.mrb[20].mxu0 %vm280_vm2, %v446_v31 }
 0x299   :  { %v718_v33 = vpop.f32.mrb[8].mxu0 }
 0x29a   :  { %v532_v34 = vadd.f32 %v718_v33, %v634_v23  ;;  %v523_v35 = vpop.f32.mrb[9].mxu0 }
 0x29b   :  { %v524_v36 = vadd.f32 %v634_v23, %v523_v35  ;;  %v719_v37 = vpop.f32.mrb[10].mxu0 }
 0x29c   :  { %588 = vst.msk [vmem:[%s967_s7 + $0x10] sm:$0xff] %vm280_vm2, %v532_v34  ;;  %v535_v38 = vadd.f32 %v719_v37, %v634_v23  ;;  %v526_v39 = vpop.f32.mrb[11].mxu0 }
 0x29d   :  { %586 = vst.msk [vmem:[%s967_s7] sm:$0xff] %vm280_vm2, %v524_v36  ;;  %v527_v40 = vadd.f32 %v634_v23, %v526_v39 }
 0x29e   :  { %589 = vst.msk [vmem:[%s967_s7 + $0x18] sm:$0xff] %vm280_vm2, %v535_v38 }
 0x29f   :  { %587 = vst.msk [vmem:[%s967_s7 + $0x8] sm:$0xff] %vm280_vm2, %v527_v40 }
 0x2a1   :  { %v722_v41 = vpop.f32.mrb[12].mxu0 }
 0x2a2   :  { %v548_v42 = vadd.f32 %v722_v41, %v634_v23  ;;  %v539_v43 = vpop.f32.mrb[13].mxu0 }
 0x2a3   :  { %v540_v44 = vadd.f32 %v634_v23, %v539_v43  ;;  %v723_v45 = vpop.f32.mrb[14].mxu0 }
 0x2a4   :  { %592 = vst.msk [vmem:[%s967_s7 + $0x30] sm:$0xff] %vm280_vm2, %v548_v42  ;;  %v551_v46 = vadd.f32 %v723_v45, %v634_v23  ;;  %v542_v47 = vpop.f32.mrb[15].mxu0 }
 0x2a5   :  { %590 = vst.msk [vmem:[%s967_s7 + $0x20] sm:$0xff] %vm280_vm2, %v540_v44  ;;  %v543_v48 = vadd.f32 %v634_v23, %v542_v47 }
 0x2a6   :  { %593 = vst.msk [vmem:[%s967_s7 + $0x38] sm:$0xff] %vm280_vm2, %v551_v46 }
 0x2a7   :  { %591 = vst.msk [vmem:[%s967_s7 + $0x28] sm:$0xff] %vm280_vm2, %v543_v48 }
 0x2a9   :  { %v726_v49 = vpop.f32.mrb[16].mxu0 }
 0x2aa   :  { %v564_v50 = vadd.f32 %v726_v49, %v634_v23  ;;  %v555_v51 = vpop.f32.mrb[17].mxu0 }
 0x2ab   :  { %v556_v52 = vadd.f32 %v634_v23, %v555_v51  ;;  %v727_v53 = vpop.f32.mrb[18].mxu0 }
 0x2ac   :  { %596 = vst.msk [vmem:[%s967_s7 + $0x50] sm:$0xff] %vm280_vm2, %v564_v50  ;;  %v567_v54 = vadd.f32 %v727_v53, %v634_v23  ;;  %v558_v55 = vpop.f32.mrb[19].mxu0 }
 0x2ad   :  { %594 = vst.msk [vmem:[%s967_s7 + $0x40] sm:$0xff] %vm280_vm2, %v556_v52  ;;  %v559_v56 = vadd.f32 %v634_v23, %v558_v55 }
 0x2ae   :  { %597 = vst.msk [vmem:[%s967_s7 + $0x58] sm:$0xff] %vm280_vm2, %v567_v54 }
 0x2af   :  { %595 = vst.msk [vmem:[%s967_s7 + $0x48] sm:$0xff] %vm280_vm2, %v559_v56 }
 0x2b1   :  { %v730_v57 = vpop.f32.mrb[20].mxu0 }
 0x2b2   :  { %v580_v58 = vadd.f32 %v730_v57, %v634_v23  ;;  %v571_v59 = vpop.f32.mrb[21].mxu0 }
 0x2b3   :  { %v572_v60 = vadd.f32 %v634_v23, %v571_v59  ;;  %v731_v61 = vpop.f32.mrb[22].mxu0 }
 0x2b4   :  { %600 = vst.msk [vmem:[%s967_s7 + $0x70] sm:$0xff] %vm280_vm2, %v580_v58  ;;  %v583_v62 = vadd.f32 %v731_v61, %v634_v23  ;;  %v574_v63 = vpop.f32.mrb[23].mxu0 }
 0x2b5   :  { %598 = vst.msk [vmem:[%s967_s7 + $0x60] sm:$0xff] %vm280_vm2, %v572_v60  ;;  %v575_v0 = vadd.f32 %v634_v23, %v574_v63 }
 0x2b6   :  { %601 = vst.msk [vmem:[%s967_s7 + $0x78] sm:$0xff] %vm280_vm2, %v583_v62 }
 0x2b7   :  { %599 = vst.msk [vmem:[%s967_s7 + $0x68] sm:$0xff] %vm280_vm2, %v575_v0 }

// kernel: frag_gfn_forward.28
= control target key start
LH: loop header
LB: loop body
LE: loop exit
PB: predicated region body
PF: predicated region fallthrough
CT: control target
= control target key end

     0   :  { %vm368_vm0 = vcmask 257024   ;;  %s728_s1 = inlined_call_operand.vmem [shape: bf16[128,32], index: 1, kind: input, shape index: {}]   ;;  %s729_s0 = inlined_call_operand.vmem [shape: bf16[128,128], index: 0, kind: input, shape index: {}]   ;;  %s730_s2 = inlined_call_operand.vmem [shape: bf16[128,32], index: 2, kind: input, shape index: {}]   ;;  %s731_s3 = inlined_call_operand.vmem [shape: bf16[128,32], index: 3, kind: output, shape index: {}]  }
   0x1   :  { %v540_v0 = vld [vmem:[%s728_s1] sm:$0xff]   ;;  %v541_v1 = vld [vmem:[%s728_s1 + $0x8] sm:$0xff]   ;;  %v542_v2 = vld [vmem:[%s728_s1 + $0x10] sm:$0xff]  }
   0x2   :  { %492 = vmatprep.subr.bf16.mxu0 %v540_v0  ;;  %524 = vmatprep.subr.bf16.mxu1 %v540_v0  ;;  %v543_v3 = vld [vmem:[%s728_s1 + $0x18] sm:$0xff]   ;;  %v548_v4 = vld [vmem:[%s729_s0] sm:$0xff]   ;;  %v545_v7 = vld [vmem:[%s728_s1 + $0x28] sm:$0xff]  }
   0x3   :  { %493 = vmatpush3.bf16.msra.mxu0 %v540_v0  ;;  %532 = vmatpush3.bf16.msra.mxu1 %v540_v0  ;;  %v549_v5 = vld [vmem:[%s729_s0 + $0x20] sm:$0xff]   ;;  %v546_v8 = vld [vmem:[%s728_s1 + $0x30] sm:$0xff]   ;;  %v547_v9 = vld [vmem:[%s728_s1 + $0x38] sm:$0xff]  }
   0x4   :  { %494 = vmatprep.subr.bf16.mxu0 %v541_v1  ;;  %525 = vmatprep.subr.bf16.mxu1 %v541_v1  ;;  %v544_v6 = vld [vmem:[%s728_s1 + $0x20] sm:$0xff]   ;;  %v550_v10 = vld [vmem:[%s729_s0 + $0x8] sm:$0xff]   ;;  %v552_v12 = vld [vmem:[%s729_s0 + $0x10] sm:$0xff]  }
   0x5   :  { %508 = vmatprep.mubr.bf16.mxu0 %v548_v4  ;;  %516 = vmatprep.mubr.bf16.mxu1 %v549_v5  ;;  %v551_v11 = vld [vmem:[%s729_s0 + $0x28] sm:$0xff]   ;;  %v553_v13 = vld [vmem:[%s729_s0 + $0x30] sm:$0xff]   ;;  %v554_v14 = vld [vmem:[%s729_s0 + $0x18] sm:$0xff]  }
   0x6   :  { %v555_v15 = vld [vmem:[%s729_s0 + $0x38] sm:$0xff]   ;;  %v469_v16 = vld [vmem:[%s730_s2 + $0x8] sm:$0xff]   ;;  %v438_v18 = vld [vmem:[%s730_s2] sm:$0xff]  }
   0x7   :  { %495 = vmatpush3.bf16.msra.mxu0 %v541_v1  ;;  %533 = vmatpush3.bf16.msra.mxu1 %v541_v1  ;;  %v473_v17 = vld [vmem:[%s730_s2 + $0x28] sm:$0xff]   ;;  %v472_v19 = vld [vmem:[%s730_s2 + $0x20] sm:$0xff]   ;;  %v639_v20 = vld [vmem:[%s730_s2 + $0x18] sm:$0xff]   ;;  %v443_v21 = vunpack.c.l.bf16 %v469_v16  ;;  %v439_v26 = vunpack.c.l.bf16 %v438_v18  ;;  %v444_v28 = vunpack.c.h.bf16 %v469_v16  ;;  %v440_v30 = vunpack.c.h.bf16 %v438_v18 }
   0x8   :  { %496 = vmatprep.subr.bf16.mxu0 %v542_v2  ;;  %526 = vmatprep.subr.bf16.mxu1 %v542_v2  ;;  %v459_v22 = vunpack.c.l.bf16 %v473_v17  ;;  %v644_v23 = vld [vmem:[%s730_s2 + $0x38] sm:$0xff]   ;;  %v649_v24 = vld [vmem:[%s730_s2 + $0x10] sm:$0xff]   ;;  %v455_v27 = vunpack.c.l.bf16 %v472_v19  ;;  %v460_v29 = vunpack.c.h.bf16 %v473_v17  ;;  %v456_v31 = vunpack.c.h.bf16 %v472_v19 }
   0x9   :  { %v654_v25 = vld [vmem:[%s730_s2 + $0x30] sm:$0xff]   ;;  %v451_v34 = vunpack.c.l.bf16 %v639_v20  ;;  %v467_v35 = vunpack.c.l.bf16 %v644_v23  ;;  %v447_v36 = vunpack.c.l.bf16 %v649_v24  ;;  %v452_v42 = vunpack.c.h.bf16 %v639_v20 }
   0xa   :  { %v463_v37 = vunpack.c.l.bf16 %v654_v25  ;;  %v468_v43 = vunpack.c.h.bf16 %v644_v23  ;;  %v448_v48 = vunpack.c.h.bf16 %v649_v24  ;;  %v464_v49 = vunpack.c.h.bf16 %v654_v25 }
   0xb   :  { %497 = vmatpush3.bf16.msra.mxu0 %v542_v2  ;;  %534 = vmatpush3.bf16.msra.mxu1 %v542_v2 }
   0xc   :  { %498 = vmatprep.subr.bf16.mxu0 %v543_v3  ;;  %527 = vmatprep.subr.bf16.mxu1 %v543_v3 }
   0xf   :  { %499 = vmatpush3.bf16.msra.mxu0 %v543_v3  ;;  %535 = vmatpush3.bf16.msra.mxu1 %v543_v3 }
  0x10   :  { %500 = vmatprep.subr.bf16.mxu0 %v544_v6  ;;  %528 = vmatprep.subr.bf16.mxu1 %v544_v6 }
  0x13   :  { %501 = vmatpush3.bf16.msra.mxu0 %v544_v6  ;;  %536 = vmatpush3.bf16.msra.mxu1 %v544_v6 }
  0x14   :  { %502 = vmatprep.subr.bf16.mxu0 %v545_v7  ;;  %529 = vmatprep.subr.bf16.mxu1 %v545_v7 }
  0x17   :  { %503 = vmatpush3.bf16.msra.mxu0 %v545_v7  ;;  %537 = vmatpush3.bf16.msra.mxu1 %v545_v7 }
  0x18   :  { %504 = vmatprep.subr.bf16.mxu0 %v546_v8  ;;  %530 = vmatprep.subr.bf16.mxu1 %v546_v8 }
  0x1b   :  { %505 = vmatpush3.bf16.msra.mxu0 %v546_v8  ;;  %538 = vmatpush3.bf16.msra.mxu1 %v546_v8 }
  0x1c   :  { %506 = vmatprep.subr.bf16.mxu0 %v547_v9  ;;  %531 = vmatprep.subr.bf16.mxu1 %v547_v9 }
  0x1f   :  { %507 = vmatpush3.bf16.msra.mxu0 %v547_v9  ;;  %539 = vmatpush3.bf16.msra.mxu1 %v547_v9 }
  0x22   :  { %509 = vmatmul.mubr.bf16.vlgmr.msra.gmra.mrb[0].mxu0 %v550_v10  ;;  %517 = vmatmul.mubr.bf16.vlgmr.msra.gmra.mrb[0].mxu1 %v551_v11 }
  0x23   :  { %512 = vmatprep.mubr.bf16.mxu0 %v552_v12  ;;  %520 = vmatprep.mubr.bf16.mxu1 %v553_v13 }
  0x2a   :  { %513 = vmatmul.mubr.bf16.gmra.mrb[4].mxu0 %v554_v14  ;;  %521 = vmatmul.mubr.bf16.gmra.mrb[4].mxu1 %v555_v15 }
  0xf5   :  { %v510_v32 = vpop.f32.mrb[0].mxu0  ;;  %v518_v33 = vpop.f32.mrb[0].mxu1 }
  0xf6   :  { %v218_v38 = vadd.f32 %v510_v32, %v443_v21  ;;  %v250_v39 = vadd.f32 %v518_v33, %v459_v22  ;;  %v209_v40 = vpop.f32.mrb[1].mxu0  ;;  %v241_v41 = vpop.f32.mrb[1].mxu1 }
  0xf7   :  { %v210_v44 = vadd.f32 %v439_v26, %v209_v40  ;;  %v242_v45 = vadd.f32 %v455_v27, %v241_v41  ;;  %v511_v46 = vpop.f32.mrb[2].mxu0  ;;  %v519_v47 = vpop.f32.mrb[2].mxu1 }
  0xf8   :  { %v274_v50 = vmax.f32 %v218_v38, 0.0  ;;  %v282_v51 = vmax.f32 %v250_v39, 0.0  ;;  %v221_v52 = vadd.f32 %v511_v46, %v444_v28  ;;  %v253_v53 = vadd.f32 %v519_v47, %v460_v29  ;;  %v212_v54 = vpop.f32.mrb[3].mxu0  ;;  %v244_v55 = vpop.f32.mrb[3].mxu1 }
  0xf9   :  { %v272_v56 = vmax.f32 %v210_v44, 0.0  ;;  %v280_v57 = vmax.f32 %v242_v45, 0.0  ;;  %v213_v58 = vadd.f32 %v440_v30, %v212_v54  ;;  %v245_v59 = vadd.f32 %v456_v31, %v244_v55 }
  0xfa   :  { %v290_v60 = vadd.f32 1e-07, %v274_v50  ;;  %v298_v61 = vadd.f32 1e-07, %v282_v51  ;;  %v275_v62 = vmax.f32 %v221_v52, 0.0  ;;  %v283_v63 = vmax.f32 %v253_v53, 0.0 }
  0xfb   :  { %v288_v0 = vadd.f32 1e-07, %v272_v56  ;;  %v296_v1 = vadd.f32 1e-07, %v280_v57  ;;  %v273_v2 = vmax.f32 %v213_v58, 0.0  ;;  %v281_v3 = vmax.f32 %v245_v59, 0.0 }
  0xfc   :  { %v423_v4 = vpack.c.bf16 %v290_v60, %v290_v60  ;;  %v431_v5 = vpack.c.bf16 %v298_v61, %v298_v61  ;;  %v291_v6 = vadd.f32 1e-07, %v275_v62  ;;  %v299_v7 = vadd.f32 1e-07, %v283_v63 }
  0xfd   :  { %v421_v8 = vpack.c.bf16 %v288_v0, %v288_v0  ;;  %v429_v9 = vpack.c.bf16 %v296_v1, %v296_v1  ;;  %v289_v10 = vadd.f32 1e-07, %v273_v2  ;;  %v297_v11 = vadd.f32 1e-07, %v281_v3  ;;  %v514_v12 = vpop.f32.mrb[4].mxu0  ;;  %v522_v13 = vpop.f32.mrb[4].mxu1 }
  0xfe   :  { %371 = vst.msk [vmem:[%s731_s3 + $0x8] sm:$0xf] %vm368_vm0, %v423_v4  ;;  %379 = vst.msk [vmem:[%s731_s3 + $0x28] sm:$0xf] %vm368_vm0, %v431_v5  ;;  %v424_v14 = vpack.c.bf16 %v291_v6, %v291_v6  ;;  %v432_v15 = vpack.c.bf16 %v299_v7, %v299_v7  ;;  %v234_v16 = vadd.f32 %v514_v12, %v451_v34  ;;  %v225_v18 = vpop.f32.mrb[5].mxu0  ;;  %v257_v19 = vpop.f32.mrb[5].mxu1 }
  0xff   :  { %v266_v17 = vadd.f32 %v522_v13, %v467_v35  ;;  %369 = vst.msk [vmem:[%s731_s3] sm:$0xf] %vm368_vm0, %v421_v8  ;;  %377 = vst.msk [vmem:[%s731_s3 + $0x20] sm:$0xf] %vm368_vm0, %v429_v9  ;;  %v422_v20 = vpack.c.bf16 %v289_v10, %v289_v10  ;;  %v430_v21 = vpack.c.bf16 %v297_v11, %v297_v11  ;;  %v515_v24 = vpop.f32.mrb[6].mxu0  ;;  %v523_v25 = vpop.f32.mrb[6].mxu1 }
 0x100   :  { %v226_v22 = vadd.f32 %v447_v36, %v225_v18  ;;  %v258_v23 = vadd.f32 %v463_v37, %v257_v19  ;;  %372 = vst.msk [vmem:[%s731_s3 + $0xc] sm:$0xf] %vm368_vm0, %v424_v14  ;;  %380 = vst.msk [vmem:[%s731_s3 + $0x2c] sm:$0xf] %vm368_vm0, %v432_v15  ;;  %v278_v26 = vmax.f32 %v234_v16, 0.0  ;;  %v237_v28 = vadd.f32 %v515_v24, %v452_v42  ;;  %v228_v30 = vpop.f32.mrb[7].mxu0 }
 0x101   :  { %v286_v27 = vmax.f32 %v266_v17, 0.0  ;;  %v269_v29 = vadd.f32 %v523_v25, %v468_v43  ;;  %v260_v31 = vpop.f32.mrb[7].mxu1  ;;  %370 = vst.msk [vmem:[%s731_s3 + $0x4] sm:$0xf] %vm368_vm0, %v422_v20  ;;  %378 = vst.msk [vmem:[%s731_s3 + $0x24] sm:$0xf] %vm368_vm0, %v430_v21  ;;  %v229_v34 = vadd.f32 %v448_v48, %v228_v30 }
 0x102   :  { %v276_v32 = vmax.f32 %v226_v22, 0.0  ;;  %v284_v33 = vmax.f32 %v258_v23, 0.0  ;;  %v261_v35 = vadd.f32 %v464_v49, %v260_v31  ;;  %v294_v36 = vadd.f32 1e-07, %v278_v26 }
 0x103   :  { %v302_v37 = vadd.f32 1e-07, %v286_v27  ;;  %v279_v38 = vmax.f32 %v237_v28, 0.0  ;;  %v287_v39 = vmax.f32 %v269_v29, 0.0  ;;  %v277_v42 = vmax.f32 %v229_v34, 0.0 }
 0x104   :  { %v292_v40 = vadd.f32 1e-07, %v276_v32  ;;  %v300_v41 = vadd.f32 1e-07, %v284_v33  ;;  %v285_v43 = vmax.f32 %v261_v35, 0.0  ;;  %v427_v44 = vpack.c.bf16 %v294_v36, %v294_v36 }
 0x105   :  { %v435_v45 = vpack.c.bf16 %v302_v37, %v302_v37  ;;  %v295_v46 = vadd.f32 1e-07, %v279_v38  ;;  %v303_v47 = vadd.f32 1e-07, %v287_v39  ;;  %v293_v52 = vadd.f32 1e-07, %v277_v42 }
 0x106   :  { %v425_v50 = vpack.c.bf16 %v292_v40, %v292_v40  ;;  %v433_v51 = vpack.c.bf16 %v300_v41, %v300_v41  ;;  %v301_v53 = vadd.f32 1e-07, %v285_v43  ;;  %375 = vst.msk [vmem:[%s731_s3 + $0x18] sm:$0xf] %vm368_vm0, %v427_v44 }
 0x107   :  { %383 = vst.msk [vmem:[%s731_s3 + $0x38] sm:$0xf] %vm368_vm0, %v435_v45  ;;  %v428_v48 = vpack.c.bf16 %v295_v46, %v295_v46  ;;  %v436_v49 = vpack.c.bf16 %v303_v47, %v303_v47  ;;  %v426_v54 = vpack.c.bf16 %v293_v52, %v293_v52 }
 0x108   :  { %373 = vst.msk [vmem:[%s731_s3 + $0x10] sm:$0xf] %vm368_vm0, %v425_v50  ;;  %381 = vst.msk [vmem:[%s731_s3 + $0x30] sm:$0xf] %vm368_vm0, %v433_v51  ;;  %v434_v55 = vpack.c.bf16 %v301_v53, %v301_v53 }
 0x109   :  { %376 = vst.msk [vmem:[%s731_s3 + $0x1c] sm:$0xf] %vm368_vm0, %v428_v48  ;;  %384 = vst.msk [vmem:[%s731_s3 + $0x3c] sm:$0xf] %vm368_vm0, %v436_v49 }
 0x10a   :  { %374 = vst.msk [vmem:[%s731_s3 + $0x14] sm:$0xf] %vm368_vm0, %v426_v54  ;;  %382 = vst.msk [vmem:[%s731_s3 + $0x34] sm:$0xf] %vm368_vm0, %v434_v55 }

// kernel: frag_gfn_forward.29
= control target key start
LH: loop header
LB: loop body
LE: loop exit
PB: predicated region body
PF: predicated region fallthrough
CT: control target
= control target key end

     0   :  { %vm299_vm0 = vcmask 261120   ;;  %vm569_vm1 = vcmask 523264   ;;  %s1422_s1 = inlined_call_operand.vmem [shape: bf16[128,32], index: 1, kind: input, shape index: {}]   ;;  %s1423_s0 = inlined_call_operand.vmem [shape: bf16[128,128], index: 0, kind: input, shape index: {}]   ;;  %s1424_s3 = inlined_call_operand.vmem [shape: bf16[32,32], index: 3, kind: input, shape index: {}]   ;;  %s1425_s2 = inlined_call_operand.vmem [shape: f32[128,32], index: 2, kind: input, shape index: {}]   ;;  %s1426_s5 = inlined_call_operand.vmem [shape: bf16[64,256], index: 5, kind: input, shape index: {}]   ;;  %s1427_s4 = inlined_call_operand.vmem [shape: f32[1,32], index: 4, kind: input, shape index: {}]   ;;  %s1428_s6 = inlined_call_operand.vmem [shape: f32[1,256], index: 6, kind: input, shape index: {}]   ;;  %s1429_s7 = inlined_call_operand.vmem [shape: bf16[128,256], index: 7, kind: output, shape index: {}]  }
   0x1   :  { %v1022_v0 = vld [vmem:[%s1422_s1] sm:$0xff]   ;;  %v1023_v1 = vld [vmem:[%s1422_s1 + $0x8] sm:$0xff]   ;;  %v1024_v2 = vld [vmem:[%s1422_s1 + $0x10] sm:$0xff]  }
   0x2   :  { %924 = vmatprep.subr.bf16.mxu0 %v1022_v0  ;;  %v1025_v3 = vld [vmem:[%s1422_s1 + $0x18] sm:$0xff]   ;;  %v1030_v4 = vld [vmem:[%s1423_s0] sm:$0xff]   ;;  %v1027_v6 = vld [vmem:[%s1422_s1 + $0x28] sm:$0xff]  }
   0x3   :  { %925 = vmatpush3.bf16.msra.mxu0 %v1022_v0  ;;  %940 = vmatprep.mubr.bf16.mxu0 %v1030_v4  ;;  %v1026_v5 = vld [vmem:[%s1422_s1 + $0x20] sm:$0xff]   ;;  %v1039_v8 = vld [vmem:[%s1424_s3 + $0x8] sm:$0xff]   ;;  %v1028_v9 = vld [vmem:[%s1422_s1 + $0x30] sm:$0xff]  }
   0x4   :  { %926 = vmatprep.subr.bf16.mxu0 %v1023_v1  ;;  %v1038_v7 = vld [vmem:[%s1424_s3] sm:$0xff]   ;;  %v1029_v10 = vld [vmem:[%s1422_s1 + $0x38] sm:$0xff]   ;;  %v1031_v11 = vld [vmem:[%s1423_s0 + $0x8] sm:$0xff]  }
   0x5   :  { %976 = vmatprep.subr.bf16.mxu1 %v1038_v7  ;;  %v1032_v12 = vld [vmem:[%s1423_s0 + $0x10] sm:$0xff]   ;;  %v1033_v13 = vld [vmem:[%s1423_s0 + $0x18] sm:$0xff]   ;;  %v1034_v14 = vld [vmem:[%s1423_s0 + $0x20] sm:$0xff]  }
   0x6   :  { %978 = vmatpush3.bf16.msra.mxu1 %v1038_v7  ;;  %v1035_v15 = vld [vmem:[%s1423_s0 + $0x28] sm:$0xff]   ;;  %v1036_v16 = vld [vmem:[%s1423_s0 + $0x30] sm:$0xff]   ;;  %v1037_v17 = vld [vmem:[%s1423_s0 + $0x38] sm:$0xff]  }
   0x7   :  { %927 = vmatpush3.bf16.msra.mxu0 %v1023_v1  ;;  %977 = vmatprep.subr.bf16.mxu1 %v1039_v8  ;;  %v1151_v18 = vld [vmem:[%s1425_s2 + $0x10] sm:$0xff]  ;;  %v1156_v20 = vld [vmem:[%s1425_s2 + $0x18] sm:$0xff]  ;;  %v1161_v22 = vld [vmem:[%s1425_s2] sm:$0xff] }
   0x8   :  { %928 = vmatprep.subr.bf16.mxu0 %v1024_v2  ;;  %v1166_v23 = vld [vmem:[%s1425_s2 + $0x8] sm:$0xff]  ;;  %v1175_v32 = vld [vmem:[%s1425_s2 + $0x30] sm:$0xff]  ;;  %v1180_v33 = vld [vmem:[%s1425_s2 + $0x20] sm:$0xff] }
   0x9   :  { %v1186_v35 = vld [vmem:[%s1425_s2 + $0x38] sm:$0xff]  ;;  %v1193_v38 = vld [vmem:[%s1425_s2 + $0x28] sm:$0xff]  ;;  %v1201_v46 = vld [vmem:[%s1425_s2 + $0x50] sm:$0xff] }
   0xa   :  { %979 = vmatpush3.bf16.msra.mxu1 %v1039_v8  ;;  %v1206_v47 = vld [vmem:[%s1425_s2 + $0x40] sm:$0xff]  ;;  %v1212_v49 = vld [vmem:[%s1425_s2 + $0x58] sm:$0xff]  ;;  %v1219_v52 = vld [vmem:[%s1425_s2 + $0x48] sm:$0xff] }
   0xb   :  { %929 = vmatpush3.bf16.msra.mxu0 %v1024_v2  ;;  %v1227_v60 = vld [vmem:[%s1425_s2 + $0x70] sm:$0xff]  ;;  %v1232_v61 = vld [vmem:[%s1425_s2 + $0x60] sm:$0xff]  ;;  %v1238_v63 = vld [vmem:[%s1425_s2 + $0x78] sm:$0xff] }
   0xc   :  { %930 = vmatprep.subr.bf16.mxu0 %v1025_v3  ;;  %v1245_v2 = vld [vmem:[%s1425_s2 + $0x68] sm:$0xff] }
   0xf   :  { %931 = vmatpush3.bf16.msra.mxu0 %v1025_v3 }
  0x10   :  { %932 = vmatprep.subr.bf16.mxu0 %v1026_v5 }
  0x13   :  { %933 = vmatpush3.bf16.msra.mxu0 %v1026_v5 }
  0x14   :  { %934 = vmatprep.subr.bf16.mxu0 %v1027_v6 }
  0x17   :  { %935 = vmatpush3.bf16.msra.mxu0 %v1027_v6 }
  0x18   :  { %936 = vmatprep.subr.bf16.mxu0 %v1028_v9 }
  0x1b   :  { %937 = vmatpush3.bf16.msra.mxu0 %v1028_v9 }
  0x1c   :  { %938 = vmatprep.subr.bf16.mxu0 %v1029_v10 }
  0x1f   :  { %939 = vmatpush3.bf16.msra.mxu0 %v1029_v10  ;;  %v1040_v10 = vld [vmem:[%s1426_s5] ss:$8 sps:$4 sm:$0xff]  }
  0x20   :  { %956 = vmatprep.subr.bf16.mxu0 %v1038_v7 }
  0x22   :  { %941 = vmatmul.mubr.bf16.vlgmr.msra.gmra.mrb[0].mxu0 %v1031_v11  ;;  %v1042_v11 = vld [vmem:[%s1426_s5 + $0x4] ss:$8 sps:$4 sm:$0xff]  }
  0x23   :  { %944 = vmatprep.mubr.bf16.mxu0 %v1032_v12  ;;  %957 = vmatpush3.bf16.msra.mxu0 %v1038_v7  ;;  %v1045_v12 = vld [vmem:[%s1426_s5 + $0x14] ss:$8 sps:$4 sm:$0xff]  }
  0x24   :  { %958 = vmatprep.subr.bf16.mxu0 %v1039_v8  ;;  %594 = vmatprep.subr.bf16.mxu1 %v1042_v11 }
  0x27   :  { %959 = vmatpush3.bf16.msra.mxu0 %v1039_v8 }
  0x2a   :  { %945 = vmatmul.mubr.bf16.gmra.mrb[4].mxu0 %v1033_v13  ;;  %v1043_v13 = vld [vmem:[%s1426_s5 + $0x10] ss:$8 sps:$4 sm:$0xff]  }
  0x2b   :  { %948 = vmatprep.mubr.bf16.mxu0 %v1034_v14  ;;  %v1048_v14 = vld [vmem:[%s1426_s5 + $0x24] ss:$8 sps:$4 sm:$0xff]  }
  0x32   :  { %949 = vmatmul.mubr.bf16.gmra.mrb[8].mxu0 %v1035_v15  ;;  %v1046_v15 = vld [vmem:[%s1426_s5 + $0x20] ss:$8 sps:$4 sm:$0xff]  }
  0x33   :  { %952 = vmatprep.mubr.bf16.mxu0 %v1036_v16  ;;  %v1051_v16 = vld [vmem:[%s1426_s5 + $0x34] ss:$8 sps:$4 sm:$0xff]  }
  0x3a   :  { %953 = vmatmul.mubr.bf16.gmra.mrb[12].mxu0 %v1037_v17  ;;  %v1049_v17 = vld [vmem:[%s1426_s5 + $0x30] ss:$8 sps:$4 sm:$0xff]   ;;  %s1053_s5 = smov 32  }
  0xf5   :  { %v942_v19 = vpop.f32.mrb[0].mxu0 }
  0xf6   :  { %v205_v21 = vpop.f32.mrb[1].mxu0  ;;  %v214_v25 = vadd.f32 %v942_v19, %v1151_v18  ;;  %v1052_v19 = vmov 0  }
  0xf7   :  { %v943_v24 = vpop.f32.mrb[2].mxu0  ;;  %v206_v28 = vadd.f32 %v205_v21, %v1161_v22 }
  0xf8   :  { %v217_v26 = vadd.f32 %v943_v24, %v1156_v20  ;;  %v208_v27 = vpop.f32.mrb[3].mxu0  ;;  %v839_v24 = vld [vmem:[%s1427_s4] ss:$0 sm:$0xff] }
  0xf9   :  { %v209_v29 = vadd.f32 %v208_v27, %v1166_v23 }
  0xfa   :  { %v269_v30 = vpack.c.bf16 %v217_v26, %v214_v25 }
  0xfb   :  { %v268_v31 = vpack.c.bf16 %v209_v29, %v206_v28 }
  0xfd   :  { %v946_v34 = vpop.f32.mrb[4].mxu0  ;;  %960 = vmatprep.mubr.msk.bf16.mxu0 %vm299_vm0, %v268_v31 }
  0xfe   :  { %v230_v36 = vadd.f32 %v946_v34, %v1175_v32  ;;  %v221_v37 = vpop.f32.mrb[5].mxu0  ;;  %961 = vmatmul.mubr.msk.bf16.vlgmr.msra.gmra.mrb[16].mxu0 %vm299_vm0, %v269_v30 }
  0xff   :  { %v222_v39 = vadd.f32 %v221_v37, %v1180_v33  ;;  %v947_v40 = vpop.f32.mrb[6].mxu0 }
 0x100   :  { %v233_v41 = vadd.f32 %v947_v40, %v1186_v35  ;;  %v224_v42 = vpop.f32.mrb[7].mxu0 }
 0x101   :  { %v225_v43 = vadd.f32 %v224_v42, %v1193_v38 }
 0x102   :  { %v271_v44 = vpack.c.bf16 %v233_v41, %v230_v36 }
 0x103   :  { %v270_v45 = vpack.c.bf16 %v225_v43, %v222_v39 }
 0x105   :  { %964 = vmatprep.mubr.msk.bf16.mxu0 %vm299_vm0, %v270_v45  ;;  %v950_v48 = vpop.f32.mrb[8].mxu0 }
 0x106   :  { %965 = vmatmul.mubr.msk.bf16.gmra.mrb[20].mxu0 %vm299_vm0, %v271_v44  ;;  %v246_v50 = vadd.f32 %v950_v48, %v1201_v46  ;;  %v237_v51 = vpop.f32.mrb[9].mxu0 }
 0x107   :  { %v238_v53 = vadd.f32 %v237_v51, %v1206_v47  ;;  %v951_v54 = vpop.f32.mrb[10].mxu0 }
 0x108   :  { %v249_v55 = vadd.f32 %v951_v54, %v1212_v49  ;;  %v240_v56 = vpop.f32.mrb[11].mxu0 }
 0x109   :  { %v241_v57 = vadd.f32 %v240_v56, %v1219_v52 }
 0x10a   :  { %v273_v58 = vpack.c.bf16 %v249_v55, %v246_v50 }
 0x10b   :  { %v272_v59 = vpack.c.bf16 %v241_v57, %v238_v53 }
 0x10d   :  { %968 = vmatprep.mubr.msk.bf16.mxu1 %vm299_vm0, %v272_v59  ;;  %v954_v62 = vpop.f32.mrb[12].mxu0 }
 0x10e   :  { %969 = vmatmul.mubr.msk.bf16.vlgmr.msra.gmra.mrb[0].mxu1 %vm299_vm0, %v273_v58  ;;  %v262_v0 = vadd.f32 %v954_v62, %v1227_v60  ;;  %v253_v1 = vpop.f32.mrb[13].mxu0 }
 0x10f   :  { %v254_v3 = vadd.f32 %v253_v1, %v1232_v61  ;;  %v955_v4 = vpop.f32.mrb[14].mxu0  ;;  %595 = vmatpush1.bf16.msra.mxu1 %v1040_v10 }
 0x110   :  { %v265_v5 = vadd.f32 %v955_v4, %v1238_v63  ;;  %v256_v6 = vpop.f32.mrb[15].mxu0  ;;  %596 = vmatprep.subr.bf16.mxu1 %v1045_v12 }
 0x111   :  { %v257_v7 = vadd.f32 %v256_v6, %v1245_v2 }
 0x112   :  { %v275_v8 = vpack.c.bf16 %v265_v5, %v262_v0 }
 0x113   :  { %v274_v9 = vpack.c.bf16 %v257_v7, %v254_v3  ;;  %597 = vmatpush1.bf16.msra.mxu1 %v1043_v13 }
 0x114   :  { %598 = vmatprep.subr.bf16.mxu1 %v1048_v14 }
 0x115   :  { %972 = vmatprep.mubr.msk.bf16.mxu1 %vm299_vm0, %v274_v9 }
 0x116   :  { %973 = vmatmul.mubr.msk.bf16.gmra.mrb[4].mxu1 %vm299_vm0, %v275_v8 }
 0x117   :  { %599 = vmatpush1.bf16.msra.mxu1 %v1046_v15  ;;  %626 = vmatprep.mubr.bf16.mxu1 %v1052_v19 }
 0x118   :  { %600 = vmatprep.subr.bf16.mxu1 %v1051_v16 }
 0x11b   :  { %601 = vmatpush1.bf16.msra.mxu1 %v1049_v17 }
 0x1d1   :  { %v962_v21 = vpop.f32.mrb[16].mxu0 }
 0x1d2   :  { %v358_v25 = vpop.f32.mrb[17].mxu0  ;;  %v367_v27 = vadd.f32 %v962_v21, %v839_v24 }
 0x1d3   :  { %v963_v26 = vpop.f32.mrb[18].mxu0  ;;  %v359_v30 = vadd.f32 %v839_v24, %v358_v25 }
 0x1d4   :  { %v370_v28 = vadd.f32 %v963_v26, %v839_v24  ;;  %v361_v29 = vpop.f32.mrb[19].mxu0 }
 0x1d5   :  { %v362_v31 = vadd.f32 %v839_v24, %v361_v29 }
 0x1d6   :  { %v987_v34 = vpack.i.bf16 %v370_v28, %v367_v27 }
 0x1d7   :  { %v982_v36 = vpack.i.bf16 %v362_v31, %v359_v30 }
 0x1d9   :  { %v966_v37 = vpop.f32.mrb[20].mxu0  ;;  %983 = vrot.lane.b32.xlu0 %v982_v36, %s1053_s5 }
 0x1da   :  { %v383_v39 = vadd.f32 %v966_v37, %v839_v24  ;;  %v374_v40 = vpop.f32.mrb[21].mxu0 }
 0x1db   :  { %v375_v41 = vadd.f32 %v839_v24, %v374_v40  ;;  %v967_v42 = vpop.f32.mrb[22].mxu0 }
 0x1dc   :  { %v386_v43 = vadd.f32 %v967_v42, %v839_v24  ;;  %v377_v44 = vpop.f32.mrb[23].mxu0 }
 0x1dd   :  { %v378_v45 = vadd.f32 %v839_v24, %v377_v44  ;;  %988 = vrot.lane.b32.xlu0 %v987_v34, %s1053_s5 }
 0x1de   :  { %v997_v48 = vpack.i.bf16 %v386_v43, %v383_v39 }
 0x1df   :  { %v992_v50 = vpack.i.bf16 %v378_v45, %v375_v41 }
 0x1e1   :  { %993 = vrot.lane.b32.xlu1 %v992_v50, %s1053_s5  ;;  %v970_v51 = vpop.f32.mrb[0].mxu1 }
 0x1e2   :  { %v399_v53 = vadd.f32 %v970_v51, %v839_v24  ;;  %v390_v54 = vpop.f32.mrb[1].mxu1 }
 0x1e3   :  { %v391_v55 = vadd.f32 %v839_v24, %v390_v54  ;;  %v971_v56 = vpop.f32.mrb[2].mxu1 }
 0x1e4   :  { %v402_v57 = vadd.f32 %v971_v56, %v839_v24  ;;  %v393_v58 = vpop.f32.mrb[3].mxu1 }
 0x1e5   :  { %998 = vrot.lane.b32.xlu1 %v997_v48, %s1053_s5  ;;  %v394_v59 = vadd.f32 %v839_v24, %v393_v58 }
 0x1e6   :  { %v1007_v62 = vpack.i.bf16 %v402_v57, %v399_v53 }
 0x1e7   :  { %v1002_v0 = vpack.i.bf16 %v394_v59, %v391_v55 }
 0x1e9   :  { %1008 = vrot.lane.b32.xlu1 %v1007_v62, %s1053_s5  ;;  %1003 = vrot.lane.b32.xlu0 %v1002_v0, %s1053_s5  ;;  %v974_v1 = vpop.f32.mrb[4].mxu1 }
 0x1ea   :  { %v415_v3 = vadd.f32 %v974_v1, %v839_v24  ;;  %v406_v4 = vpop.f32.mrb[5].mxu1  ;;  %v517_v1 = vld [vmem:[%s1428_s6] sm:$0x3] }
 0x1eb   :  { %v407_v5 = vadd.f32 %v839_v24, %v406_v4  ;;  %v975_v6 = vpop.f32.mrb[6].mxu1 }
 0x1ec   :  { %v418_v7 = vadd.f32 %v975_v6, %v839_v24  ;;  %v409_v8 = vpop.f32.mrb[7].mxu1 }
 0x1ed   :  { %v410_v9 = vadd.f32 %v839_v24, %v409_v8 }
 0x1ee   :  { %v1017_v10 = vpack.i.bf16 %v418_v7, %v415_v3 }
 0x1ef   :  { %v1012_v11 = vpack.i.bf16 %v410_v9, %v407_v5 }
 0x1f0   :  { %1018 = vrot.lane.b32.xlu1 %v1017_v10, %s1053_s5 }
 0x1f1   :  { %1013 = vrot.lane.b32.xlu0 %v1012_v11, %s1053_s5 }
 0x24b   :  { %v984_v12 = vpop.permute.xlu0 %983 }
 0x24c   :  { %v986_v13 = vunpack.i.h.bf16 %v984_v12  ;;  %v985_v14 = vunpack.i.l.bf16 %v984_v12 }
 0x24e   :  { %v486_v15 = vsel %vm299_vm0, %v1166_v23, %v986_v13  ;;  %v485_v16 = vsel %vm299_vm0, %v1161_v22, %v985_v14 }
 0x24f   :  { %v501_v17 = vpack.c.bf16 %v486_v15, %v485_v16  ;;  %v989_v21 = vpop.permute.xlu0 %988 }
 0x250   :  { %v991_v25 = vunpack.i.h.bf16 %v989_v21  ;;  %v990_v24 = vunpack.i.l.bf16 %v989_v21 }
 0x251   :  { %858 = vmatmul.mubr.msk.bf16.vlgmr.msra.gmra.mrb[8].mxu1 %vm569_vm1, %v501_v17 }
 0x252   :  { %636 = vmatprep.mubr.bf16.mxu1 %v1052_v19  ;;  %v488_v26 = vsel %vm299_vm0, %v1156_v20, %v991_v25  ;;  %v487_v27 = vsel %vm299_vm0, %v1151_v18, %v990_v24 }
 0x253   :  { %v994_v28 = vpop.permute.xlu1 %993  ;;  %v502_v23 = vpack.c.bf16 %v488_v26, %v487_v27 }
 0x254   :  { %v996_v29 = vunpack.i.h.bf16 %v994_v28  ;;  %v995_v30 = vunpack.i.l.bf16 %v994_v28 }
 0x256   :  { %v490_v22 = vsel %vm299_vm0, %v1193_v38, %v996_v29  ;;  %v489_v31 = vsel %vm299_vm0, %v1180_v33, %v995_v30 }
 0x257   :  { %v999_v34 = vpop.permute.xlu1 %998  ;;  %v503_v36 = vpack.c.bf16 %v490_v22, %v489_v31 }
 0x258   :  { %v1001_v20 = vunpack.i.h.bf16 %v999_v34  ;;  %v1000_v37 = vunpack.i.l.bf16 %v999_v34 }
 0x259   :  { %859 = vmatmul.mubr.msk.bf16.gmra.mrb[12].mxu1 %vm569_vm1, %v502_v23 }
 0x25a   :  { %646 = vmatprep.mubr.bf16.mxu1 %v1052_v19  ;;  %v492_v18 = vsel %vm299_vm0, %v1186_v35, %v1001_v20  ;;  %v491_v39 = vsel %vm299_vm0, %v1175_v32, %v1000_v37 }
 0x25b   :  { %v1004_v40 = vpop.permute.xlu0 %1003  ;;  %v504_v41 = vpack.c.bf16 %v492_v18, %v491_v39  ;;  %v1009_v44 = vpop.permute.xlu1 %1008 }
 0x25c   :  { %v1006_v38 = vunpack.i.h.bf16 %v1004_v40  ;;  %v1005_v42 = vunpack.i.l.bf16 %v1004_v40  ;;  %v1011_v35 = vunpack.i.h.bf16 %v1009_v44  ;;  %v1010_v48 = vunpack.i.l.bf16 %v1009_v44 }
 0x25e   :  { %v494_v33 = vsel %vm299_vm0, %v1219_v52, %v1006_v38  ;;  %v493_v43 = vsel %vm299_vm0, %v1206_v47, %v1005_v42  ;;  %v496_v32 = vsel %vm299_vm0, %v1212_v49, %v1011_v35  ;;  %v495_v50 = vsel %vm299_vm0, %v1201_v46, %v1010_v48 }
 0x25f   :  { %v505_v45 = vpack.c.bf16 %v494_v33, %v493_v43  ;;  %v506_v53 = vpack.c.bf16 %v496_v32, %v495_v50 }
 0x261   :  { %860 = vmatmul.mubr.msk.bf16.gmra.mrb[16].mxu1 %vm569_vm1, %v503_v36 }
 0x262   :  { %656 = vmatprep.mubr.bf16.mxu1 %v1052_v19  ;;  %v1019_v56 = vpop.permute.xlu1 %1018 }
 0x263   :  { %v1014_v51 = vpop.permute.xlu0 %1013  ;;  %v1021_v49 = vunpack.i.h.bf16 %v1019_v56  ;;  %v1020_v58 = vunpack.i.l.bf16 %v1019_v56 }
 0x264   :  { %v1016_v52 = vunpack.i.h.bf16 %v1014_v51  ;;  %v1015_v54 = vunpack.i.l.bf16 %v1014_v51 }
 0x265   :  { %v500_v46 = vsel %vm299_vm0, %v1238_v63, %v1021_v49  ;;  %v499_v59 = vsel %vm299_vm0, %v1227_v60, %v1020_v58 }
 0x266   :  { %v498_v47 = vsel %vm299_vm0, %v1245_v2, %v1016_v52  ;;  %v497_v55 = vsel %vm299_vm0, %v1232_v61, %v1015_v54  ;;  %v508_v62 = vpack.c.bf16 %v500_v46, %v499_v59  ;;  %v519_v2 = vlaneseq }
 0x267   :  { %v507_v57 = vpack.c.bf16 %v498_v47, %v497_v55 }
 0x268   :  { %v520_v0 = vshrl.u32 %v519_v2, 7 }
 0x269   :  { %861 = vmatmul.mubr.msk.bf16.gmra.mrb[20].mxu1 %vm569_vm1, %v504_v41 }
 0x26a   :  { %666 = vmatprep.mubr.bf16.mxu1 %v1052_v19  ;;  %v521_v61 = vsub.s32 0, %v520_v0  ;;  %v525_v3 = vsub.s32 1, %v520_v0 }
 0x26c   :  { %v1338_v4 = vrot.slane %v517_v1, %v521_v61 }
 0x271   :  { %862 = vmatmul.mubr.msk.bf16.gmra.mrb[24].mxu1 %vm569_vm1, %v505_v45 }
 0x272   :  { %676 = vmatprep.mubr.bf16.mxu1 %v1052_v19 }
 0x279   :  { %863 = vmatmul.mubr.msk.bf16.gmra.mrb[28].mxu1 %vm569_vm1, %v506_v53 }
 0x27a   :  { %686 = vmatprep.mubr.bf16.mxu1 %v1052_v19 }
 0x281   :  { %864 = vmatmul.mubr.msk.bf16.gmra.mrb[32].mxu1 %vm569_vm1, %v507_v57 }
 0x282   :  { %696 = vmatprep.mubr.bf16.mxu1 %v1052_v19  ;;  %v1340_v19 = vrot.slane %v517_v1, %v525_v3 }
 0x289   :  { %865 = vmatmul.mubr.msk.bf16.gmra.mrb[36].mxu1 %vm569_vm1, %v508_v62 }
 0x324   :  { %v628_v5 = vpop.f32.mrb[8].mxu1 }
 0x325   :  { %v629_v63 = vadd.f32 %v628_v5, %v1338_v4  ;;  %v630_v6 = vpop.f32.mrb[9].mxu1 }
 0x326   :  { %v631_v60 = vadd.f32 %v630_v6, %v1340_v19  ;;  %v632_v7 = vpop.f32.mrb[10].mxu1 }
 0x327   :  { %v633_v8 = vadd.f32 %v632_v7, %v1338_v4  ;;  %v634_v9 = vpop.f32.mrb[11].mxu1 }
 0x328   :  { %v882_v10 = vpack.c.bf16 %v631_v60, %v629_v63  ;;  %v635_v11 = vadd.f32 %v634_v9, %v1340_v19 }
 0x32a   :  { %803 = vst [vmem:[%s1429_s7] sm:$0xff] %v882_v10  ;;  %v883_v12 = vpack.c.bf16 %v635_v11, %v633_v8 }
 0x32c   :  { %804 = vst [vmem:[%s1429_s7 + $0x8] sm:$0xff] %v883_v12  ;;  %v638_v13 = vpop.f32.mrb[12].mxu1 }
 0x32d   :  { %v639_v14 = vadd.f32 %v638_v13, %v1338_v4  ;;  %v640_v15 = vpop.f32.mrb[13].mxu1 }
 0x32e   :  { %v641_v16 = vadd.f32 %v640_v15, %v1340_v19  ;;  %v642_v17 = vpop.f32.mrb[14].mxu1 }
 0x32f   :  { %v643_v21 = vadd.f32 %v642_v17, %v1338_v4  ;;  %v644_v25 = vpop.f32.mrb[15].mxu1 }
 0x330   :  { %v884_v24 = vpack.c.bf16 %v641_v16, %v639_v14  ;;  %v645_v26 = vadd.f32 %v644_v25, %v1340_v19 }
 0x332   :  { %805 = vst [vmem:[%s1429_s7 + $0x10] sm:$0xff] %v884_v24  ;;  %v885_v27 = vpack.c.bf16 %v645_v26, %v643_v21 }
 0x334   :  { %806 = vst [vmem:[%s1429_s7 + $0x18] sm:$0xff] %v885_v27  ;;  %v648_v28 = vpop.f32.mrb[16].mxu1 }
 0x335   :  { %v649_v23 = vadd.f32 %v648_v28, %v1338_v4  ;;  %v650_v29 = vpop.f32.mrb[17].mxu1 }
 0x336   :  { %v651_v30 = vadd.f32 %v650_v29, %v1340_v19  ;;  %v652_v22 = vpop.f32.mrb[18].mxu1 }
 0x337   :  { %v653_v31 = vadd.f32 %v652_v22, %v1338_v4  ;;  %v654_v34 = vpop.f32.mrb[19].mxu1 }
 0x338   :  { %v886_v36 = vpack.c.bf16 %v651_v30, %v649_v23  ;;  %v655_v20 = vadd.f32 %v654_v34, %v1340_v19 }
 0x33a   :  { %807 = vst [vmem:[%s1429_s7 + $0x20] sm:$0xff] %v886_v36  ;;  %v887_v37 = vpack.c.bf16 %v655_v20, %v653_v31 }
 0x33c   :  { %808 = vst [vmem:[%s1429_s7 + $0x28] sm:$0xff] %v887_v37  ;;  %v658_v18 = vpop.f32.mrb[20].mxu1 }
 0x33d   :  { %v659_v39 = vadd.f32 %v658_v18, %v1338_v4  ;;  %v660_v40 = vpop.f32.mrb[21].mxu1 }
 0x33e   :  { %v661_v41 = vadd.f32 %v660_v40, %v1340_v19  ;;  %v662_v38 = vpop.f32.mrb[22].mxu1 }
 0x33f   :  { %v663_v42 = vadd.f32 %v662_v38, %v1338_v4  ;;  %v664_v33 = vpop.f32.mrb[23].mxu1 }
 0x340   :  { %v888_v43 = vpack.c.bf16 %v661_v41, %v659_v39  ;;  %v665_v44 = vadd.f32 %v664_v33, %v1340_v19 }
 0x342   :  { %809 = vst [vmem:[%s1429_s7 + $0x30] sm:$0xff] %v888_v43  ;;  %v889_v45 = vpack.c.bf16 %v665_v44, %v663_v42 }
 0x344   :  { %810 = vst [vmem:[%s1429_s7 + $0x38] sm:$0xff] %v889_v45  ;;  %v668_v35 = vpop.f32.mrb[24].mxu1 }
 0x345   :  { %v669_v48 = vadd.f32 %v668_v35, %v1338_v4  ;;  %v670_v32 = vpop.f32.mrb[25].mxu1 }
 0x346   :  { %v671_v50 = vadd.f32 %v670_v32, %v1340_v19  ;;  %v672_v51 = vpop.f32.mrb[26].mxu1 }
 0x347   :  { %v673_v53 = vadd.f32 %v672_v51, %v1338_v4  ;;  %v674_v52 = vpop.f32.mrb[27].mxu1 }
 0x348   :  { %v890_v54 = vpack.c.bf16 %v671_v50, %v669_v48  ;;  %v675_v47 = vadd.f32 %v674_v52, %v1340_v19 }
 0x34a   :  { %811 = vst [vmem:[%s1429_s7 + $0x40] sm:$0xff] %v890_v54  ;;  %v891_v55 = vpack.c.bf16 %v675_v47, %v673_v53 }
 0x34c   :  { %812 = vst [vmem:[%s1429_s7 + $0x48] sm:$0xff] %v891_v55  ;;  %v678_v56 = vpop.f32.mrb[28].mxu1 }
 0x34d   :  { %v679_v57 = vadd.f32 %v678_v56, %v1338_v4  ;;  %v680_v49 = vpop.f32.mrb[29].mxu1 }
 0x34e   :  { %v681_v58 = vadd.f32 %v680_v49, %v1340_v19  ;;  %v682_v46 = vpop.f32.mrb[30].mxu1 }
 0x34f   :  { %v683_v59 = vadd.f32 %v682_v46, %v1338_v4  ;;  %v684_v62 = vpop.f32.mrb[31].mxu1 }
 0x350   :  { %v892_v2 = vpack.c.bf16 %v681_v58, %v679_v57  ;;  %v685_v0 = vadd.f32 %v684_v62, %v1340_v19 }
 0x352   :  { %813 = vst [vmem:[%s1429_s7 + $0x50] sm:$0xff] %v892_v2  ;;  %v893_v61 = vpack.c.bf16 %v685_v0, %v683_v59 }
 0x354   :  { %814 = vst [vmem:[%s1429_s7 + $0x58] sm:$0xff] %v893_v61  ;;  %v688_v1 = vpop.f32.mrb[32].mxu1 }
 0x355   :  { %v689_v3 = vadd.f32 %v688_v1, %v1338_v4  ;;  %v690_v5 = vpop.f32.mrb[33].mxu1 }
 0x356   :  { %v691_v63 = vadd.f32 %v690_v5, %v1340_v19  ;;  %v692_v6 = vpop.f32.mrb[34].mxu1 }
 0x357   :  { %v693_v60 = vadd.f32 %v692_v6, %v1338_v4  ;;  %v694_v7 = vpop.f32.mrb[35].mxu1 }
 0x358   :  { %v894_v8 = vpack.c.bf16 %v691_v63, %v689_v3  ;;  %v695_v9 = vadd.f32 %v694_v7, %v1340_v19 }
 0x35a   :  { %815 = vst [vmem:[%s1429_s7 + $0x60] sm:$0xff] %v894_v8  ;;  %v895_v10 = vpack.c.bf16 %v695_v9, %v693_v60 }
 0x35c   :  { %816 = vst [vmem:[%s1429_s7 + $0x68] sm:$0xff] %v895_v10  ;;  %v698_v11 = vpop.f32.mrb[36].mxu1 }
 0x35d   :  { %v699_v12 = vadd.f32 %v698_v11, %v1338_v4  ;;  %v700_v13 = vpop.f32.mrb[37].mxu1 }
 0x35e   :  { %v701_v14 = vadd.f32 %v700_v13, %v1340_v19  ;;  %v702_v15 = vpop.f32.mrb[38].mxu1 }
 0x35f   :  { %v703_v16 = vadd.f32 %v702_v15, %v1338_v4  ;;  %v704_v17 = vpop.f32.mrb[39].mxu1 }
 0x360   :  { %v896_v21 = vpack.c.bf16 %v701_v14, %v699_v12  ;;  %v705_v25 = vadd.f32 %v704_v17, %v1340_v19 }
 0x362   :  { %817 = vst [vmem:[%s1429_s7 + $0x70] sm:$0xff] %v896_v21  ;;  %v897_v24 = vpack.c.bf16 %v705_v25, %v703_v16 }
 0x364   :  { %818 = vst [vmem:[%s1429_s7 + $0x78] sm:$0xff] %v897_v24 }

// kernel: frag_gfn_forward.30
= control target key start
LH: loop header
LB: loop body
LE: loop exit
PB: predicated region body
PF: predicated region fallthrough
CT: control target
= control target key end

     0   :  { %vm90_vm0 = vcmask 261120   ;;  %s836_s11 = smov 64   ;;  %vm308_vm1 = vcmask 523264   ;;  %s1050_s3 = inlined_call_operand.vmem [shape: bf16[32,64], index: 3, kind: input, shape index: {}]   ;;  %s1051_s2 = inlined_call_operand.vmem [shape: bf16[128,32], index: 2, kind: input, shape index: {}]   ;;  %s1052_s1 = inlined_call_operand.vmem [shape: bf16[128,256], index: 1, kind: input, shape index: {}]   ;;  %s1053_s0 = inlined_call_operand.vmem [shape: bf16[128,128], index: 0, kind: input, shape index: {}]   ;;  %s1054_s4 = inlined_call_operand.vmem [shape: bf16[128,128], index: 4, kind: output, shape index: {}]  }
   0x1   :  { %v810_v0 = vld [vmem:[%s1050_s3] sm:$0xff]   ;;  %v811_v1 = vld [vmem:[%s1050_s3 + $0x8] sm:$0xff]   ;;  %v814_v4 = vld [vmem:[%s1051_s2 + $0x10] sm:$0xff]  }
   0x2   :  { %741 = vmatprep.subr.bf16.mxu0 %v810_v0  ;;  %v812_v2 = vld [vmem:[%s1051_s2] sm:$0xff]   ;;  %v813_v3 = vld [vmem:[%s1051_s2 + $0x8] sm:$0xff]   ;;  %v821_v6 = vld [vmem:[%s1052_s1 + $0x14] ss:$8 sps:$4 sm:$0xff]  }
   0x3   :  { %742 = vmatpush3.bf16.msra.mxu0 %v810_v0  ;;  %745 = vmatprep.mubr.msk.bf16.mxu0 %vm90_vm0, %v812_v2  ;;  %v820_v5 = vld [vmem:[%s1052_s1 + $0x4] ss:$8 sps:$4 sm:$0xff]   ;;  %v815_v7 = vld [vmem:[%s1051_s2 + $0x18] sm:$0xff]   ;;  %v830_v11 = vld [vmem:[%s1053_s0 + $0x10] sm:$0xff]  }
   0x4   :  { %743 = vmatprep.subr.bf16.mxu0 %v811_v1  ;;  %793 = vmatprep.subr.bf16.mxu1 %v820_v5  ;;  %v822_v8 = vld [vmem:[%s1052_s1 + $0x24] ss:$8 sps:$4 sm:$0xff]   ;;  %v823_v10 = vld [vmem:[%s1052_s1 + $0x34] ss:$8 sps:$4 sm:$0xff]  }
   0x5   :  { %801 = vmatpush3.bf16.msra.mxu1 %v820_v5  ;;  %v816_v9 = vld [vmem:[%s1051_s2 + $0x20] sm:$0xff]   ;;  %v817_v12 = vld [vmem:[%s1051_s2 + $0x28] sm:$0xff]   ;;  %v818_v14 = vld [vmem:[%s1051_s2 + $0x30] sm:$0xff]   ;;  %781 = vmatprep.mubr.bf16.mxu1 %v830_v11 }
   0x6   :  { %794 = vmatprep.subr.bf16.mxu1 %v821_v6  ;;  %v824_v13 = vld [vmem:[%s1052_s1 + $0x44] ss:$8 sps:$4 sm:$0xff]   ;;  %v825_v15 = vld [vmem:[%s1052_s1 + $0x54] ss:$8 sps:$4 sm:$0xff]  }
   0x7   :  { %744 = vmatpush3.bf16.msra.mxu0 %v811_v1  ;;  %v819_v16 = vld [vmem:[%s1051_s2 + $0x38] sm:$0xff]   ;;  %v826_v17 = vld [vmem:[%s1052_s1 + $0x64] ss:$8 sps:$4 sm:$0xff]   ;;  %v834_v24 = vld [vmem:[%s1053_s0 + $0x30] sm:$0xff]  }
   0x8   :  { %761 = vmatprep.subr.bf16.mxu0 %v820_v5  ;;  %v828_v18 = vld [vmem:[%s1053_s0] sm:$0xff]   ;;  %v827_v19 = vld [vmem:[%s1052_s1 + $0x74] ss:$8 sps:$4 sm:$0xff]   ;;  %v829_v20 = vld [vmem:[%s1053_s0 + $0x8] sm:$0xff]  }
   0x9   :  { %802 = vmatpush3.bf16.msra.mxu1 %v821_v6  ;;  %v831_v21 = vld [vmem:[%s1053_s0 + $0x18] sm:$0xff]   ;;  %v832_v22 = vld [vmem:[%s1053_s0 + $0x20] sm:$0xff]   ;;  %v833_v23 = vld [vmem:[%s1053_s0 + $0x28] sm:$0xff]  }
   0xa   :  { %746 = vmatmul.mubr.msk.bf16.vlgmr.msra.gmra.mrb[0].mxu0 %vm90_vm0, %v813_v3  ;;  %795 = vmatprep.subr.bf16.mxu1 %v822_v8  ;;  %v835_v25 = vld [vmem:[%s1053_s0 + $0x38] sm:$0xff]  }
   0xb   :  { %749 = vmatprep.mubr.msk.bf16.mxu0 %vm90_vm0, %v814_v4  ;;  %762 = vmatpush3.bf16.msra.mxu0 %v820_v5 }
   0xc   :  { %763 = vmatprep.subr.bf16.mxu0 %v821_v6 }
   0xd   :  { %803 = vmatpush3.bf16.msra.mxu1 %v822_v8 }
   0xe   :  { %796 = vmatprep.subr.bf16.mxu1 %v823_v10 }
   0xf   :  { %764 = vmatpush3.bf16.msra.mxu0 %v821_v6 }
  0x10   :  { %765 = vmatprep.subr.bf16.mxu0 %v822_v8 }
  0x11   :  { %804 = vmatpush3.bf16.msra.mxu1 %v823_v10 }
  0x12   :  { %750 = vmatmul.mubr.msk.bf16.gmra.mrb[4].mxu0 %vm90_vm0, %v815_v7  ;;  %797 = vmatprep.subr.bf16.mxu1 %v824_v13 }
  0x13   :  { %753 = vmatprep.mubr.msk.bf16.mxu0 %vm90_vm0, %v816_v9  ;;  %766 = vmatpush3.bf16.msra.mxu0 %v822_v8 }
  0x14   :  { %767 = vmatprep.subr.bf16.mxu0 %v823_v10 }
  0x15   :  { %805 = vmatpush3.bf16.msra.mxu1 %v824_v13 }
  0x16   :  { %798 = vmatprep.subr.bf16.mxu1 %v825_v15 }
  0x17   :  { %768 = vmatpush3.bf16.msra.mxu0 %v823_v10 }
  0x18   :  { %769 = vmatprep.subr.bf16.mxu0 %v824_v13 }
  0x19   :  { %806 = vmatpush3.bf16.msra.mxu1 %v825_v15 }
  0x1a   :  { %754 = vmatmul.mubr.msk.bf16.gmra.mrb[8].mxu0 %vm90_vm0, %v817_v12  ;;  %799 = vmatprep.subr.bf16.mxu1 %v826_v17 }
  0x1b   :  { %757 = vmatprep.mubr.msk.bf16.mxu0 %vm90_vm0, %v818_v14  ;;  %770 = vmatpush3.bf16.msra.mxu0 %v824_v13 }
  0x1c   :  { %771 = vmatprep.subr.bf16.mxu0 %v825_v15 }
  0x1d   :  { %807 = vmatpush3.bf16.msra.mxu1 %v826_v17 }
  0x1e   :  { %800 = vmatprep.subr.bf16.mxu1 %v827_v19 }
  0x1f   :  { %772 = vmatpush3.bf16.msra.mxu0 %v825_v15 }
  0x20   :  { %773 = vmatprep.subr.bf16.mxu0 %v826_v17 }
  0x21   :  { %808 = vmatpush3.bf16.msra.mxu1 %v827_v19 }
  0x22   :  { %758 = vmatmul.mubr.msk.bf16.gmra.mrb[12].mxu0 %vm90_vm0, %v819_v16 }
  0x23   :  { %777 = vmatprep.mubr.bf16.mxu0 %v828_v18  ;;  %774 = vmatpush3.bf16.msra.mxu0 %v826_v17 }
  0x24   :  { %775 = vmatprep.subr.bf16.mxu0 %v827_v19  ;;  %782 = vmatmul.mubr.bf16.vlgmr.msra.gmra.mrb[0].mxu1 %v831_v21 }
  0x25   :  { %785 = vmatprep.mubr.bf16.mxu1 %v832_v22 }
  0x27   :  { %776 = vmatpush3.bf16.msra.mxu0 %v827_v19 }
  0x2a   :  { %778 = vmatmul.mubr.bf16.vlgmr.msra.gmra.mrb[16].mxu0 %v829_v20 }
  0x2c   :  { %786 = vmatmul.mubr.bf16.gmra.mrb[4].mxu1 %v833_v23 }
  0x2d   :  { %789 = vmatprep.mubr.bf16.mxu1 %v834_v24 }
  0x34   :  { %790 = vmatmul.mubr.bf16.gmra.mrb[8].mxu1 %v835_v25 }
  0xdd   :  { %v747_v26 = vpop.f32.mrb[0].mxu0 }
  0xde   :  { %264 = vrot.lane.b32.xlu1 %v747_v26, %s836_s11  ;;  %v149_v27 = vpop.f32.mrb[1].mxu0 }
  0xdf   :  { %260 = vrot.lane.b32.xlu0 %v149_v27, %s836_s11  ;;  %v748_v28 = vpop.f32.mrb[2].mxu0 }
  0xe0   :  { %v152_v29 = vpop.f32.mrb[3].mxu0 }
  0xe2   :  { %266 = vrot.lane.b32.xlu1 %v748_v28, %s836_s11 }
  0xe3   :  { %262 = vrot.lane.b32.xlu0 %v152_v29, %s836_s11 }
  0xe5   :  { %v751_v30 = vpop.f32.mrb[4].mxu0 }
  0xe6   :  { %v952_v31 = vpop.f32.mrb[5].mxu0 }
  0xe7   :  { %272 = vrot.lane.b32.xlu0 %v751_v30, %s836_s11  ;;  %v752_v32 = vpop.f32.mrb[6].mxu0 }
  0xe8   :  { %274 = vrot.lane.b32.xlu1 %v752_v32, %s836_s11  ;;  %v956_v33 = vpop.f32.mrb[7].mxu0 }
  0xeb   :  { %268 = vrot.lane.b32.xlu0 %v952_v31, %s836_s11 }
  0xec   :  { %270 = vrot.lane.b32.xlu1 %v956_v33, %s836_s11 }
  0xed   :  { %v962_v34 = vpop.f32.mrb[8].mxu0 }
  0xee   :  { %v964_v35 = vpop.f32.mrb[9].mxu0 }
  0xef   :  { %280 = vrot.lane.b32.xlu0 %v962_v34, %s836_s11  ;;  %v968_v36 = vpop.f32.mrb[10].mxu0 }
  0xf0   :  { %282 = vrot.lane.b32.xlu1 %v968_v36, %s836_s11  ;;  %v972_v37 = vpop.f32.mrb[11].mxu0 }
  0xf3   :  { %276 = vrot.lane.b32.xlu0 %v964_v35, %s836_s11 }
  0xf4   :  { %278 = vrot.lane.b32.xlu1 %v972_v37, %s836_s11 }
  0xf5   :  { %v978_v38 = vpop.f32.mrb[12].mxu0 }
  0xf6   :  { %v980_v39 = vpop.f32.mrb[13].mxu0 }
  0xf7   :  { %284 = vrot.lane.b32.xlu0 %v980_v39, %s836_s11  ;;  %v984_v40 = vpop.f32.mrb[14].mxu0  ;;  %v783_v43 = vpop.f32.mrb[0].mxu1 }
  0xf8   :  { %v986_v41 = vpop.f32.mrb[15].mxu0  ;;  %v471_v45 = vpop.f32.mrb[1].mxu1 }
  0xf9   :  { %286 = vrot.lane.b32.xlu1 %v986_v41, %s836_s11  ;;  %v784_v47 = vpop.f32.mrb[2].mxu1 }
  0xfa   :  { %v474_v49 = vpop.f32.mrb[3].mxu1 }
  0xfb   :  { %288 = vrot.lane.b32.xlu0 %v978_v38, %s836_s11 }
  0xfd   :  { %290 = vrot.lane.b32.xlu1 %v984_v40, %s836_s11  ;;  %v779_v42 = vpop.f32.mrb[16].mxu0 }
  0xfe   :  { %v455_v44 = vpop.f32.mrb[17].mxu0 }
  0xff   :  { %v780_v46 = vpop.f32.mrb[18].mxu0  ;;  %v787_v50 = vpop.f32.mrb[4].mxu1 }
 0x100   :  { %v458_v48 = vpop.f32.mrb[19].mxu0  ;;  %v487_v51 = vpop.f32.mrb[5].mxu1 }
 0x101   :  { %v788_v52 = vpop.f32.mrb[6].mxu1 }
 0x102   :  { %v490_v53 = vpop.f32.mrb[7].mxu1 }
 0x107   :  { %v994_v54 = vpop.f32.mrb[8].mxu1 }
 0x108   :  { %v503_v55 = vpop.f32.mrb[9].mxu1 }
 0x109   :  { %v996_v56 = vpop.f32.mrb[10].mxu1 }
 0x10a   :  { %v506_v57 = vpop.f32.mrb[11].mxu1 }
 0x150   :  { %v265_v58 = vpop.permute.xlu1 %264 }
 0x151   :  { %v261_v59 = vpop.permute.xlu0 %260  ;;  %v311_v60 = vsel %vm308_vm1, %v747_v26, %v265_v58 }
 0x152   :  { %v464_v61 = vadd.f32 %v779_v42, %v311_v60  ;;  %v309_v62 = vsel %vm308_vm1, %v149_v27, %v261_v59 }
 0x153   :  { %v456_v63 = vadd.f32 %v455_v44, %v309_v62 }
 0x154   :  { %v267_v0 = vpop.permute.xlu1 %266 }
 0x155   :  { %v263_v1 = vpop.permute.xlu0 %262  ;;  %v312_v2 = vsel %vm308_vm1, %v748_v28, %v267_v0 }
 0x156   :  { %v467_v3 = vadd.f32 %v780_v46, %v312_v2  ;;  %v310_v4 = vsel %vm308_vm1, %v152_v29, %v263_v1 }
 0x157   :  { %v459_v5 = vadd.f32 %v458_v48, %v310_v4 }
 0x158   :  { %v676_v6 = vpack.c.bf16 %v467_v3, %v464_v61 }
 0x159   :  { %v671_v7 = vpack.c.bf16 %v459_v5, %v456_v63  ;;  %v273_v8 = vpop.permute.xlu0 %272 }
 0x15a   :  { %708 = vst [vmem:[%s1054_s4 + $0x8] sm:$0xff] %v676_v6   ;;  %v315_v9 = vsel %vm308_vm1, %v751_v30, %v273_v8  ;;  %v275_v10 = vpop.permute.xlu1 %274 }
 0x15b   :  { %672 = vst [vmem:[%s1054_s4] sm:$0xff] %v671_v7   ;;  %v480_v11 = vadd.f32 %v783_v43, %v315_v9  ;;  %v316_v12 = vsel %vm308_vm1, %v752_v32, %v275_v10 }
 0x15c   :  { %v483_v13 = vadd.f32 %v784_v47, %v316_v12 }
 0x15d   :  { %v269_v14 = vpop.permute.xlu0 %268 }
 0x15e   :  { %v686_v15 = vpack.c.bf16 %v483_v13, %v480_v11  ;;  %v313_v16 = vsel %vm308_vm1, %v952_v31, %v269_v14  ;;  %v271_v17 = vpop.permute.xlu1 %270 }
 0x15f   :  { %v472_v18 = vadd.f32 %v471_v45, %v313_v16  ;;  %v314_v19 = vsel %vm308_vm1, %v956_v33, %v271_v17 }
 0x160   :  { %710 = vst [vmem:[%s1054_s4 + $0x18] sm:$0xff] %v686_v15   ;;  %v475_v20 = vadd.f32 %v474_v49, %v314_v19 }
 0x161   :  { %v281_v21 = vpop.permute.xlu0 %280 }
 0x162   :  { %v681_v22 = vpack.c.bf16 %v475_v20, %v472_v18  ;;  %v319_v23 = vsel %vm308_vm1, %v962_v34, %v281_v21  ;;  %v283_v24 = vpop.permute.xlu1 %282 }
 0x163   :  { %v496_v25 = vadd.f32 %v787_v50, %v319_v23  ;;  %v320_v26 = vsel %vm308_vm1, %v968_v36, %v283_v24 }
 0x164   :  { %709 = vst [vmem:[%s1054_s4 + $0x10] sm:$0xff] %v681_v22   ;;  %v499_v27 = vadd.f32 %v788_v52, %v320_v26 }
 0x165   :  { %v277_v28 = vpop.permute.xlu0 %276 }
 0x166   :  { %v696_v29 = vpack.c.bf16 %v499_v27, %v496_v25  ;;  %v317_v30 = vsel %vm308_vm1, %v964_v35, %v277_v28  ;;  %v279_v31 = vpop.permute.xlu1 %278 }
 0x167   :  { %v488_v32 = vadd.f32 %v487_v51, %v317_v30  ;;  %v318_v33 = vsel %vm308_vm1, %v972_v37, %v279_v31 }
 0x168   :  { %712 = vst [vmem:[%s1054_s4 + $0x28] sm:$0xff] %v696_v29   ;;  %v491_v34 = vadd.f32 %v490_v53, %v318_v33 }
 0x169   :  { %v285_v36 = vpop.permute.xlu0 %284 }
 0x16a   :  { %v691_v42 = vpack.c.bf16 %v491_v34, %v488_v32  ;;  %v321_v43 = vsel %vm308_vm1, %v980_v39, %v285_v36 }
 0x16b   :  { %v504_v44 = vadd.f32 %v503_v55, %v321_v43  ;;  %v287_v45 = vpop.permute.xlu1 %286 }
 0x16c   :  { %711 = vst [vmem:[%s1054_s4 + $0x20] sm:$0xff] %v691_v42   ;;  %v322_v35 = vsel %vm308_vm1, %v986_v41, %v287_v45 }
 0x16d   :  { %v507_v37 = vadd.f32 %v506_v57, %v322_v35  ;;  %v289_v46 = vpop.permute.xlu0 %288 }
 0x16e   :  { %v323_v47 = vsel %vm308_vm1, %v978_v38, %v289_v46 }
 0x16f   :  { %v701_v48 = vpack.c.bf16 %v507_v37, %v504_v44  ;;  %v512_v49 = vadd.f32 %v994_v54, %v323_v47  ;;  %v291_v50 = vpop.permute.xlu1 %290 }
 0x170   :  { %v324_v39 = vsel %vm308_vm1, %v984_v40, %v291_v50 }
 0x171   :  { %713 = vst [vmem:[%s1054_s4 + $0x30] sm:$0xff] %v701_v48   ;;  %v515_v51 = vadd.f32 %v996_v56, %v324_v39 }
 0x173   :  { %v706_v52 = vpack.c.bf16 %v515_v51, %v512_v49 }
 0x175   :  { %714 = vst [vmem:[%s1054_s4 + $0x38] sm:$0xff] %v706_v52  }

// kernel: frag_gfn_forward.43
= control target key start
LH: loop header
LB: loop body
LE: loop exit
PB: predicated region body
PF: predicated region fallthrough
CT: control target
= control target key end

     0   :  { %v195_v0 = vmov 0.0|0.0   ;;  %vm196_vm0 = vmmov 0   ;;  %v197_v4 = vmov 0.0   ;;  %v198_v7 = vmov 0   ;;  %s276_s1 = inlined_call_operand.vmem [shape: f32[128,32], index: 1, kind: input, shape index: {}]   ;;  %s277_s2 = inlined_call_operand.vmem [shape: f32[2,1], index: 2, kind: input, shape index: {}]   ;;  %s278_s0 = inlined_call_operand.vmem [shape: f32[2,128], index: 0, kind: input, shape index: {}]   ;;  %s279_s3 = inlined_call_operand.vmem [shape: f32[2,32], index: 3, kind: output, shape index: {}]  }
   0x1   :  { %166 = vmatprep.subr.bf16.mxu0 %v195_v0  ;;  %v15_v1 = vld [vmem:[%s276_s1] sm:$0xff]  ;;  %v16_v2 = vld [vmem:[%s276_s1 + $0x8] sm:$0xff]  ;;  %v17_v3 = vld [vmem:[%s276_s1 + $0x10] sm:$0xff]  ;;  %163 = vmatprep.mubr.msk.f32.mxu0 %vm196_vm0, %v197_v4  ;;  %vm108_vm1 = vcmask 254976  }
   0x2   :  { %v167_v5 = vpack.c.bf16 %v16_v2, %v15_v1  ;;  %v18_v6 = vld [vmem:[%s276_s1 + $0x18] sm:$0xff]  ;;  %194 = vset.pattern.permute.xlu0 %v198_v7  ;;  %v19_v9 = vld [vmem:[%s276_s1 + $0x20] sm:$0xff]  ;;  %v20_v10 = vld [vmem:[%s276_s1 + $0x28] sm:$0xff] }
   0x3   :  { %v170_v8 = vpack.c.bf16 %v18_v6, %v17_v3  ;;  %v101_v11 = vld [vmem:[%s277_s2] sm:$0x3]  ;;  %v173_v12 = vpack.c.bf16 %v20_v10, %v19_v9  ;;  %v21_v13 = vld [vmem:[%s276_s1 + $0x30] sm:$0xff]  ;;  %v22_v14 = vld [vmem:[%s276_s1 + $0x38] sm:$0xff] }
   0x4   :  { %168 = vmatpush3.bf16.msra.mxu0 %v167_v5  ;;  %104 = vperm.xlu0 %194, %v101_v11   ;;  %v176_v15 = vpack.c.bf16 %v22_v14, %v21_v13  ;;  %v23_v16 = vld [vmem:[%s276_s1 + $0x40] sm:$0xff]  ;;  %v24_v17 = vld [vmem:[%s276_s1 + $0x48] sm:$0xff]  ;;  %v25_v19 = vld [vmem:[%s276_s1 + $0x50] sm:$0xff] }
   0x5   :  { %169 = vmatprep.subr.bf16.mxu0 %v195_v0  ;;  %v179_v18 = vpack.c.bf16 %v24_v17, %v23_v16  ;;  %v26_v20 = vld [vmem:[%s276_s1 + $0x58] sm:$0xff]  ;;  %v27_v22 = vld [vmem:[%s276_s1 + $0x60] sm:$0xff]  ;;  %v28_v23 = vld [vmem:[%s276_s1 + $0x68] sm:$0xff] }
   0x6   :  { %v182_v21 = vpack.c.bf16 %v26_v20, %v25_v19  ;;  %v185_v24 = vpack.c.bf16 %v28_v23, %v27_v22  ;;  %v29_v25 = vld [vmem:[%s276_s1 + $0x70] sm:$0xff]  ;;  %v30_v26 = vld [vmem:[%s276_s1 + $0x78] sm:$0xff]  ;;  %v14_v28 = vld [vmem:[%s278_s0] sm:$0x3] }
   0x7   :  { %v188_v27 = vpack.c.bf16 %v30_v26, %v29_v25 }
   0x8   :  { %171 = vmatpush3.bf16.msra.mxu0 %v170_v8 }
   0x9   :  { %172 = vmatprep.subr.bf16.mxu0 %v195_v0 }
   0xc   :  { %174 = vmatpush3.bf16.msra.mxu0 %v173_v12 }
   0xd   :  { %175 = vmatprep.subr.bf16.mxu0 %v195_v0 }
  0x10   :  { %177 = vmatpush3.bf16.msra.mxu0 %v176_v15 }
  0x11   :  { %178 = vmatprep.subr.bf16.mxu0 %v195_v0 }
  0x14   :  { %180 = vmatpush3.bf16.msra.mxu0 %v179_v18 }
  0x15   :  { %181 = vmatprep.subr.bf16.mxu0 %v195_v0 }
  0x18   :  { %183 = vmatpush3.bf16.msra.mxu0 %v182_v21 }
  0x19   :  { %184 = vmatprep.subr.bf16.mxu0 %v195_v0 }
  0x1c   :  { %186 = vmatpush3.bf16.msra.mxu0 %v185_v24 }
  0x1d   :  { %187 = vmatprep.subr.bf16.mxu0 %v195_v0 }
  0x20   :  { %189 = vmatpush3.bf16.msra.mxu0 %v188_v27 }
  0x23   :  { %164 = vmatmul.mubr.f32.vlgmr.msra.gmra.mrb[0].mxu0 %v14_v28 }
  0x83   :  { %v105_v29 = vpop.permute.xlu0 %104 }
  0xf6   :  { %v97_v30 = vpop.f32.mrb[0].mxu0 }
  0xf7   :  { %v107_v31 = vmul.f32 %v105_v29, %v97_v30  ;;  %v165_v32 = vpop.f32.mrb[1].mxu0 }
  0xf9   :  { %109 = vst.msk [vmem:[%s279_s3] sm:$0x3] %vm108_vm1, %v107_v31 }

// kernel: frag_gfn_forward.46
= control target key start
LH: loop header
LB: loop body
LE: loop exit
PB: predicated region body
PF: predicated region fallthrough
CT: control target
= control target key end

     0   :  { %vm126_vm0 = vcmask 785408   ;;  %vm248_vm1 = vcmask 15360   ;;  %s497_s1 = inlined_call_operand.vmem [shape: bf16[96,2], index: 1, kind: input, shape index: {}]   ;;  %s498_s0 = inlined_call_operand.vmem [shape: bf16[128,96], index: 0, kind: input, shape index: {}]   ;;  %s499_s2 = inlined_call_operand.vmem [shape: f32[1,2], index: 2, kind: input, shape index: {}]   ;;  %s500_s3 = inlined_call_operand.vmem [shape: f32[128,2], index: 3, kind: output, shape index: {}]  }
   0x1   :  { %v346_v0 = vld [vmem:[%s497_s1] sm:$0xff]   ;;  %v347_v1 = vld [vmem:[%s497_s1 + $0x8] sm:$0xff]   ;;  %v348_v2 = vld [vmem:[%s497_s1 + $0x10] sm:$0xff]  }
   0x2   :  { %306 = vmatprep.subr.bf16.mxu0 %v346_v0  ;;  %334 = vmatprep.subr.bf16.mxu1 %v346_v0  ;;  %v352_v3 = vld [vmem:[%s498_s0] sm:$0xff]   ;;  %v349_v5 = vld [vmem:[%s497_s1 + $0x18] sm:$0xff]   ;;  %v351_v7 = vld [vmem:[%s497_s1 + $0x28] sm:$0xff]  }
   0x3   :  { %307 = vmatpush3.bf16.msra.mxu0 %v346_v0  ;;  %340 = vmatpush3.bf16.msra.mxu1 %v346_v0  ;;  %v353_v4 = vld [vmem:[%s498_s0 + $0x20] sm:$0xff]   ;;  %v354_v8 = vld [vmem:[%s498_s0 + $0x8] sm:$0xff]   ;;  %v356_v10 = vld [vmem:[%s498_s0 + $0x10] sm:$0xff]  }
   0x4   :  { %308 = vmatprep.subr.bf16.mxu0 %v347_v1  ;;  %335 = vmatprep.subr.bf16.mxu1 %v347_v1  ;;  %v350_v6 = vld [vmem:[%s497_s1 + $0x20] sm:$0xff]   ;;  %v355_v9 = vld [vmem:[%s498_s0 + $0x28] sm:$0xff]   ;;  %v357_v11 = vld [vmem:[%s498_s0 + $0x30] sm:$0xff]  }
   0x5   :  { %318 = vmatprep.mubr.msk.bf16.mxu0 %vm126_vm0, %v352_v3  ;;  %326 = vmatprep.mubr.msk.bf16.mxu1 %vm126_vm0, %v353_v4  ;;  %v358_v12 = vld [vmem:[%s498_s0 + $0x18] sm:$0xff]   ;;  %v269_v14 = vld [vmem:[%s499_s2] ss:$0 sm:$0xff] }
   0x6   :  { %v359_v13 = vld [vmem:[%s498_s0 + $0x38] sm:$0xff]  }
   0x7   :  { %309 = vmatpush3.bf16.msra.mxu0 %v347_v1  ;;  %341 = vmatpush3.bf16.msra.mxu1 %v347_v1 }
   0x8   :  { %310 = vmatprep.subr.bf16.mxu0 %v348_v2  ;;  %336 = vmatprep.subr.bf16.mxu1 %v348_v2 }
   0xb   :  { %311 = vmatpush3.bf16.msra.mxu0 %v348_v2  ;;  %342 = vmatpush3.bf16.msra.mxu1 %v348_v2 }
   0xc   :  { %312 = vmatprep.subr.bf16.mxu0 %v349_v5  ;;  %337 = vmatprep.subr.bf16.mxu1 %v349_v5 }
   0xf   :  { %313 = vmatpush3.bf16.msra.mxu0 %v349_v5  ;;  %343 = vmatpush3.bf16.msra.mxu1 %v349_v5 }
  0x10   :  { %314 = vmatprep.subr.bf16.mxu0 %v350_v6  ;;  %338 = vmatprep.subr.bf16.mxu1 %v350_v6 }
  0x13   :  { %315 = vmatpush3.bf16.msra.mxu0 %v350_v6  ;;  %344 = vmatpush3.bf16.msra.mxu1 %v350_v6 }
  0x14   :  { %316 = vmatprep.subr.bf16.mxu0 %v351_v7  ;;  %339 = vmatprep.subr.bf16.mxu1 %v351_v7 }
  0x17   :  { %317 = vmatpush3.bf16.msra.mxu0 %v351_v7  ;;  %345 = vmatpush3.bf16.msra.mxu1 %v351_v7 }
  0x1a   :  { %319 = vmatmul.mubr.msk.bf16.vlgmr.msra.gmra.mrb[0].mxu0 %vm126_vm0, %v354_v8  ;;  %327 = vmatmul.mubr.msk.bf16.vlgmr.msra.gmra.mrb[0].mxu1 %vm126_vm0, %v355_v9 }
  0x1b   :  { %322 = vmatprep.mubr.msk.bf16.mxu0 %vm126_vm0, %v356_v10  ;;  %330 = vmatprep.mubr.msk.bf16.mxu1 %vm126_vm0, %v357_v11 }
  0x22   :  { %323 = vmatmul.mubr.msk.bf16.gmra.mrb[4].mxu0 %vm126_vm0, %v358_v12  ;;  %331 = vmatmul.mubr.msk.bf16.gmra.mrb[4].mxu1 %vm126_vm0, %v359_v13 }
  0xed   :  { %v320_v15 = vpop.f32.mrb[0].mxu0  ;;  %v328_v16 = vpop.f32.mrb[0].mxu1 }
  0xee   :  { %v194_v17 = vadd.f32 %v320_v15, %v269_v14  ;;  %v226_v18 = vadd.f32 %v328_v16, %v269_v14  ;;  %v185_v19 = vpop.f32.mrb[1].mxu0  ;;  %v217_v20 = vpop.f32.mrb[1].mxu1 }
  0xef   :  { %v186_v21 = vadd.f32 %v269_v14, %v185_v19  ;;  %v218_v22 = vadd.f32 %v269_v14, %v217_v20  ;;  %v321_v23 = vpop.f32.mrb[2].mxu0  ;;  %v329_v24 = vpop.f32.mrb[2].mxu1 }
  0xf0   :  { %251 = vst.msk [vmem:[%s500_s3 + $0x10] sm:$0xff] %vm248_vm1, %v194_v17  ;;  %259 = vst.msk [vmem:[%s500_s3 + $0x50] sm:$0xff] %vm248_vm1, %v226_v18  ;;  %v197_v25 = vadd.f32 %v321_v23, %v269_v14  ;;  %v229_v26 = vadd.f32 %v329_v24, %v269_v14  ;;  %v188_v27 = vpop.f32.mrb[3].mxu0  ;;  %v220_v28 = vpop.f32.mrb[3].mxu1 }
  0xf1   :  { %249 = vst.msk [vmem:[%s500_s3] sm:$0xff] %vm248_vm1, %v186_v21  ;;  %257 = vst.msk [vmem:[%s500_s3 + $0x40] sm:$0xff] %vm248_vm1, %v218_v22  ;;  %v189_v29 = vadd.f32 %v269_v14, %v188_v27  ;;  %v221_v30 = vadd.f32 %v269_v14, %v220_v28 }
  0xf2   :  { %252 = vst.msk [vmem:[%s500_s3 + $0x18] sm:$0xff] %vm248_vm1, %v197_v25  ;;  %260 = vst.msk [vmem:[%s500_s3 + $0x58] sm:$0xff] %vm248_vm1, %v229_v26 }
  0xf3   :  { %250 = vst.msk [vmem:[%s500_s3 + $0x8] sm:$0xff] %vm248_vm1, %v189_v29  ;;  %258 = vst.msk [vmem:[%s500_s3 + $0x48] sm:$0xff] %vm248_vm1, %v221_v30 }
  0xf5   :  { %v324_v31 = vpop.f32.mrb[4].mxu0  ;;  %v332_v32 = vpop.f32.mrb[4].mxu1 }
  0xf6   :  { %v210_v33 = vadd.f32 %v324_v31, %v269_v14  ;;  %v242_v34 = vadd.f32 %v332_v32, %v269_v14  ;;  %v201_v35 = vpop.f32.mrb[5].mxu0  ;;  %v233_v36 = vpop.f32.mrb[5].mxu1 }
  0xf7   :  { %v202_v37 = vadd.f32 %v269_v14, %v201_v35  ;;  %v234_v38 = vadd.f32 %v269_v14, %v233_v36  ;;  %v325_v39 = vpop.f32.mrb[6].mxu0  ;;  %v333_v40 = vpop.f32.mrb[6].mxu1 }
  0xf8   :  { %255 = vst.msk [vmem:[%s500_s3 + $0x30] sm:$0xff] %vm248_vm1, %v210_v33  ;;  %263 = vst.msk [vmem:[%s500_s3 + $0x70] sm:$0xff] %vm248_vm1, %v242_v34  ;;  %v213_v41 = vadd.f32 %v325_v39, %v269_v14  ;;  %v245_v42 = vadd.f32 %v333_v40, %v269_v14  ;;  %v204_v43 = vpop.f32.mrb[7].mxu0  ;;  %v236_v44 = vpop.f32.mrb[7].mxu1 }
  0xf9   :  { %253 = vst.msk [vmem:[%s500_s3 + $0x20] sm:$0xff] %vm248_vm1, %v202_v37  ;;  %261 = vst.msk [vmem:[%s500_s3 + $0x60] sm:$0xff] %vm248_vm1, %v234_v38  ;;  %v205_v45 = vadd.f32 %v269_v14, %v204_v43  ;;  %v237_v46 = vadd.f32 %v269_v14, %v236_v44 }
  0xfa   :  { %256 = vst.msk [vmem:[%s500_s3 + $0x38] sm:$0xff] %vm248_vm1, %v213_v41  ;;  %264 = vst.msk [vmem:[%s500_s3 + $0x78] sm:$0xff] %vm248_vm1, %v245_v42 }
  0xfb   :  { %254 = vst.msk [vmem:[%s500_s3 + $0x28] sm:$0xff] %vm248_vm1, %v205_v45  ;;  %262 = vst.msk [vmem:[%s500_s3 + $0x68] sm:$0xff] %vm248_vm1, %v237_v46 }

// kernel: frag_gfn_forward.31
= control target key start
LH: loop header
LB: loop body
LE: loop exit
PB: predicated region body
PF: predicated region fallthrough
CT: control target
= control target key end

     0   :  { %vm3190_vm0 = vcmask 261120   ;;  %s2180_s25 = smov 64   ;;  %s2181_s28 = smov 96   ;;  %s3183_s2 = inlined_call_operand.vmem [shape: bf16[128,128], index: 2, kind: input, shape index: {}]   ;;  %s3184_s1 = inlined_call_operand.vmem [shape: bf16[128,256], index: 1, kind: input, shape index: {}]   ;;  %s3185_s0 = inlined_call_operand.vmem [shape: bf16[128,128], index: 0, kind: input, shape index: {}]   ;;  %s3186_s4 = inlined_call_operand.vmem [shape: bf16[64,32], index: 4, kind: input, shape index: {}]   ;;  %s3187_s5 = inlined_call_operand.vmem [shape: f32[1,32], index: 5, kind: input, shape index: {}]   ;;  %s3188_s3 = inlined_call_operand.vmem [shape: f32[128,32], index: 3, kind: input, shape index: {}]   ;;  %s3189_s6 = inlined_call_operand.vmem [shape: f32[128,32], index: 6, kind: output, shape index: {}]  }
   0x1   :  { %v2221_v0 = vld [vmem:[%s3183_s2] sm:$0xff]   ;;  %v2226_v1 = vld [vmem:[%s3183_s2 + $0x8] sm:$0xff]   ;;  %v2241_v3 = vld [vmem:[%s3183_s2 + $0x10] sm:$0xff]  }
   0x2   :  { %1938 = vmatprep.subr.msk.bf16.mxu0 %vm3190_vm0, %v2221_v0  ;;  %v210_v2 = vsel %vm3190_vm0, %v2221_v0, 0  ;;  %562 = vrot.lane.b32.xlu0 %v2221_v0, %s2180_s25  ;;  %v2246_v4 = vld [vmem:[%s3183_s2 + $0x18] sm:$0xff]   ;;  %v213_v5 = vsel %vm3190_vm0, %v2226_v1, 0  ;;  %v2257_v6 = vld [vmem:[%s3183_s2 + $0x30] sm:$0xff]   ;;  %v72_v7 = vld [vmem:[%s3184_s1] sm:$0xf] }
   0x3   :  { %1771 = vmatpush3.bf16.xpose.msra.mxu0 %v210_v2  ;;  %564 = vrot.lane.b32.xlu1 %v2226_v1, %s2180_s25  ;;  %v73_v8 = vld [vmem:[%s3184_s1 + $0x8] sm:$0xf]  ;;  %v2270_v10 = vld [vmem:[%s3183_s2 + $0x20] sm:$0xff]   ;;  %v216_v12 = vsel %vm3190_vm0, %v2241_v3, 0  ;;  %v219_v13 = vsel %vm3190_vm0, %v2246_v4, 0  ;;  %v228_v16 = vsel %vm3190_vm0, %v2257_v6, 0 }
   0x4   :  { %1939 = vmatprep.subr.msk.bf16.mxu0 %vm3190_vm0, %v2226_v1  ;;  %v2265_v9 = vcombine.low %v72_v7, %v73_v8  ;;  %v2283_v11 = vld [vmem:[%s3183_s2 + $0x28] sm:$0xff]   ;;  %v222_v14 = vsel %vm3190_vm0, %v2270_v10, 0  ;;  %v2308_v17 = vld [vmem:[%s3183_s2 + $0x38] sm:$0xff]   ;;  %v74_v19 = vld [vmem:[%s3184_s1 + $0x10] sm:$0xf] }
   0x5   :  { %v225_v15 = vsel %vm3190_vm0, %v2283_v11, 0  ;;  %v231_v18 = vsel %vm3190_vm0, %v2308_v17, 0  ;;  %v75_v20 = vld [vmem:[%s3184_s1 + $0x18] sm:$0xf]  ;;  %v76_v21 = vld [vmem:[%s3184_s1 + $0x20] sm:$0xf] }
   0x6   :  { %566 = vrot.lane.b32.xlu0 %v2241_v3, %s2180_s25  ;;  %1786 = vmatprep.mubr.msk.bf16.mxu0 %vm3190_vm0, %v2265_v9  ;;  %v77_v22 = vld [vmem:[%s3184_s1 + $0x28] sm:$0xf]  ;;  %v2326_v23 = vcombine.low %v74_v19, %v75_v20  ;;  %v78_v25 = vld [vmem:[%s3184_s1 + $0x30] sm:$0xf]  ;;  %v79_v26 = vld [vmem:[%s3184_s1 + $0x38] sm:$0xf] }
   0x7   :  { %568 = vrot.lane.b32.xlu1 %v2246_v4, %s2180_s25  ;;  %v2328_v24 = vcombine.low %v76_v21, %v77_v22  ;;  %v80_v27 = vld [vmem:[%s3184_s1 + $0x40] sm:$0xf]  ;;  %v81_v28 = vld [vmem:[%s3184_s1 + $0x48] sm:$0xf]  ;;  %v2346_v29 = vcombine.low %v78_v25, %v79_v26  ;;  %v82_v31 = vld [vmem:[%s3184_s1 + $0x50] sm:$0xf] }
   0x8   :  { %v2348_v30 = vcombine.low %v80_v27, %v81_v28  ;;  %v83_v32 = vld [vmem:[%s3184_s1 + $0x58] sm:$0xf]  ;;  %v84_v33 = vld [vmem:[%s3184_s1 + $0x60] sm:$0xf]  ;;  %v85_v34 = vld [vmem:[%s3184_s1 + $0x68] sm:$0xf] }
   0x9   :  { %v2366_v35 = vcombine.low %v82_v31, %v83_v32  ;;  %v2368_v36 = vcombine.low %v84_v33, %v85_v34  ;;  %v86_v37 = vld [vmem:[%s3184_s1 + $0x70] sm:$0xf]  ;;  %v87_v38 = vld [vmem:[%s3184_s1 + $0x78] sm:$0xf]  ;;  %v1687_v47 = vld [vmem:[%s3185_s0 + $0x8] sm:$0xff]  }
   0xa   :  { %574 = vrot.lane.b32.xlu0 %v2257_v6, %s2180_s25  ;;  %v2380_v39 = vcombine.low %v86_v37, %v87_v38  ;;  %v1656_v48 = vld [vmem:[%s3185_s0] sm:$0xff]   ;;  %v1661_v49 = vunpack.c.l.bf16 %v1687_v47  ;;  %v1662_v53 = vunpack.c.h.bf16 %v1687_v47  ;;  %v1689_v22 = vld [vmem:[%s3185_s0 + $0x18] sm:$0xff]   ;;  %v1688_v26 = vld [vmem:[%s3185_s0 + $0x10] sm:$0xff]  }
   0xb   :  { %1773 = vmatpush3.bf16.xpose.msra.mxu0 %v213_v5  ;;  %570 = vrot.lane.b32.xlu1 %v2270_v10, %s2180_s25  ;;  %v1657_v50 = vunpack.c.l.bf16 %v1656_v48  ;;  %v1670_v25 = vunpack.c.h.bf16 %v1689_v22  ;;  %v1658_v28 = vunpack.c.h.bf16 %v1656_v48  ;;  %v1666_v32 = vunpack.c.h.bf16 %v1688_v26  ;;  %v1691_v34 = vld [vmem:[%s3185_s0 + $0x28] sm:$0xff]  }
   0xc   :  { %1940 = vmatprep.subr.msk.bf16.mxu0 %vm3190_vm0, %v2241_v3  ;;  %vm2390_vm1 = vcmp.gt.f32.partialorder %v1661_v49, 0.5  ;;  %vm2407_vm3 = vcmp.gt.f32.partialorder %v1662_v53, 0.5  ;;  %v1669_v33 = vunpack.c.l.bf16 %v1689_v22 }
   0xd   :  { %vm2394_vm2 = vcmp.gt.f32.partialorder %v1657_v50, 0.5  ;;  %vm2433_vm4 = vcmp.gt.f32.partialorder %v1670_v25, 0.5  ;;  %vm2444_vm5 = vcmp.gt.f32.partialorder %v1658_v28, 0.5  ;;  %vm2448_vm6 = vcmp.gt.f32.partialorder %v1666_v32, 0.5 }
   0xe   :  { %vm2452_vm7 = vcmp.gt.f32.partialorder %v1669_v33, 0.5  ;;  %v1665_v50 = vunpack.c.l.bf16 %v1688_v26  ;;  %v3221_v28 = vmov 0 }
   0xf   :  { %572 = vrot.lane.b32.xlu1 %v2283_v11, %s2180_s25 }
  0x10   :  { %vm2486_vm9 = vcmp.gt.f32.partialorder %v1665_v50, 0.5 }
  0x13   :  { %1775 = vmatpush3.bf16.xpose.msra.mxu0 %v216_v12 }
  0x14   :  { %1941 = vmatprep.subr.msk.bf16.mxu0 %vm3190_vm0, %v2246_v4 }
  0x1b   :  { %1777 = vmatpush3.bf16.xpose.msra.mxu0 %v219_v13 }
  0x1c   :  { %1942 = vmatprep.subr.msk.bf16.mxu0 %vm3190_vm0, %v2270_v10 }
  0x23   :  { %1779 = vmatpush3.bf16.xpose.msra.mxu0 %v222_v14 }
  0x24   :  { %1943 = vmatprep.subr.msk.bf16.mxu0 %vm3190_vm0, %v2283_v11 }
  0x2b   :  { %1781 = vmatpush3.bf16.xpose.msra.mxu0 %v225_v15 }
  0x2c   :  { %1944 = vmatprep.subr.msk.bf16.mxu0 %vm3190_vm0, %v2257_v6 }
  0x33   :  { %1783 = vmatpush3.bf16.xpose.msra.mxu0 %v228_v16 }
  0x34   :  { %1945 = vmatprep.subr.msk.bf16.mxu0 %vm3190_vm0, %v2308_v17 }
  0x3b   :  { %1785 = vmatpush3.bf16.xpose.msra.mxu0 %v231_v18 }
  0x42   :  { %1787 = vmatmul.mubr.msk.bf16.vlgmr.msra.gmra.mrb[0].mxu0 %vm3190_vm0, %v2326_v23 }
  0x43   :  { %1790 = vmatprep.mubr.msk.bf16.mxu0 %vm3190_vm0, %v2328_v24 }
  0x4a   :  { %1791 = vmatmul.mubr.msk.bf16.gmra.mrb[4].mxu0 %vm3190_vm0, %v2346_v29 }
  0x4b   :  { %1794 = vmatprep.mubr.msk.bf16.mxu0 %vm3190_vm0, %v2348_v30 }
  0x52   :  { %1795 = vmatmul.mubr.msk.bf16.gmra.mrb[8].mxu0 %vm3190_vm0, %v2366_v35 }
  0x53   :  { %1798 = vmatprep.mubr.msk.bf16.mxu0 %vm3190_vm0, %v2368_v36 }
  0x5a   :  { %1799 = vmatmul.mubr.msk.bf16.gmra.mrb[12].mxu0 %vm3190_vm0, %v2380_v39 }
  0x74   :  { %v563_v40 = vpop.permute.xlu0 %562 }
  0x75   :  { %1802 = vmatprep.subr.bf16.mxu1 %v563_v40  ;;  %v565_v41 = vpop.permute.xlu1 %564 }
  0x76   :  { %1803 = vmatpush3.bf16.msra.mxu1 %v563_v40 }
  0x77   :  { %1804 = vmatprep.subr.bf16.mxu1 %v565_v41 }
  0x78   :  { %v567_v42 = vpop.permute.xlu0 %566 }
  0x79   :  { %v569_v43 = vpop.permute.xlu1 %568 }
  0x7a   :  { %1805 = vmatpush3.bf16.msra.mxu1 %v565_v41 }
  0x7b   :  { %1806 = vmatprep.subr.bf16.mxu1 %v567_v42 }
  0x7c   :  { %v575_v46 = vpop.permute.xlu0 %574 }
  0x7d   :  { %v571_v44 = vpop.permute.xlu1 %570 }
  0x7e   :  { %1807 = vmatpush3.bf16.msra.mxu1 %v567_v42 }
  0x7f   :  { %1808 = vmatprep.subr.bf16.mxu1 %v569_v43 }
  0x81   :  { %v573_v45 = vpop.permute.xlu1 %572 }
  0x82   :  { %1809 = vmatpush3.bf16.msra.mxu1 %v569_v43 }
  0x83   :  { %1810 = vmatprep.subr.bf16.mxu1 %v571_v44 }
  0x86   :  { %1811 = vmatpush3.bf16.msra.mxu1 %v571_v44  ;;  %v1678_v44 = vunpack.c.h.bf16 %v1691_v34 }
  0x87   :  { %1812 = vmatprep.subr.bf16.mxu1 %v573_v45 }
  0x88   :  { %vm2473_vm8 = vcmp.gt.f32.partialorder %v1678_v44, 0.5  ;;  %v3225_v44 = vmov 0 }
  0x8a   :  { %1813 = vmatpush3.bf16.msra.mxu1 %v573_v45 }
  0x8b   :  { %1814 = vmatprep.subr.bf16.mxu1 %v575_v46 }
  0x8e   :  { %1815 = vmatpush3.bf16.msra.mxu1 %v575_v46  ;;  %v1690_v46 = vld [vmem:[%s3185_s0 + $0x20] sm:$0xff]  }
  0x8f   :  { %v1673_v26 = vunpack.c.l.bf16 %v1690_v46 }
  0x91   :  { %vm2525_vm13 = vcmp.gt.f32.partialorder %v1673_v26, 0.5 }
 0x115   :  { %v1788_v51 = vpop.f32.mrb[0].mxu0 }
 0x116   :  { %v332_v54 = vmul.f32 0.17677669, %v1788_v51  ;;  %v267_v55 = vpop.f32.mrb[1].mxu0 }
 0x117   :  { %v330_v57 = vmul.f32 0.17677669, %v267_v55  ;;  %v1789_v58 = vpop.f32.mrb[2].mxu0  ;;  %v1677_v55 = vunpack.c.l.bf16 %v1691_v34 }
 0x118   :  { %v333_v59 = vmul.f32 0.17677669, %v1789_v58  ;;  %v270_v60 = vpop.f32.mrb[3].mxu0  ;;  %v2400_v61 = vsel %vm2390_vm1, %v332_v54, -1e+30  ;;  %v1674_v54 = vunpack.c.h.bf16 %v1690_v46 }
 0x119   :  { %366 = vmax.xlane.f32.xlu1 %v2400_v61  ;;  %v2405_v62 = vsel %vm2394_vm2, %v330_v57, -1e+30  ;;  %v331_v37 = vmul.f32 0.17677669, %v270_v60  ;;  %v1693_v57 = vld [vmem:[%s3185_s0 + $0x38] sm:$0xff]   ;;  %vm2494_vm11 = vcmp.gt.f32.partialorder %v1677_v55, 0.5 }
 0x11a   :  { %362 = vmax.xlane.f32.xlu0 %v2405_v62  ;;  %v2414_v2 = vsel %vm2407_vm3, %v333_v59, -1e+30  ;;  %vm2490_vm10 = vcmp.gt.f32.partialorder %v1674_v54, 0.5  ;;  %v1685_v33 = vunpack.c.l.bf16 %v1693_v57  ;;  %v3229_v54 = vmov 0 }
 0x11b   :  { %v2462_v47 = vsel %vm2444_vm5, %v331_v37, -1e+30 }
 0x11c   :  { %vm2534_vm15 = vcmp.gt.f32.partialorder %v1685_v33, 0.5 }
 0x11d   :  { %368 = vmax.xlane.f32.xlu1 %v2414_v2  ;;  %v1792_v5 = vpop.f32.mrb[4].mxu0 }
 0x11e   :  { %v283_v7 = vpop.f32.mrb[5].mxu0  ;;  %v336_v42 = vmul.f32 0.17677669, %v1792_v5 }
 0x11f   :  { %v1793_v8 = vpop.f32.mrb[6].mxu0  ;;  %v334_v58 = vmul.f32 0.17677669, %v283_v7  ;;  %v3219_v7 = vmov 0 }
 0x120   :  { %v286_v12 = vpop.f32.mrb[7].mxu0  ;;  %v337_v27 = vmul.f32 0.17677669, %v1793_v8  ;;  %v2471_v51 = vsel %vm2452_vm7, %v336_v42, -1e+30  ;;  %v3220_v7 = vsel %vm2494_vm11, 4294967295, %v3219_v7 }
 0x121   :  { %v335_v38 = vmul.f32 0.17677669, %v286_v12  ;;  %v3217_v12 = vmov 0  ;;  %v2504_v22 = vsel %vm2486_vm9, %v334_v58, -1e+30 }
 0x122   :  { %v2442_v40 = vsel %vm2433_vm4, %v337_v27, -1e+30  ;;  %v3218_v12 = vsel %vm2490_vm10, 4294967295, %v3217_v12 }
 0x123   :  { %v2467_v49 = vsel %vm2448_vm6, %v335_v38, -1e+30  ;;  %v3223_v38 = vmov 0 }
 0x124   :  { %v3224_v38 = vsel %vm2525_vm13, 4294967295, %v3223_v38 }
 0x125   :  { %v1796_v13 = vpop.f32.mrb[8].mxu0 }
 0x126   :  { %v299_v14 = vpop.f32.mrb[9].mxu0  ;;  %v340_v8 = vmul.f32 0.17677669, %v1796_v13 }
 0x127   :  { %v1797_v15 = vpop.f32.mrb[10].mxu0  ;;  %v338_v34 = vmul.f32 0.17677669, %v299_v14  ;;  %v3227_v14 = vmov 0 }
 0x128   :  { %v302_v16 = vpop.f32.mrb[11].mxu0  ;;  %v341_v48 = vmul.f32 0.17677669, %v1797_v15  ;;  %v1686_v15 = vunpack.c.h.bf16 %v1693_v57  ;;  %v2513_v27 = vsel %vm2494_vm11, %v340_v8, -1e+30  ;;  %v3228_v14 = vsel %vm2534_vm15, 4294967295, %v3227_v14 }
 0x129   :  { %v339_v59 = vmul.f32 0.17677669, %v302_v16  ;;  %v1692_v16 = vld [vmem:[%s3185_s0 + $0x30] sm:$0xff]   ;;  %s2182_s0 = smov 32  }
 0x12a   :  { %v2484_v60 = vsel %vm2473_vm8, %v341_v48, -1e+30  ;;  %vm2515_vm12 = vcmp.gt.f32.partialorder %v1686_v15, 0.5  ;;  %v1682_v32 = vunpack.c.h.bf16 %v1692_v16 }
 0x12b   :  { %v2509_v25 = vsel %vm2490_vm10, %v339_v59, -1e+30  ;;  %v3222_v28 = vsel %vm2515_vm12, 4294967295, %v3221_v28 }
 0x12c   :  { %vm2530_vm14 = vcmp.gt.f32.partialorder %v1682_v32, 0.5 }
 0x12d   :  { %v2417_v18 = vpop.f32.mrb[12].mxu0  ;;  %v3226_v44 = vsel %vm2530_vm14, 4294967295, %v3225_v44 }
 0x12e   :  { %576 = vrot.lane.b32.xlu1 %v2308_v17, %s2180_s25  ;;  %v2421_v19 = vpop.f32.mrb[13].mxu0  ;;  %v344_v42 = vmul.f32 0.17677669, %v2417_v18  ;;  %v1681_v18 = vunpack.c.l.bf16 %v1692_v16 }
 0x12f   :  { %v1801_v20 = vpop.f32.mrb[14].mxu0  ;;  %v342_v50 = vmul.f32 0.17677669, %v2421_v19 }
 0x130   :  { %699 = vrot.lane.b32.xlu0 %v2221_v0, %s2181_s28  ;;  %v318_v21 = vpop.f32.mrb[15].mxu0  ;;  %v345_v13 = vmul.f32 0.17677669, %v1801_v20  ;;  %v2550_v48 = vsel %vm2534_vm15, %v344_v42, -1e+30  ;;  %vm2555_vm0 = vcmp.gt.f32.partialorder %v1681_v18, 0.5 }
 0x131   :  { %v343_v20 = vmul.f32 0.17677669, %v318_v21  ;;  %v2541_v21 = vsel %vm2525_vm13, %v338_v34, -1e+30  ;;  %v3230_v54 = vsel %vm2555_vm0, 4294967295, %v3229_v54 }
 0x132   :  { %v2523_v37 = vsel %vm2515_vm12, %v345_v13, -1e+30  ;;  %3231 = vst [vmem:[#allocation2_spill] sm:$0xff] %v3230_v54  ;;  %v2561_v55 = vsel %vm2555_vm0, %v342_v50, -1e+30 }
 0x133   :  { %v2546_v46 = vsel %vm2530_vm14, %v343_v20, -1e+30 }
 0x134   :  { %701 = vrot.lane.b32.xlu0 %v2226_v1, %s2181_s28 }
 0x152   :  { %376 = vmax.xlane.f32.xlu1 %v2442_v40 }
 0x153   :  { %364 = vmax.xlane.f32.xlu0 %v2462_v47 }
 0x156   :  { %372 = vmax.xlane.f32.xlu1 %v2467_v49 }
 0x157   :  { %374 = vmax.xlane.f32.xlu0 %v2471_v51 }
 0x15a   :  { %384 = vmax.xlane.f32.xlu1 %v2484_v60 }
 0x15b   :  { %370 = vmax.xlane.f32.xlu0 %v2504_v22 }
 0x15e   :  { %380 = vmax.xlane.f32.xlu1 %v2509_v25 }
 0x15f   :  { %382 = vmax.xlane.f32.xlu0 %v2513_v27 }
 0x162   :  { %392 = vmax.xlane.f32.xlu1 %v2523_v37 }
 0x163   :  { %378 = vmax.xlane.f32.xlu0 %v2541_v21 }
 0x166   :  { %388 = vmax.xlane.f32.xlu1 %v2546_v46 }
 0x167   :  { %390 = vmax.xlane.f32.xlu0 %v2550_v48 }
 0x16b   :  { %386 = vmax.xlane.f32.xlu0 %v2561_v55 }
 0x177   :  { %703 = vrot.lane.b32.xlu1 %v2241_v3, %s2181_s28 }
 0x181   :  { %705 = vrot.lane.b32.xlu0 %v2246_v4, %s2181_s28 }
 0x1a6   :  { %v367_v19 = vpop.xlane.xlu1 %366 }
 0x1a7   :  { %vm396_vm14 = vcmp.lt.f32.partialorder %v367_v19, -1e+29  ;;  %v363_v57 = vpop.xlane.xlu0 %362 }
 0x1a8   :  { %v412_v58 = vsel %vm396_vm14, 0.0, %v367_v19  ;;  %vm394_vm15 = vcmp.lt.f32.partialorder %v363_v57, -1e+29  ;;  %vm3232_vm14 = vcmask 261120  }
 0x1a9   :  { %v428_v59 = vsub.f32 %v2400_v61, %v412_v58  ;;  %v410_v8 = vsel %vm394_vm15, 0.0, %v363_v57 }
 0x1aa   :  { %v426_v15 = vsub.f32 %v2405_v62, %v410_v8  ;;  %v369_v16 = vpop.xlane.xlu1 %368 }
 0x1ab   :  { %v446_v13 = vmul.f32 1.442695, %v428_v59  ;;  %vm397_vm0 = vcmp.lt.f32.partialorder %v369_v16, -1e+29  ;;  %v2571_v42 = vpop.permute.xlu0 %699 }
 0x1ac   :  { %v442_v26 = vmul.f32 1.442695, %v426_v15  ;;  %v413_v32 = vsel %vm397_vm0, 0.0, %v369_v16 }
 0x1ad   :  { %2017 = vpow2.f32 %v446_v13  ;;  %v429_v33 = vsub.f32 %v2414_v2, %v413_v32 }
 0x1ae   :  { %2019 = vpow2.f32 %v442_v26  ;;  %v577_v34 = vpop.permute.xlu1 %576 }
 0x1af   :  { %v448_v20 = vmul.f32 1.442695, %v429_v33  ;;  %1816 = vmatprep.subr.bf16.mxu1 %v577_v34  ;;  %v2584_v18 = vpop.permute.xlu0 %701 }
 0x1b0   :  { %1817 = vmatpush3.bf16.msra.mxu1 %v577_v34 }
 0x1b1   :  { %2021 = vpow2.f32 %v448_v20  ;;  %1946 = vmatprep.subr.msk.bf16.mxu1 %vm3232_vm14, %v2571_v42 }
 0x1b7   :  { %v2575_v61 = vpop.eup %2017 }
 0x1b8   :  { %v2577_v62 = vpop.eup %2019  ;;  %478 = vadd.xlane.f32.xlu0 %v2575_v61 }
 0x1b9   :  { %474 = vadd.xlane.f32.xlu1 %v2577_v62 }
 0x1bb   :  { %v2581_v2 = vpop.eup %2021 }
 0x1bd   :  { %480 = vadd.xlane.f32.xlu1 %v2581_v2 }
 0x1df   :  { %v377_v50 = vpop.xlane.xlu1 %376 }
 0x1e0   :  { %v365_v19 = vpop.xlane.xlu0 %364  ;;  %vm401_vm15 = vcmp.lt.f32.partialorder %v377_v50, -1e+29 }
 0x1e1   :  { %vm395_vm0 = vcmp.lt.f32.partialorder %v365_v19, -1e+29  ;;  %v417_v32 = vsel %vm401_vm15, 0.0, %v377_v50 }
 0x1e2   :  { %v411_v57 = vsel %vm395_vm0, 0.0, %v365_v19 }
 0x1e3   :  { %v427_v58 = vsub.f32 %v2462_v47, %v411_v57  ;;  %v373_v59 = vpop.xlane.xlu1 %372  ;;  %v433_v47 = vsub.f32 %v2442_v40, %v417_v32 }
 0x1e4   :  { %vm399_vm14 = vcmp.lt.f32.partialorder %v373_v59, -1e+29  ;;  %v375_v8 = vpop.xlane.xlu0 %374 }
 0x1e5   :  { %v444_v15 = vmul.f32 1.442695, %v427_v58  ;;  %v415_v16 = vsel %vm399_vm14, 0.0, %v373_v59  ;;  %vm400_vm12 = vcmp.lt.f32.partialorder %v375_v8, -1e+29 }
 0x1e6   :  { %v431_v13 = vsub.f32 %v2467_v49, %v415_v16  ;;  %v416_v26 = vsel %vm400_vm12, 0.0, %v375_v8  ;;  %v456_v50 = vmul.f32 1.442695, %v433_v47 }
 0x1e7   :  { %2023 = vpow2.f32 %v444_v15  ;;  %v432_v33 = vsub.f32 %v2471_v51, %v416_v26  ;;  %v385_v34 = vpop.xlane.xlu1 %384 }
 0x1e8   :  { %v452_v20 = vmul.f32 1.442695, %v431_v13  ;;  %v371_v54 = vpop.xlane.xlu0 %370  ;;  %vm405_vm14 = vcmp.lt.f32.partialorder %v385_v34, -1e+29 }
 0x1e9   :  { %v454_v19 = vmul.f32 1.442695, %v432_v33  ;;  %vm398_vm0 = vcmp.lt.f32.partialorder %v371_v54, -1e+29  ;;  %v421_v16 = vsel %vm405_vm14, 0.0, %v385_v34 }
 0x1ea   :  { %2025 = vpow2.f32 %v452_v20  ;;  %v414_v57 = vsel %vm398_vm0, 0.0, %v371_v54 }
 0x1eb   :  { %2027 = vpow2.f32 %v454_v19  ;;  %v430_v58 = vsub.f32 %v2504_v22, %v414_v57  ;;  %v381_v8 = vpop.xlane.xlu1 %380  ;;  %v437_v22 = vsub.f32 %v2484_v60, %v421_v16 }
 0x1ec   :  { %v383_v59 = vpop.xlane.xlu0 %382  ;;  %vm403_vm15 = vcmp.lt.f32.partialorder %v381_v8, -1e+29 }
 0x1ed   :  { %v450_v49 = vmul.f32 1.442695, %v430_v58  ;;  %vm404_vm12 = vcmp.lt.f32.partialorder %v383_v59, -1e+29  ;;  %v419_v32 = vsel %vm403_vm15, 0.0, %v381_v8 }
 0x1ee   :  { %v420_v15 = vsel %vm404_vm12, 0.0, %v383_v59  ;;  %v435_v47 = vsub.f32 %v2509_v25, %v419_v32  ;;  %v464_v58 = vmul.f32 1.442695, %v437_v22 }
 0x1ef   :  { %2029 = vpow2.f32 %v450_v49  ;;  %v436_v51 = vsub.f32 %v2513_v27, %v420_v15  ;;  %v393_v57 = vpop.xlane.xlu1 %392 }
 0x1f0   :  { %v379_v13 = vpop.xlane.xlu0 %378  ;;  %2031 = vpow2.f32 %v456_v50  ;;  %vm409_vm12 = vcmp.lt.f32.partialorder %v393_v57, -1e+29 }
 0x1f1   :  { %v2592_v26 = vpop.eup %2023  ;;  %v462_v40 = vmul.f32 1.442695, %v436_v51  ;;  %vm402_vm0 = vcmp.lt.f32.partialorder %v379_v13, -1e+29  ;;  %v425_v51 = vsel %vm409_vm12, 0.0, %v393_v57 }
 0x1f2   :  { %v418_v54 = vsel %vm402_vm0, 0.0, %v379_v13  ;;  %476 = vadd.xlane.f32.xlu0 %v2592_v26 }
 0x1f3   :  { %2033 = vpow2.f32 %v462_v40  ;;  %v434_v33 = vsub.f32 %v2541_v21, %v418_v54  ;;  %v460_v21 = vmul.f32 1.442695, %v435_v47  ;;  %v441_v40 = vsub.f32 %v2523_v37, %v425_v51 }
 0x1f4   :  { %v2597_v20 = vpop.eup %2025  ;;  %v391_v27 = vpop.xlane.xlu0 %390 }
 0x1f5   :  { %v2599_v34 = vpop.eup %2027  ;;  %v458_v19 = vmul.f32 1.442695, %v434_v33  ;;  %vm408_vm14 = vcmp.lt.f32.partialorder %v391_v27, -1e+29 }
 0x1f6   :  { %484 = vadd.xlane.f32.xlu0 %v2597_v20  ;;  %486 = vadd.xlane.f32.xlu1 %v2599_v34  ;;  %v424_v60 = vsel %vm408_vm14, 0.0, %v391_v27  ;;  %vm3233_vm14 = vcmask 261120  }
 0x1f7   :  { %2035 = vpow2.f32 %v458_v19  ;;  %v440_v25 = vsub.f32 %v2550_v48, %v424_v60  ;;  %v472_v48 = vmul.f32 1.442695, %v441_v40  ;;  %v389_v19 = vpop.xlane.xlu1 %388  ;;  %vm3234_vm12 = vmmov %vm3233_vm14 }
 0x1f8   :  { %v387_v59 = vpop.xlane.xlu0 %386  ;;  %2037 = vpow2.f32 %v464_v58  ;;  %vm407_vm0 = vcmp.lt.f32.partialorder %v389_v19, -1e+29 }
 0x1f9   :  { %v2604_v49 = vpop.eup %2029  ;;  %vm406_vm15 = vcmp.lt.f32.partialorder %v387_v59, -1e+29  ;;  %2039 = vpow2.f32 %v460_v21  ;;  %v470_v54 = vmul.f32 1.442695, %v440_v25  ;;  %v423_v47 = vsel %vm407_vm0, 0.0, %v389_v19  ;;  %vm3236_vm0 = vmmov %vm3234_vm12 }
 0x1fa   :  { %v422_v8 = vsel %vm406_vm15, 0.0, %v387_v59  ;;  %482 = vadd.xlane.f32.xlu1 %v2604_v49  ;;  %v2609_v15 = vpop.eup %2031  ;;  %v439_v57 = vsub.f32 %v2546_v46, %v423_v47  ;;  %vm3235_vm15 = vmmov %vm3234_vm12 }
 0x1fb   :  { %v438_v50 = vsub.f32 %v2561_v55, %v422_v8  ;;  %vm3242_vm13 = vmmov %vm3236_vm0 }
 0x1fc   :  { %v468_v58 = vmul.f32 1.442695, %v439_v57  ;;  %vm3250_vm10 = vmmov %vm3236_vm0 }
 0x1fd   :  { %v2611_v16 = vpop.eup %2033  ;;  %v466_v13 = vmul.f32 1.442695, %v438_v50  ;;  %vm3251_vm11 = vmmov %vm3236_vm0 }
 0x1fe   :  { %488 = vadd.xlane.f32.xlu1 %v2609_v15  ;;  %494 = vadd.xlane.f32.xlu0 %v2611_v16 }
 0x1ff   :  { %2041 = vpow2.f32 %v466_v13 }
 0x200   :  { %2043 = vpow2.f32 %v470_v54 }
 0x201   :  { %v2616_v22 = vpop.eup %2035  ;;  %2045 = vpow2.f32 %v472_v48 }
 0x202   :  { %490 = vadd.xlane.f32.xlu1 %v2616_v22  ;;  %v2619_v55 = vpop.eup %2037  ;;  %2047 = vpow2.f32 %v468_v58 }
 0x203   :  { %v2622_v32 = vpop.eup %2039 }
 0x206   :  { %496 = vadd.xlane.f32.xlu1 %v2619_v55 }
 0x209   :  { %v2624_v33 = vpop.eup %2041 }
 0x20a   :  { %492 = vadd.xlane.f32.xlu1 %v2622_v32  ;;  %498 = vadd.xlane.f32.xlu0 %v2624_v33  ;;  %v2628_v37 = vpop.eup %2043 }
 0x20b   :  { %v2631_v27 = vpop.eup %2045 }
 0x20e   :  { %502 = vadd.xlane.f32.xlu1 %v2628_v37 }
 0x212   :  { %504 = vadd.xlane.f32.xlu1 %v2631_v27 }
 0x220   :  { %709 = vrot.lane.b32.xlu0 %v2283_v11, %s2181_s28  ;;  %v2647_v11 = vpop.eup %2047 }
 0x223   :  { %707 = vrot.lane.b32.xlu1 %v2270_v10, %s2181_s28 }
 0x227   :  { %685 = vrot.lane.b32.xlu1 %v2326_v23, %s2181_s28  ;;  %v2662_v23 = vpop.permute.xlu1 %703 }
 0x22b   :  { %689 = vrot.lane.b32.xlu1 %v2346_v29, %s2181_s28 }
 0x22f   :  { %693 = vrot.lane.b32.xlu1 %v2366_v35, %s2181_s28  ;;  %v2664_v35 = vpop.permute.xlu0 %705 }
 0x233   :  { %697 = vrot.lane.b32.xlu1 %v2380_v39, %s2181_s28 }
 0x237   :  { %1094 = vrot.lane.b32.xlu1 %v2226_v1, %s2182_s0 }
 0x23b   :  { %1098 = vrot.lane.b32.xlu1 %v2246_v4, %s2182_s0 }
 0x23f   :  { %500 = vadd.xlane.f32.xlu0 %v2647_v11 }
 0x245   :  { %v479_v39 = vpop.xlane.xlu0 %478 }
 0x246   :  { %v475_v29 = vpop.xlane.xlu1 %474  ;;  %v508_v60 = vadd.f32 1e-16, %v479_v39 }
 0x247   :  { %v506_v46 = vadd.f32 1e-16, %v475_v29 }
 0x255   :  { %711 = vrot.lane.b32.xlu0 %v2257_v6, %s2181_s28  ;;  %v481_v6 = vpop.xlane.xlu1 %480 }
 0x259   :  { %713 = vrot.lane.b32.xlu0 %v2308_v17, %s2181_s28  ;;  %v509_v17 = vadd.f32 1e-16, %v481_v6 }
 0x25b   :  { %2049 = vrcp.f32 %v509_v17 }
 0x25c   :  { %2051 = vrcp.f32 %v506_v46 }
 0x25d   :  { %683 = vrot.lane.b32.xlu0 %v2265_v9, %s2181_s28  ;;  %2053 = vrcp.f32 %v508_v60  ;;  %v740_v60 = vsel %vm3233_vm14, %v2571_v42, 0  ;;  %vm3237_vm14 = vmmov %vm3236_vm0 }
 0x261   :  { %687 = vrot.lane.b32.xlu0 %v2328_v24, %s2181_s28 }
 0x265   :  { %691 = vrot.lane.b32.xlu0 %v2348_v30, %s2181_s28  ;;  %v2050_v50 = vpop.eup %2049 }
 0x266   :  { %v2052_v51 = vpop.eup %2051  ;;  %v541_v19 = vmul.f32 %v2050_v50, %v2581_v2 }
 0x267   :  { %v2054_v13 = vpop.eup %2053  ;;  %v538_v47 = vmul.f32 %v2052_v51, %v2577_v62  ;;  %v743_v51 = vsel %vm3235_vm15, %v2584_v18, 0  ;;  %vm3239_vm15 = vmmov %vm3236_vm0 }
 0x268   :  { %v540_v58 = vmul.f32 %v2054_v13, %v2575_v61 }
 0x269   :  { %695 = vrot.lane.b32.xlu0 %v2368_v36, %s2181_s28 }
 0x26a   :  { %v555_v39 = vpack.c.bf16 %v541_v19, %v540_v58 }
 0x26d   :  { %1092 = vrot.lane.b32.xlu0 %v2221_v0, %s2182_s0 }
 0x271   :  { %1096 = vrot.lane.b32.xlu0 %v2241_v3, %s2182_s0 }
 0x275   :  { %1100 = vrot.lane.b32.xlu0 %v2270_v10, %s2182_s0 }
 0x27f   :  { %v477_v9 = vpop.xlane.xlu0 %476 }
 0x280   :  { %v507_v24 = vadd.f32 1e-16, %v477_v9 }
 0x282   :  { %2055 = vrcp.f32 %v507_v24 }
 0x283   :  { %v487_v30 = vpop.xlane.xlu1 %486  ;;  %v485_v59 = vpop.xlane.xlu0 %484 }
 0x284   :  { %v511_v21 = vadd.f32 1e-16, %v485_v59  ;;  %v512_v8 = vadd.f32 1e-16, %v487_v30 }
 0x286   :  { %2057 = vrcp.f32 %v511_v21 }
 0x287   :  { %v483_v36 = vpop.xlane.xlu1 %482 }
 0x288   :  { %v510_v25 = vadd.f32 1e-16, %v483_v36 }
 0x28a   :  { %2059 = vrcp.f32 %v510_v25 }
 0x28b   :  { %v489_v40 = vpop.xlane.xlu1 %488  ;;  %2061 = vrcp.f32 %v512_v8  ;;  %v495_v46 = vpop.xlane.xlu0 %494 }
 0x28c   :  { %v2056_v54 = vpop.eup %2055  ;;  %v513_v48 = vadd.f32 1e-16, %v489_v40 }
 0x28d   :  { %v539_v57 = vmul.f32 %v2056_v54, %v2592_v26  ;;  %v516_v26 = vadd.f32 1e-16, %v495_v46  ;;  %v746_v54 = vsel %vm3237_vm14, %v2662_v23, 0  ;;  %vm3240_vm14 = vmmov %vm3236_vm0 }
 0x28e   :  { %2063 = vrcp.f32 %v513_v48 }
 0x28f   :  { %v491_v29 = vpop.xlane.xlu1 %490  ;;  %v554_v6 = vpack.c.bf16 %v539_v57, %v538_v47 }
 0x290   :  { %v2058_v17 = vpop.eup %2057  ;;  %v514_v24 = vadd.f32 1e-16, %v491_v29 }
 0x291   :  { %1818 = vmatprep.mubr.bf16.mxu1 %v554_v6  ;;  %v543_v30 = vmul.f32 %v2058_v17, %v2597_v20 }
 0x292   :  { %1819 = vmatmul.mubr.bf16.vlgmr.msra.gmra.mrb[0].mxu1 %v555_v39 }
 0x293   :  { %1835 = vmatpush3.bf16.xpose.msra.mxu1 %v740_v60  ;;  %v497_v9 = vpop.xlane.xlu1 %496 }
 0x294   :  { %v2060_v2 = vpop.eup %2059  ;;  %v517_v62 = vadd.f32 1e-16, %v497_v9  ;;  %1947 = vmatprep.subr.msk.bf16.mxu1 %vm3234_vm12, %v2584_v18  ;;  %vm3238_vm12 = vmmov %vm3236_vm0 }
 0x295   :  { %v542_v61 = vmul.f32 %v2060_v2, %v2604_v49  ;;  %v2062_v59 = vpop.eup %2061 }
 0x296   :  { %2065 = vrcp.f32 %v517_v62  ;;  %v544_v25 = vmul.f32 %v2062_v59, %v2599_v34 }
 0x297   :  { %v493_v21 = vpop.xlane.xlu1 %492  ;;  %v556_v36 = vpack.c.bf16 %v543_v30, %v542_v61  ;;  %2067 = vrcp.f32 %v514_v24  ;;  %v499_v39 = vpop.xlane.xlu0 %498 }
 0x298   :  { %v2064_v8 = vpop.eup %2063  ;;  %v515_v42 = vadd.f32 1e-16, %v493_v21  ;;  %2069 = vrcp.f32 %v516_v26 }
 0x299   :  { %1822 = vmatprep.mubr.bf16.mxu1 %v556_v36  ;;  %v545_v50 = vmul.f32 %v2064_v8, %v2609_v15 }
 0x29a   :  { %2071 = vrcp.f32 %v515_v42 }
 0x29b   :  { %1837 = vmatpush3.bf16.xpose.msra.mxu1 %v743_v51  ;;  %v557_v49 = vpack.c.bf16 %v545_v50, %v544_v25  ;;  %v503_v20 = vpop.xlane.xlu1 %502  ;;  %v710_v17 = vpop.permute.xlu0 %709 }
 0x29c   :  { %1948 = vmatprep.subr.msk.bf16.mxu1 %vm3236_vm0, %v2662_v23  ;;  %v749_v23 = vsel %vm3239_vm15, %v2664_v35, 0  ;;  %v520_v46 = vadd.f32 1e-16, %v503_v20  ;;  %vm3243_vm15 = vmmov %vm3236_vm0 }
 0x29d   :  { %1823 = vmatmul.mubr.bf16.gmra.mrb[4].mxu1 %v557_v49 }
 0x29f   :  { %v505_v15 = vpop.xlane.xlu1 %504 }
 0x2a0   :  { %v2066_v13 = vpop.eup %2065 }
 0x2a1   :  { %v2068_v40 = vpop.eup %2067  ;;  %v549_v18 = vmul.f32 %v2066_v13, %v2619_v55 }
 0x2a2   :  { %v2070_v48 = vpop.eup %2069  ;;  %v546_v19 = vmul.f32 %v2068_v40, %v2616_v22  ;;  %v521_v22 = vadd.f32 1e-16, %v505_v15 }
 0x2a3   :  { %1839 = vmatpush3.bf16.xpose.msra.mxu1 %v746_v54  ;;  %v548_v57 = vmul.f32 %v2070_v48, %v2611_v16  ;;  %v708_v6 = vpop.permute.xlu1 %707  ;;  %v755_v16 = vsel %vm3242_vm13, %v710_v17, 0  ;;  %vm3245_vm13 = vmmov %vm3236_vm0 }
 0x2a4   :  { %v2072_v34 = vpop.eup %2071  ;;  %1949 = vmatprep.subr.msk.bf16.mxu1 %vm3238_vm12, %v2664_v35  ;;  %v752_v55 = vsel %vm3240_vm14, %v708_v6, 0  ;;  %vm3241_vm12 = vmmov %vm3236_vm0  ;;  %2073 = vrcp.f32 %v521_v22 }
 0x2a5   :  { %v547_v47 = vmul.f32 %v2072_v34, %v2622_v32  ;;  %v559_v29 = vpack.c.bf16 %v549_v18, %v548_v57  ;;  %v518_v32 = vadd.f32 1e-16, %v499_v39  ;;  %vm3244_vm14 = vmmov %vm3236_vm0 }
 0x2a7   :  { %v558_v58 = vpack.c.bf16 %v547_v47, %v546_v19  ;;  %2075 = vrcp.f32 %v518_v32  ;;  %v686_v49 = vpop.permute.xlu1 %685 }
 0x2a8   :  { %2077 = vrcp.f32 %v520_v46 }
 0x2a9   :  { %1826 = vmatprep.mubr.bf16.mxu1 %v558_v58 }
 0x2aa   :  { %1827 = vmatmul.mubr.bf16.gmra.mrb[8].mxu1 %v559_v29 }
 0x2ab   :  { %1841 = vmatpush3.bf16.xpose.msra.mxu1 %v749_v23 }
 0x2ac   :  { %1950 = vmatprep.subr.msk.bf16.mxu1 %vm3236_vm0, %v708_v6 }
 0x2ae   :  { %v2074_v62 = vpop.eup %2073 }
 0x2af   :  { %v553_v21 = vmul.f32 %v2074_v62, %v2631_v27  ;;  %v690_v27 = vpop.permute.xlu1 %689 }
 0x2b1   :  { %v2076_v26 = vpop.eup %2075 }
 0x2b2   :  { %v2078_v30 = vpop.eup %2077  ;;  %v550_v36 = vmul.f32 %v2076_v26, %v2624_v33 }
 0x2b3   :  { %1843 = vmatpush3.bf16.xpose.msra.mxu1 %v752_v55  ;;  %v552_v42 = vmul.f32 %v2078_v30, %v2628_v37  ;;  %v694_v37 = vpop.permute.xlu1 %693 }
 0x2b4   :  { %1951 = vmatprep.subr.msk.bf16.mxu1 %vm3241_vm12, %v710_v17  ;;  %vm3246_vm12 = vmmov %vm3236_vm0 }
 0x2b5   :  { %v561_v50 = vpack.c.bf16 %v553_v21, %v552_v42 }
 0x2b7   :  { %v698_v13 = vpop.permute.xlu1 %697 }
 0x2bb   :  { %1845 = vmatpush3.bf16.xpose.msra.mxu1 %v755_v16  ;;  %v1095_v10 = vpop.permute.xlu1 %1094 }
 0x2bf   :  { %v1099_v19 = vpop.permute.xlu1 %1098 }
 0x2cc   :  { %v501_v60 = vpop.xlane.xlu0 %500 }
 0x2cd   :  { %v519_v35 = vadd.f32 1e-16, %v501_v60 }
 0x2cf   :  { %2079 = vrcp.f32 %v519_v35 }
 0x2d0   :  { %v712_v9 = vpop.permute.xlu0 %711 }
 0x2d1   :  { %v758_v2 = vsel %vm3243_vm15, %v712_v9, 0  ;;  %1952 = vmatprep.subr.msk.bf16.mxu1 %vm3236_vm0, %v712_v9  ;;  %vm3247_vm15 = vmmov %vm3236_vm0 }
 0x2d2   :  { %1847 = vmatpush3.bf16.xpose.msra.mxu1 %v758_v2 }
 0x2d4   :  { %v714_v24 = vpop.permute.xlu0 %713 }
 0x2d5   :  { %1953 = vmatprep.subr.msk.bf16.mxu1 %vm3244_vm14, %v714_v24  ;;  %v761_v61 = vsel %vm3245_vm13, %v714_v24, 0  ;;  %vm3248_vm14 = vmmov %vm3236_vm0 }
 0x2d6   :  { %vm3249_vm13 = vmmov %vm3236_vm0 }
 0x2d8   :  { %v684_v51 = vpop.permute.xlu0 %683 }
 0x2d9   :  { %v2080_v59 = vpop.eup %2079 }
 0x2da   :  { %v551_v8 = vmul.f32 %v2080_v59, %v2647_v11  ;;  %1849 = vmatpush3.bf16.xpose.msra.mxu1 %v761_v61 }
 0x2dc   :  { %v560_v25 = vpack.c.bf16 %v551_v8, %v550_v36  ;;  %v688_v20 = vpop.permute.xlu0 %687 }
 0x2de   :  { %1830 = vmatprep.mubr.bf16.mxu1 %v560_v25 }
 0x2df   :  { %1831 = vmatmul.mubr.bf16.gmra.mrb[12].mxu1 %v561_v50 }
 0x2e0   :  { %1850 = vmatprep.mubr.msk.bf16.mxu1 %vm3246_vm12, %v684_v51  ;;  %v692_v33 = vpop.permute.xlu0 %691  ;;  %vm3252_vm12 = vmmov %vm3236_vm0 }
 0x2e4   :  { %v696_v11 = vpop.permute.xlu0 %695 }
 0x2e7   :  { %1851 = vmatmul.mubr.msk.bf16.vlgmr.msra.gmra.mrb[16].mxu1 %vm3247_vm15, %v686_v49 }
 0x2e8   :  { %1854 = vmatprep.mubr.msk.bf16.mxu1 %vm3236_vm0, %v688_v20  ;;  %v1093_v4 = vpop.permute.xlu0 %1092 }
 0x2e9   :  { %1866 = vmatprep.subr.bf16.mxu0 %v1093_v4  ;;  %1922 = vmatprep.subr.bf16.mxu1 %v1093_v4 }
 0x2ea   :  { %1867 = vmatpush3.bf16.msra.mxu0 %v1093_v4  ;;  %1930 = vmatpush3.bf16.msra.mxu1 %v1093_v4 }
 0x2eb   :  { %1868 = vmatprep.subr.bf16.mxu0 %v1095_v10  ;;  %1923 = vmatprep.subr.bf16.mxu1 %v1095_v10 }
 0x2ec   :  { %v1097_v15 = vpop.permute.xlu0 %1096 }
 0x2ee   :  { %1869 = vmatpush3.bf16.msra.mxu0 %v1095_v10  ;;  %1931 = vmatpush3.bf16.msra.mxu1 %v1095_v10 }
 0x2ef   :  { %1855 = vmatmul.mubr.msk.bf16.gmra.mrb[20].mxu1 %vm3248_vm14, %v690_v27  ;;  %1870 = vmatprep.subr.bf16.mxu0 %v1097_v15 }
 0x2f0   :  { %1858 = vmatprep.mubr.msk.bf16.mxu1 %vm3249_vm13, %v692_v33  ;;  %1924 = vmatprep.subr.bf16.mxu1 %v1097_v15  ;;  %v1101_v29 = vpop.permute.xlu0 %1100 }
 0x2f2   :  { %1871 = vmatpush3.bf16.msra.mxu0 %v1097_v15  ;;  %1932 = vmatpush3.bf16.msra.mxu1 %v1097_v15 }
 0x2f3   :  { %1872 = vmatprep.subr.bf16.mxu0 %v1099_v19  ;;  %1925 = vmatprep.subr.bf16.mxu1 %v1099_v19 }
 0x2f6   :  { %1873 = vmatpush3.bf16.msra.mxu0 %v1099_v19  ;;  %1933 = vmatpush3.bf16.msra.mxu1 %v1099_v19 }
 0x2f7   :  { %1859 = vmatmul.mubr.msk.bf16.gmra.mrb[24].mxu1 %vm3250_vm10, %v694_v37  ;;  %1874 = vmatprep.subr.bf16.mxu0 %v1101_v29 }
 0x2f8   :  { %1862 = vmatprep.mubr.msk.bf16.mxu1 %vm3251_vm11, %v696_v11  ;;  %1926 = vmatprep.subr.bf16.mxu1 %v1101_v29 }
 0x2fa   :  { %1875 = vmatpush3.bf16.msra.mxu0 %v1101_v29  ;;  %1934 = vmatpush3.bf16.msra.mxu1 %v1101_v29 }
 0x2ff   :  { %1863 = vmatmul.mubr.msk.bf16.gmra.mrb[28].mxu1 %vm3252_vm12, %v698_v13 }
 0x365   :  { %v2722_v40 = vpop.f32.mrb[0].mxu1 }
 0x366   :  { %v2724_v54 = vpop.f32.mrb[1].mxu1 }
 0x367   :  { %v2726_v48 = vpop.f32.mrb[2].mxu1 }
 0x368   :  { %v2728_v34 = vpop.f32.mrb[3].mxu1 }
 0x370   :  { %v2730_v0 = vpop.f32.mrb[4].mxu1 }
 0x371   :  { %v2732_v1 = vpop.f32.mrb[5].mxu1 }
 0x372   :  { %v2734_v18 = vpop.f32.mrb[6].mxu1 }
 0x373   :  { %v2736_v3 = vpop.f32.mrb[7].mxu1 }
 0x37d   :  { %v2738_v47 = vpop.f32.mrb[8].mxu1 }
 0x37e   :  { %v2740_v57 = vpop.f32.mrb[9].mxu1 }
 0x37f   :  { %v2742_v58 = vpop.f32.mrb[10].mxu1 }
 0x380   :  { %v2744_v6 = vpop.f32.mrb[11].mxu1 }
 0x3b2   :  { %v2746_v23 = vpop.f32.mrb[12].mxu1 }
 0x3b3   :  { %v2748_v39 = vpop.f32.mrb[13].mxu1 }
 0x3b4   :  { %v2750_v55 = vpop.f32.mrb[14].mxu1 }
 0x3b5   :  { %v2752_v17 = vpop.f32.mrb[15].mxu1 }
 0x3ba   :  { %v1852_v16 = vpop.f32.mrb[16].mxu1 }
 0x3bb   :  { %v862_v22 = vmul.f32 0.17677669, %v1852_v16  ;;  %v797_v32 = vpop.f32.mrb[17].mxu1 }
 0x3bc   :  { %v1853_v46 = vpop.f32.mrb[18].mxu1  ;;  %v860_v60 = vmul.f32 0.17677669, %v797_v32  ;;  %v3259_v32 = vld [vmem:[#allocation2_spill] sm:$0xff] }
 0x3bd   :  { %v800_v35 = vpop.f32.mrb[19].mxu1  ;;  %v2756_v9 = vsel %vm2390_vm1, %v862_v22, -1e+30  ;;  %v863_v62 = vmul.f32 0.17677669, %v1853_v46  ;;  %vm3253_vm1 = vnez %v3220_v7 }
 0x3be   :  { %v861_v2 = vmul.f32 0.17677669, %v800_v35  ;;  %896 = vmax.xlane.f32.xlu0 %v2756_v9  ;;  %v2766_v26 = vsel %vm2394_vm2, %v860_v60, -1e+30  ;;  %vm3254_vm2 = vnez %v3218_v12 }
 0x3bf   :  { %v2771_v36 = vsel %vm2407_vm3, %v863_v62, -1e+30  ;;  %vm3255_vm3 = vnez %v3224_v38 }
 0x3c0   :  { %v2761_v24 = vsel %vm2444_vm5, %v861_v2, -1e+30  ;;  %vm3257_vm5 = vnez %v3228_v14 }
 0x3c1   :  { %894 = vmax.xlane.f32.xlu1 %v2761_v24 }
 0x3c2   :  { %892 = vmax.xlane.f32.xlu0 %v2766_v26  ;;  %v1856_v61 = vpop.f32.mrb[20].mxu1 }
 0x3c3   :  { %v866_v52 = vmul.f32 0.17677669, %v1856_v61  ;;  %v813_v30 = vpop.f32.mrb[21].mxu1 }
 0x3c4   :  { %v1857_v59 = vpop.f32.mrb[22].mxu1  ;;  %v864_v42 = vmul.f32 0.17677669, %v813_v30 }
 0x3c5   :  { %v867_v21 = vmul.f32 0.17677669, %v1857_v59  ;;  %v816_v41 = vpop.f32.mrb[23].mxu1  ;;  %v2780_v25 = vsel %vm2452_vm7, %v866_v52, -1e+30  ;;  %vm3260_vm7 = vnez %v3259_v32 }
 0x3c6   :  { %898 = vmax.xlane.f32.xlu0 %v2771_v36  ;;  %v865_v8 = vmul.f32 0.17677669, %v816_v41  ;;  %v2790_v31 = vsel %vm2486_vm9, %v864_v42, -1e+30 }
 0x3c7   :  { %v2776_v56 = vsel %vm2433_vm4, %v867_v21, -1e+30  ;;  %vm3256_vm4 = vnez %v3222_v28  ;;  %v2145_v28 = vld [vmem:[%s3183_s2 + $0x28] sm:$0xff]  }
 0x3c8   :  { %906 = vmax.xlane.f32.xlu1 %v2776_v56  ;;  %v2785_v63 = vsel %vm2448_vm6, %v865_v8, -1e+30  ;;  %vm3258_vm6 = vnez %v3226_v44 }
 0x3ca   :  { %904 = vmax.xlane.f32.xlu0 %v2780_v25  ;;  %v1860_v50 = vpop.f32.mrb[24].mxu1 }
 0x3cb   :  { %v870_v51 = vmul.f32 0.17677669, %v1860_v50  ;;  %v829_v49 = vpop.f32.mrb[25].mxu1 }
 0x3cc   :  { %902 = vmax.xlane.f32.xlu1 %v2785_v63  ;;  %v1861_v45 = vpop.f32.mrb[26].mxu1  ;;  %v868_v43 = vmul.f32 0.17677669, %v829_v49 }
 0x3cd   :  { %v871_v20 = vmul.f32 0.17677669, %v1861_v45  ;;  %v832_v27 = vpop.f32.mrb[27].mxu1  ;;  %v2800_v11 = vsel %vm3253_vm1, %v870_v51, -1e+30 }
 0x3ce   :  { %900 = vmax.xlane.f32.xlu0 %v2790_v31  ;;  %v869_v33 = vmul.f32 0.17677669, %v832_v27  ;;  %v2810_v53 = vsel %vm3255_vm3, %v868_v43, -1e+30 }
 0x3cf   :  { %v2796_v37 = vsel %vm2473_vm8, %v871_v20, -1e+30 }
 0x3d0   :  { %914 = vmax.xlane.f32.xlu1 %v2796_v37  ;;  %v2805_v5 = vsel %vm3254_vm2, %v869_v33, -1e+30 }
 0x3d2   :  { %912 = vmax.xlane.f32.xlu0 %v2800_v11  ;;  %v1864_v13 = vpop.f32.mrb[28].mxu1 }
 0x3d3   :  { %v874_v4 = vmul.f32 0.17677669, %v1864_v13  ;;  %v845_v10 = vpop.f32.mrb[29].mxu1 }
 0x3d4   :  { %910 = vmax.xlane.f32.xlu1 %v2805_v5  ;;  %v1865_v7 = vpop.f32.mrb[30].mxu1  ;;  %v872_v12 = vmul.f32 0.17677669, %v845_v10 }
 0x3d5   :  { %v875_v15 = vmul.f32 0.17677669, %v1865_v7  ;;  %v848_v19 = vpop.f32.mrb[31].mxu1  ;;  %v2820_v22 = vsel %vm3257_vm5, %v874_v4, -1e+30 }
 0x3d6   :  { %908 = vmax.xlane.f32.xlu0 %v2810_v53  ;;  %v873_v29 = vmul.f32 0.17677669, %v848_v19  ;;  %v2830_v46 = vsel %vm3260_vm7, %v872_v12, -1e+30 }
 0x3d7   :  { %v2816_v16 = vsel %vm3256_vm4, %v875_v15, -1e+30 }
 0x3d8   :  { %922 = vmax.xlane.f32.xlu1 %v2816_v16  ;;  %v2825_v38 = vsel %vm3258_vm6, %v873_v29, -1e+30 }
 0x3da   :  { %920 = vmax.xlane.f32.xlu0 %v2820_v22 }
 0x3dc   :  { %918 = vmax.xlane.f32.xlu1 %v2825_v38 }
 0x3de   :  { %916 = vmax.xlane.f32.xlu0 %v2830_v46 }
 0x3f4   :  { %1102 = vrot.lane.b32.xlu0 %v2145_v28, %s2182_s0 }
 0x44b   :  { %v897_v14 = vpop.xlane.xlu0 %896 }
 0x44c   :  { %vm926_vm8 = vcmp.lt.f32.partialorder %v897_v14, -1e+29 }
 0x44d   :  { %v942_v44 = vsel %vm926_vm8, 0.0, %v897_v14  ;;  %vm3261_vm8 = vcmask 261120  }
 0x44e   :  { %v958_v60 = vsub.f32 %v2756_v9, %v942_v44  ;;  %v895_v35 = vpop.xlane.xlu1 %894 }
 0x44f   :  { %v893_v2 = vpop.xlane.xlu0 %892  ;;  %vm925_vm9 = vcmp.lt.f32.partialorder %v895_v35, -1e+29 }
 0x450   :  { %v976_v62 = vmul.f32 1.442695, %v958_v60  ;;  %vm924_vm10 = vcmp.lt.f32.partialorder %v893_v2, -1e+29  ;;  %v941_v30 = vsel %vm925_vm9, 0.0, %v895_v35  ;;  %vm3262_vm9 = vmmov %vm3261_vm8 }
 0x451   :  { %v940_v61 = vsel %vm924_vm10, 0.0, %v893_v2  ;;  %v957_v42 = vsub.f32 %v2761_v24, %v941_v30  ;;  %vm3263_vm10 = vmmov %vm3261_vm8 }
 0x452   :  { %2081 = vpow2.f32 %v976_v62  ;;  %v956_v52 = vsub.f32 %v2766_v26, %v940_v61 }
 0x453   :  { %v899_v59 = vpop.xlane.xlu0 %898  ;;  %v974_v20 = vmul.f32 1.442695, %v957_v42 }
 0x454   :  { %v972_v21 = vmul.f32 1.442695, %v956_v52  ;;  %vm927_vm11 = vcmp.lt.f32.partialorder %v899_v59, -1e+29 }
 0x455   :  { %v943_v41 = vsel %vm927_vm11, 0.0, %v899_v59  ;;  %v907_v8 = vpop.xlane.xlu1 %906  ;;  %vm3264_vm11 = vmmov %vm3261_vm8 }
 0x456   :  { %2083 = vpow2.f32 %v972_v21  ;;  %v959_v9 = vsub.f32 %v2771_v36, %v943_v41  ;;  %vm931_vm15 = vcmp.lt.f32.partialorder %v907_v8, -1e+29 }
 0x457   :  { %v905_v50 = vpop.xlane.xlu0 %904  ;;  %v947_v27 = vsel %vm931_vm15, 0.0, %v907_v8  ;;  %vm3265_vm15 = vmmov %vm3261_vm8 }
 0x458   :  { %v978_v51 = vmul.f32 1.442695, %v959_v9  ;;  %vm930_vm0 = vcmp.lt.f32.partialorder %v905_v50, -1e+29  ;;  %v963_v36 = vsub.f32 %v2776_v56, %v947_v27 }
 0x459   :  { %v946_v49 = vsel %vm930_vm0, 0.0, %v905_v50  ;;  %v903_v45 = vpop.xlane.xlu1 %902  ;;  %vm1436_vm0 = vcmask 523264  }
 0x45a   :  { %2085 = vpow2.f32 %v978_v51  ;;  %v962_v26 = vsub.f32 %v2780_v25, %v946_v49  ;;  %vm929_vm14 = vcmp.lt.f32.partialorder %v903_v45, -1e+29  ;;  %v986_v32 = vmul.f32 1.442695, %v963_v36 }
 0x45b   :  { %v901_v33 = vpop.xlane.xlu0 %900  ;;  %2087 = vpow2.f32 %v974_v20  ;;  %v945_v10 = vsel %vm929_vm14, 0.0, %v903_v45  ;;  %vm3266_vm14 = vmmov %vm3261_vm8 }
 0x45c   :  { %v2843_v43 = vpop.eup %2081  ;;  %vm928_vm13 = vcmp.lt.f32.partialorder %v901_v33, -1e+29  ;;  %v984_v24 = vmul.f32 1.442695, %v962_v26  ;;  %v961_v29 = vsub.f32 %v2785_v63, %v945_v10  ;;  %v2146_v10 = vld [vmem:[%s3183_s2 + $0x30] sm:$0xff]  }
 0x45d   :  { %v944_v13 = vsel %vm928_vm13, 0.0, %v901_v33  ;;  %v915_v4 = vpop.xlane.xlu1 %914  ;;  %1008 = vadd.xlane.f32.xlu1 %v2843_v43  ;;  %vm3267_vm13 = vmmov %vm3261_vm8 }
 0x45e   :  { %v960_v7 = vsub.f32 %v2790_v31, %v944_v13  ;;  %2089 = vpow2.f32 %v984_v24  ;;  %vm935_vm1 = vcmp.lt.f32.partialorder %v915_v4, -1e+29  ;;  %v982_v31 = vmul.f32 1.442695, %v961_v29 }
 0x45f   :  { %v913_v15 = vpop.xlane.xlu0 %912  ;;  %v951_v63 = vsel %vm935_vm1, 0.0, %v915_v4  ;;  %vm3269_vm1 = vmmov %vm3261_vm8 }
 0x460   :  { %v2848_v19 = vpop.eup %2083  ;;  %v980_v25 = vmul.f32 1.442695, %v960_v7  ;;  %vm934_vm12 = vcmp.lt.f32.partialorder %v913_v15, -1e+29  ;;  %v2147_v7 = vld [vmem:[%s3183_s2 + $0x38] sm:$0xff]  }
 0x461   :  { %v911_v12 = vpop.xlane.xlu1 %910  ;;  %1004 = vadd.xlane.f32.xlu0 %v2848_v19  ;;  %v950_v28 = vsel %vm934_vm12, 0.0, %v913_v15  ;;  %vm3268_vm12 = vmmov %vm3261_vm8 }
 0x462   :  { %2091 = vpow2.f32 %v980_v25  ;;  %v966_v44 = vsub.f32 %v2800_v11, %v950_v28  ;;  %vm933_vm4 = vcmp.lt.f32.partialorder %v911_v12, -1e+29  ;;  %v967_v11 = vsub.f32 %v2796_v37, %v951_v63  ;;  %v2150_v63 = vld [vmem:[%s3184_s1 + $0x10] sm:$0xf] }
 0x463   :  { %v909_v14 = vpop.xlane.xlu0 %908  ;;  %2093 = vpow2.f32 %v986_v32  ;;  %v949_v42 = vsel %vm933_vm4, 0.0, %v911_v12  ;;  %vm3272_vm4 = vmmov %vm3269_vm1 }
 0x464   :  { %v2852_v56 = vpop.eup %2085  ;;  %vm932_vm2 = vcmp.lt.f32.partialorder %v909_v14, -1e+29  ;;  %2095 = vpow2.f32 %v982_v31  ;;  %v992_v21 = vmul.f32 1.442695, %v966_v44  ;;  %v965_v37 = vsub.f32 %v2805_v5, %v949_v42  ;;  %v2148_v44 = vld [vmem:[%s3184_s1] sm:$0xf] }
 0x465   :  { %v948_v60 = vsel %vm932_vm2, 0.0, %v909_v14  ;;  %v923_v35 = vpop.xlane.xlu1 %922  ;;  %1010 = vadd.xlane.f32.xlu1 %v2852_v56  ;;  %v2857_v52 = vpop.eup %2087  ;;  %v2155_v42 = vld [vmem:[%s3184_s1 + $0x38] sm:$0xf]  ;;  %vm3270_vm2 = vmmov %vm3269_vm1 }
 0x466   :  { %v964_v2 = vsub.f32 %v2810_v53, %v948_v60  ;;  %vm939_vm3 = vcmp.lt.f32.partialorder %v923_v35, -1e+29 }
 0x467   :  { %v955_v62 = vsel %vm939_vm3, 0.0, %v923_v35  ;;  %v921_v61 = vpop.xlane.xlu0 %920  ;;  %vm3271_vm3 = vmmov %vm3269_vm1 }
 0x468   :  { %v988_v30 = vmul.f32 1.442695, %v964_v2  ;;  %v971_v59 = vsub.f32 %v2816_v16, %v955_v62  ;;  %v2862_v53 = vpop.eup %2089  ;;  %v994_v16 = vmul.f32 1.442695, %v967_v11  ;;  %vm938_vm7 = vcmp.lt.f32.partialorder %v921_v61, -1e+29 }
 0x469   :  { %v919_v41 = vpop.xlane.xlu1 %918  ;;  %1006 = vadd.xlane.f32.xlu1 %v2857_v52  ;;  %v954_v29 = vsel %vm938_vm7, 0.0, %v921_v61  ;;  %v1295_v2 = vunpack.c.l.bf16 %v2150_v63  ;;  %v2151_v62 = vld [vmem:[%s3184_s1 + $0x18] sm:$0xf]  ;;  %v2153_v11 = vld [vmem:[%s3184_s1 + $0x28] sm:$0xf]  ;;  %vm3275_vm7 = vmmov %vm3269_vm1 }
 0x46a   :  { %2097 = vpow2.f32 %v988_v30  ;;  %v1002_v8 = vmul.f32 1.442695, %v971_v59  ;;  %vm937_vm5 = vcmp.lt.f32.partialorder %v919_v41, -1e+29  ;;  %v970_v12 = vsub.f32 %v2820_v22, %v954_v29  ;;  %v2149_v22 = vld [vmem:[%s3184_s1 + $0x8] sm:$0xf] }
 0x46b   :  { %v953_v9 = vsel %vm937_vm5, 0.0, %v919_v41  ;;  %v917_v50 = vpop.xlane.xlu0 %916  ;;  %2099 = vpow2.f32 %v992_v21  ;;  %v1294_v60 = vunpack.c.l.bf16 %v2149_v22  ;;  %v1296_v61 = vunpack.c.l.bf16 %v2151_v62  ;;  %v2152_v30 = vld [vmem:[%s3184_s1 + $0x20] sm:$0xf]  ;;  %v2154_v41 = vld [vmem:[%s3184_s1 + $0x30] sm:$0xf]  ;;  %vm3273_vm5 = vmmov %vm3269_vm1 }
 0x46c   :  { %v2864_v51 = vpop.eup %2091  ;;  %v969_v49 = vsub.f32 %v2825_v38, %v953_v9  ;;  %2101 = vpow2.f32 %v1002_v8  ;;  %v990_v38 = vmul.f32 1.442695, %v965_v37  ;;  %vm936_vm6 = vcmp.lt.f32.partialorder %v917_v50, -1e+29  ;;  %v2157_v37 = vld [vmem:[%s3184_s1 + $0x48] sm:$0xf] }
 0x46d   :  { %1016 = vadd.xlane.f32.xlu1 %v2862_v53  ;;  %1012 = vadd.xlane.f32.xlu0 %v2864_v51  ;;  %v2870_v26 = vpop.eup %2093  ;;  %2103 = vpow2.f32 %v994_v16  ;;  %v952_v15 = vsel %vm936_vm6, 0.0, %v917_v50  ;;  %v1000_v28 = vmul.f32 1.442695, %v970_v12  ;;  %v1297_v59 = vunpack.c.l.bf16 %v2152_v30  ;;  %vm3274_vm6 = vmmov %vm3269_vm1 }
 0x46e   :  { %v998_v45 = vmul.f32 1.442695, %v969_v49  ;;  %v2873_v27 = vpop.eup %2095  ;;  %v968_v25 = vsub.f32 %v2830_v46, %v952_v15  ;;  %v1293_v46 = vunpack.c.l.bf16 %v2148_v44  ;;  %v1298_v21 = vunpack.c.l.bf16 %v2153_v11  ;;  %v2156_v49 = vld [vmem:[%s3184_s1 + $0x40] sm:$0xf]  ;;  %v2159_v15 = vld [vmem:[%s3184_s1 + $0x58] sm:$0xf] }
 0x46f   :  { %v1103_v20 = vpop.permute.xlu0 %1102  ;;  %v1299_v8 = vunpack.c.l.bf16 %v2154_v41  ;;  %v1300_v9 = vunpack.c.l.bf16 %v2155_v42  ;;  %v1962_v50 = vpack.i.bf16 %v1296_v61, %v1295_v2  ;;  %v1301_v16 = vunpack.c.l.bf16 %v2156_v49 }
 0x470   :  { %1876 = vmatprep.subr.bf16.mxu0 %v1103_v20  ;;  %1927 = vmatprep.subr.bf16.mxu1 %v1103_v20  ;;  %2105 = vpow2.f32 %v998_v45  ;;  %v996_v32 = vmul.f32 1.442695, %v968_v25  ;;  %v1957_v35 = vpack.i.bf16 %v1294_v60, %v1293_v46  ;;  %v1302_v45 = vunpack.c.l.bf16 %v2157_v37 }
 0x471   :  { %1018 = vadd.xlane.f32.xlu1 %v2870_v26  ;;  %1877 = vmatpush3.bf16.msra.mxu0 %v1103_v20  ;;  %2107 = vpow2.f32 %v990_v38  ;;  %v1972_v38 = vpack.i.bf16 %v1300_v9, %v1299_v8  ;;  %v1304_v25 = vunpack.c.l.bf16 %v2159_v15 }
 0x472   :  { %1935 = vmatpush3.bf16.msra.mxu1 %v1103_v20  ;;  %2109 = vpow2.f32 %v996_v32  ;;  %v1967_v20 = vpack.i.bf16 %v1298_v21, %v1297_v59  ;;  %v1977_v29 = vpack.i.bf16 %v1302_v45, %v1301_v16 }
 0x473   :  { %2111 = vpow2.f32 %v1000_v28 }
 0x474   :  { %v2875_v33 = vpop.eup %2097 }
 0x475   :  { %1014 = vadd.xlane.f32.xlu1 %v2873_v27  ;;  %1020 = vadd.xlane.f32.xlu0 %v2875_v33  ;;  %v2879_v5 = vpop.eup %2099 }
 0x476   :  { %v2881_v24 = vpop.eup %2101 }
 0x477   :  { %v2885_v13 = vpop.eup %2103 }
 0x479   :  { %1024 = vadd.xlane.f32.xlu1 %v2879_v5  ;;  %1034 = vadd.xlane.f32.xlu0 %v2881_v24 }
 0x47a   :  { %v2887_v4 = vpop.eup %2105 }
 0x47b   :  { %v2891_v36 = vpop.eup %2107 }
 0x47c   :  { %v2904_v14 = vpop.eup %2109 }
 0x47d   :  { %1026 = vadd.xlane.f32.xlu1 %v2885_v13  ;;  %1030 = vadd.xlane.f32.xlu0 %v2887_v4  ;;  %v2907_v31 = vpop.eup %2111 }
 0x481   :  { %1022 = vadd.xlane.f32.xlu1 %v2891_v36 }
 0x492   :  { %1104 = vrot.lane.b32.xlu1 %v2146_v10, %s2182_s0  ;;  %v2158_v10 = vld [vmem:[%s3184_s1 + $0x50] sm:$0xf] }
 0x493   :  { %1106 = vrot.lane.b32.xlu0 %v2147_v7, %s2182_s0  ;;  %v1303_v7 = vunpack.c.l.bf16 %v2158_v10 }
 0x495   :  { %v1982_v12 = vpack.i.bf16 %v1304_v25, %v1303_v7 }
 0x497   :  { %1958 = vrot.lane.b32.xlu0 %v1957_v35, %s2180_s25 }
 0x49b   :  { %1968 = vrot.lane.b32.xlu0 %v1967_v20, %s2180_s25 }
 0x49f   :  { %1978 = vrot.lane.b32.xlu0 %v1977_v29, %s2180_s25 }
 0x4b6   :  { %1028 = vadd.xlane.f32.xlu1 %v2904_v14 }
 0x4ba   :  { %1032 = vadd.xlane.f32.xlu1 %v2907_v31 }
 0x4cb   :  { %1963 = vrot.lane.b32.xlu1 %v1962_v50, %s2180_s25 }
 0x4cf   :  { %1973 = vrot.lane.b32.xlu1 %v1972_v38, %s2180_s25 }
 0x4d3   :  { %1983 = vrot.lane.b32.xlu1 %v1982_v12, %s2180_s25 }
 0x4ea   :  { %v1009_v32 = vpop.xlane.xlu1 %1008 }
 0x4eb   :  { %v1038_v42 = vadd.f32 1e-16, %v1009_v32 }
 0x4ee   :  { %v1005_v28 = vpop.xlane.xlu0 %1004 }
 0x4ef   :  { %v1036_v46 = vadd.f32 1e-16, %v1005_v28 }
 0x4f1   :  { %2113 = vrcp.f32 %v1036_v46 }
 0x4f2   :  { %v1011_v44 = vpop.xlane.xlu1 %1010 }
 0x4f3   :  { %v1039_v11 = vadd.f32 1e-16, %v1011_v44 }
 0x4f6   :  { %v1007_v22 = vpop.xlane.xlu1 %1006 }
 0x4f7   :  { %v1037_v60 = vadd.f32 1e-16, %v1007_v22 }
 0x4f9   :  { %2115 = vrcp.f32 %v1037_v60 }
 0x4fa   :  { %v1017_v35 = vpop.xlane.xlu1 %1016  ;;  %v1013_v63 = vpop.xlane.xlu0 %1012  ;;  %2117 = vrcp.f32 %v1039_v11 }
 0x4fb   :  { %v2114_v62 = vpop.eup %2113  ;;  %v1040_v49 = vadd.f32 1e-16, %v1013_v63 }
 0x4fc   :  { %v1068_v21 = vmul.f32 %v2114_v62, %v2848_v19  ;;  %v1042_v19 = vadd.f32 1e-16, %v1017_v35 }
 0x4fe   :  { %v1019_v2 = vpop.xlane.xlu1 %1018 }
 0x4ff   :  { %v1043_v37 = vadd.f32 1e-16, %v1019_v2 }
 0x502   :  { %v1015_v61 = vpop.xlane.xlu1 %1014  ;;  %v1021_v30 = vpop.xlane.xlu0 %1020 }
 0x503   :  { %v2116_v59 = vpop.eup %2115  ;;  %v1041_v8 = vadd.f32 1e-16, %v1015_v61  ;;  %v1044_v20 = vadd.f32 1e-16, %v1021_v30 }
 0x504   :  { %v1069_v41 = vmul.f32 %v2116_v59, %v2857_v52  ;;  %v2118_v25 = vpop.eup %2117 }
 0x505   :  { %2119 = vrcp.f32 %v1041_v8  ;;  %v1071_v46 = vmul.f32 %v2118_v25, %v2852_v56 }
 0x506   :  { %v1025_v9 = vpop.xlane.xlu1 %1024  ;;  %v1084_v50 = vpack.c.bf16 %v1069_v41, %v1068_v21  ;;  %v1035_v16 = vpop.xlane.xlu0 %1034  ;;  %2121 = vrcp.f32 %v1038_v42 }
 0x507   :  { %2123 = vrcp.f32 %v1040_v49  ;;  %v1046_v10 = vadd.f32 1e-16, %v1025_v9 }
 0x508   :  { %1882 = vmatprep.mubr.bf16.mxu0 %v1084_v50  ;;  %2125 = vrcp.f32 %v1043_v37  ;;  %v1051_v37 = vadd.f32 1e-16, %v1035_v16 }
 0x50a   :  { %v1027_v45 = vpop.xlane.xlu1 %1026  ;;  %v1031_v52 = vpop.xlane.xlu0 %1030 }
 0x50b   :  { %v1047_v38 = vadd.f32 1e-16, %v1027_v45 }
 0x50d   :  { %2127 = vrcp.f32 %v1047_v38 }
 0x50e   :  { %v1023_v7 = vpop.xlane.xlu1 %1022  ;;  %2129 = vrcp.f32 %v1044_v20  ;;  %v1107_v12 = vpop.permute.xlu0 %1106 }
 0x50f   :  { %v1045_v15 = vadd.f32 1e-16, %v1023_v7  ;;  %2131 = vrcp.f32 %v1046_v10  ;;  %v2120_v32 = vpop.eup %2119 }
 0x510   :  { %v2122_v28 = vpop.eup %2121  ;;  %v1073_v22 = vmul.f32 %v2120_v32, %v2873_v27 }
 0x511   :  { %2133 = vrcp.f32 %v1045_v15  ;;  %v2124_v44 = vpop.eup %2123  ;;  %v1070_v35 = vmul.f32 %v2122_v28, %v2843_v43  ;;  %v2013_v15 = vld [vmem:[%s3186_s4] sm:$0xff]  }
 0x512   :  { %2135 = vrcp.f32 %v1042_v19  ;;  %v1105_v29 = vpop.permute.xlu1 %1104  ;;  %v2126_v60 = vpop.eup %2125  ;;  %v1072_v2 = vmul.f32 %v2124_v44, %v2864_v51 }
 0x513   :  { %1878 = vmatprep.subr.bf16.mxu0 %v1105_v29  ;;  %1928 = vmatprep.subr.bf16.mxu1 %v1105_v29  ;;  %v1085_v61 = vpack.c.bf16 %v1071_v46, %v1070_v35  ;;  %v1075_v8 = vmul.f32 %v2126_v60, %v2870_v26 }
 0x514   :  { %1879 = vmatpush3.bf16.msra.mxu0 %v1105_v29  ;;  %1936 = vmatpush3.bf16.msra.mxu1 %v1105_v29  ;;  %v1086_v59 = vpack.c.bf16 %v1073_v22, %v1072_v2 }
 0x515   :  { %1880 = vmatprep.subr.bf16.mxu0 %v1107_v12  ;;  %1929 = vmatprep.subr.bf16.mxu1 %v1107_v12 }
 0x517   :  { %v2128_v63 = vpop.eup %2127 }
 0x518   :  { %1881 = vmatpush3.bf16.msra.mxu0 %v1107_v12  ;;  %1937 = vmatpush3.bf16.msra.mxu1 %v1107_v12  ;;  %v2130_v62 = vpop.eup %2129  ;;  %v1079_v21 = vmul.f32 %v2128_v63, %v2885_v13  ;;  %v1049_v13 = vadd.f32 1e-16, %v1031_v52 }
 0x519   :  { %v2132_v30 = vpop.eup %2131  ;;  %v1076_v27 = vmul.f32 %v2130_v62, %v2875_v33  ;;  %1898 = vmatprep.subr.bf16.mxu0 %v2013_v15 }
 0x51a   :  { %v1078_v43 = vmul.f32 %v2132_v30, %v2879_v5  ;;  %2137 = vrcp.f32 %v1049_v13 }
 0x51b   :  { %v2134_v11 = vpop.eup %2133  ;;  %1883 = vmatmul.mubr.bf16.vlgmr.msra.gmra.mrb[16].mxu0 %v1085_v61  ;;  %v2160_v61 = vld [vmem:[%s3184_s1 + $0x60] sm:$0xf] }
 0x51c   :  { %v2136_v56 = vpop.eup %2135  ;;  %1886 = vmatprep.mubr.bf16.mxu0 %v1086_v59  ;;  %v1077_v41 = vmul.f32 %v2134_v11, %v2891_v36  ;;  %v1089_v42 = vpack.c.bf16 %v1079_v21, %v1078_v43  ;;  %1899 = vmatpush3.bf16.msra.mxu0 %v2013_v15  ;;  %v1305_v30 = vunpack.c.l.bf16 %v2160_v61  ;;  %v2161_v59 = vld [vmem:[%s3184_s1 + $0x68] sm:$0xf]  ;;  %v2163_v43 = vld [vmem:[%s3184_s1 + $0x78] sm:$0xf] }
 0x51d   :  { %v1074_v9 = vmul.f32 %v2136_v56, %v2862_v53  ;;  %v1306_v11 = vunpack.c.l.bf16 %v2161_v59 }
 0x51e   :  { %v1088_v51 = vpack.c.bf16 %v1077_v41, %v1076_v27  ;;  %v2162_v27 = vld [vmem:[%s3184_s1 + $0x70] sm:$0xf] }
 0x51f   :  { %v1087_v50 = vpack.c.bf16 %v1075_v8, %v1074_v9  ;;  %v1307_v41 = vunpack.c.l.bf16 %v2162_v27  ;;  %v1308_v8 = vunpack.c.l.bf16 %v2163_v43  ;;  %v1959_v9 = vpop.permute.xlu0 %1958 }
 0x520   :  { %1890 = vmatprep.mubr.bf16.mxu1 %v1088_v51  ;;  %v1987_v51 = vpack.i.bf16 %v1306_v11, %v1305_v30 }
 0x521   :  { %1891 = vmatmul.mubr.bf16.vlgmr.msra.gmra.mrb[32].mxu1 %v1089_v42  ;;  %v1992_v42 = vpack.i.bf16 %v1308_v8, %v1307_v41 }
 0x523   :  { %1887 = vmatmul.mubr.bf16.gmra.mrb[20].mxu0 %v1087_v50  ;;  %v1969_v13 = vpop.permute.xlu0 %1968 }
 0x524   :  { %v2138_v5 = vpop.eup %2137 }
 0x525   :  { %v1081_v53 = vmul.f32 %v2138_v5, %v2887_v4  ;;  %v2014_v4 = vld [vmem:[%s3186_s4 + $0x8] sm:$0xff]  }
 0x526   :  { %1900 = vmatprep.subr.bf16.mxu0 %v2014_v4 }
 0x527   :  { %1901 = vmatpush3.bf16.msra.mxu0 %v2014_v4 }
 0x543   :  { %v1029_v49 = vpop.xlane.xlu1 %1028 }
 0x544   :  { %v1048_v45 = vadd.f32 1e-16, %v1029_v49 }
 0x546   :  { %2139 = vrcp.f32 %v1048_v45 }
 0x547   :  { %v1033_v33 = vpop.xlane.xlu1 %1032  ;;  %2141 = vrcp.f32 %v1051_v37  ;;  %v1979_v37 = vpop.permute.xlu0 %1978 }
 0x548   :  { %v1050_v36 = vadd.f32 1e-16, %v1033_v33 }
 0x54a   :  { %2143 = vrcp.f32 %v1050_v36 }
 0x54b   :  { %v1964_v50 = vpop.permute.xlu1 %1963 }
 0x54f   :  { %v1974_v49 = vpop.permute.xlu1 %1973 }
 0x550   :  { %v2140_v26 = vpop.eup %2139 }
 0x551   :  { %v1080_v20 = vmul.f32 %v2140_v26, %v2904_v14  ;;  %v2142_v38 = vpop.eup %2141  ;;  %v2015_v14 = vld [vmem:[%s3186_s4 + $0x10] sm:$0xff]  }
 0x552   :  { %v1083_v16 = vmul.f32 %v2142_v38, %v2881_v24  ;;  %1902 = vmatprep.subr.bf16.mxu0 %v2015_v14  ;;  %v2016_v24 = vld [vmem:[%s3186_s4 + $0x18] sm:$0xff]  }
 0x553   :  { %v1090_v10 = vpack.c.bf16 %v1081_v53, %v1080_v20  ;;  %1903 = vmatpush3.bf16.msra.mxu0 %v2015_v14  ;;  %v1984_v45 = vpop.permute.xlu1 %1983 }
 0x554   :  { %v2144_v19 = vpop.eup %2143  ;;  %1904 = vmatprep.subr.bf16.mxu0 %v2016_v24 }
 0x555   :  { %1894 = vmatprep.mubr.bf16.mxu1 %v1090_v10  ;;  %v1082_v52 = vmul.f32 %v2144_v19, %v2907_v31 }
 0x557   :  { %v1091_v7 = vpack.c.bf16 %v1083_v16, %v1082_v52  ;;  %1905 = vmatpush3.bf16.msra.mxu0 %v2016_v24 }
 0x559   :  { %1895 = vmatmul.mubr.bf16.gmra.mrb[36].mxu1 %v1091_v7 }
 0x5ee   :  { %v1884_v31 = vpop.f32.mrb[16].mxu0 }
 0x5ef   :  { %1233 = vrot.lane.b32.xlu0 %v1884_v31, %s2182_s0  ;;  %v1150_v25 = vpop.f32.mrb[17].mxu0 }
 0x5f0   :  { %1229 = vrot.lane.b32.xlu1 %v1150_v25, %s2182_s0  ;;  %v1885_v29 = vpop.f32.mrb[18].mxu0 }
 0x5f1   :  { %v1153_v12 = vpop.f32.mrb[19].mxu0 }
 0x5f3   :  { %1235 = vrot.lane.b32.xlu0 %v1885_v29, %s2182_s0 }
 0x5f4   :  { %v1892_v32 = vpop.f32.mrb[32].mxu1 }
 0x5f5   :  { %v1182_v28 = vpop.f32.mrb[33].mxu1 }
 0x5f6   :  { %v1888_v44 = vpop.f32.mrb[20].mxu0  ;;  %v1893_v46 = vpop.f32.mrb[34].mxu1 }
 0x5f7   :  { %v1185_v22 = vpop.f32.mrb[35].mxu1  ;;  %1231 = vrot.lane.b32.xlu0 %v1153_v12, %s2182_s0  ;;  %v1166_v60 = vpop.f32.mrb[21].mxu0 }
 0x5f8   :  { %v1889_v35 = vpop.f32.mrb[22].mxu0 }
 0x5f9   :  { %1243 = vrot.lane.b32.xlu1 %v1889_v35, %s2182_s0  ;;  %v1169_v63 = vpop.f32.mrb[23].mxu0 }
 0x5fb   :  { %1241 = vrot.lane.b32.xlu0 %v1888_v44, %s2182_s0 }
 0x5fd   :  { %1239 = vrot.lane.b32.xlu1 %v1169_v63, %s2182_s0 }
 0x5ff   :  { %1237 = vrot.lane.b32.xlu0 %v1166_v60, %s2182_s0 }
 0x601   :  { %1251 = vrot.lane.b32.xlu1 %v1893_v46, %s2182_s0 }
 0x603   :  { %1249 = vrot.lane.b32.xlu0 %v1892_v32, %s2182_s0 }
 0x605   :  { %1247 = vrot.lane.b32.xlu1 %v1185_v22, %s2182_s0 }
 0x607   :  { %1245 = vrot.lane.b32.xlu0 %v1182_v28, %s2182_s0 }
 0x62c   :  { %v1896_v2 = vpop.f32.mrb[36].mxu1 }
 0x62d   :  { %v1198_v62 = vpop.f32.mrb[37].mxu1  ;;  %1257 = vrot.lane.b32.xlu0 %v1896_v2, %s2182_s0 }
 0x62e   :  { %v1897_v21 = vpop.f32.mrb[38].mxu1 }
 0x62f   :  { %v1201_v56 = vpop.f32.mrb[39].mxu1  ;;  %1259 = vrot.lane.b32.xlu1 %v1897_v21, %s2182_s0 }
 0x631   :  { %1253 = vrot.lane.b32.xlu0 %v1198_v62, %s2182_s0 }
 0x633   :  { %1255 = vrot.lane.b32.xlu1 %v1201_v56, %s2182_s0 }
 0x635   :  { %1988 = vrot.lane.b32.xlu0 %v1987_v51, %s2180_s25 }
 0x637   :  { %1993 = vrot.lane.b32.xlu1 %v1992_v42, %s2180_s25 }
 0x661   :  { %v1234_v33 = vpop.permute.xlu0 %1233 }
 0x662   :  { %v1279_v36 = vsel %vm3261_vm8, %v2722_v40, %v1234_v33  ;;  %v1230_v5 = vpop.permute.xlu1 %1229  ;;  %vm3276_vm8 = vmmov %vm3269_vm1 }
 0x663   :  { %v2164_v53 = vadd.low.f32.bf16 %v1279_v36, %v1964_v50  ;;  %v1277_v10 = vsel %vm3263_vm10, %v2724_v54, %v1230_v5  ;;  %v1561_v5 = vld [vmem:[%s3188_s3 + $0x18] sm:$0xff]  ;;  %vm3278_vm10 = vmmov %vm3269_vm1 }
 0x664   :  { %v2166_v7 = vadd.low.f32.bf16 %v1277_v10, %v1959_v9 }
 0x665   :  { %v1236_v26 = vpop.permute.xlu0 %1235 }
 0x666   :  { %v1280_v20 = vsel %vm3262_vm9, %v2726_v48, %v1236_v26  ;;  %vm3277_vm9 = vmmov %vm3269_vm1 }
 0x667   :  { %v2165_v38 = vadd.high.f32.bf16 %v1280_v20, %v1964_v50 }
 0x669   :  { %v1390_v19 = vpack.c.bf16 %v2165_v38, %v2164_v53  ;;  %v1232_v52 = vpop.permute.xlu0 %1231  ;;  %v1559_v38 = vld [vmem:[%s3188_s3 + $0x8] sm:$0xff] }
 0x66a   :  { %v1278_v16 = vsel %vm3264_vm11, %v2728_v34, %v1232_v52  ;;  %vm3279_vm11 = vmmov %vm3269_vm1 }
 0x66b   :  { %v2167_v15 = vadd.high.f32.bf16 %v1278_v16, %v1959_v9  ;;  %v1244_v4 = vpop.permute.xlu1 %1243 }
 0x66c   :  { %v1284_v40 = vsel %vm3265_vm15, %v2734_v18, %v1244_v4  ;;  %vm3280_vm15 = vmmov %vm3269_vm1 }
 0x66d   :  { %v1389_v14 = vpack.c.bf16 %v2167_v15, %v2166_v7  ;;  %v1242_v24 = vpop.permute.xlu0 %1241  ;;  %v2168_v31 = vadd.high.f32.bf16 %v1284_v40, %v1974_v49  ;;  %v1564_v15 = vld [vmem:[%s3188_s3 + $0x30] sm:$0xff] }
 0x66e   :  { %v1283_v48 = vsel %vm3266_vm14, %v2730_v0, %v1242_v24 }
 0x66f   :  { %v2169_v25 = vadd.low.f32.bf16 %v1283_v48, %v1974_v49  ;;  %v1240_v54 = vpop.permute.xlu1 %1239  ;;  %1906 = vmatprep.mubr.msk.bf16.mxu0 %vm1436_vm0, %v1389_v14  ;;  %v1562_v14 = vld [vmem:[%s3188_s3 + $0x20] sm:$0xff] }
 0x670   :  { %v1282_v34 = vsel %vm3267_vm13, %v2736_v3, %v1240_v54  ;;  %1907 = vmatmul.mubr.msk.bf16.vlgmr.msra.gmra.mrb[24].mxu0 %vm1436_vm0, %v1390_v19 }
 0x671   :  { %v1392_v29 = vpack.c.bf16 %v2168_v31, %v2169_v25  ;;  %v1238_v12 = vpop.permute.xlu0 %1237  ;;  %v2170_v32 = vadd.high.f32.bf16 %v1282_v34, %v1969_v13  ;;  %v1565_v31 = vld [vmem:[%s3188_s3 + $0x38] sm:$0xff] }
 0x672   :  { %v1281_v18 = vsel %vm3268_vm12, %v2732_v1, %v1238_v12 }
 0x673   :  { %v2171_v28 = vadd.low.f32.bf16 %v1281_v18, %v1969_v13  ;;  %v1252_v44 = vpop.permute.xlu1 %1251 }
 0x674   :  { %v1288_v0 = vsel %vm3269_vm1, %v2742_v58, %v1252_v44 }
 0x675   :  { %v1391_v46 = vpack.c.bf16 %v2170_v32, %v2171_v28  ;;  %v1250_v22 = vpop.permute.xlu0 %1249  ;;  %v2172_v35 = vadd.high.f32.bf16 %v1288_v0, %v1984_v45  ;;  %v1568_v0 = vld [vmem:[%s3188_s3 + $0x50] sm:$0xff] }
 0x676   :  { %v1287_v60 = vsel %vm3270_vm2, %v2738_v47, %v1250_v22 }
 0x677   :  { %v2173_v3 = vadd.low.f32.bf16 %v1287_v60, %v1984_v45  ;;  %v1248_v63 = vpop.permute.xlu1 %1247  ;;  %1910 = vmatprep.mubr.msk.bf16.mxu0 %vm1436_vm0, %v1391_v46  ;;  %v1558_v45 = vld [vmem:[%s3188_s3] sm:$0xff] }
 0x678   :  { %v1286_v2 = vsel %vm3271_vm3, %v2744_v6, %v1248_v63  ;;  %1911 = vmatmul.mubr.msk.bf16.gmra.mrb[28].mxu0 %vm1436_vm0, %v1392_v29  ;;  %v1563_v29 = vld [vmem:[%s3188_s3 + $0x28] sm:$0xff]  ;;  %v1566_v60 = vld [vmem:[%s3188_s3 + $0x40] sm:$0xff]  ;;  %v1569_v63 = vld [vmem:[%s3188_s3 + $0x58] sm:$0xff] }
 0x679   :  { %v1394_v1 = vpack.c.bf16 %v2172_v35, %v2173_v3  ;;  %v1246_v62 = vpop.permute.xlu0 %1245  ;;  %v2174_v61 = vadd.high.f32.bf16 %v1286_v2, %v1979_v37 }
 0x67a   :  { %v1285_v58 = vsel %vm3272_vm4, %v2740_v57, %v1246_v62 }
 0x67b   :  { %v2175_v30 = vadd.low.f32.bf16 %v1285_v58, %v1979_v37  ;;  %v1567_v58 = vld [vmem:[%s3188_s3 + $0x48] sm:$0xff] }
 0x67d   :  { %v1393_v59 = vpack.c.bf16 %v2174_v61, %v2175_v30 }
 0x67f   :  { %1914 = vmatprep.mubr.msk.bf16.mxu0 %vm1436_vm0, %v1393_v59 }
 0x680   :  { %1915 = vmatmul.mubr.msk.bf16.gmra.mrb[32].mxu0 %vm1436_vm0, %v1394_v1 }
 0x69f   :  { %v1258_v47 = vpop.permute.xlu0 %1257 }
 0x6a0   :  { %v1291_v51 = vsel %vm3275_vm7, %v2746_v23, %v1258_v47  ;;  %v1560_v23 = vld [vmem:[%s3188_s3 + $0x10] sm:$0xff] }
 0x6a1   :  { %v1260_v11 = vpop.permute.xlu1 %1259 }
 0x6a2   :  { %v1292_v42 = vsel %vm3276_vm8, %v2750_v55, %v1260_v11 }
 0x6a3   :  { %v1254_v21 = vpop.permute.xlu0 %1253 }
 0x6a4   :  { %v1289_v6 = vsel %vm3273_vm5, %v2748_v39, %v1254_v21  ;;  %v3053_v39 = vld [vmem:[%s3187_s5] ss:$0 sm:$0xff]  ;;  %v1572_v21 = vld [vmem:[%s3188_s3 + $0x70] sm:$0xff] }
 0x6a5   :  { %v1256_v56 = vpop.permute.xlu1 %1255 }
 0x6a6   :  { %v1290_v41 = vsel %vm3274_vm6, %v2752_v17, %v1256_v56 }
 0x6a7   :  { %v1989_v27 = vpop.permute.xlu0 %1988 }
 0x6a8   :  { %v2176_v57 = vadd.high.f32.bf16 %v1290_v41, %v1989_v27  ;;  %v2177_v8 = vadd.low.f32.bf16 %v1289_v6, %v1989_v27  ;;  %v1570_v6 = vld [vmem:[%s3188_s3 + $0x60] sm:$0xff] }
 0x6a9   :  { %v1994_v43 = vpop.permute.xlu1 %1993 }
 0x6aa   :  { %v1395_v9 = vpack.c.bf16 %v2176_v57, %v2177_v8  ;;  %v2178_v50 = vadd.high.f32.bf16 %v1292_v42, %v1994_v43  ;;  %v2179_v13 = vadd.low.f32.bf16 %v1291_v51, %v1994_v43  ;;  %v1573_v57 = vld [vmem:[%s3188_s3 + $0x78] sm:$0xff] }
 0x6ac   :  { %v1396_v49 = vpack.c.bf16 %v2178_v50, %v2179_v13  ;;  %1918 = vmatprep.mubr.msk.bf16.mxu0 %vm1436_vm0, %v1395_v9  ;;  %v1571_v9 = vld [vmem:[%s3188_s3 + $0x68] sm:$0xff] }
 0x6ae   :  { %1919 = vmatmul.mubr.msk.bf16.gmra.mrb[36].mxu0 %vm1436_vm0, %v1396_v49  ;;  %vm3281_vm0 = vmmov %vm3269_vm1 }
 0x6af   :  { %vm3282_vm14 = vmmov %vm3281_vm0 }
 0x6b0   :  { %vm3283_vm13 = vmmov %vm3281_vm0 }
 0x6b1   :  { %vm3284_vm12 = vmmov %vm3281_vm0 }
 0x6b2   :  { %vm3285_vm1 = vmmov %vm3281_vm0 }
 0x6b3   :  { %vm3286_vm2 = vmmov %vm3281_vm0 }
 0x6b4   :  { %vm3287_vm3 = vmmov %vm3281_vm0 }
 0x6b5   :  { %vm3288_vm4 = vmmov %vm3281_vm0 }
 0x6b6   :  { %vm3289_vm5 = vmmov %vm3281_vm0 }
 0x6b7   :  { %vm3290_vm6 = vmmov %vm3281_vm0 }
 0x6b8   :  { %vm3291_vm7 = vmmov %vm3281_vm0 }
 0x6b9   :  { %vm3292_vm8 = vmmov %vm3281_vm0 }
 0x743   :  { %v1908_v17 = vpop.f32.mrb[24].mxu0 }
 0x744   :  { %v1504_v55 = vadd.f32 %v1908_v17, %v3053_v39  ;;  %v1495_v37 = vpop.f32.mrb[25].mxu0 }
 0x745   :  { %v1496_v33 = vadd.f32 %v3053_v39, %v1495_v37  ;;  %v1909_v36 = vpop.f32.mrb[26].mxu0 }
 0x746   :  { %v1576_v26 = vadd.f32 %v1560_v23, %v1504_v55  ;;  %v1507_v20 = vadd.f32 %v1909_v36, %v3053_v39  ;;  %v1498_v53 = vpop.f32.mrb[27].mxu0 }
 0x747   :  { %v1574_v10 = vadd.f32 %v1558_v45, %v1496_v33  ;;  %v1499_v19 = vadd.f32 %v3053_v39, %v1498_v53 }
 0x748   :  { %1592 = vst.msk [vmem:[%s3189_s6 + $0x10] sm:$0xff] %vm3277_vm9, %v1576_v26  ;;  %v1577_v52 = vadd.f32 %v1561_v5, %v1507_v20 }
 0x749   :  { %1590 = vst.msk [vmem:[%s3189_s6] sm:$0xff] %vm3278_vm10, %v1574_v10  ;;  %v1575_v16 = vadd.f32 %v1559_v38, %v1499_v19 }
 0x74a   :  { %1593 = vst.msk [vmem:[%s3189_s6 + $0x18] sm:$0xff] %vm3279_vm11, %v1577_v52 }
 0x74b   :  { %1591 = vst.msk [vmem:[%s3189_s6 + $0x8] sm:$0xff] %vm3280_vm15, %v1575_v16  ;;  %v1912_v7 = vpop.f32.mrb[28].mxu0 }
 0x74c   :  { %v1520_v4 = vadd.f32 %v1912_v7, %v3053_v39  ;;  %v1511_v40 = vpop.f32.mrb[29].mxu0 }
 0x74d   :  { %v1512_v24 = vadd.f32 %v3053_v39, %v1511_v40  ;;  %v1913_v48 = vpop.f32.mrb[30].mxu0 }
 0x74e   :  { %v1580_v25 = vadd.f32 %v1564_v15, %v1520_v4  ;;  %v1523_v54 = vadd.f32 %v1913_v48, %v3053_v39  ;;  %v1514_v34 = vpop.f32.mrb[31].mxu0 }
 0x74f   :  { %v1578_v12 = vadd.f32 %v1562_v14, %v1512_v24  ;;  %v1515_v18 = vadd.f32 %v3053_v39, %v1514_v34 }
 0x750   :  { %1596 = vst.msk [vmem:[%s3189_s6 + $0x30] sm:$0xff] %vm3281_vm0, %v1580_v25  ;;  %v1581_v32 = vadd.f32 %v1565_v31, %v1523_v54 }
 0x751   :  { %1594 = vst.msk [vmem:[%s3189_s6 + $0x20] sm:$0xff] %vm3282_vm14, %v1578_v12  ;;  %v1579_v28 = vadd.f32 %v1563_v29, %v1515_v18 }
 0x752   :  { %1597 = vst.msk [vmem:[%s3189_s6 + $0x38] sm:$0xff] %vm3283_vm13, %v1581_v32 }
 0x753   :  { %1595 = vst.msk [vmem:[%s3189_s6 + $0x28] sm:$0xff] %vm3284_vm12, %v1579_v28  ;;  %v1916_v44 = vpop.f32.mrb[32].mxu0 }
 0x754   :  { %v1536_v46 = vadd.f32 %v1916_v44, %v3053_v39  ;;  %v1527_v22 = vpop.f32.mrb[33].mxu0 }
 0x755   :  { %v1528_v35 = vadd.f32 %v3053_v39, %v1527_v22  ;;  %v1917_v3 = vpop.f32.mrb[34].mxu0 }
 0x756   :  { %v1584_v2 = vadd.f32 %v1568_v0, %v1536_v46  ;;  %v1539_v1 = vadd.f32 %v1917_v3, %v3053_v39  ;;  %v1530_v62 = vpop.f32.mrb[35].mxu0 }
 0x757   :  { %v1582_v61 = vadd.f32 %v1566_v60, %v1528_v35  ;;  %v1531_v30 = vadd.f32 %v3053_v39, %v1530_v62 }
 0x758   :  { %1600 = vst.msk [vmem:[%s3189_s6 + $0x50] sm:$0xff] %vm3285_vm1, %v1584_v2  ;;  %v1585_v59 = vadd.f32 %v1569_v63, %v1539_v1 }
 0x759   :  { %1598 = vst.msk [vmem:[%s3189_s6 + $0x40] sm:$0xff] %vm3286_vm2, %v1582_v61  ;;  %v1583_v47 = vadd.f32 %v1567_v58, %v1531_v30 }
 0x75a   :  { %1601 = vst.msk [vmem:[%s3189_s6 + $0x58] sm:$0xff] %vm3287_vm3, %v1585_v59 }
 0x75b   :  { %1599 = vst.msk [vmem:[%s3189_s6 + $0x48] sm:$0xff] %vm3288_vm4, %v1583_v47 }
 0x781   :  { %v1920_v11 = vpop.f32.mrb[36].mxu0 }
 0x782   :  { %v1552_v56 = vadd.f32 %v1920_v11, %v3053_v39  ;;  %v1543_v27 = vpop.f32.mrb[37].mxu0 }
 0x783   :  { %v1544_v41 = vadd.f32 %v3053_v39, %v1543_v27  ;;  %v1921_v43 = vpop.f32.mrb[38].mxu0 }
 0x784   :  { %v1588_v8 = vadd.f32 %v1572_v21, %v1552_v56  ;;  %v1555_v51 = vadd.f32 %v1921_v43, %v3053_v39  ;;  %v1546_v42 = vpop.f32.mrb[39].mxu0 }
 0x785   :  { %v1586_v50 = vadd.f32 %v1570_v6, %v1544_v41  ;;  %v1547_v13 = vadd.f32 %v3053_v39, %v1546_v42 }
 0x786   :  { %1604 = vst.msk [vmem:[%s3189_s6 + $0x70] sm:$0xff] %vm3289_vm5, %v1588_v8  ;;  %v1589_v49 = vadd.f32 %v1573_v57, %v1555_v51 }
 0x787   :  { %1602 = vst.msk [vmem:[%s3189_s6 + $0x60] sm:$0xff] %vm3290_vm6, %v1586_v50  ;;  %v1587_v17 = vadd.f32 %v1571_v9, %v1547_v13 }
 0x788   :  { %1605 = vst.msk [vmem:[%s3189_s6 + $0x78] sm:$0xff] %vm3291_vm7, %v1589_v49 }
 0x789   :  { %1603 = vst.msk [vmem:[%s3189_s6 + $0x68] sm:$0xff] %vm3292_vm8, %v1587_v17 }

// kernel: frag_gfn_forward.47
= control target key start
LH: loop header
LB: loop body
LE: loop exit
PB: predicated region body
PF: predicated region fallthrough
CT: control target
= control target key end

     0   :  { %vm110_vm0 = vcmask 523264   ;;  %vm232_vm1 = vcmask 39936   ;;  %s461_s1 = inlined_call_operand.vmem [shape: bf16[64,5], index: 1, kind: input, shape index: {}]   ;;  %s462_s0 = inlined_call_operand.vmem [shape: bf16[128,64], index: 0, kind: input, shape index: {}]   ;;  %s463_s2 = inlined_call_operand.vmem [shape: f32[1,5], index: 2, kind: input, shape index: {}]   ;;  %s464_s3 = inlined_call_operand.vmem [shape: f32[128,5], index: 3, kind: output, shape index: {}]  }
   0x1   :  { %v318_v0 = vld [vmem:[%s461_s1] sm:$0xff]   ;;  %v319_v1 = vld [vmem:[%s461_s1 + $0x8] sm:$0xff]   ;;  %v320_v2 = vld [vmem:[%s461_s1 + $0x10] sm:$0xff]  }
   0x2   :  { %286 = vmatprep.subr.bf16.mxu0 %v318_v0  ;;  %310 = vmatprep.subr.bf16.mxu1 %v318_v0  ;;  %v322_v3 = vld [vmem:[%s462_s0] sm:$0xff]   ;;  %v321_v5 = vld [vmem:[%s461_s1 + $0x18] sm:$0xff]   ;;  %v324_v6 = vld [vmem:[%s462_s0 + $0x8] sm:$0xff]  }
   0x3   :  { %287 = vmatpush3.bf16.msra.mxu0 %v318_v0  ;;  %314 = vmatpush3.bf16.msra.mxu1 %v318_v0  ;;  %v323_v4 = vld [vmem:[%s462_s0 + $0x20] sm:$0xff]   ;;  %v325_v7 = vld [vmem:[%s462_s0 + $0x28] sm:$0xff]   ;;  %v326_v8 = vld [vmem:[%s462_s0 + $0x10] sm:$0xff]  }
   0x4   :  { %288 = vmatprep.subr.bf16.mxu0 %v319_v1  ;;  %311 = vmatprep.subr.bf16.mxu1 %v319_v1  ;;  %v327_v9 = vld [vmem:[%s462_s0 + $0x30] sm:$0xff]   ;;  %v328_v10 = vld [vmem:[%s462_s0 + $0x18] sm:$0xff]   ;;  %v253_v12 = vld [vmem:[%s463_s2] ss:$0 sm:$0xff] }
   0x5   :  { %294 = vmatprep.mubr.msk.bf16.mxu0 %vm110_vm0, %v322_v3  ;;  %302 = vmatprep.mubr.msk.bf16.mxu1 %vm110_vm0, %v323_v4  ;;  %v329_v11 = vld [vmem:[%s462_s0 + $0x38] sm:$0xff]  }
   0x7   :  { %289 = vmatpush3.bf16.msra.mxu0 %v319_v1  ;;  %315 = vmatpush3.bf16.msra.mxu1 %v319_v1 }
   0x8   :  { %290 = vmatprep.subr.bf16.mxu0 %v320_v2  ;;  %312 = vmatprep.subr.bf16.mxu1 %v320_v2 }
   0xb   :  { %291 = vmatpush3.bf16.msra.mxu0 %v320_v2  ;;  %316 = vmatpush3.bf16.msra.mxu1 %v320_v2 }
   0xc   :  { %292 = vmatprep.subr.bf16.mxu0 %v321_v5  ;;  %313 = vmatprep.subr.bf16.mxu1 %v321_v5 }
   0xf   :  { %293 = vmatpush3.bf16.msra.mxu0 %v321_v5  ;;  %317 = vmatpush3.bf16.msra.mxu1 %v321_v5 }
  0x12   :  { %295 = vmatmul.mubr.msk.bf16.vlgmr.msra.gmra.mrb[0].mxu0 %vm110_vm0, %v324_v6  ;;  %303 = vmatmul.mubr.msk.bf16.vlgmr.msra.gmra.mrb[0].mxu1 %vm110_vm0, %v325_v7 }
  0x13   :  { %298 = vmatprep.mubr.msk.bf16.mxu0 %vm110_vm0, %v326_v8  ;;  %306 = vmatprep.mubr.msk.bf16.mxu1 %vm110_vm0, %v327_v9 }
  0x1a   :  { %299 = vmatmul.mubr.msk.bf16.gmra.mrb[4].mxu0 %vm110_vm0, %v328_v10  ;;  %307 = vmatmul.mubr.msk.bf16.gmra.mrb[4].mxu1 %vm110_vm0, %v329_v11 }
  0xe5   :  { %v296_v13 = vpop.f32.mrb[0].mxu0  ;;  %v304_v14 = vpop.f32.mrb[0].mxu1 }
  0xe6   :  { %v178_v15 = vadd.f32 %v296_v13, %v253_v12  ;;  %v210_v16 = vadd.f32 %v304_v14, %v253_v12  ;;  %v169_v17 = vpop.f32.mrb[1].mxu0  ;;  %v201_v18 = vpop.f32.mrb[1].mxu1 }
  0xe7   :  { %v170_v19 = vadd.f32 %v253_v12, %v169_v17  ;;  %v202_v20 = vadd.f32 %v253_v12, %v201_v18  ;;  %v297_v21 = vpop.f32.mrb[2].mxu0  ;;  %v305_v22 = vpop.f32.mrb[2].mxu1 }
  0xe8   :  { %235 = vst.msk [vmem:[%s464_s3 + $0x10] sm:$0xff] %vm232_vm1, %v178_v15  ;;  %243 = vst.msk [vmem:[%s464_s3 + $0x50] sm:$0xff] %vm232_vm1, %v210_v16  ;;  %v181_v23 = vadd.f32 %v297_v21, %v253_v12  ;;  %v213_v24 = vadd.f32 %v305_v22, %v253_v12  ;;  %v172_v25 = vpop.f32.mrb[3].mxu0  ;;  %v204_v26 = vpop.f32.mrb[3].mxu1 }
  0xe9   :  { %233 = vst.msk [vmem:[%s464_s3] sm:$0xff] %vm232_vm1, %v170_v19  ;;  %241 = vst.msk [vmem:[%s464_s3 + $0x40] sm:$0xff] %vm232_vm1, %v202_v20  ;;  %v173_v27 = vadd.f32 %v253_v12, %v172_v25  ;;  %v205_v28 = vadd.f32 %v253_v12, %v204_v26 }
  0xea   :  { %236 = vst.msk [vmem:[%s464_s3 + $0x18] sm:$0xff] %vm232_vm1, %v181_v23  ;;  %244 = vst.msk [vmem:[%s464_s3 + $0x58] sm:$0xff] %vm232_vm1, %v213_v24 }
  0xeb   :  { %234 = vst.msk [vmem:[%s464_s3 + $0x8] sm:$0xff] %vm232_vm1, %v173_v27  ;;  %242 = vst.msk [vmem:[%s464_s3 + $0x48] sm:$0xff] %vm232_vm1, %v205_v28 }
  0xed   :  { %v300_v29 = vpop.f32.mrb[4].mxu0  ;;  %v308_v30 = vpop.f32.mrb[4].mxu1 }
  0xee   :  { %v194_v31 = vadd.f32 %v300_v29, %v253_v12  ;;  %v226_v32 = vadd.f32 %v308_v30, %v253_v12  ;;  %v185_v33 = vpop.f32.mrb[5].mxu0  ;;  %v217_v34 = vpop.f32.mrb[5].mxu1 }
  0xef   :  { %v186_v35 = vadd.f32 %v253_v12, %v185_v33  ;;  %v218_v36 = vadd.f32 %v253_v12, %v217_v34  ;;  %v301_v37 = vpop.f32.mrb[6].mxu0  ;;  %v309_v38 = vpop.f32.mrb[6].mxu1 }
  0xf0   :  { %239 = vst.msk [vmem:[%s464_s3 + $0x30] sm:$0xff] %vm232_vm1, %v194_v31  ;;  %247 = vst.msk [vmem:[%s464_s3 + $0x70] sm:$0xff] %vm232_vm1, %v226_v32  ;;  %v197_v39 = vadd.f32 %v301_v37, %v253_v12  ;;  %v229_v40 = vadd.f32 %v309_v38, %v253_v12  ;;  %v188_v41 = vpop.f32.mrb[7].mxu0  ;;  %v220_v42 = vpop.f32.mrb[7].mxu1 }
  0xf1   :  { %237 = vst.msk [vmem:[%s464_s3 + $0x20] sm:$0xff] %vm232_vm1, %v186_v35  ;;  %245 = vst.msk [vmem:[%s464_s3 + $0x60] sm:$0xff] %vm232_vm1, %v218_v36  ;;  %v189_v43 = vadd.f32 %v253_v12, %v188_v41  ;;  %v221_v44 = vadd.f32 %v253_v12, %v220_v42 }
  0xf2   :  { %240 = vst.msk [vmem:[%s464_s3 + $0x38] sm:$0xff] %vm232_vm1, %v197_v39  ;;  %248 = vst.msk [vmem:[%s464_s3 + $0x78] sm:$0xff] %vm232_vm1, %v229_v40 }
  0xf3   :  { %238 = vst.msk [vmem:[%s464_s3 + $0x28] sm:$0xff] %vm232_vm1, %v189_v43  ;;  %246 = vst.msk [vmem:[%s464_s3 + $0x68] sm:$0xff] %vm232_vm1, %v221_v44 }

// kernel: frag_gfn_forward.32
= control target key start
LH: loop header
LB: loop body
LE: loop exit
PB: predicated region body
PF: predicated region fallthrough
CT: control target
= control target key end

     0   :  { %v2633_v0 = vmov 0.0|0.0   ;;  %vm2634_vm0 = vmmov 0   ;;  %v2635_v4 = vmov 0.0   ;;  %vm153_vm1 = vcmask 254976   ;;  %s3687_s0 = inlined_call_operand.vmem [shape: f32[128,32], index: 0, kind: input, shape index: {}]   ;;  %s3688_s2 = inlined_call_operand.vmem [shape: f32[2,128], index: 2, kind: input, shape index: {}]   ;;  %s3689_s1 = inlined_call_operand.vmem [shape: f32[128,2], index: 1, kind: input, shape index: {}]   ;;  %s3690_s3 = inlined_call_operand.vmem [shape: f32[2,1], index: 3, kind: input, shape index: {}]   ;;  %s3691_s4 = inlined_call_operand.vmem [shape: f32[128,1], index: 4, kind: input, shape index: {}]   ;;  %s3692_s5 = inlined_call_operand.vmem [shape: bf16[32,128], index: 5, kind: input, shape index: {}]   ;;  %s3693_s7 = inlined_call_operand.vmem [shape: bf16[128,32], index: 7, kind: input, shape index: {}]   ;;  %s3694_s6 = inlined_call_operand.vmem [shape: f32[1,128], index: 6, kind: input, shape index: {}]   ;;  %s3695_s8 = inlined_call_operand.vmem [shape: f32[1,32], index: 8, kind: input, shape index: {}]   ;;  %s3696_s9 = inlined_call_operand.vmem [shape: f32[128,32], index: 9, kind: output, shape index: {}]  }
   0x1   :  { %2497 = vmatprep.subr.bf16.mxu0 %v2633_v0  ;;  %v2691_v1 = vld [vmem:[%s3687_s0] sm:$0xff]  ;;  %v2696_v2 = vld [vmem:[%s3687_s0 + $0x8] sm:$0xff]  ;;  %v2701_v3 = vld [vmem:[%s3687_s0 + $0x10] sm:$0xff]  ;;  %2233 = vmatprep.mubr.msk.f32.mxu0 %vm2634_vm0, %v2635_v4  ;;  %vm158_vm2 = vcmask 15360   ;;  %v2636_v31 = vmov 0   ;;  %vm207_vm3 = vcmask 1041408  }
   0x2   :  { %v2498_v5 = vpack.c.bf16 %v2696_v2, %v2691_v1  ;;  %v2710_v6 = vld [vmem:[%s3687_s0 + $0x18] sm:$0xff]  ;;  %v2718_v8 = vld [vmem:[%s3687_s0 + $0x20] sm:$0xff]  ;;  %v2723_v9 = vld [vmem:[%s3687_s0 + $0x28] sm:$0xff]  ;;  %2600 = vset.pattern.permute.xlu1 %v2636_v31  ;;  %2599 = vset.pattern.permute.xlu0 %v2636_v31  ;;  %vm915_vm4 = vcmask 261120  }
   0x3   :  { %v2501_v7 = vpack.c.bf16 %v2710_v6, %v2701_v3  ;;  %v2504_v10 = vpack.c.bf16 %v2723_v9, %v2718_v8  ;;  %v2731_v11 = vld [vmem:[%s3687_s0 + $0x30] sm:$0xff]  ;;  %v2736_v12 = vld [vmem:[%s3687_s0 + $0x38] sm:$0xff]  ;;  %v2744_v14 = vld [vmem:[%s3687_s0 + $0x40] sm:$0xff] }
   0x4   :  { %2499 = vmatpush3.bf16.msra.mxu0 %v2498_v5  ;;  %v2507_v13 = vpack.c.bf16 %v2736_v12, %v2731_v11  ;;  %v2749_v15 = vld [vmem:[%s3687_s0 + $0x48] sm:$0xff]  ;;  %v2757_v17 = vld [vmem:[%s3687_s0 + $0x50] sm:$0xff]  ;;  %v2762_v18 = vld [vmem:[%s3687_s0 + $0x58] sm:$0xff] }
   0x5   :  { %2500 = vmatprep.subr.bf16.mxu0 %v2633_v0  ;;  %v2510_v16 = vpack.c.bf16 %v2749_v15, %v2744_v14  ;;  %v2513_v19 = vpack.c.bf16 %v2762_v18, %v2757_v17  ;;  %v2770_v20 = vld [vmem:[%s3687_s0 + $0x60] sm:$0xff]  ;;  %v2775_v21 = vld [vmem:[%s3687_s0 + $0x68] sm:$0xff]  ;;  %v2783_v23 = vld [vmem:[%s3687_s0 + $0x70] sm:$0xff] }
   0x6   :  { %v2516_v22 = vpack.c.bf16 %v2775_v21, %v2770_v20  ;;  %v2788_v24 = vld [vmem:[%s3687_s0 + $0x78] sm:$0xff]  ;;  %v2796_v26 = vld [vmem:[%s3688_s2] sm:$0x3]  ;;  %v2814_v35 = vld [vmem:[%s3689_s1 + $0x8] sm:$0xff] }
   0x7   :  { %v2519_v25 = vpack.c.bf16 %v2788_v24, %v2783_v23  ;;  %v33_v30 = vld [vmem:[%s3689_s1] sm:$0xff]  ;;  %v2820_v36 = vld [vmem:[%s3689_s1 + $0x10] sm:$0xff]  ;;  %v2831_v37 = vld [vmem:[%s3689_s1 + $0x18] sm:$0xff] }
   0x8   :  { %2502 = vmatpush3.bf16.msra.mxu0 %v2501_v7  ;;  %2238 = vmatprep.mubr.msk.f32.mxu1 %vm158_vm2, %v33_v30  ;;  %v2808_v32 = vld [vmem:[%s3690_s3] sm:$0x3]  ;;  %v2845_v39 = vld [vmem:[%s3689_s1 + $0x28] sm:$0xff]  ;;  %v2850_v40 = vld [vmem:[%s3689_s1 + $0x30] sm:$0xff] }
   0x9   :  { %2503 = vmatprep.subr.bf16.mxu0 %v2633_v0  ;;  %v2836_v38 = vld [vmem:[%s3689_s1 + $0x20] sm:$0xff]  ;;  %v2859_v41 = vld [vmem:[%s3689_s1 + $0x38] sm:$0xff]  ;;  %v2873_v43 = vld [vmem:[%s3689_s1 + $0x48] sm:$0xff] }
   0xa   :  { %v2864_v42 = vld [vmem:[%s3689_s1 + $0x40] sm:$0xff]  ;;  %v2878_v44 = vld [vmem:[%s3689_s1 + $0x50] sm:$0xff]  ;;  %v2887_v45 = vld [vmem:[%s3689_s1 + $0x58] sm:$0xff] }
   0xb   :  { %v2892_v46 = vld [vmem:[%s3689_s1 + $0x60] sm:$0xff]  ;;  %v2901_v47 = vld [vmem:[%s3689_s1 + $0x68] sm:$0xff]  ;;  %v2906_v48 = vld [vmem:[%s3689_s1 + $0x70] sm:$0xff] }
   0xc   :  { %2505 = vmatpush3.bf16.msra.mxu0 %v2504_v10  ;;  %v2915_v49 = vld [vmem:[%s3689_s1 + $0x78] sm:$0xff]  ;;  %v51_v10 = vld [vmem:[%s3691_s4] sm:$0xff] }
   0xd   :  { %2506 = vmatprep.subr.bf16.mxu0 %v2633_v0 }
  0x10   :  { %2508 = vmatpush3.bf16.msra.mxu0 %v2507_v13  ;;  %v52_v13 = vld [vmem:[%s3691_s4 + $0x8] sm:$0xff] }
  0x11   :  { %2509 = vmatprep.subr.bf16.mxu0 %v2633_v0 }
  0x14   :  { %2511 = vmatpush3.bf16.msra.mxu0 %v2510_v16  ;;  %v53_v16 = vld [vmem:[%s3691_s4 + $0x10] sm:$0xff] }
  0x15   :  { %2512 = vmatprep.subr.bf16.mxu0 %v2633_v0 }
  0x18   :  { %2514 = vmatpush3.bf16.msra.mxu0 %v2513_v19  ;;  %v54_v19 = vld [vmem:[%s3691_s4 + $0x18] sm:$0xff] }
  0x19   :  { %2515 = vmatprep.subr.bf16.mxu0 %v2633_v0 }
  0x1c   :  { %2517 = vmatpush3.bf16.msra.mxu0 %v2516_v22  ;;  %v55_v22 = vld [vmem:[%s3691_s4 + $0x20] sm:$0xff] }
  0x1d   :  { %2518 = vmatprep.subr.bf16.mxu0 %v2633_v0 }
  0x20   :  { %2520 = vmatpush3.bf16.msra.mxu0 %v2519_v25  ;;  %v56_v25 = vld [vmem:[%s3691_s4 + $0x28] sm:$0xff] }
  0x23   :  { %2234 = vmatmul.mubr.f32.vlgmr.msra.gmra.mrb[0].mxu0 %v2796_v26 }
  0x24   :  { %2299 = vmatprep.mubr.msk.f32.mxu0 %vm158_vm2, %v33_v30  ;;  %v64_v30 = vld [vmem:[%s3691_s4 + $0x68] sm:$0xff] }
  0xf6   :  { %v149_v27 = vpop.f32.mrb[0].mxu0 }
  0xf7   :  { %v2235_v28 = vpop.f32.mrb[1].mxu0  ;;  %v154_v29 = vsel %vm153_vm1, %v149_v27, 0.0  ;;  %v58_v27 = vld [vmem:[%s3691_s4 + $0x38] sm:$0xff] }
  0xf8   :  { %155 = vadd.xlane.f32.xlu0 %v154_v29  ;;  %v60_v28 = vld [vmem:[%s3691_s4 + $0x48] sm:$0xff]  ;;  %v62_v29 = vld [vmem:[%s3691_s4 + $0x58] sm:$0xff] }
 0x185   :  { %v156_v33 = vpop.xlane.xlu0 %155 }
 0x186   :  { %v157_v34 = vmul.f32 %v156_v33, %v2808_v32 }
 0x188   :  { %2236 = vmatprep.subr.msk.mxu1 %vm207_vm3, %v157_v34 }
 0x189   :  { %2237 = vmatpush3.msk.msra.mxu1 %vm207_vm3, %v157_v34 }
 0x18a   :  { %2239 = vmatmul.mubr.msk.f32.vlgmr.msra.gmra.mrb[0].mxu1 %vm158_vm2, %v2814_v35  ;;  %2521 = vmatprep.subr.bf16.mxu1 %v2633_v0 }
 0x18b   :  { %2241 = vmatprep.mubr.msk.f32.mxu1 %vm158_vm2, %v2820_v36 }
 0x18e   :  { %2242 = vmatmul.mubr.msk.f32.gmra.mrb[2].mxu1 %vm158_vm2, %v2831_v37 }
 0x18f   :  { %2244 = vmatprep.mubr.msk.f32.mxu1 %vm158_vm2, %v2836_v38 }
 0x192   :  { %2245 = vmatmul.mubr.msk.f32.gmra.mrb[4].mxu1 %vm158_vm2, %v2845_v39 }
 0x193   :  { %2247 = vmatprep.mubr.msk.f32.mxu1 %vm158_vm2, %v2850_v40 }
 0x196   :  { %2248 = vmatmul.mubr.msk.f32.gmra.mrb[6].mxu1 %vm158_vm2, %v2859_v41 }
 0x197   :  { %2250 = vmatprep.mubr.msk.f32.mxu1 %vm158_vm2, %v2864_v42 }
 0x19a   :  { %2251 = vmatmul.mubr.msk.f32.gmra.mrb[8].mxu1 %vm158_vm2, %v2873_v43 }
 0x19b   :  { %2253 = vmatprep.mubr.msk.f32.mxu1 %vm158_vm2, %v2878_v44 }
 0x19e   :  { %2254 = vmatmul.mubr.msk.f32.gmra.mrb[10].mxu1 %vm158_vm2, %v2887_v45 }
 0x19f   :  { %2256 = vmatprep.mubr.msk.f32.mxu1 %vm158_vm2, %v2892_v46 }
 0x1a2   :  { %2257 = vmatmul.mubr.msk.f32.gmra.mrb[12].mxu1 %vm158_vm2, %v2901_v47 }
 0x1a3   :  { %2259 = vmatprep.mubr.msk.f32.mxu1 %vm158_vm2, %v2906_v48 }
 0x1a6   :  { %2260 = vmatmul.mubr.msk.f32.gmra.mrb[14].mxu1 %vm158_vm2, %v2915_v49 }
 0x1a7   :  { %2294 = vmatprep.mubr.msk.f32.mxu1 %vm2634_vm0, %v2635_v4 }
 0x25d   :  { %v2240_v50 = vpop.f32.mrb[0].mxu1 }
 0x25e   :  { %363 = vperm.xlu1 %2600, %v2240_v50   ;;  %v277_v51 = vpop.f32.mrb[1].mxu1 }
 0x25f   :  { %358 = vperm.xlu0 %2599, %v277_v51  }
 0x261   :  { %v2243_v52 = vpop.f32.mrb[2].mxu1 }
 0x262   :  { %373 = vperm.xlu1 %2600, %v2243_v52   ;;  %v287_v53 = vpop.f32.mrb[3].mxu1 }
 0x265   :  { %v2246_v54 = vpop.f32.mrb[4].mxu1 }
 0x266   :  { %368 = vperm.xlu1 %2600, %v287_v53   ;;  %v297_v55 = vpop.f32.mrb[5].mxu1 }
 0x269   :  { %v2249_v56 = vpop.f32.mrb[6].mxu1 }
 0x26a   :  { %383 = vperm.xlu1 %2600, %v2246_v54   ;;  %v307_v57 = vpop.f32.mrb[7].mxu1 }
 0x26d   :  { %v2252_v58 = vpop.f32.mrb[8].mxu1 }
 0x26e   :  { %378 = vperm.xlu1 %2600, %v297_v55   ;;  %v317_v59 = vpop.f32.mrb[9].mxu1 }
 0x271   :  { %v2255_v60 = vpop.f32.mrb[10].mxu1 }
 0x272   :  { %393 = vperm.xlu1 %2600, %v2249_v56   ;;  %v327_v61 = vpop.f32.mrb[11].mxu1 }
 0x275   :  { %v2258_v62 = vpop.f32.mrb[12].mxu1 }
 0x276   :  { %388 = vperm.xlu1 %2600, %v307_v57   ;;  %423 = vperm.xlu0 %2599, %v2258_v62   ;;  %v337_v63 = vpop.f32.mrb[13].mxu1 }
 0x279   :  { %v2261_v5 = vpop.f32.mrb[14].mxu1 }
 0x27a   :  { %403 = vperm.xlu1 %2600, %v2252_v58   ;;  %433 = vperm.xlu0 %2599, %v2261_v5   ;;  %v347_v7 = vpop.f32.mrb[15].mxu1 }
 0x27e   :  { %398 = vperm.xlu1 %2600, %v317_v59   ;;  %790 = vperm.xlu0 %2599, %v51_v10  }
 0x282   :  { %413 = vperm.xlu1 %2600, %v2255_v60   ;;  %795 = vperm.xlu0 %2599, %v52_v13  }
 0x286   :  { %408 = vperm.xlu1 %2600, %v327_v61   ;;  %800 = vperm.xlu0 %2599, %v53_v16  }
 0x28a   :  { %418 = vperm.xlu1 %2600, %v337_v63   ;;  %805 = vperm.xlu0 %2599, %v54_v19  }
 0x28e   :  { %810 = vperm.xlu0 %2599, %v55_v22   ;;  %428 = vperm.xlu1 %2600, %v347_v7  }
 0x292   :  { %815 = vperm.xlu0 %2599, %v56_v25  }
 0x296   :  { %825 = vperm.xlu0 %2599, %v58_v27  }
 0x29a   :  { %835 = vperm.xlu0 %2599, %v60_v28  }
 0x29e   :  { %845 = vperm.xlu0 %2599, %v62_v29  }
 0x2a2   :  { %855 = vperm.xlu0 %2599, %v64_v30  }
 0x2dd   :  { %v364_v31 = vpop.permute.xlu1 %363 }
 0x2de   :  { %v2952_v33 = vsub.f32 %v2696_v2, %v364_v31  ;;  %v359_v34 = vpop.permute.xlu0 %358 }
 0x2df   :  { %v2955_v50 = vsub.f32 %v2691_v1, %v359_v34 }
 0x2e0   :  { %v453_v51 = vmul.f32 %v2952_v33, %v2952_v33 }
 0x2e1   :  { %v452_v52 = vmul.f32 %v2955_v50, %v2955_v50  ;;  %v374_v53 = vpop.permute.xlu1 %373 }
 0x2e2   :  { %v2962_v55 = vsub.f32 %v2710_v6, %v374_v53 }
 0x2e3   :  { %v2522_v54 = vpack.c.bf16 %v453_v51, %v452_v52 }
 0x2e4   :  { %v455_v1 = vmul.f32 %v2962_v55, %v2962_v55 }
 0x2e5   :  { %2523 = vmatpush3.bf16.msra.mxu1 %v2522_v54  ;;  %v369_v56 = vpop.permute.xlu1 %368 }
 0x2e6   :  { %v2965_v2 = vsub.f32 %v2701_v3, %v369_v56  ;;  %2524 = vmatprep.subr.bf16.mxu1 %v2633_v0 }
 0x2e8   :  { %v454_v57 = vmul.f32 %v2965_v2, %v2965_v2 }
 0x2e9   :  { %v384_v58 = vpop.permute.xlu1 %383 }
 0x2ea   :  { %v2525_v59 = vpack.c.bf16 %v455_v1, %v454_v57  ;;  %v2973_v60 = vsub.f32 %v2723_v9, %v384_v58 }
 0x2ec   :  { %2526 = vmatpush3.bf16.msra.mxu1 %v2525_v59  ;;  %v457_v61 = vmul.f32 %v2973_v60, %v2973_v60 }
 0x2ed   :  { %v379_v6 = vpop.permute.xlu1 %378  ;;  %2527 = vmatprep.subr.bf16.mxu1 %v2633_v0 }
 0x2ee   :  { %v2977_v3 = vsub.f32 %v2718_v8, %v379_v6 }
 0x2f0   :  { %v456_v62 = vmul.f32 %v2977_v3, %v2977_v3 }
 0x2f1   :  { %v394_v63 = vpop.permute.xlu1 %393 }
 0x2f2   :  { %v2528_v5 = vpack.c.bf16 %v457_v61, %v456_v62  ;;  %v2984_v7 = vsub.f32 %v2736_v12, %v394_v63 }
 0x2f4   :  { %2529 = vmatpush3.bf16.msra.mxu1 %v2528_v5  ;;  %v459_v8 = vmul.f32 %v2984_v7, %v2984_v7  ;;  %v59_v5 = vld [vmem:[%s3691_s4 + $0x40] sm:$0xff] }
 0x2f5   :  { %v389_v9 = vpop.permute.xlu1 %388  ;;  %2530 = vmatprep.subr.bf16.mxu1 %v2633_v0  ;;  %v424_v30 = vpop.permute.xlu0 %423 }
 0x2f6   :  { %v2988_v10 = vsub.f32 %v2731_v11, %v389_v9  ;;  %v61_v9 = vld [vmem:[%s3691_s4 + $0x50] sm:$0xff] }
 0x2f8   :  { %v458_v13 = vmul.f32 %v2988_v10, %v2988_v10 }
 0x2f9   :  { %v404_v16 = vpop.permute.xlu1 %403  ;;  %v434_v53 = vpop.permute.xlu0 %433 }
 0x2fa   :  { %v2531_v19 = vpack.c.bf16 %v459_v8, %v458_v13  ;;  %v2995_v22 = vsub.f32 %v2749_v15, %v404_v16 }
 0x2fc   :  { %2532 = vmatpush3.bf16.msra.mxu1 %v2531_v19  ;;  %v461_v11 = vmul.f32 %v2995_v22, %v2995_v22 }
 0x2fd   :  { %v399_v12 = vpop.permute.xlu1 %398  ;;  %2533 = vmatprep.subr.bf16.mxu1 %v2633_v0 }
 0x2fe   :  { %v2999_v25 = vsub.f32 %v2744_v14, %v399_v12  ;;  %v3013_v14 = vsub.f32 %v2775_v21, %v424_v30  ;;  %v2604_v30 = vld [vmem:[%s3693_s7 + $0x8] sm:$0xff]  }
 0x300   :  { %v460_v27 = vmul.f32 %v2999_v25, %v2999_v25  ;;  %v465_v1 = vmul.f32 %v3013_v14, %v3013_v14 }
 0x301   :  { %v414_v28 = vpop.permute.xlu1 %413 }
 0x302   :  { %v2534_v29 = vpack.c.bf16 %v461_v11, %v460_v27  ;;  %v3006_v31 = vsub.f32 %v2762_v18, %v414_v28  ;;  %v65_v27 = vld [vmem:[%s3691_s4 + $0x70] sm:$0xff]  ;;  %v66_v28 = vld [vmem:[%s3691_s4 + $0x78] sm:$0xff] }
 0x304   :  { %2535 = vmatpush3.bf16.msra.mxu1 %v2534_v29  ;;  %v463_v51 = vmul.f32 %v3006_v31, %v3006_v31  ;;  %v2603_v29 = vld [vmem:[%s3693_s7] sm:$0xff]  }
 0x305   :  { %v409_v15 = vpop.permute.xlu1 %408  ;;  %2536 = vmatprep.subr.bf16.mxu1 %v2633_v0 }
 0x306   :  { %v3010_v34 = vsub.f32 %v2757_v17, %v409_v15  ;;  %v3025_v17 = vsub.f32 %v2788_v24, %v434_v53  ;;  %v2605_v15 = vld [vmem:[%s3693_s7 + $0x10] sm:$0xff]   ;;  %v3113_v53 = vpop.permute.xlu0 %790 }
 0x308   :  { %v462_v52 = vmul.f32 %v3010_v34, %v3010_v34 }
 0x309   :  { %v419_v54 = vpop.permute.xlu1 %418 }
 0x30a   :  { %v2537_v18 = vpack.c.bf16 %v463_v51, %v462_v52  ;;  %v3020_v56 = vsub.f32 %v2770_v20, %v419_v54  ;;  %v467_v20 = vmul.f32 %v3025_v17, %v3025_v17  ;;  %v2606_v51 = vld [vmem:[%s3693_s7 + $0x18] sm:$0xff]   ;;  %v2607_v52 = vld [vmem:[%s3693_s7 + $0x20] sm:$0xff]   ;;  %v3115_v54 = vpop.permute.xlu0 %795 }
 0x30c   :  { %v464_v21 = vmul.f32 %v3020_v56, %v3020_v56  ;;  %2538 = vmatpush3.bf16.msra.mxu1 %v2537_v18 }
 0x30d   :  { %v429_v57 = vpop.permute.xlu1 %428  ;;  %2539 = vmatprep.subr.bf16.mxu1 %v2633_v0 }
 0x30e   :  { %v2540_v58 = vpack.c.bf16 %v465_v1, %v464_v21  ;;  %v3031_v59 = vsub.f32 %v2783_v23, %v429_v57  ;;  %v57_v23 = vld [vmem:[%s3691_s4 + $0x30] sm:$0xff]  ;;  %v3117_v18 = vpop.permute.xlu0 %800 }
 0x310   :  { %v466_v6 = vmul.f32 %v3031_v59, %v3031_v59  ;;  %2541 = vmatpush3.bf16.msra.mxu1 %v2540_v58 }
 0x311   :  { %2542 = vmatprep.subr.bf16.mxu1 %v2633_v0 }
 0x312   :  { %v2543_v24 = vpack.c.bf16 %v467_v20, %v466_v6  ;;  %v3119_v1 = vpop.permute.xlu0 %805 }
 0x314   :  { %2544 = vmatpush3.bf16.msra.mxu1 %v2543_v24 }
 0x316   :  { %v3121_v21 = vpop.permute.xlu0 %810 }
 0x317   :  { %2295 = vmatmul.mubr.f32.vlgmr.msra.gmra.mrb[16].mxu1 %v2796_v26  ;;  %v63_v26 = vld [vmem:[%s3691_s4 + $0x60] sm:$0xff] }
 0x31a   :  { %v3123_v57 = vpop.permute.xlu0 %815 }
 0x31e   :  { %v3125_v58 = vpop.permute.xlu0 %825 }
 0x322   :  { %v3127_v20 = vpop.permute.xlu0 %835 }
 0x326   :  { %v3129_v6 = vpop.permute.xlu0 %845 }
 0x3ea   :  { %v534_v61 = vpop.f32.mrb[16].mxu1 }
 0x3eb   :  { %v2296_v62 = vpop.f32.mrb[17].mxu1  ;;  %v538_v63 = vsel %vm153_vm1, %v534_v61, 0.0  ;;  %v3133_v61 = vpop.permute.xlu0 %855 }
 0x3ec   :  { %539 = vadd.xlane.f32.xlu1 %v538_v63 }
 0x3fd   :  { %820 = vperm.xlu1 %2600, %v57_v23  }
 0x401   :  { %830 = vperm.xlu1 %2600, %v59_v5  }
 0x405   :  { %840 = vperm.xlu1 %2600, %v61_v9  }
 0x409   :  { %850 = vperm.xlu1 %2600, %v63_v26  }
 0x479   :  { %v540_v8 = vpop.xlane.xlu1 %539 }
 0x47a   :  { %v541_v13 = vmul.f32 %v540_v8, %v2808_v32 }
 0x47c   :  { %v542_v16 = vadd.f32 1e-05, %v541_v13 }
 0x47d   :  { %v3131_v24 = vpop.permute.xlu1 %820 }
 0x47e   :  { %2611 = vrsqrt.f32 %v542_v16 }
 0x481   :  { %v3135_v62 = vpop.permute.xlu1 %830 }
 0x485   :  { %v3137_v23 = vpop.permute.xlu1 %840 }
 0x488   :  { %v2612_v19 = vpop.eup %2611 }
 0x489   :  { %2297 = vmatprep.subr.msk.mxu0 %vm207_vm3, %v2612_v19  ;;  %v3147_v16 = vpop.permute.xlu1 %850 }
 0x48a   :  { %2298 = vmatpush3.msk.msra.mxu0 %vm207_vm3, %v2612_v19 }
 0x48b   :  { %2300 = vmatmul.mubr.msk.f32.vlgmr.msra.gmra.mrb[2].mxu0 %vm158_vm2, %v2814_v35  ;;  %2343 = vmatprep.subr.bf16.mxu0 %v2603_v29 }
 0x48c   :  { %2302 = vmatprep.mubr.msk.f32.mxu0 %vm158_vm2, %v2820_v36  ;;  %2344 = vmatpush3.bf16.msra.mxu0 %v2603_v29 }
 0x48d   :  { %2345 = vmatprep.subr.bf16.mxu0 %v2604_v30 }
 0x48f   :  { %2303 = vmatmul.mubr.msk.f32.gmra.mrb[4].mxu0 %vm158_vm2, %v2831_v37 }
 0x490   :  { %2305 = vmatprep.mubr.msk.f32.mxu0 %vm158_vm2, %v2836_v38  ;;  %2346 = vmatpush3.bf16.msra.mxu0 %v2604_v30 }
 0x491   :  { %2347 = vmatprep.subr.bf16.mxu0 %v2605_v15 }
 0x493   :  { %2306 = vmatmul.mubr.msk.f32.gmra.mrb[6].mxu0 %vm158_vm2, %v2845_v39 }
 0x494   :  { %2308 = vmatprep.mubr.msk.f32.mxu0 %vm158_vm2, %v2850_v40  ;;  %v2601_v40 = vld [vmem:[%s3692_s5] sm:$0xff]   ;;  %2348 = vmatpush3.bf16.msra.mxu0 %v2605_v15 }
 0x495   :  { %2323 = vmatprep.subr.bf16.mxu1 %v2601_v40  ;;  %2349 = vmatprep.subr.bf16.mxu0 %v2606_v51 }
 0x496   :  { %2324 = vmatpush3.bf16.msra.mxu1 %v2601_v40 }
 0x497   :  { %2309 = vmatmul.mubr.msk.f32.gmra.mrb[8].mxu0 %vm158_vm2, %v2859_v41 }
 0x498   :  { %2311 = vmatprep.mubr.msk.f32.mxu0 %vm158_vm2, %v2864_v42  ;;  %2350 = vmatpush3.bf16.msra.mxu0 %v2606_v51 }
 0x499   :  { %2351 = vmatprep.subr.bf16.mxu0 %v2607_v52 }
 0x49b   :  { %2312 = vmatmul.mubr.msk.f32.gmra.mrb[10].mxu0 %vm158_vm2, %v2873_v43  ;;  %v2602_v43 = vld [vmem:[%s3692_s5 + $0x8] sm:$0xff]  }
 0x49c   :  { %2314 = vmatprep.mubr.msk.f32.mxu0 %vm158_vm2, %v2878_v44  ;;  %2325 = vmatprep.subr.bf16.mxu1 %v2602_v43 }
 0x49d   :  { %2326 = vmatpush3.bf16.msra.mxu1 %v2602_v43  ;;  %2352 = vmatpush3.bf16.msra.mxu0 %v2607_v52 }
 0x49e   :  { %2545 = vmatprep.subr.bf16.mxu1 %v2633_v0 }
 0x49f   :  { %2315 = vmatmul.mubr.msk.f32.gmra.mrb[12].mxu0 %vm158_vm2, %v2887_v45 }
 0x4a0   :  { %2317 = vmatprep.mubr.msk.f32.mxu0 %vm158_vm2, %v2892_v46 }
 0x4a3   :  { %2318 = vmatmul.mubr.msk.f32.gmra.mrb[14].mxu0 %vm158_vm2, %v2901_v47 }
 0x4a4   :  { %2320 = vmatprep.mubr.msk.f32.mxu0 %vm158_vm2, %v2906_v48 }
 0x4a7   :  { %2321 = vmatmul.mubr.msk.f32.gmra.mrb[16].mxu0 %vm158_vm2, %v2915_v49 }
 0x55e   :  { %v2301_v32 = vpop.f32.mrb[2].mxu0 }
 0x55f   :  { %699 = vperm.xlu0 %2599, %v2301_v32   ;;  %v613_v35 = vpop.f32.mrb[3].mxu0 }
 0x562   :  { %v2304_v36 = vpop.f32.mrb[4].mxu0 }
 0x563   :  { %694 = vperm.xlu0 %2599, %v613_v35   ;;  %v623_v37 = vpop.f32.mrb[5].mxu0 }
 0x566   :  { %v2307_v38 = vpop.f32.mrb[6].mxu0 }
 0x567   :  { %709 = vperm.xlu0 %2599, %v2304_v36   ;;  %719 = vperm.xlu1 %2600, %v2307_v38   ;;  %v633_v39 = vpop.f32.mrb[7].mxu0 }
 0x56a   :  { %v2310_v41 = vpop.f32.mrb[8].mxu0 }
 0x56b   :  { %704 = vperm.xlu0 %2599, %v623_v37   ;;  %v643_v42 = vpop.f32.mrb[9].mxu0 }
 0x56e   :  { %v2313_v44 = vpop.f32.mrb[10].mxu0 }
 0x56f   :  { %714 = vperm.xlu0 %2599, %v633_v39   ;;  %v653_v45 = vpop.f32.mrb[11].mxu0 }
 0x570   :  { %734 = vperm.xlu1 %2600, %v653_v45  }
 0x572   :  { %v2316_v46 = vpop.f32.mrb[12].mxu0 }
 0x573   :  { %729 = vperm.xlu0 %2599, %v2310_v41   ;;  %v663_v47 = vpop.f32.mrb[13].mxu0 }
 0x574   :  { %744 = vperm.xlu1 %2600, %v663_v47  }
 0x576   :  { %v2319_v48 = vpop.f32.mrb[14].mxu0 }
 0x577   :  { %724 = vperm.xlu0 %2599, %v643_v42   ;;  %v673_v49 = vpop.f32.mrb[15].mxu0 }
 0x578   :  { %754 = vperm.xlu1 %2600, %v673_v49  }
 0x57a   :  { %v2322_v12 = vpop.f32.mrb[16].mxu0 }
 0x57b   :  { %739 = vperm.xlu0 %2599, %v2313_v44   ;;  %v683_v11 = vpop.f32.mrb[17].mxu0 }
 0x57c   :  { %764 = vperm.xlu1 %2600, %v683_v11  }
 0x57f   :  { %749 = vperm.xlu0 %2599, %v2316_v46  }
 0x580   :  { %860 = vperm.xlu1 %2600, %v65_v27  }
 0x583   :  { %759 = vperm.xlu0 %2599, %v2319_v48  }
 0x587   :  { %769 = vperm.xlu0 %2599, %v2322_v12  }
 0x58b   :  { %865 = vperm.xlu0 %2599, %v66_v28  }
 0x5de   :  { %v700_v63 = vpop.permute.xlu0 %699 }
 0x5df   :  { %v773_v5 = vmul.f32 %v700_v63, %v2952_v33 }
 0x5e1   :  { %v3142_v8 = vmul.f32 %v3115_v54, %v773_v5 }
 0x5e2   :  { %v695_v9 = vpop.permute.xlu0 %694 }
 0x5e3   :  { %v772_v26 = vmul.f32 %v695_v9, %v2955_v50 }
 0x5e5   :  { %v3145_v13 = vmul.f32 %v3113_v53, %v772_v26 }
 0x5e6   :  { %v710_v19 = vpop.permute.xlu0 %709  ;;  %v720_v33 = vpop.permute.xlu1 %719 }
 0x5e7   :  { %v884_v32 = vpack.c.bf16 %v3142_v8, %v3145_v13  ;;  %v775_v35 = vmul.f32 %v710_v19, %v2962_v55  ;;  %v777_v38 = vmul.f32 %v720_v33, %v2973_v60 }
 0x5e9   :  { %2327 = vmatprep.mubr.msk.bf16.mxu1 %vm915_vm4, %v884_v32  ;;  %v3155_v37 = vmul.f32 %v3119_v1, %v775_v35  ;;  %v3165_v43 = vmul.f32 %v3123_v57, %v777_v38 }
 0x5ea   :  { %v705_v36 = vpop.permute.xlu0 %704 }
 0x5eb   :  { %v774_v50 = vmul.f32 %v705_v36, %v2965_v2 }
 0x5ed   :  { %v3159_v39 = vmul.f32 %v3117_v18, %v774_v50 }
 0x5ee   :  { %v715_v40 = vpop.permute.xlu0 %714 }
 0x5ef   :  { %v885_v41 = vpack.c.bf16 %v3155_v37, %v3159_v39  ;;  %v776_v55 = vmul.f32 %v715_v40, %v2977_v3  ;;  %v735_v42 = vpop.permute.xlu1 %734 }
 0x5f0   :  { %v780_v48 = vmul.f32 %v735_v42, %v2999_v25 }
 0x5f1   :  { %v3168_v2 = vmul.f32 %v3121_v21, %v776_v55  ;;  %2328 = vmatmul.mubr.msk.bf16.vlgmr.msra.gmra.mrb[20].mxu1 %vm915_vm4, %v885_v41  ;;  %v2610_v41 = vld [vmem:[%s3693_s7 + $0x38] sm:$0xff]   ;;  %v3248_v55 = vld [vmem:[%s3694_s6] ss:$0 sm:$0xff] }
 0x5f2   :  { %v730_v44 = vpop.permute.xlu0 %729  ;;  %v3187_v29 = vmul.f32 %v3135_v62, %v780_v48 }
 0x5f3   :  { %v886_v60 = vpack.c.bf16 %v3165_v43, %v3168_v2  ;;  %v779_v45 = vmul.f32 %v730_v44, %v2984_v7  ;;  %v745_v46 = vpop.permute.xlu1 %744 }
 0x5f5   :  { %2331 = vmatprep.mubr.msk.bf16.mxu1 %vm915_vm4, %v886_v60  ;;  %v3178_v49 = vmul.f32 %v3125_v58, %v779_v45 }
 0x5f6   :  { %v725_v47 = vpop.permute.xlu0 %724 }
 0x5f7   :  { %v778_v3 = vmul.f32 %v725_v47, %v2988_v10  ;;  %v755_v28 = vpop.permute.xlu1 %754  ;;  %v782_v10 = vmul.f32 %v745_v46, %v3010_v34 }
 0x5f9   :  { %v3181_v12 = vmul.f32 %v3131_v24, %v778_v3  ;;  %v3198_v52 = vmul.f32 %v3137_v23, %v782_v10 }
 0x5fa   :  { %v740_v11 = vpop.permute.xlu0 %739 }
 0x5fb   :  { %v887_v27 = vpack.c.bf16 %v3178_v49, %v3181_v12  ;;  %v781_v7 = vmul.f32 %v740_v11, %v2995_v22  ;;  %v784_v22 = vmul.f32 %v755_v28, %v3020_v56  ;;  %v765_v34 = vpop.permute.xlu1 %764 }
 0x5fc   :  { %v786_v33 = vmul.f32 %v765_v34, %v3031_v59  ;;  %v2609_v59 = vld [vmem:[%s3693_s7 + $0x30] sm:$0xff]  }
 0x5fd   :  { %v3191_v25 = vmul.f32 %v3127_v20, %v781_v7  ;;  %2332 = vmatmul.mubr.msk.bf16.gmra.mrb[24].mxu1 %vm915_vm4, %v887_v27  ;;  %v3209_v19 = vmul.f32 %v3147_v16, %v784_v22 }
 0x5fe   :  { %v750_v30 = vpop.permute.xlu0 %749 }
 0x5ff   :  { %v888_v15 = vpack.c.bf16 %v3191_v25, %v3187_v29  ;;  %v783_v51 = vmul.f32 %v750_v30, %v3006_v31  ;;  %v3217_v35 = vpop.permute.xlu1 %860 }
 0x600   :  { %v3225_v50 = vmul.f32 %v3217_v35, %v786_v33 }
 0x601   :  { %v3202_v63 = vmul.f32 %v3129_v6, %v783_v51  ;;  %2335 = vmatprep.mubr.msk.bf16.mxu1 %vm915_vm4, %v888_v15 }
 0x602   :  { %v760_v5 = vpop.permute.xlu0 %759 }
 0x603   :  { %v889_v9 = vpack.c.bf16 %v3202_v63, %v3198_v52  ;;  %v785_v26 = vmul.f32 %v760_v5, %v3013_v14 }
 0x605   :  { %v3212_v31 = vmul.f32 %v3133_v61, %v785_v26  ;;  %2336 = vmatmul.mubr.msk.bf16.gmra.mrb[28].mxu1 %vm915_vm4, %v889_v9 }
 0x606   :  { %v770_v56 = vpop.permute.xlu0 %769 }
 0x607   :  { %v890_v32 = vpack.c.bf16 %v3212_v31, %v3209_v19  ;;  %v787_v36 = vmul.f32 %v770_v56, %v3025_v17  ;;  %v2608_v17 = vld [vmem:[%s3693_s7 + $0x28] sm:$0xff]  }
 0x608   :  { %2353 = vmatprep.subr.bf16.mxu0 %v2608_v17 }
 0x609   :  { %2339 = vmatprep.mubr.msk.bf16.mxu1 %vm915_vm4, %v890_v32  ;;  %2354 = vmatpush3.bf16.msra.mxu0 %v2608_v17 }
 0x60a   :  { %v3222_v14 = vpop.permute.xlu0 %865  ;;  %2355 = vmatprep.subr.bf16.mxu0 %v2609_v59 }
 0x60b   :  { %v3228_v38 = vmul.f32 %v3222_v14, %v787_v36 }
 0x60d   :  { %v891_v40 = vpack.c.bf16 %v3228_v38, %v3225_v50  ;;  %2356 = vmatpush3.bf16.msra.mxu0 %v2609_v59 }
 0x60e   :  { %2357 = vmatprep.subr.bf16.mxu0 %v2610_v41 }
 0x60f   :  { %2340 = vmatmul.mubr.msk.bf16.gmra.mrb[32].mxu1 %vm915_vm4, %v891_v40 }
 0x610   :  { %2407 = vmatprep.mubr.msk.f32.mxu1 %vm2634_vm0, %v2635_v4 }
 0x611   :  { %2358 = vmatpush3.bf16.msra.mxu0 %v2610_v41 }
 0x612   :  { %2569 = vmatprep.subr.bf16.mxu0 %v2633_v0 }
 0x6c4   :  { %v2329_v42 = vpop.f32.mrb[20].mxu1 }
 0x6c5   :  { %v983_v44 = vadd.f32 %v2329_v42, %v3248_v55  ;;  %v974_v60 = vpop.f32.mrb[21].mxu1 }
 0x6c6   :  { %v975_v45 = vadd.f32 %v3248_v55, %v974_v60  ;;  %v2330_v46 = vpop.f32.mrb[22].mxu1 }
 0x6c7   :  { %v1039_v47 = vmul.f32 0.01, %v983_v44  ;;  %v986_v3 = vadd.f32 %v2330_v46, %v3248_v55  ;;  %v977_v48 = vpop.f32.mrb[23].mxu1 }
 0x6c8   :  { %v1037_v11 = vmul.f32 0.01, %v975_v45  ;;  %v978_v27 = vadd.f32 %v3248_v55, %v977_v48 }
 0x6c9   :  { %v1040_v7 = vmul.f32 0.01, %v986_v3  ;;  %v1055_v10 = vmax.f32 %v983_v44, %v1039_v47 }
 0x6ca   :  { %v1038_v28 = vmul.f32 0.01, %v978_v27  ;;  %v1053_v15 = vmax.f32 %v975_v45, %v1037_v11 }
 0x6cb   :  { %v1056_v30 = vmax.f32 %v986_v3, %v1040_v7 }
 0x6cc   :  { %v1054_v51 = vmax.f32 %v978_v27, %v1038_v28 }
 0x6cd   :  { %v1070_v22 = vpack.c.bf16 %v1056_v30, %v1055_v10 }
 0x6ce   :  { %v1069_v34 = vpack.c.bf16 %v1054_v51, %v1053_v15 }
 0x6d0   :  { %v2333_v5 = vpop.f32.mrb[24].mxu1  ;;  %2359 = vmatprep.mubr.bf16.mxu0 %v1069_v34 }
 0x6d1   :  { %v999_v9 = vadd.f32 %v2333_v5, %v3248_v55  ;;  %v990_v26 = vpop.f32.mrb[25].mxu1  ;;  %2360 = vmatmul.mubr.bf16.vlgmr.msra.gmra.mrb[20].mxu0 %v1070_v22 }
 0x6d2   :  { %v991_v56 = vadd.f32 %v3248_v55, %v990_v26  ;;  %v2334_v32 = vpop.f32.mrb[26].mxu1 }
 0x6d3   :  { %v1043_v33 = vmul.f32 0.01, %v999_v9  ;;  %v1002_v36 = vadd.f32 %v2334_v32, %v3248_v55  ;;  %v993_v40 = vpop.f32.mrb[27].mxu1 }
 0x6d4   :  { %v1041_v17 = vmul.f32 0.01, %v991_v56  ;;  %v994_v59 = vadd.f32 %v3248_v55, %v993_v40 }
 0x6d5   :  { %v1044_v41 = vmul.f32 0.01, %v1002_v36  ;;  %v1059_v44 = vmax.f32 %v999_v9, %v1043_v33 }
 0x6d6   :  { %v1042_v42 = vmul.f32 0.01, %v994_v59  ;;  %v1057_v45 = vmax.f32 %v991_v56, %v1041_v17 }
 0x6d7   :  { %v1060_v60 = vmax.f32 %v1002_v36, %v1044_v41 }
 0x6d8   :  { %v1058_v46 = vmax.f32 %v994_v59, %v1042_v42  ;;  %v2337_v47 = vpop.f32.mrb[28].mxu1 }
 0x6d9   :  { %v1015_v3 = vadd.f32 %v2337_v47, %v3248_v55  ;;  %v1006_v48 = vpop.f32.mrb[29].mxu1  ;;  %v1072_v11 = vpack.c.bf16 %v1060_v60, %v1059_v44 }
 0x6da   :  { %v1007_v27 = vadd.f32 %v3248_v55, %v1006_v48  ;;  %v2338_v7 = vpop.f32.mrb[30].mxu1  ;;  %v1071_v28 = vpack.c.bf16 %v1058_v46, %v1057_v45 }
 0x6db   :  { %v1047_v10 = vmul.f32 0.01, %v1015_v3  ;;  %v1018_v30 = vadd.f32 %v2338_v7, %v3248_v55  ;;  %v1009_v15 = vpop.f32.mrb[31].mxu1 }
 0x6dc   :  { %v1045_v51 = vmul.f32 0.01, %v1007_v27  ;;  %v1010_v22 = vadd.f32 %v3248_v55, %v1009_v15  ;;  %2363 = vmatprep.mubr.bf16.mxu0 %v1071_v28  ;;  %v1996_v15 = vld [vmem:[%s3695_s8] ss:$0 sm:$0xff] }
 0x6dd   :  { %v1048_v34 = vmul.f32 0.01, %v1018_v30  ;;  %2364 = vmatmul.mubr.bf16.gmra.mrb[24].mxu0 %v1072_v11  ;;  %v1063_v9 = vmax.f32 %v1015_v3, %v1047_v10 }
 0x6de   :  { %v1046_v5 = vmul.f32 0.01, %v1010_v22  ;;  %v1061_v56 = vmax.f32 %v1007_v27, %v1045_v51 }
 0x6df   :  { %v1064_v26 = vmax.f32 %v1018_v30, %v1048_v34 }
 0x6e0   :  { %v1062_v32 = vmax.f32 %v1010_v22, %v1046_v5 }
 0x6e1   :  { %v1074_v33 = vpack.c.bf16 %v1064_v26, %v1063_v9 }
 0x6e2   :  { %v2341_v36 = vpop.f32.mrb[32].mxu1  ;;  %v1073_v40 = vpack.c.bf16 %v1062_v32, %v1061_v56 }
 0x6e3   :  { %v1031_v17 = vadd.f32 %v2341_v36, %v3248_v55  ;;  %v1022_v59 = vpop.f32.mrb[33].mxu1 }
 0x6e4   :  { %v1023_v41 = vadd.f32 %v3248_v55, %v1022_v59  ;;  %v2342_v42 = vpop.f32.mrb[34].mxu1  ;;  %2367 = vmatprep.mubr.bf16.mxu0 %v1073_v40 }
 0x6e5   :  { %v1051_v44 = vmul.f32 0.01, %v1031_v17  ;;  %v1034_v60 = vadd.f32 %v2342_v42, %v3248_v55  ;;  %v1025_v45 = vpop.f32.mrb[35].mxu1  ;;  %2368 = vmatmul.mubr.bf16.gmra.mrb[28].mxu0 %v1074_v33 }
 0x6e6   :  { %v1049_v46 = vmul.f32 0.01, %v1023_v41  ;;  %v1026_v47 = vadd.f32 %v3248_v55, %v1025_v45 }
 0x6e7   :  { %v1052_v3 = vmul.f32 0.01, %v1034_v60  ;;  %v1067_v11 = vmax.f32 %v1031_v17, %v1051_v44 }
 0x6e8   :  { %v1050_v48 = vmul.f32 0.01, %v1026_v47  ;;  %v1065_v7 = vmax.f32 %v1023_v41, %v1049_v46 }
 0x6e9   :  { %v1068_v27 = vmax.f32 %v1034_v60, %v1052_v3 }
 0x6ea   :  { %v1066_v28 = vmax.f32 %v1026_v47, %v1050_v48 }
 0x6eb   :  { %v1076_v10 = vpack.c.bf16 %v1068_v27, %v1067_v11 }
 0x6ec   :  { %v1075_v30 = vpack.c.bf16 %v1066_v28, %v1065_v7 }
 0x6ee   :  { %2371 = vmatprep.mubr.bf16.mxu0 %v1075_v30 }
 0x6ef   :  { %2372 = vmatmul.mubr.bf16.gmra.mrb[32].mxu0 %v1076_v10 }
 0x6f0   :  { %2468 = vmatprep.mubr.msk.f32.mxu0 %vm2634_vm0, %v2635_v4 }
 0x7a4   :  { %v2361_v51 = vpop.f32.mrb[20].mxu0 }
 0x7a5   :  { %v1182_v22 = vpop.f32.mrb[21].mxu0  ;;  %v1191_v56 = vadd.f32 %v2361_v51, %v1996_v15 }
 0x7a6   :  { %v1183_v55 = vadd.f32 %v1996_v15, %v1182_v22  ;;  %v2362_v34 = vpop.f32.mrb[22].mxu0 }
 0x7a7   :  { %v1185_v5 = vpop.f32.mrb[23].mxu0  ;;  %v1194_v9 = vadd.f32 %v2362_v34, %v1996_v15  ;;  %v3283_v40 = vadd.f32 %v1191_v56, %v3159_v39 }
 0x7a8   :  { %v1186_v26 = vadd.f32 %v1996_v15, %v1185_v5  ;;  %v3272_v32 = vadd.f32 %v1183_v55, %v3145_v13 }
 0x7a9   :  { %v3278_v4 = vadd.f32 %v1194_v9, %v3155_v37 }
 0x7aa   :  { %v3275_v33 = vadd.f32 %v1186_v26, %v3142_v8 }
 0x7ab   :  { %v2549_v17 = vpack.c.bf16 %v3278_v4, %v3283_v40 }
 0x7ac   :  { %v2546_v36 = vpack.c.bf16 %v3275_v33, %v3272_v32 }
 0x7ae   :  { %2547 = vmatpush3.bf16.msra.mxu1 %v2546_v36 }
 0x7af   :  { %2548 = vmatprep.subr.bf16.mxu1 %v2633_v0 }
 0x7b0   :  { %v2365_v13 = vpop.f32.mrb[24].mxu0 }
 0x7b1   :  { %v1198_v59 = vpop.f32.mrb[25].mxu0  ;;  %v1207_v60 = vadd.f32 %v2365_v13, %v1996_v15 }
 0x7b2   :  { %v1199_v41 = vadd.f32 %v1996_v15, %v1198_v59  ;;  %v2366_v8 = vpop.f32.mrb[26].mxu0  ;;  %2550 = vmatpush3.bf16.msra.mxu1 %v2549_v17 }
 0x7b3   :  { %v1201_v42 = vpop.f32.mrb[27].mxu0  ;;  %2551 = vmatprep.subr.bf16.mxu1 %v2633_v0  ;;  %v1210_v37 = vadd.f32 %v2366_v8, %v1996_v15  ;;  %v3301_v11 = vadd.f32 %v1207_v60, %v3181_v12  ;;  %v3367_v60 = vld [vmem:[%s3689_s1 + $0x8] sm:$0xff] }
 0x7b4   :  { %v1202_v44 = vadd.f32 %v1996_v15, %v1201_v42  ;;  %v3290_v39 = vadd.f32 %v1199_v41, %v3168_v2 }
 0x7b5   :  { %v3296_v46 = vadd.f32 %v1210_v37, %v3178_v49  ;;  %v3359_v37 = vld [vmem:[%s3690_s3] sm:$0x3] }
 0x7b6   :  { %v3293_v45 = vadd.f32 %v1202_v44, %v3165_v43 }
 0x7b7   :  { %v2555_v43 = vpack.c.bf16 %v3296_v46, %v3301_v11 }
 0x7b8   :  { %v2552_v47 = vpack.c.bf16 %v3293_v45, %v3290_v39  ;;  %v2369_v3 = vpop.f32.mrb[28].mxu0 }
 0x7b9   :  { %v1214_v48 = vpop.f32.mrb[29].mxu0  ;;  %v1223_v10 = vadd.f32 %v2369_v3, %v1996_v15  ;;  %v3381_v3 = vld [vmem:[%s3689_s1 + $0x18] sm:$0xff] }
 0x7ba   :  { %v1215_v27 = vadd.f32 %v1996_v15, %v1214_v48  ;;  %v2370_v7 = vpop.f32.mrb[30].mxu0  ;;  %2553 = vmatpush3.bf16.msra.mxu1 %v2552_v47  ;;  %v3374_v47 = vld [vmem:[%s3689_s1 + $0x10] sm:$0xff]  ;;  %v3388_v48 = vld [vmem:[%s3689_s1 + $0x20] sm:$0xff] }
 0x7bb   :  { %v1217_v28 = vpop.f32.mrb[31].mxu0  ;;  %2554 = vmatprep.subr.bf16.mxu1 %v2633_v0  ;;  %v1226_v2 = vadd.f32 %v2370_v7, %v1996_v15  ;;  %v3319_v55 = vadd.f32 %v1223_v10, %v3198_v52  ;;  %v3402_v7 = vld [vmem:[%s3689_s1 + $0x30] sm:$0xff]  ;;  %v3434_v10 = vld [vmem:[%s3689_s1 + $0x58] sm:$0xff] }
 0x7bc   :  { %v1218_v49 = vadd.f32 %v1996_v15, %v1217_v28  ;;  %v3307_v30 = vadd.f32 %v1215_v27, %v3187_v29  ;;  %v3395_v27 = vld [vmem:[%s3689_s1 + $0x28] sm:$0xff]  ;;  %v3409_v28 = vld [vmem:[%s3689_s1 + $0x38] sm:$0xff] }
 0x7bd   :  { %v3314_v12 = vadd.f32 %v1226_v2, %v3202_v63  ;;  %v3423_v2 = vld [vmem:[%s3689_s1 + $0x48] sm:$0xff] }
 0x7be   :  { %v3310_v51 = vadd.f32 %v1218_v49, %v3191_v25  ;;  %2556 = vmatpush3.bf16.msra.mxu1 %v2555_v43  ;;  %v3416_v43 = vld [vmem:[%s3689_s1 + $0x40] sm:$0xff]  ;;  %v2627_v49 = vld [vmem:[%s3689_s1 + $0x50] sm:$0xff] }
 0x7bf   :  { %2557 = vmatprep.subr.bf16.mxu1 %v2633_v0  ;;  %v2561_v29 = vpack.c.bf16 %v3314_v12, %v3319_v55 }
 0x7c0   :  { %v2558_v22 = vpack.c.bf16 %v3310_v51, %v3307_v30 }
 0x7c2   :  { %v2373_v34 = vpop.f32.mrb[32].mxu0  ;;  %2559 = vmatpush3.bf16.msra.mxu1 %v2558_v22  ;;  %v3441_v22 = vld [vmem:[%s3689_s1 + $0x60] sm:$0xff] }
 0x7c3   :  { %v1230_v5 = vpop.f32.mrb[33].mxu0  ;;  %2560 = vmatprep.subr.bf16.mxu1 %v2633_v0  ;;  %v1239_v36 = vadd.f32 %v2373_v34, %v1996_v15  ;;  %v3448_v34 = vld [vmem:[%s3689_s1 + $0x68] sm:$0xff] }
 0x7c4   :  { %v1231_v25 = vadd.f32 %v1996_v15, %v1230_v5  ;;  %v2374_v9 = vpop.f32.mrb[34].mxu0  ;;  %v3455_v5 = vld [vmem:[%s3689_s1 + $0x70] sm:$0xff] }
 0x7c5   :  { %v1233_v26 = vpop.f32.mrb[35].mxu0  ;;  %v1242_v56 = vadd.f32 %v2374_v9, %v1996_v15  ;;  %v3337_v41 = vadd.f32 %v1239_v36, %v3225_v50 }
 0x7c6   :  { %v1234_v63 = vadd.f32 %v1996_v15, %v1233_v26  ;;  %2562 = vmatpush3.bf16.msra.mxu1 %v2561_v29  ;;  %v3326_v52 = vadd.f32 %v1231_v25, %v3209_v19  ;;  %v3345_v19 = vld [vmem:[%s3688_s2] sm:$0x3]  ;;  %v3462_v29 = vld [vmem:[%s3689_s1 + $0x78] sm:$0xff] }
 0x7c7   :  { %2563 = vmatprep.subr.bf16.mxu1 %v2633_v0  ;;  %v3332_v13 = vadd.f32 %v1242_v56, %v3228_v38 }
 0x7c8   :  { %v3329_v17 = vadd.f32 %v1234_v63, %v3212_v31  ;;  %v3351_v31 = vld [vmem:[%s3689_s1] sm:$0xff] }
 0x7c9   :  { %v2567_v15 = vpack.c.bf16 %v3332_v13, %v3337_v41 }
 0x7ca   :  { %v2564_v59 = vpack.c.bf16 %v3329_v17, %v3326_v52 }
 0x7cc   :  { %2565 = vmatpush3.bf16.msra.mxu1 %v2564_v59 }
 0x7cd   :  { %2566 = vmatprep.subr.bf16.mxu1 %v2633_v0 }
 0x7d0   :  { %2568 = vmatpush3.bf16.msra.mxu1 %v2567_v15 }
 0x7d3   :  { %2408 = vmatmul.mubr.f32.vlgmr.msra.gmra.mrb[18].mxu1 %v3345_v19 }
 0x7d4   :  { %2412 = vmatprep.mubr.msk.f32.mxu1 %vm158_vm2, %v3351_v31 }
 0x8a6   :  { %v1327_v50 = vpop.f32.mrb[18].mxu1 }
 0x8a7   :  { %v2409_v38 = vpop.f32.mrb[19].mxu1  ;;  %v1331_v8 = vsel %vm153_vm1, %v1327_v50, 0.0 }
 0x8a8   :  { %1332 = vadd.xlane.f32.xlu1 %v1331_v8 }
 0x935   :  { %v1333_v42 = vpop.xlane.xlu1 %1332 }
 0x936   :  { %v1334_v44 = vmul.f32 %v3359_v37, %v1333_v42 }
 0x938   :  { %2410 = vmatprep.subr.msk.mxu1 %vm207_vm3, %v1334_v44 }
 0x939   :  { %2411 = vmatpush3.msk.msra.mxu1 %vm207_vm3, %v1334_v44 }
 0x93a   :  { %2413 = vmatmul.mubr.msk.f32.vlgmr.msra.gmra.mrb[36].mxu1 %vm158_vm2, %v3367_v60 }
 0x93b   :  { %2415 = vmatprep.mubr.msk.f32.mxu1 %vm158_vm2, %v3374_v47 }
 0x93e   :  { %2416 = vmatmul.mubr.msk.f32.gmra.mrb[38].mxu1 %vm158_vm2, %v3381_v3 }
 0x93f   :  { %2418 = vmatprep.mubr.msk.f32.mxu1 %vm158_vm2, %v3388_v48 }
 0x942   :  { %2419 = vmatmul.mubr.msk.f32.gmra.mrb[40].mxu1 %vm158_vm2, %v3395_v27 }
 0x943   :  { %2421 = vmatprep.mubr.msk.f32.mxu1 %vm158_vm2, %v3402_v7 }
 0x946   :  { %2422 = vmatmul.mubr.msk.f32.gmra.mrb[42].mxu1 %vm158_vm2, %v3409_v28 }
 0x947   :  { %2424 = vmatprep.mubr.msk.f32.mxu1 %vm158_vm2, %v3416_v43 }
 0x94a   :  { %2425 = vmatmul.mubr.msk.f32.gmra.mrb[44].mxu1 %vm158_vm2, %v3423_v2 }
 0x94b   :  { %2427 = vmatprep.mubr.msk.f32.mxu1 %vm158_vm2, %v2627_v49 }
 0x94e   :  { %2428 = vmatmul.mubr.msk.f32.gmra.mrb[46].mxu1 %vm158_vm2, %v3434_v10 }
 0x94f   :  { %2430 = vmatprep.mubr.msk.f32.mxu1 %vm158_vm2, %v3441_v22 }
 0x952   :  { %2431 = vmatmul.mubr.msk.f32.gmra.mrb[48].mxu1 %vm158_vm2, %v3448_v34 }
 0x953   :  { %2433 = vmatprep.mubr.msk.f32.mxu1 %vm158_vm2, %v3455_v5 }
 0x956   :  { %2434 = vmatmul.mubr.msk.f32.gmra.mrb[50].mxu1 %vm158_vm2, %v3462_v29 }
 0x957   :  { %2488 = vmatprep.mubr.msk.f32.mxu1 %vm158_vm2, %v2627_v49 }
 0xa0d   :  { %v2414_v25 = vpop.f32.mrb[36].mxu1 }
 0xa0e   :  { %1490 = vperm.xlu0 %2599, %v2414_v25   ;;  %v1404_v9 = vpop.f32.mrb[37].mxu1 }
 0xa11   :  { %v2417_v26 = vpop.f32.mrb[38].mxu1 }
 0xa12   :  { %1485 = vperm.xlu0 %2599, %v1404_v9   ;;  %v1414_v56 = vpop.f32.mrb[39].mxu1 }
 0xa15   :  { %v2420_v63 = vpop.f32.mrb[40].mxu1 }
 0xa16   :  { %1500 = vperm.xlu0 %2599, %v2417_v26   ;;  %v1424_v36 = vpop.f32.mrb[41].mxu1 }
 0xa19   :  { %v2423_v59 = vpop.f32.mrb[42].mxu1 }
 0xa1a   :  { %1495 = vperm.xlu0 %2599, %v1414_v56   ;;  %v1434_v15 = vpop.f32.mrb[43].mxu1 }
 0xa1d   :  { %v2426_v50 = vpop.f32.mrb[44].mxu1 }
 0xa1e   :  { %1510 = vperm.xlu0 %2599, %v2420_v63   ;;  %1530 = vperm.xlu1 %2600, %v2426_v50   ;;  %v1444_v38 = vpop.f32.mrb[45].mxu1 }
 0xa21   :  { %v2429_v8 = vpop.f32.mrb[46].mxu1 }
 0xa22   :  { %1505 = vperm.xlu0 %2599, %v1424_v36   ;;  %v1454_v42 = vpop.f32.mrb[47].mxu1 }
 0xa25   :  { %v2432_v44 = vpop.f32.mrb[48].mxu1 }
 0xa26   :  { %1520 = vperm.xlu0 %2599, %v2423_v59   ;;  %v1464_v49 = vpop.f32.mrb[49].mxu1 }
 0xa29   :  { %v2435_v25 = vpop.f32.mrb[50].mxu1 }
 0xa2a   :  { %1515 = vperm.xlu0 %2599, %v1434_v15   ;;  %v1474_v9 = vpop.f32.mrb[51].mxu1 }
 0xa2b   :  { %1555 = vperm.xlu1 %2600, %v1474_v9  }
 0xa2e   :  { %1525 = vperm.xlu0 %2599, %v1444_v38  }
 0xa32   :  { %1540 = vperm.xlu0 %2599, %v2429_v8  }
 0xa36   :  { %1535 = vperm.xlu0 %2599, %v1454_v42  }
 0xa3a   :  { %1550 = vperm.xlu0 %2599, %v2432_v44  }
 0xa3e   :  { %1545 = vperm.xlu0 %2599, %v1464_v49  }
 0xa42   :  { %1560 = vperm.xlu0 %2599, %v2435_v25  }
 0xa8d   :  { %v1491_v26 = vpop.permute.xlu0 %1490 }
 0xa8e   :  { %v3468_v56 = vsub.f32 %v3275_v33, %v1491_v26 }
 0xa90   :  { %v1580_v59 = vmul.f32 %v3468_v56, %v3468_v56 }
 0xa91   :  { %v1486_v63 = vpop.permute.xlu0 %1485 }
 0xa92   :  { %v3471_v36 = vsub.f32 %v3272_v32, %v1486_v63 }
 0xa94   :  { %v1579_v15 = vmul.f32 %v3471_v36, %v3471_v36 }
 0xa95   :  { %v1501_v50 = vpop.permute.xlu0 %1500 }
 0xa96   :  { %v2570_v38 = vpack.c.bf16 %v1580_v59, %v1579_v15  ;;  %v3478_v8 = vsub.f32 %v3278_v4, %v1501_v50 }
 0xa98   :  { %2571 = vmatpush3.bf16.msra.mxu0 %v2570_v38  ;;  %v1582_v32 = vmul.f32 %v3478_v8, %v3478_v8 }
 0xa99   :  { %v1496_v42 = vpop.permute.xlu0 %1495  ;;  %2572 = vmatprep.subr.bf16.mxu0 %v2633_v0 }
 0xa9a   :  { %v3482_v33 = vsub.f32 %v3283_v40, %v1496_v42 }
 0xa9c   :  { %v1581_v44 = vmul.f32 %v3482_v33, %v3482_v33 }
 0xa9d   :  { %v1511_v49 = vpop.permute.xlu0 %1510 }
 0xa9e   :  { %v2573_v25 = vpack.c.bf16 %v1582_v32, %v1581_v44  ;;  %v3489_v9 = vsub.f32 %v3293_v45, %v1511_v49  ;;  %v1531_v45 = vpop.permute.xlu1 %1530 }
 0xaa0   :  { %2574 = vmatpush3.bf16.msra.mxu0 %v2573_v25  ;;  %v1584_v40 = vmul.f32 %v3489_v9, %v3489_v9 }
 0xaa1   :  { %v1506_v4 = vpop.permute.xlu0 %1505  ;;  %2575 = vmatprep.subr.bf16.mxu0 %v2633_v0 }
 0xaa2   :  { %v3493_v26 = vsub.f32 %v3290_v39, %v1506_v4  ;;  %v3507_v39 = vsub.f32 %v3310_v51, %v1531_v45 }
 0xaa4   :  { %v1583_v63 = vmul.f32 %v3493_v26, %v3493_v26  ;;  %v1588_v4 = vmul.f32 %v3507_v39, %v3507_v39 }
 0xaa5   :  { %v1521_v59 = vpop.permute.xlu0 %1520 }
 0xaa6   :  { %v2576_v15 = vpack.c.bf16 %v1584_v40, %v1583_v63  ;;  %v3500_v50 = vsub.f32 %v3296_v46, %v1521_v59 }
 0xaa8   :  { %2577 = vmatpush3.bf16.msra.mxu0 %v2576_v15  ;;  %v1586_v32 = vmul.f32 %v3500_v50, %v3500_v50 }
 0xaa9   :  { %v1516_v38 = vpop.permute.xlu0 %1515  ;;  %2578 = vmatprep.subr.bf16.mxu0 %v2633_v0 }
 0xaaa   :  { %v3504_v42 = vsub.f32 %v3301_v11, %v1516_v38 }
 0xaac   :  { %v1585_v44 = vmul.f32 %v3504_v42, %v3504_v42 }
 0xaad   :  { %v1526_v49 = vpop.permute.xlu0 %1525 }
 0xaae   :  { %v2579_v46 = vpack.c.bf16 %v1586_v32, %v1585_v44  ;;  %v3514_v25 = vsub.f32 %v3307_v30, %v1526_v49 }
 0xab0   :  { %v1587_v11 = vmul.f32 %v3514_v25, %v3514_v25  ;;  %2580 = vmatpush3.bf16.msra.mxu0 %v2579_v46 }
 0xab1   :  { %v1541_v51 = vpop.permute.xlu0 %1540  ;;  %2581 = vmatprep.subr.bf16.mxu0 %v2633_v0 }
 0xab2   :  { %v2582_v40 = vpack.c.bf16 %v1588_v4, %v1587_v11  ;;  %v3522_v63 = vsub.f32 %v3314_v12, %v1541_v51  ;;  %v1556_v12 = vpop.permute.xlu1 %1555 }
 0xab4   :  { %2583 = vmatpush3.bf16.msra.mxu0 %v2582_v40  ;;  %v1590_v15 = vmul.f32 %v3522_v63, %v3522_v63 }
 0xab5   :  { %v1536_v59 = vpop.permute.xlu0 %1535  ;;  %2584 = vmatprep.subr.bf16.mxu0 %v2633_v0 }
 0xab6   :  { %v3526_v30 = vsub.f32 %v3319_v55, %v1536_v59  ;;  %v3540_v55 = vsub.f32 %v3337_v41, %v1556_v12 }
 0xab8   :  { %v1589_v45 = vmul.f32 %v3526_v30, %v3526_v30  ;;  %v1593_v59 = vmul.f32 %v3540_v55, %v3540_v55 }
 0xab9   :  { %v1551_v38 = vpop.permute.xlu0 %1550 }
 0xaba   :  { %v2585_v32 = vpack.c.bf16 %v1590_v15, %v1589_v45  ;;  %v3533_v44 = vsub.f32 %v3329_v17, %v1551_v38 }
 0xabc   :  { %2586 = vmatpush3.bf16.msra.mxu0 %v2585_v32  ;;  %v1592_v4 = vmul.f32 %v3533_v44, %v3533_v44 }
 0xabd   :  { %v1546_v49 = vpop.permute.xlu0 %1545  ;;  %2587 = vmatprep.subr.bf16.mxu0 %v2633_v0 }
 0xabe   :  { %v3537_v46 = vsub.f32 %v3326_v52, %v1546_v49 }
 0xac0   :  { %v1591_v11 = vmul.f32 %v3537_v46, %v3537_v46 }
 0xac1   :  { %v1561_v51 = vpop.permute.xlu0 %1560 }
 0xac2   :  { %v2588_v17 = vpack.c.bf16 %v1592_v4, %v1591_v11  ;;  %v3547_v40 = vsub.f32 %v3332_v13, %v1561_v51 }
 0xac4   :  { %v1594_v52 = vmul.f32 %v3547_v40, %v3547_v40  ;;  %2589 = vmatpush3.bf16.msra.mxu0 %v2588_v17 }
 0xac5   :  { %2590 = vmatprep.subr.bf16.mxu0 %v2633_v0 }
 0xac6   :  { %v2591_v41 = vpack.c.bf16 %v1594_v52, %v1593_v59 }
 0xac8   :  { %2592 = vmatpush3.bf16.msra.mxu0 %v2591_v41 }
 0xacb   :  { %2469 = vmatmul.mubr.f32.vlgmr.msra.gmra.mrb[18].mxu0 %v3345_v19 }
 0xacc   :  { %2473 = vmatprep.mubr.msk.f32.mxu0 %vm158_vm2, %v3351_v31 }
 0xb9e   :  { %v1661_v15 = vpop.f32.mrb[18].mxu0 }
 0xb9f   :  { %v2470_v45 = vpop.f32.mrb[19].mxu0  ;;  %v1665_v13 = vsel %vm153_vm1, %v1661_v15, 0.0 }
 0xba0   :  { %1666 = vadd.xlane.f32.xlu1 %v1665_v13 }
 0xc2d   :  { %v1667_v38 = vpop.xlane.xlu1 %1666 }
 0xc2e   :  { %v1668_v32 = vmul.f32 %v3359_v37, %v1667_v38 }
 0xc30   :  { %v1669_v12 = vadd.f32 1e-05, %v1668_v32 }
 0xc32   :  { %2613 = vrsqrt.f32 %v1669_v12 }
 0xc3c   :  { %v2614_v49 = vpop.eup %2613 }
 0xc3d   :  { %2471 = vmatprep.subr.msk.mxu0 %vm207_vm3, %v2614_v49  ;;  %2593 = vmatprep.subr.msk.mxu1 %vm207_vm3, %v2614_v49 }
 0xc3e   :  { %2472 = vmatpush3.msk.msra.mxu0 %vm207_vm3, %v2614_v49  ;;  %2594 = vmatpush3.msk.msra.mxu1 %vm207_vm3, %v2614_v49 }
 0xc3f   :  { %2474 = vmatmul.mubr.msk.f32.vlgmr.msra.gmra.mrb[36].mxu0 %vm158_vm2, %v3367_v60  ;;  %2489 = vmatmul.mubr.msk.f32.vlgmr.msra.gmra.mrb[52].mxu1 %vm158_vm2, %v3434_v10 }
 0xc40   :  { %2476 = vmatprep.mubr.msk.f32.mxu0 %vm158_vm2, %v3374_v47  ;;  %2491 = vmatprep.mubr.msk.f32.mxu1 %vm158_vm2, %v3441_v22 }
 0xc43   :  { %2477 = vmatmul.mubr.msk.f32.gmra.mrb[38].mxu0 %vm158_vm2, %v3381_v3  ;;  %2492 = vmatmul.mubr.msk.f32.gmra.mrb[54].mxu1 %vm158_vm2, %v3448_v34 }
 0xc44   :  { %2479 = vmatprep.mubr.msk.f32.mxu0 %vm158_vm2, %v3388_v48  ;;  %2494 = vmatprep.mubr.msk.f32.mxu1 %vm158_vm2, %v3455_v5 }
 0xc47   :  { %2480 = vmatmul.mubr.msk.f32.gmra.mrb[40].mxu0 %vm158_vm2, %v3395_v27  ;;  %2495 = vmatmul.mubr.msk.f32.gmra.mrb[56].mxu1 %vm158_vm2, %v3462_v29 }
 0xc48   :  { %2482 = vmatprep.mubr.msk.f32.mxu0 %vm158_vm2, %v3402_v7 }
 0xc4b   :  { %2483 = vmatmul.mubr.msk.f32.gmra.mrb[42].mxu0 %vm158_vm2, %v3409_v28 }
 0xc4c   :  { %2485 = vmatprep.mubr.msk.f32.mxu0 %vm158_vm2, %v3416_v43 }
 0xc4f   :  { %2486 = vmatmul.mubr.msk.f32.gmra.mrb[44].mxu0 %vm158_vm2, %v3423_v2 }
 0xd12   :  { %v2475_v0 = vpop.f32.mrb[36].mxu0  ;;  %v2490_v19 = vpop.f32.mrb[52].mxu1 }
 0xd13   :  { %1826 = vperm.xlu0 %2599, %v2475_v0   ;;  %v1740_v31 = vpop.f32.mrb[37].mxu0  ;;  %v1790_v37 = vpop.f32.mrb[53].mxu1 }
 0xd16   :  { %v2478_v60 = vpop.f32.mrb[38].mxu0  ;;  %v2493_v47 = vpop.f32.mrb[54].mxu1 }
 0xd17   :  { %1876 = vperm.xlu0 %2599, %v2490_v19   ;;  %v1750_v3 = vpop.f32.mrb[39].mxu0  ;;  %v1800_v48 = vpop.f32.mrb[55].mxu1 }
 0xd1a   :  { %v2481_v27 = vpop.f32.mrb[40].mxu0  ;;  %v2496_v7 = vpop.f32.mrb[56].mxu1 }
 0xd1b   :  { %1821 = vperm.xlu0 %2599, %v1740_v31   ;;  %v1760_v28 = vpop.f32.mrb[41].mxu0  ;;  %v1810_v10 = vpop.f32.mrb[57].mxu1 }
 0xd1e   :  { %v2484_v22 = vpop.f32.mrb[42].mxu0 }
 0xd1f   :  { %1871 = vperm.xlu0 %2599, %v1790_v37   ;;  %v1770_v43 = vpop.f32.mrb[43].mxu0 }
 0xd22   :  { %v2487_v34 = vpop.f32.mrb[44].mxu0 }
 0xd23   :  { %1836 = vperm.xlu0 %2599, %v2478_v60   ;;  %1866 = vperm.xlu1 %2600, %v2487_v34   ;;  %v1780_v2 = vpop.f32.mrb[45].mxu0 }
 0xd27   :  { %1886 = vperm.xlu0 %2599, %v2493_v47   ;;  %1891 = vperm.xlu1 %2600, %v1810_v10  }
 0xd2b   :  { %1831 = vperm.xlu0 %2599, %v1750_v3  }
 0xd2f   :  { %1881 = vperm.xlu0 %2599, %v1800_v48  }
 0xd33   :  { %1846 = vperm.xlu0 %2599, %v2481_v27  }
 0xd37   :  { %1841 = vperm.xlu0 %2599, %v1760_v28  }
 0xd3b   :  { %1856 = vperm.xlu0 %2599, %v2484_v22  }
 0xd3f   :  { %1851 = vperm.xlu0 %2599, %v1770_v43  }
 0xd43   :  { %1861 = vperm.xlu0 %2599, %v1780_v2  }
 0xd47   :  { %1896 = vperm.xlu0 %2599, %v2496_v7  }
 0xd92   :  { %v1827_v5 = vpop.permute.xlu0 %1826 }
 0xd93   :  { %v1900_v29 = vmul.f32 %v1827_v5, %v3468_v56 }
 0xd95   :  { %v1916_v4 = vmul.f32 %v1900_v29, %v3115_v54 }
 0xd96   :  { %v1877_v11 = vpop.permute.xlu0 %1876 }
 0xd97   :  { %1932 = vst.msk [vmem:[%s3696_s9 + $0x8] sm:$0xff] %vm915_vm4, %v1916_v4  ;;  %v1910_v51 = vmul.f32 %v1877_v11, %v3522_v63 }
 0xd99   :  { %v1926_v17 = vmul.f32 %v1910_v51, %v3129_v6 }
 0xd9a   :  { %v1822_v59 = vpop.permute.xlu0 %1821 }
 0xd9b   :  { %1942 = vst.msk [vmem:[%s3696_s9 + $0x58] sm:$0xff] %vm915_vm4, %v1926_v17  ;;  %v1899_v56 = vmul.f32 %v1822_v59, %v3471_v36 }
 0xd9d   :  { %v1915_v54 = vmul.f32 %v1899_v56, %v3113_v53 }
 0xd9e   :  { %v1872_v52 = vpop.permute.xlu0 %1871 }
 0xd9f   :  { %1931 = vst.msk [vmem:[%s3696_s9] sm:$0xff] %vm915_vm4, %v1915_v54  ;;  %v1909_v63 = vmul.f32 %v1872_v52, %v3526_v30 }
 0xda1   :  { %v1925_v6 = vmul.f32 %v1909_v63, %v3137_v23 }
 0xda2   :  { %v1837_v41 = vpop.permute.xlu0 %1836  ;;  %v1867_v15 = vpop.permute.xlu1 %1866 }
 0xda3   :  { %1941 = vst.msk [vmem:[%s3696_s9 + $0x50] sm:$0xff] %vm915_vm4, %v1925_v6  ;;  %v1902_v36 = vmul.f32 %v1837_v41, %v3478_v8  ;;  %v1908_v53 = vmul.f32 %v1867_v15, %v3507_v39 }
 0xda5   :  { %v1918_v45 = vmul.f32 %v1902_v36, %v3119_v1  ;;  %v1924_v13 = vmul.f32 %v1908_v53, %v3127_v20 }
 0xda6   :  { %v1887_v38 = vpop.permute.xlu0 %1886  ;;  %v1892_v32 = vpop.permute.xlu1 %1891 }
 0xda7   :  { %1934 = vst.msk [vmem:[%s3696_s9 + $0x18] sm:$0xff] %vm915_vm4, %v1918_v45  ;;  %1940 = vst.msk [vmem:[%s3696_s9 + $0x48] sm:$0xff] %vm915_vm4, %v1924_v13  ;;  %v1912_v23 = vmul.f32 %v1887_v38, %v3533_v44  ;;  %v1913_v8 = vmul.f32 %v1892_v32, %v3540_v55 }
 0xda9   :  { %v1928_v1 = vmul.f32 %v1912_v23, %v3133_v61  ;;  %v1929_v20 = vmul.f32 %v1913_v8, %v3217_v35 }
 0xdaa   :  { %v1832_v39 = vpop.permute.xlu0 %1831 }
 0xdab   :  { %1944 = vst.msk [vmem:[%s3696_s9 + $0x68] sm:$0xff] %vm915_vm4, %v1928_v1  ;;  %1945 = vst.msk [vmem:[%s3696_s9 + $0x70] sm:$0xff] %vm915_vm4, %v1929_v20  ;;  %v1901_v30 = vmul.f32 %v1832_v39, %v3482_v33 }
 0xdad   :  { %v1917_v44 = vmul.f32 %v1901_v30, %v3117_v18 }
 0xdae   :  { %v1882_v55 = vpop.permute.xlu0 %1881 }
 0xdaf   :  { %1933 = vst.msk [vmem:[%s3696_s9 + $0x10] sm:$0xff] %vm915_vm4, %v1917_v44  ;;  %v1911_v61 = vmul.f32 %v1882_v55, %v3537_v46 }
 0xdb1   :  { %v1927_v35 = vmul.f32 %v1911_v61, %v3147_v16 }
 0xdb2   :  { %v1847_v12 = vpop.permute.xlu0 %1846 }
 0xdb3   :  { %1943 = vst.msk [vmem:[%s3696_s9 + $0x60] sm:$0xff] %vm915_vm4, %v1927_v35  ;;  %v1904_v33 = vmul.f32 %v1847_v12, %v3489_v9 }
 0xdb5   :  { %v1920_v18 = vmul.f32 %v1904_v33, %v3123_v57 }
 0xdb6   :  { %v1842_v49 = vpop.permute.xlu0 %1841 }
 0xdb7   :  { %1936 = vst.msk [vmem:[%s3696_s9 + $0x28] sm:$0xff] %vm915_vm4, %v1920_v18  ;;  %v1903_v46 = vmul.f32 %v1842_v49, %v3493_v26 }
 0xdb9   :  { %v1919_v16 = vmul.f32 %v1903_v46, %v3121_v21 }
 0xdba   :  { %v1857_v0 = vpop.permute.xlu0 %1856 }
 0xdbb   :  { %1935 = vst.msk [vmem:[%s3696_s9 + $0x20] sm:$0xff] %vm915_vm4, %v1919_v16  ;;  %v1906_v9 = vmul.f32 %v1857_v0, %v3500_v50 }
 0xdbd   :  { %v1922_v57 = vmul.f32 %v1906_v9, %v3125_v58 }
 0xdbe   :  { %v1852_v19 = vpop.permute.xlu0 %1851 }
 0xdbf   :  { %1938 = vst.msk [vmem:[%s3696_s9 + $0x38] sm:$0xff] %vm915_vm4, %v1922_v57  ;;  %v1905_v26 = vmul.f32 %v1852_v19, %v3504_v42 }
 0xdc1   :  { %v1921_v21 = vmul.f32 %v1905_v26, %v3131_v24 }
 0xdc2   :  { %v1862_v31 = vpop.permute.xlu0 %1861 }
 0xdc3   :  { %1937 = vst.msk [vmem:[%s3696_s9 + $0x30] sm:$0xff] %vm915_vm4, %v1921_v21  ;;  %v1907_v50 = vmul.f32 %v1862_v31, %v3514_v25 }
 0xdc5   :  { %v1923_v58 = vmul.f32 %v1907_v50, %v3135_v62 }
 0xdc6   :  { %v1897_v37 = vpop.permute.xlu0 %1896 }
 0xdc7   :  { %1939 = vst.msk [vmem:[%s3696_s9 + $0x40] sm:$0xff] %vm915_vm4, %v1923_v58  ;;  %v1914_v42 = vmul.f32 %v1897_v37, %v3547_v40 }
 0xdc9   :  { %v1930_v24 = vmul.f32 %v1914_v42, %v3222_v14 }
 0xdcb   :  { %1946 = vst.msk [vmem:[%s3696_s9 + $0x78] sm:$0xff] %vm915_vm4, %v1930_v24 }

// kernel: frag_gfn_forward.44
= control target key start
LH: loop header
LB: loop body
LE: loop exit
PB: predicated region body
PF: predicated region fallthrough
CT: control target
= control target key end

     0   :  { %vm110_vm0 = vcmask 523264   ;;  %vm232_vm1 = vcmask 261120   ;;  %s461_s1 = inlined_call_operand.vmem [shape: bf16[64,32], index: 1, kind: input, shape index: {}]   ;;  %s462_s0 = inlined_call_operand.vmem [shape: bf16[128,64], index: 0, kind: input, shape index: {}]   ;;  %s463_s2 = inlined_call_operand.vmem [shape: f32[1,32], index: 2, kind: input, shape index: {}]   ;;  %s464_s3 = inlined_call_operand.vmem [shape: f32[128,32], index: 3, kind: output, shape index: {}]  }
   0x1   :  { %v318_v0 = vld [vmem:[%s461_s1] sm:$0xff]   ;;  %v319_v1 = vld [vmem:[%s461_s1 + $0x8] sm:$0xff]   ;;  %v320_v2 = vld [vmem:[%s461_s1 + $0x10] sm:$0xff]  }
   0x2   :  { %286 = vmatprep.subr.bf16.mxu0 %v318_v0  ;;  %310 = vmatprep.subr.bf16.mxu1 %v318_v0  ;;  %v322_v3 = vld [vmem:[%s462_s0] sm:$0xff]   ;;  %v321_v5 = vld [vmem:[%s461_s1 + $0x18] sm:$0xff]   ;;  %v324_v6 = vld [vmem:[%s462_s0 + $0x8] sm:$0xff]  }
   0x3   :  { %287 = vmatpush3.bf16.msra.mxu0 %v318_v0  ;;  %314 = vmatpush3.bf16.msra.mxu1 %v318_v0  ;;  %v323_v4 = vld [vmem:[%s462_s0 + $0x20] sm:$0xff]   ;;  %v325_v7 = vld [vmem:[%s462_s0 + $0x28] sm:$0xff]   ;;  %v326_v8 = vld [vmem:[%s462_s0 + $0x10] sm:$0xff]  }
   0x4   :  { %288 = vmatprep.subr.bf16.mxu0 %v319_v1  ;;  %311 = vmatprep.subr.bf16.mxu1 %v319_v1  ;;  %v327_v9 = vld [vmem:[%s462_s0 + $0x30] sm:$0xff]   ;;  %v328_v10 = vld [vmem:[%s462_s0 + $0x18] sm:$0xff]   ;;  %v253_v12 = vld [vmem:[%s463_s2] ss:$0 sm:$0xff] }
   0x5   :  { %294 = vmatprep.mubr.msk.bf16.mxu0 %vm110_vm0, %v322_v3  ;;  %302 = vmatprep.mubr.msk.bf16.mxu1 %vm110_vm0, %v323_v4  ;;  %v329_v11 = vld [vmem:[%s462_s0 + $0x38] sm:$0xff]  }
   0x7   :  { %289 = vmatpush3.bf16.msra.mxu0 %v319_v1  ;;  %315 = vmatpush3.bf16.msra.mxu1 %v319_v1 }
   0x8   :  { %290 = vmatprep.subr.bf16.mxu0 %v320_v2  ;;  %312 = vmatprep.subr.bf16.mxu1 %v320_v2 }
   0xb   :  { %291 = vmatpush3.bf16.msra.mxu0 %v320_v2  ;;  %316 = vmatpush3.bf16.msra.mxu1 %v320_v2 }
   0xc   :  { %292 = vmatprep.subr.bf16.mxu0 %v321_v5  ;;  %313 = vmatprep.subr.bf16.mxu1 %v321_v5 }
   0xf   :  { %293 = vmatpush3.bf16.msra.mxu0 %v321_v5  ;;  %317 = vmatpush3.bf16.msra.mxu1 %v321_v5 }
  0x12   :  { %295 = vmatmul.mubr.msk.bf16.vlgmr.msra.gmra.mrb[0].mxu0 %vm110_vm0, %v324_v6  ;;  %303 = vmatmul.mubr.msk.bf16.vlgmr.msra.gmra.mrb[0].mxu1 %vm110_vm0, %v325_v7 }
  0x13   :  { %298 = vmatprep.mubr.msk.bf16.mxu0 %vm110_vm0, %v326_v8  ;;  %306 = vmatprep.mubr.msk.bf16.mxu1 %vm110_vm0, %v327_v9 }
  0x1a   :  { %299 = vmatmul.mubr.msk.bf16.gmra.mrb[4].mxu0 %vm110_vm0, %v328_v10  ;;  %307 = vmatmul.mubr.msk.bf16.gmra.mrb[4].mxu1 %vm110_vm0, %v329_v11 }
  0xe5   :  { %v296_v13 = vpop.f32.mrb[0].mxu0  ;;  %v304_v14 = vpop.f32.mrb[0].mxu1 }
  0xe6   :  { %v178_v15 = vadd.f32 %v296_v13, %v253_v12  ;;  %v210_v16 = vadd.f32 %v304_v14, %v253_v12  ;;  %v169_v17 = vpop.f32.mrb[1].mxu0  ;;  %v201_v18 = vpop.f32.mrb[1].mxu1 }
  0xe7   :  { %v170_v19 = vadd.f32 %v253_v12, %v169_v17  ;;  %v202_v20 = vadd.f32 %v253_v12, %v201_v18  ;;  %v297_v21 = vpop.f32.mrb[2].mxu0  ;;  %v305_v22 = vpop.f32.mrb[2].mxu1 }
  0xe8   :  { %235 = vst.msk [vmem:[%s464_s3 + $0x10] sm:$0xff] %vm232_vm1, %v178_v15  ;;  %243 = vst.msk [vmem:[%s464_s3 + $0x50] sm:$0xff] %vm232_vm1, %v210_v16  ;;  %v181_v23 = vadd.f32 %v297_v21, %v253_v12  ;;  %v213_v24 = vadd.f32 %v305_v22, %v253_v12  ;;  %v172_v25 = vpop.f32.mrb[3].mxu0  ;;  %v204_v26 = vpop.f32.mrb[3].mxu1 }
  0xe9   :  { %233 = vst.msk [vmem:[%s464_s3] sm:$0xff] %vm232_vm1, %v170_v19  ;;  %241 = vst.msk [vmem:[%s464_s3 + $0x40] sm:$0xff] %vm232_vm1, %v202_v20  ;;  %v173_v27 = vadd.f32 %v253_v12, %v172_v25  ;;  %v205_v28 = vadd.f32 %v253_v12, %v204_v26 }
  0xea   :  { %236 = vst.msk [vmem:[%s464_s3 + $0x18] sm:$0xff] %vm232_vm1, %v181_v23  ;;  %244 = vst.msk [vmem:[%s464_s3 + $0x58] sm:$0xff] %vm232_vm1, %v213_v24 }
  0xeb   :  { %234 = vst.msk [vmem:[%s464_s3 + $0x8] sm:$0xff] %vm232_vm1, %v173_v27  ;;  %242 = vst.msk [vmem:[%s464_s3 + $0x48] sm:$0xff] %vm232_vm1, %v205_v28 }
  0xed   :  { %v300_v29 = vpop.f32.mrb[4].mxu0  ;;  %v308_v30 = vpop.f32.mrb[4].mxu1 }
  0xee   :  { %v194_v31 = vadd.f32 %v300_v29, %v253_v12  ;;  %v226_v32 = vadd.f32 %v308_v30, %v253_v12  ;;  %v185_v33 = vpop.f32.mrb[5].mxu0  ;;  %v217_v34 = vpop.f32.mrb[5].mxu1 }
  0xef   :  { %v186_v35 = vadd.f32 %v253_v12, %v185_v33  ;;  %v218_v36 = vadd.f32 %v253_v12, %v217_v34  ;;  %v301_v37 = vpop.f32.mrb[6].mxu0  ;;  %v309_v38 = vpop.f32.mrb[6].mxu1 }
  0xf0   :  { %239 = vst.msk [vmem:[%s464_s3 + $0x30] sm:$0xff] %vm232_vm1, %v194_v31  ;;  %247 = vst.msk [vmem:[%s464_s3 + $0x70] sm:$0xff] %vm232_vm1, %v226_v32  ;;  %v197_v39 = vadd.f32 %v301_v37, %v253_v12  ;;  %v229_v40 = vadd.f32 %v309_v38, %v253_v12  ;;  %v188_v41 = vpop.f32.mrb[7].mxu0  ;;  %v220_v42 = vpop.f32.mrb[7].mxu1 }
  0xf1   :  { %237 = vst.msk [vmem:[%s464_s3 + $0x20] sm:$0xff] %vm232_vm1, %v186_v35  ;;  %245 = vst.msk [vmem:[%s464_s3 + $0x60] sm:$0xff] %vm232_vm1, %v218_v36  ;;  %v189_v43 = vadd.f32 %v253_v12, %v188_v41  ;;  %v221_v44 = vadd.f32 %v253_v12, %v220_v42 }
  0xf2   :  { %240 = vst.msk [vmem:[%s464_s3 + $0x38] sm:$0xff] %vm232_vm1, %v197_v39  ;;  %248 = vst.msk [vmem:[%s464_s3 + $0x78] sm:$0xff] %vm232_vm1, %v229_v40 }
  0xf3   :  { %238 = vst.msk [vmem:[%s464_s3 + $0x28] sm:$0xff] %vm232_vm1, %v189_v43  ;;  %246 = vst.msk [vmem:[%s464_s3 + $0x68] sm:$0xff] %vm232_vm1, %v221_v44 }

// kernel: frag_gfn_forward.45
= control target key start
LH: loop header
LB: loop body
LE: loop exit
PB: predicated region body
PF: predicated region fallthrough
CT: control target
= control target key end

     0   :  { %vm126_vm0 = vcmask 785408   ;;  %vm248_vm1 = vcmask 31744   ;;  %s497_s1 = inlined_call_operand.vmem [shape: bf16[96,4], index: 1, kind: input, shape index: {}]   ;;  %s498_s0 = inlined_call_operand.vmem [shape: bf16[128,96], index: 0, kind: input, shape index: {}]   ;;  %s499_s2 = inlined_call_operand.vmem [shape: f32[1,4], index: 2, kind: input, shape index: {}]   ;;  %s500_s3 = inlined_call_operand.vmem [shape: f32[128,4], index: 3, kind: output, shape index: {}]  }
   0x1   :  { %v346_v0 = vld [vmem:[%s497_s1] sm:$0xff]   ;;  %v347_v1 = vld [vmem:[%s497_s1 + $0x8] sm:$0xff]   ;;  %v348_v2 = vld [vmem:[%s497_s1 + $0x10] sm:$0xff]  }
   0x2   :  { %306 = vmatprep.subr.bf16.mxu0 %v346_v0  ;;  %334 = vmatprep.subr.bf16.mxu1 %v346_v0  ;;  %v352_v3 = vld [vmem:[%s498_s0] sm:$0xff]   ;;  %v349_v5 = vld [vmem:[%s497_s1 + $0x18] sm:$0xff]   ;;  %v351_v7 = vld [vmem:[%s497_s1 + $0x28] sm:$0xff]  }
   0x3   :  { %307 = vmatpush3.bf16.msra.mxu0 %v346_v0  ;;  %340 = vmatpush3.bf16.msra.mxu1 %v346_v0  ;;  %v353_v4 = vld [vmem:[%s498_s0 + $0x20] sm:$0xff]   ;;  %v354_v8 = vld [vmem:[%s498_s0 + $0x8] sm:$0xff]   ;;  %v356_v10 = vld [vmem:[%s498_s0 + $0x10] sm:$0xff]  }
   0x4   :  { %308 = vmatprep.subr.bf16.mxu0 %v347_v1  ;;  %335 = vmatprep.subr.bf16.mxu1 %v347_v1  ;;  %v350_v6 = vld [vmem:[%s497_s1 + $0x20] sm:$0xff]   ;;  %v355_v9 = vld [vmem:[%s498_s0 + $0x28] sm:$0xff]   ;;  %v357_v11 = vld [vmem:[%s498_s0 + $0x30] sm:$0xff]  }
   0x5   :  { %318 = vmatprep.mubr.msk.bf16.mxu0 %vm126_vm0, %v352_v3  ;;  %326 = vmatprep.mubr.msk.bf16.mxu1 %vm126_vm0, %v353_v4  ;;  %v358_v12 = vld [vmem:[%s498_s0 + $0x18] sm:$0xff]   ;;  %v269_v14 = vld [vmem:[%s499_s2] ss:$0 sm:$0xff] }
   0x6   :  { %v359_v13 = vld [vmem:[%s498_s0 + $0x38] sm:$0xff]  }
   0x7   :  { %309 = vmatpush3.bf16.msra.mxu0 %v347_v1  ;;  %341 = vmatpush3.bf16.msra.mxu1 %v347_v1 }
   0x8   :  { %310 = vmatprep.subr.bf16.mxu0 %v348_v2  ;;  %336 = vmatprep.subr.bf16.mxu1 %v348_v2 }
   0xb   :  { %311 = vmatpush3.bf16.msra.mxu0 %v348_v2  ;;  %342 = vmatpush3.bf16.msra.mxu1 %v348_v2 }
   0xc   :  { %312 = vmatprep.subr.bf16.mxu0 %v349_v5  ;;  %337 = vmatprep.subr.bf16.mxu1 %v349_v5 }
   0xf   :  { %313 = vmatpush3.bf16.msra.mxu0 %v349_v5  ;;  %343 = vmatpush3.bf16.msra.mxu1 %v349_v5 }
  0x10   :  { %314 = vmatprep.subr.bf16.mxu0 %v350_v6  ;;  %338 = vmatprep.subr.bf16.mxu1 %v350_v6 }
  0x13   :  { %315 = vmatpush3.bf16.msra.mxu0 %v350_v6  ;;  %344 = vmatpush3.bf16.msra.mxu1 %v350_v6 }
  0x14   :  { %316 = vmatprep.subr.bf16.mxu0 %v351_v7  ;;  %339 = vmatprep.subr.bf16.mxu1 %v351_v7 }
  0x17   :  { %317 = vmatpush3.bf16.msra.mxu0 %v351_v7  ;;  %345 = vmatpush3.bf16.msra.mxu1 %v351_v7 }
  0x1a   :  { %319 = vmatmul.mubr.msk.bf16.vlgmr.msra.gmra.mrb[0].mxu0 %vm126_vm0, %v354_v8  ;;  %327 = vmatmul.mubr.msk.bf16.vlgmr.msra.gmra.mrb[0].mxu1 %vm126_vm0, %v355_v9 }
  0x1b   :  { %322 = vmatprep.mubr.msk.bf16.mxu0 %vm126_vm0, %v356_v10  ;;  %330 = vmatprep.mubr.msk.bf16.mxu1 %vm126_vm0, %v357_v11 }
  0x22   :  { %323 = vmatmul.mubr.msk.bf16.gmra.mrb[4].mxu0 %vm126_vm0, %v358_v12  ;;  %331 = vmatmul.mubr.msk.bf16.gmra.mrb[4].mxu1 %vm126_vm0, %v359_v13 }
  0xed   :  { %v320_v15 = vpop.f32.mrb[0].mxu0  ;;  %v328_v16 = vpop.f32.mrb[0].mxu1 }
  0xee   :  { %v194_v17 = vadd.f32 %v320_v15, %v269_v14  ;;  %v226_v18 = vadd.f32 %v328_v16, %v269_v14  ;;  %v185_v19 = vpop.f32.mrb[1].mxu0  ;;  %v217_v20 = vpop.f32.mrb[1].mxu1 }
  0xef   :  { %v186_v21 = vadd.f32 %v269_v14, %v185_v19  ;;  %v218_v22 = vadd.f32 %v269_v14, %v217_v20  ;;  %v321_v23 = vpop.f32.mrb[2].mxu0  ;;  %v329_v24 = vpop.f32.mrb[2].mxu1 }
  0xf0   :  { %251 = vst.msk [vmem:[%s500_s3 + $0x10] sm:$0xff] %vm248_vm1, %v194_v17  ;;  %259 = vst.msk [vmem:[%s500_s3 + $0x50] sm:$0xff] %vm248_vm1, %v226_v18  ;;  %v197_v25 = vadd.f32 %v321_v23, %v269_v14  ;;  %v229_v26 = vadd.f32 %v329_v24, %v269_v14  ;;  %v188_v27 = vpop.f32.mrb[3].mxu0  ;;  %v220_v28 = vpop.f32.mrb[3].mxu1 }
  0xf1   :  { %249 = vst.msk [vmem:[%s500_s3] sm:$0xff] %vm248_vm1, %v186_v21  ;;  %257 = vst.msk [vmem:[%s500_s3 + $0x40] sm:$0xff] %vm248_vm1, %v218_v22  ;;  %v189_v29 = vadd.f32 %v269_v14, %v188_v27  ;;  %v221_v30 = vadd.f32 %v269_v14, %v220_v28 }
  0xf2   :  { %252 = vst.msk [vmem:[%s500_s3 + $0x18] sm:$0xff] %vm248_vm1, %v197_v25  ;;  %260 = vst.msk [vmem:[%s500_s3 + $0x58] sm:$0xff] %vm248_vm1, %v229_v26 }
  0xf3   :  { %250 = vst.msk [vmem:[%s500_s3 + $0x8] sm:$0xff] %vm248_vm1, %v189_v29  ;;  %258 = vst.msk [vmem:[%s500_s3 + $0x48] sm:$0xff] %vm248_vm1, %v221_v30 }
  0xf5   :  { %v324_v31 = vpop.f32.mrb[4].mxu0  ;;  %v332_v32 = vpop.f32.mrb[4].mxu1 }
  0xf6   :  { %v210_v33 = vadd.f32 %v324_v31, %v269_v14  ;;  %v242_v34 = vadd.f32 %v332_v32, %v269_v14  ;;  %v201_v35 = vpop.f32.mrb[5].mxu0  ;;  %v233_v36 = vpop.f32.mrb[5].mxu1 }
  0xf7   :  { %v202_v37 = vadd.f32 %v269_v14, %v201_v35  ;;  %v234_v38 = vadd.f32 %v269_v14, %v233_v36  ;;  %v325_v39 = vpop.f32.mrb[6].mxu0  ;;  %v333_v40 = vpop.f32.mrb[6].mxu1 }
  0xf8   :  { %255 = vst.msk [vmem:[%s500_s3 + $0x30] sm:$0xff] %vm248_vm1, %v210_v33  ;;  %263 = vst.msk [vmem:[%s500_s3 + $0x70] sm:$0xff] %vm248_vm1, %v242_v34  ;;  %v213_v41 = vadd.f32 %v325_v39, %v269_v14  ;;  %v245_v42 = vadd.f32 %v333_v40, %v269_v14  ;;  %v204_v43 = vpop.f32.mrb[7].mxu0  ;;  %v236_v44 = vpop.f32.mrb[7].mxu1 }
  0xf9   :  { %253 = vst.msk [vmem:[%s500_s3 + $0x20] sm:$0xff] %vm248_vm1, %v202_v37  ;;  %261 = vst.msk [vmem:[%s500_s3 + $0x60] sm:$0xff] %vm248_vm1, %v234_v38  ;;  %v205_v45 = vadd.f32 %v269_v14, %v204_v43  ;;  %v237_v46 = vadd.f32 %v269_v14, %v236_v44 }
  0xfa   :  { %256 = vst.msk [vmem:[%s500_s3 + $0x38] sm:$0xff] %vm248_vm1, %v213_v41  ;;  %264 = vst.msk [vmem:[%s500_s3 + $0x78] sm:$0xff] %vm248_vm1, %v245_v42 }
  0xfb   :  { %254 = vst.msk [vmem:[%s500_s3 + $0x28] sm:$0xff] %vm248_vm1, %v205_v45  ;;  %262 = vst.msk [vmem:[%s500_s3 + $0x68] sm:$0xff] %vm248_vm1, %v237_v46 }

</bundles_post_ra>
